<compile_context>
chip_gen: v6e
topology: v6e:2x2x1
jax: 0.10.0
libtpu: 0.0.40
codegen_flags: <defaults>
</compile_context>

<pallas_src>
import jax
import jax.numpy as jnp
from jax import lax
from jax.experimental import pallas as pl
from jax.experimental.pallas import tpu as pltpu

# Hyperparameters from the PyTorch module.
INPUT_SIZE = 28
HIDDEN_SIZE = 256
NUM_CLASSES = 10
NUM_LAYERS = 2
SEQ_LEN = 28


def rnn_fc_kernel(pre0_ref, w_hh0_ref, w_ih1_ref, b1_ref, w_hh1_ref,
                  fc_w_ref, fc_b_ref, out_ref,
                  h0_seq_ref, pre1_ref, seq_ref):
    """Single-invocation kernel: 2-layer RNN recurrence + final Linear.

    pre0_ref   : (T, B, H)   layer-0 input projection (x_t @ W_ih0 + b0), f32
    w_hh0_ref  : (H, H)      layer-0 recurrent weights (transposed), bf16
    w_ih1_ref  : (H, H)      layer-1 input weights (transposed), bf16
    b1_ref     : (1, H)      layer-1 combined bias (b_ih + b_hh), f32
    w_hh1_ref  : (H, H)      layer-1 recurrent weights (transposed), bf16
    fc_w_ref   : (C, T*H)    classifier weights, lane-dense torch layout, f32
    fc_b_ref   : (1, C)      classifier bias, f32
    out_ref    : (B, C)      logits
    h0_seq_ref : (T*B, H)    scratch: all layer-0 hidden states (row = t*B + b)
    pre1_ref   : (T*B, H)    scratch: layer-1 pre-activations (input part)
    seq_ref    : (B, T*H)    scratch: flattened top-layer outputs for the FC
    """
    T, B, H = pre0_ref.shape

    w_hh0 = w_hh0_ref[...]          # (H, H) bf16, loaded once
    w_hh1 = w_hh1_ref[...]          # (H, H) bf16, loaded once

    # ---- Layer-0 recurrence: only h0 @ W_hh0 remains on the serial chain. ---
    h0 = jnp.zeros((B, H), jnp.float32)
    for t in range(T):              # fully unrolled, static offsets (T = 28)
        h0 = jnp.tanh(pre0_ref[t]
                      + jnp.dot(h0.astype(jnp.bfloat16), w_hh0,
                                preferred_element_type=jnp.float32))
        h0_seq_ref[pl.ds(t * B, B), :] = h0

    # ---- Layer-1 input projection: ONE (T*B, H) @ (H, H) matmul + bias. -----
    pre1_ref[...] = (
        jnp.dot(h0_seq_ref[...].astype(jnp.bfloat16), w_ih1_ref[...],
                preferred_element_type=jnp.float32)
        + b1_ref[...])

    # ---- Layer-1 recurrence: only h1 @ W_hh1 on the serial chain. -----------
    h1 = jnp.zeros((B, H), jnp.float32)
    for t in range(T):
        h1 = jnp.tanh(pre1_ref[pl.ds(t * B, B), :]
                      + jnp.dot(h1.astype(jnp.bfloat16), w_hh1,
                                preferred_element_type=jnp.float32))
        # Static lane offset (multiple of H=256) -> matches torch reshape(B,-1)
        seq_ref[:, pl.ds(t * H, H)] = h1

    # ---- Classifier: (B, T*H) x (C, T*H)^T with lane-dense weight. ----------
    logits = lax.dot_general(
        seq_ref[...], fc_w_ref[...],
        dimension_numbers=(((1,), (1,)), ((), ())),
        preferred_element_type=jnp.float32)
    out_ref[...] = logits + fc_b_ref[...]


def init_params(key):
    """Deterministic init matching nn.RNN / nn.Linear uniform ranges."""
    ks = jax.random.split(key, 10)
    u = lambda k, shape, bound: jax.random.uniform(
        k, shape, jnp.float32, minval=-bound, maxval=bound)

    brnn = 1.0 / float(HIDDEN_SIZE) ** 0.5
    # RNN weights stored already transposed for right-multiplication (h @ W).
    w_ih0 = u(ks[0], (INPUT_SIZE, HIDDEN_SIZE), brnn)
    w_hh0 = u(ks[1], (HIDDEN_SIZE, HIDDEN_SIZE), brnn)
    b_ih0 = u(ks[2], (HIDDEN_SIZE,), brnn)
    b_hh0 = u(ks[3], (HIDDEN_SIZE,), brnn)
    w_ih1 = u(ks[4], (HIDDEN_SIZE, HIDDEN_SIZE), brnn)
    w_hh1 = u(ks[5], (HIDDEN_SIZE, HIDDEN_SIZE), brnn)
    b_ih1 = u(ks[6], (HIDDEN_SIZE,), brnn)
    b_hh1 = u(ks[7], (HIDDEN_SIZE,), brnn)

    bfc = 1.0 / float(HIDDEN_SIZE * SEQ_LEN) ** 0.5
    # Classifier weight kept in torch's (out_features, in_features) layout:
    # lane-dense in VMEM and consumed via a trans_b dot_general.
    fc_w = u(ks[8], (NUM_CLASSES, HIDDEN_SIZE * SEQ_LEN), bfc)
    fc_b = u(ks[9], (NUM_CLASSES,), bfc)

    return dict(
        w_ih0=w_ih0, w_hh0=w_hh0, b0=(b_ih0 + b_hh0)[None, :],
        w_ih1=w_ih1, w_hh1=w_hh1, b1=(b_ih1 + b_hh1)[None, :],
        fc_w=fc_w, fc_b=fc_b[None, :],
    )


def rnn_forward(x, params):
    """x: (B, T, I) batch-first, float32. Returns logits (B, num_classes)."""
    B, T, I = x.shape
    assert T == SEQ_LEN and I == INPUT_SIZE
    H, C = HIDDEN_SIZE, NUM_CLASSES

    x_tm = jnp.transpose(x, (1, 0, 2)).astype(jnp.float32)        # (T, B, I)
    # Hoisted layer-0 input projection (+ bias): one big batched matmul done
    # by XLA outside the serial recurrence.
    pre0 = jnp.einsum('tbi,ih->tbh', x_tm, params['w_ih0'],
                      preferred_element_type=jnp.float32) + params['b0']

    vmem = pl.BlockSpec(memory_space=pltpu.MemorySpace.VMEM)
    return pl.pallas_call(
        rnn_fc_kernel,
        out_shape=jax.ShapeDtypeStruct((B, C), jnp.float32),
        in_specs=[vmem] * 7,
        out_specs=vmem,
        scratch_shapes=[
            pltpu.VMEM((T * B, H), jnp.float32),   # h0_seq (rows t-major)
            pltpu.VMEM((T * B, H), jnp.float32),   # pre1
            pltpu.VMEM((B, T * H), jnp.float32),   # flattened top-layer outputs
        ],
    )(pre0,
      params['w_hh0'].astype(jnp.bfloat16),
      params['w_ih1'].astype(jnp.bfloat16),
      params['b1'],
      params['w_hh1'].astype(jnp.bfloat16),
      params['fc_w'],
      params['fc_b'])


def rnn_forward_ref(x, params):
    """Plain-JAX f32 reference of the torch forward pass (for sanity checking)."""
    B = x.shape[0]
    h0 = jnp.zeros((B, HIDDEN_SIZE), jnp.float32)
    h1 = jnp.zeros((B, HIDDEN_SIZE), jnp.float32)
    outs = []
    for t in range(SEQ_LEN):
        xt = x[:, t, :]
        h0 = jnp.tanh(xt @ params["w_ih0"] + h0 @ params["w_hh0"] + params["b0"])
        h1 = jnp.tanh(h0 @ params["w_ih1"] + h1 @ params["w_hh1"] + params["b1"])
        outs.append(h1)
    seq = jnp.concatenate(outs, axis=-1)                           # (B, T*H)
    return seq @ params["fc_w"].T + params["fc_b"]


if __name__ == "__main__":
    key = jax.random.PRNGKey(0)
    kx, kp = jax.random.split(key)

    batch = 2
    x = jax.random.normal(kx, (batch, SEQ_LEN, INPUT_SIZE), jnp.float32)
    params = init_params(kp)

    out = rnn_forward(x, params)
    out = jax.block_until_ready(out)

    ref = jax.block_until_ready(rnn_forward_ref(x, params))
    assert out.shape == (batch, NUM_CLASSES)
    assert jnp.max(jnp.abs(out - ref)) < 1e-2, "mismatch vs JAX reference"

    print("KERNEL_OK")
</pallas_src>

<mosaic_0001>
module attributes {stable_mosaic.version = 11 : i64} {
  func.func @rnn_fc_kernel(%arg0: memref<28x2x256xf32, #tpu.memory_space<vmem>>, %arg1: memref<256x256xbf16, #tpu.memory_space<vmem>>, %arg2: memref<256x256xbf16, #tpu.memory_space<vmem>>, %arg3: memref<1x256xf32, #tpu.memory_space<vmem>>, %arg4: memref<256x256xbf16, #tpu.memory_space<vmem>>, %arg5: memref<10x7168xf32, #tpu.memory_space<vmem>>, %arg6: memref<1x10xf32, #tpu.memory_space<vmem>>, %arg7: memref<2x10xf32, #tpu.memory_space<vmem>>, %arg8: memref<56x256xf32, #tpu.memory_space<vmem>>, %arg9: memref<56x256xf32, #tpu.memory_space<vmem>>, %arg10: memref<2x7168xf32, #tpu.memory_space<vmem>>) attributes {dimension_semantics = [], scalar_prefetch = 0 : i64, scratch_operands = 3 : i64, tpu.core_type = #tpu.core_type<tc>} {
    %c0 = arith.constant 0 : index
    %c0_0 = arith.constant 0 : index
    %0 = vector.load %arg1[%c0, %c0_0] : memref<256x256xbf16, #tpu.memory_space<vmem>>, vector<256x256xbf16>
    %c0_1 = arith.constant 0 : index
    %c0_2 = arith.constant 0 : index
    %1 = vector.load %arg4[%c0_1, %c0_2] : memref<256x256xbf16, #tpu.memory_space<vmem>>, vector<256x256xbf16>
    %cst = arith.constant 0.000000e+00 : f32
    %2 = vector.broadcast %cst : f32 to vector<2x256xf32>
    %c0_3 = arith.constant 0 : index
    %c0_4 = arith.constant 0 : index
    %c0_5 = arith.constant 0 : index
    %3 = vector.load %arg0[%c0_3, %c0_4, %c0_5] : memref<28x2x256xf32, #tpu.memory_space<vmem>>, vector<1x2x256xf32>
    %4 = vector.shape_cast %3 : vector<1x2x256xf32> to vector<2x256xf32>
    %5 = arith.truncf %2 : vector<2x256xf32> to vector<2x256xbf16>
    %cst_6 = arith.constant dense<0.000000e+00> : vector<2x256xf32>
    %6 = tpu.matmul %5, %0, %cst_6 {dimension_numbers = #tpu.dot_dimension_numbers<[1], [0], [0], [1], [0, 0, 1, 1], [], []>} : vector<2x256xbf16>, vector<256x256xbf16>, vector<2x256xf32> -> vector<2x256xf32>
    %7 = arith.addf %4, %6 : vector<2x256xf32>
    %8 = math.tanh %7 : vector<2x256xf32>
    %c0_7 = arith.constant 0 : index
    %c0_8 = arith.constant 0 : index
    %9 = vector.load %arg8[%c0_7, %c0_8] : memref<56x256xf32, #tpu.memory_space<vmem>>, vector<2x256xf32>
    tpu.vector_store %arg8[%c0_7, %c0_8], %8 {strides = array<i32>} : memref<56x256xf32, #tpu.memory_space<vmem>>, vector<2x256xf32>,
    %c1 = arith.constant 1 : index
    %c0_9 = arith.constant 0 : index
    %c0_10 = arith.constant 0 : index
    %10 = vector.load %arg0[%c1, %c0_9, %c0_10] : memref<28x2x256xf32, #tpu.memory_space<vmem>>, vector<1x2x256xf32>
    %11 = vector.shape_cast %10 : vector<1x2x256xf32> to vector<2x256xf32>
    %12 = arith.truncf %8 : vector<2x256xf32> to vector<2x256xbf16>
    %cst_11 = arith.constant dense<0.000000e+00> : vector<2x256xf32>
    %13 = tpu.matmul %12, %0, %cst_11 {dimension_numbers = #tpu.dot_dimension_numbers<[1], [0], [0], [1], [0, 0, 1, 1], [], []>} : vector<2x256xbf16>, vector<256x256xbf16>, vector<2x256xf32> -> vector<2x256xf32>
    %14 = arith.addf %11, %13 : vector<2x256xf32>
    %15 = math.tanh %14 : vector<2x256xf32>
    %c2 = arith.constant 2 : index
    %c0_12 = arith.constant 0 : index
    %16 = vector.load %arg8[%c2, %c0_12] : memref<56x256xf32, #tpu.memory_space<vmem>>, vector<2x256xf32>
    tpu.vector_store %arg8[%c2, %c0_12], %15 {strides = array<i32>} : memref<56x256xf32, #tpu.memory_space<vmem>>, vector<2x256xf32>,
    %c2_13 = arith.constant 2 : index
    %c0_14 = arith.constant 0 : index
    %c0_15 = arith.constant 0 : index
    %17 = vector.load %arg0[%c2_13, %c0_14, %c0_15] : memref<28x2x256xf32, #tpu.memory_space<vmem>>, vector<1x2x256xf32>
    %18 = vector.shape_cast %17 : vector<1x2x256xf32> to vector<2x256xf32>
    %19 = arith.truncf %15 : vector<2x256xf32> to vector<2x256xbf16>
    %cst_16 = arith.constant dense<0.000000e+00> : vector<2x256xf32>
    %20 = tpu.matmul %19, %0, %cst_16 {dimension_numbers = #tpu.dot_dimension_numbers<[1], [0], [0], [1], [0, 0, 1, 1], [], []>} : vector<2x256xbf16>, vector<256x256xbf16>, vector<2x256xf32> -> vector<2x256xf32>
    %21 = arith.addf %18, %20 : vector<2x256xf32>
    %22 = math.tanh %21 : vector<2x256xf32>
    %c4 = arith.constant 4 : index
    %c0_17 = arith.constant 0 : index
    %23 = vector.load %arg8[%c4, %c0_17] : memref<56x256xf32, #tpu.memory_space<vmem>>, vector<2x256xf32>
    tpu.vector_store %arg8[%c4, %c0_17], %22 {strides = array<i32>} : memref<56x256xf32, #tpu.memory_space<vmem>>, vector<2x256xf32>,
    %c3 = arith.constant 3 : index
    %c0_18 = arith.constant 0 : index
    %c0_19 = arith.constant 0 : index
    %24 = vector.load %arg0[%c3, %c0_18, %c0_19] : memref<28x2x256xf32, #tpu.memory_space<vmem>>, vector<1x2x256xf32>
    %25 = vector.shape_cast %24 : vector<1x2x256xf32> to vector<2x256xf32>
    %26 = arith.truncf %22 : vector<2x256xf32> to vector<2x256xbf16>
    %cst_20 = arith.constant dense<0.000000e+00> : vector<2x256xf32>
    %27 = tpu.matmul %26, %0, %cst_20 {dimension_numbers = #tpu.dot_dimension_numbers<[1], [0], [0], [1], [0, 0, 1, 1], [], []>} : vector<2x256xbf16>, vector<256x256xbf16>, vector<2x256xf32> -> vector<2x256xf32>
    %28 = arith.addf %25, %27 : vector<2x256xf32>
    %29 = math.tanh %28 : vector<2x256xf32>
    %c6 = arith.constant 6 : index
    %c0_21 = arith.constant 0 : index
    %30 = vector.load %arg8[%c6, %c0_21] : memref<56x256xf32, #tpu.memory_space<vmem>>, vector<2x256xf32>
    tpu.vector_store %arg8[%c6, %c0_21], %29 {strides = array<i32>} : memref<56x256xf32, #tpu.memory_space<vmem>>, vector<2x256xf32>,
    %c4_22 = arith.constant 4 : index
    %c0_23 = arith.constant 0 : index
    %c0_24 = arith.constant 0 : index
    %31 = vector.load %arg0[%c4_22, %c0_23, %c0_24] : memref<28x2x256xf32, #tpu.memory_space<vmem>>, vector<1x2x256xf32>
    %32 = vector.shape_cast %31 : vector<1x2x256xf32> to vector<2x256xf32>
    %33 = arith.truncf %29 : vector<2x256xf32> to vector<2x256xbf16>
    %cst_25 = arith.constant dense<0.000000e+00> : vector<2x256xf32>
    %34 = tpu.matmul %33, %0, %cst_25 {dimension_numbers = #tpu.dot_dimension_numbers<[1], [0], [0], [1], [0, 0, 1, 1], [], []>} : vector<2x256xbf16>, vector<256x256xbf16>, vector<2x256xf32> -> vector<2x256xf32>
    %35 = arith.addf %32, %34 : vector<2x256xf32>
    %36 = math.tanh %35 : vector<2x256xf32>
    %c8 = arith.constant 8 : index
    %c0_26 = arith.constant 0 : index
    %37 = vector.load %arg8[%c8, %c0_26] : memref<56x256xf32, #tpu.memory_space<vmem>>, vector<2x256xf32>
    tpu.vector_store %arg8[%c8, %c0_26], %36 {strides = array<i32>} : memref<56x256xf32, #tpu.memory_space<vmem>>, vector<2x256xf32>,
    %c5 = arith.constant 5 : index
    %c0_27 = arith.constant 0 : index
    %c0_28 = arith.constant 0 : index
    %38 = vector.load %arg0[%c5, %c0_27, %c0_28] : memref<28x2x256xf32, #tpu.memory_space<vmem>>, vector<1x2x256xf32>
    %39 = vector.shape_cast %38 : vector<1x2x256xf32> to vector<2x256xf32>
    %40 = arith.truncf %36 : vector<2x256xf32> to vector<2x256xbf16>
    %cst_29 = arith.constant dense<0.000000e+00> : vector<2x256xf32>
    %41 = tpu.matmul %40, %0, %cst_29 {dimension_numbers = #tpu.dot_dimension_numbers<[1], [0], [0], [1], [0, 0, 1, 1], [], []>} : vector<2x256xbf16>, vector<256x256xbf16>, vector<2x256xf32> -> vector<2x256xf32>
    %42 = arith.addf %39, %41 : vector<2x256xf32>
    %43 = math.tanh %42 : vector<2x256xf32>
    %c10 = arith.constant 10 : index
    %c0_30 = arith.constant 0 : index
    %44 = vector.load %arg8[%c10, %c0_30] : memref<56x256xf32, #tpu.memory_space<vmem>>, vector<2x256xf32>
    tpu.vector_store %arg8[%c10, %c0_30], %43 {strides = array<i32>} : memref<56x256xf32, #tpu.memory_space<vmem>>, vector<2x256xf32>,
    %c6_31 = arith.constant 6 : index
    %c0_32 = arith.constant 0 : index
    %c0_33 = arith.constant 0 : index
    %45 = vector.load %arg0[%c6_31, %c0_32, %c0_33] : memref<28x2x256xf32, #tpu.memory_space<vmem>>, vector<1x2x256xf32>
    %46 = vector.shape_cast %45 : vector<1x2x256xf32> to vector<2x256xf32>
    %47 = arith.truncf %43 : vector<2x256xf32> to vector<2x256xbf16>
    %cst_34 = arith.constant dense<0.000000e+00> : vector<2x256xf32>
    %48 = tpu.matmul %47, %0, %cst_34 {dimension_numbers = #tpu.dot_dimension_numbers<[1], [0], [0], [1], [0, 0, 1, 1], [], []>} : vector<2x256xbf16>, vector<256x256xbf16>, vector<2x256xf32> -> vector<2x256xf32>
    %49 = arith.addf %46, %48 : vector<2x256xf32>
    %50 = math.tanh %49 : vector<2x256xf32>
    %c12 = arith.constant 12 : index
    %c0_35 = arith.constant 0 : index
    %51 = vector.load %arg8[%c12, %c0_35] : memref<56x256xf32, #tpu.memory_space<vmem>>, vector<2x256xf32>
    tpu.vector_store %arg8[%c12, %c0_35], %50 {strides = array<i32>} : memref<56x256xf32, #tpu.memory_space<vmem>>, vector<2x256xf32>,
    %c7 = arith.constant 7 : index
    %c0_36 = arith.constant 0 : index
    %c0_37 = arith.constant 0 : index
    %52 = vector.load %arg0[%c7, %c0_36, %c0_37] : memref<28x2x256xf32, #tpu.memory_space<vmem>>, vector<1x2x256xf32>
    %53 = vector.shape_cast %52 : vector<1x2x256xf32> to vector<2x256xf32>
    %54 = arith.truncf %50 : vector<2x256xf32> to vector<2x256xbf16>
    %cst_38 = arith.constant dense<0.000000e+00> : vector<2x256xf32>
    %55 = tpu.matmul %54, %0, %cst_38 {dimension_numbers = #tpu.dot_dimension_numbers<[1], [0], [0], [1], [0, 0, 1, 1], [], []>} : vector<2x256xbf16>, vector<256x256xbf16>, vector<2x256xf32> -> vector<2x256xf32>
    %56 = arith.addf %53, %55 : vector<2x256xf32>
    %57 = math.tanh %56 : vector<2x256xf32>
    %c14 = arith.constant 14 : index
    %c0_39 = arith.constant 0 : index
    %58 = vector.load %arg8[%c14, %c0_39] : memref<56x256xf32, #tpu.memory_space<vmem>>, vector<2x256xf32>
    tpu.vector_store %arg8[%c14, %c0_39], %57 {strides = array<i32>} : memref<56x256xf32, #tpu.memory_space<vmem>>, vector<2x256xf32>,
    %c8_40 = arith.constant 8 : index
    %c0_41 = arith.constant 0 : index
    %c0_42 = arith.constant 0 : index
    %59 = vector.load %arg0[%c8_40, %c0_41, %c0_42] : memref<28x2x256xf32, #tpu.memory_space<vmem>>, vector<1x2x256xf32>
    %60 = vector.shape_cast %59 : vector<1x2x256xf32> to vector<2x256xf32>
    %61 = arith.truncf %57 : vector<2x256xf32> to vector<2x256xbf16>
    %cst_43 = arith.constant dense<0.000000e+00> : vector<2x256xf32>
    %62 = tpu.matmul %61, %0, %cst_43 {dimension_numbers = #tpu.dot_dimension_numbers<[1], [0], [0], [1], [0, 0, 1, 1], [], []>} : vector<2x256xbf16>, vector<256x256xbf16>, vector<2x256xf32> -> vector<2x256xf32>
    %63 = arith.addf %60, %62 : vector<2x256xf32>
    %64 = math.tanh %63 : vector<2x256xf32>
    %c16 = arith.constant 16 : index
    %c0_44 = arith.constant 0 : index
    %65 = vector.load %arg8[%c16, %c0_44] : memref<56x256xf32, #tpu.memory_space<vmem>>, vector<2x256xf32>
    tpu.vector_store %arg8[%c16, %c0_44], %64 {strides = array<i32>} : memref<56x256xf32, #tpu.memory_space<vmem>>, vector<2x256xf32>,
    %c9 = arith.constant 9 : index
    %c0_45 = arith.constant 0 : index
    %c0_46 = arith.constant 0 : index
    %66 = vector.load %arg0[%c9, %c0_45, %c0_46] : memref<28x2x256xf32, #tpu.memory_space<vmem>>, vector<1x2x256xf32>
    %67 = vector.shape_cast %66 : vector<1x2x256xf32> to vector<2x256xf32>
    %68 = arith.truncf %64 : vector<2x256xf32> to vector<2x256xbf16>
    %cst_47 = arith.constant dense<0.000000e+00> : vector<2x256xf32>
    %69 = tpu.matmul %68, %0, %cst_47 {dimension_numbers = #tpu.dot_dimension_numbers<[1], [0], [0], [1], [0, 0, 1, 1], [], []>} : vector<2x256xbf16>, vector<256x256xbf16>, vector<2x256xf32> -> vector<2x256xf32>
    %70 = arith.addf %67, %69 : vector<2x256xf32>
    %71 = math.tanh %70 : vector<2x256xf32>
    %c18 = arith.constant 18 : index
    %c0_48 = arith.constant 0 : index
    %72 = vector.load %arg8[%c18, %c0_48] : memref<56x256xf32, #tpu.memory_space<vmem>>, vector<2x256xf32>
    tpu.vector_store %arg8[%c18, %c0_48], %71 {strides = array<i32>} : memref<56x256xf32, #tpu.memory_space<vmem>>, vector<2x256xf32>,
    %c10_49 = arith.constant 10 : index
    %c0_50 = arith.constant 0 : index
    %c0_51 = arith.constant 0 : index
    %73 = vector.load %arg0[%c10_49, %c0_50, %c0_51] : memref<28x2x256xf32, #tpu.memory_space<vmem>>, vector<1x2x256xf32>
    %74 = vector.shape_cast %73 : vector<1x2x256xf32> to vector<2x256xf32>
    %75 = arith.truncf %71 : vector<2x256xf32> to vector<2x256xbf16>
    %cst_52 = arith.constant dense<0.000000e+00> : vector<2x256xf32>
    %76 = tpu.matmul %75, %0, %cst_52 {dimension_numbers = #tpu.dot_dimension_numbers<[1], [0], [0], [1], [0, 0, 1, 1], [], []>} : vector<2x256xbf16>, vector<256x256xbf16>, vector<2x256xf32> -> vector<2x256xf32>
    %77 = arith.addf %74, %76 : vector<2x256xf32>
    %78 = math.tanh %77 : vector<2x256xf32>
    %c20 = arith.constant 20 : index
    %c0_53 = arith.constant 0 : index
    %79 = vector.load %arg8[%c20, %c0_53] : memref<56x256xf32, #tpu.memory_space<vmem>>, vector<2x256xf32>
    tpu.vector_store %arg8[%c20, %c0_53], %78 {strides = array<i32>} : memref<56x256xf32, #tpu.memory_space<vmem>>, vector<2x256xf32>,
    %c11 = arith.constant 11 : index
    %c0_54 = arith.constant 0 : index
    %c0_55 = arith.constant 0 : index
    %80 = vector.load %arg0[%c11, %c0_54, %c0_55] : memref<28x2x256xf32, #tpu.memory_space<vmem>>, vector<1x2x256xf32>
    %81 = vector.shape_cast %80 : vector<1x2x256xf32> to vector<2x256xf32>
    %82 = arith.truncf %78 : vector<2x256xf32> to vector<2x256xbf16>
    %cst_56 = arith.constant dense<0.000000e+00> : vector<2x256xf32>
    %83 = tpu.matmul %82, %0, %cst_56 {dimension_numbers = #tpu.dot_dimension_numbers<[1], [0], [0], [1], [0, 0, 1, 1], [], []>} : vector<2x256xbf16>, vector<256x256xbf16>, vector<2x256xf32> -> vector<2x256xf32>
    %84 = arith.addf %81, %83 : vector<2x256xf32>
    %85 = math.tanh %84 : vector<2x256xf32>
    %c22 = arith.constant 22 : index
    %c0_57 = arith.constant 0 : index
    %86 = vector.load %arg8[%c22, %c0_57] : memref<56x256xf32, #tpu.memory_space<vmem>>, vector<2x256xf32>
    tpu.vector_store %arg8[%c22, %c0_57], %85 {strides = array<i32>} : memref<56x256xf32, #tpu.memory_space<vmem>>, vector<2x256xf32>,
    %c12_58 = arith.constant 12 : index
    %c0_59 = arith.constant 0 : index
    %c0_60 = arith.constant 0 : index
    %87 = vector.load %arg0[%c12_58, %c0_59, %c0_60] : memref<28x2x256xf32, #tpu.memory_space<vmem>>, vector<1x2x256xf32>
    %88 = vector.shape_cast %87 : vector<1x2x256xf32> to vector<2x256xf32>
    %89 = arith.truncf %85 : vector<2x256xf32> to vector<2x256xbf16>
    %cst_61 = arith.constant dense<0.000000e+00> : vector<2x256xf32>
    %90 = tpu.matmul %89, %0, %cst_61 {dimension_numbers = #tpu.dot_dimension_numbers<[1], [0], [0], [1], [0, 0, 1, 1], [], []>} : vector<2x256xbf16>, vector<256x256xbf16>, vector<2x256xf32> -> vector<2x256xf32>
    %91 = arith.addf %88, %90 : vector<2x256xf32>
    %92 = math.tanh %91 : vector<2x256xf32>
    %c24 = arith.constant 24 : index
    %c0_62 = arith.constant 0 : index
    %93 = vector.load %arg8[%c24, %c0_62] : memref<56x256xf32, #tpu.memory_space<vmem>>, vector<2x256xf32>
    tpu.vector_store %arg8[%c24, %c0_62], %92 {strides = array<i32>} : memref<56x256xf32, #tpu.memory_space<vmem>>, vector<2x256xf32>,
    %c13 = arith.constant 13 : index
    %c0_63 = arith.constant 0 : index
    %c0_64 = arith.constant 0 : index
    %94 = vector.load %arg0[%c13, %c0_63, %c0_64] : memref<28x2x256xf32, #tpu.memory_space<vmem>>, vector<1x2x256xf32>
    %95 = vector.shape_cast %94 : vector<1x2x256xf32> to vector<2x256xf32>
    %96 = arith.truncf %92 : vector<2x256xf32> to vector<2x256xbf16>
    %cst_65 = arith.constant dense<0.000000e+00> : vector<2x256xf32>
    %97 = tpu.matmul %96, %0, %cst_65 {dimension_numbers = #tpu.dot_dimension_numbers<[1], [0], [0], [1], [0, 0, 1, 1], [], []>} : vector<2x256xbf16>, vector<256x256xbf16>, vector<2x256xf32> -> vector<2x256xf32>
    %98 = arith.addf %95, %97 : vector<2x256xf32>
    %99 = math.tanh %98 : vector<2x256xf32>
    %c26 = arith.constant 26 : index
    %c0_66 = arith.constant 0 : index
    %100 = vector.load %arg8[%c26, %c0_66] : memref<56x256xf32, #tpu.memory_space<vmem>>, vector<2x256xf32>
    tpu.vector_store %arg8[%c26, %c0_66], %99 {strides = array<i32>} : memref<56x256xf32, #tpu.memory_space<vmem>>, vector<2x256xf32>,
    %c14_67 = arith.constant 14 : index
    %c0_68 = arith.constant 0 : index
    %c0_69 = arith.constant 0 : index
    %101 = vector.load %arg0[%c14_67, %c0_68, %c0_69] : memref<28x2x256xf32, #tpu.memory_space<vmem>>, vector<1x2x256xf32>
    %102 = vector.shape_cast %101 : vector<1x2x256xf32> to vector<2x256xf32>
    %103 = arith.truncf %99 : vector<2x256xf32> to vector<2x256xbf16>
    %cst_70 = arith.constant dense<0.000000e+00> : vector<2x256xf32>
    %104 = tpu.matmul %103, %0, %cst_70 {dimension_numbers = #tpu.dot_dimension_numbers<[1], [0], [0], [1], [0, 0, 1, 1], [], []>} : vector<2x256xbf16>, vector<256x256xbf16>, vector<2x256xf32> -> vector<2x256xf32>
    %105 = arith.addf %102, %104 : vector<2x256xf32>
    %106 = math.tanh %105 : vector<2x256xf32>
    %c28 = arith.constant 28 : index
    %c0_71 = arith.constant 0 : index
    %107 = vector.load %arg8[%c28, %c0_71] : memref<56x256xf32, #tpu.memory_space<vmem>>, vector<2x256xf32>
    tpu.vector_store %arg8[%c28, %c0_71], %106 {strides = array<i32>} : memref<56x256xf32, #tpu.memory_space<vmem>>, vector<2x256xf32>,
    %c15 = arith.constant 15 : index
    %c0_72 = arith.constant 0 : index
    %c0_73 = arith.constant 0 : index
    %108 = vector.load %arg0[%c15, %c0_72, %c0_73] : memref<28x2x256xf32, #tpu.memory_space<vmem>>, vector<1x2x256xf32>
    %109 = vector.shape_cast %108 : vector<1x2x256xf32> to vector<2x256xf32>
    %110 = arith.truncf %106 : vector<2x256xf32> to vector<2x256xbf16>
    %cst_74 = arith.constant dense<0.000000e+00> : vector<2x256xf32>
    %111 = tpu.matmul %110, %0, %cst_74 {dimension_numbers = #tpu.dot_dimension_numbers<[1], [0], [0], [1], [0, 0, 1, 1], [], []>} : vector<2x256xbf16>, vector<256x256xbf16>, vector<2x256xf32> -> vector<2x256xf32>
    %112 = arith.addf %109, %111 : vector<2x256xf32>
    %113 = math.tanh %112 : vector<2x256xf32>
    %c30 = arith.constant 30 : index
    %c0_75 = arith.constant 0 : index
    %114 = vector.load %arg8[%c30, %c0_75] : memref<56x256xf32, #tpu.memory_space<vmem>>, vector<2x256xf32>
    tpu.vector_store %arg8[%c30, %c0_75], %113 {strides = array<i32>} : memref<56x256xf32, #tpu.memory_space<vmem>>, vector<2x256xf32>,
    %c16_76 = arith.constant 16 : index
    %c0_77 = arith.constant 0 : index
    %c0_78 = arith.constant 0 : index
    %115 = vector.load %arg0[%c16_76, %c0_77, %c0_78] : memref<28x2x256xf32, #tpu.memory_space<vmem>>, vector<1x2x256xf32>
    %116 = vector.shape_cast %115 : vector<1x2x256xf32> to vector<2x256xf32>
    %117 = arith.truncf %113 : vector<2x256xf32> to vector<2x256xbf16>
    %cst_79 = arith.constant dense<0.000000e+00> : vector<2x256xf32>
    %118 = tpu.matmul %117, %0, %cst_79 {dimension_numbers = #tpu.dot_dimension_numbers<[1], [0], [0], [1], [0, 0, 1, 1], [], []>} : vector<2x256xbf16>, vector<256x256xbf16>, vector<2x256xf32> -> vector<2x256xf32>
    %119 = arith.addf %116, %118 : vector<2x256xf32>
    %120 = math.tanh %119 : vector<2x256xf32>
    %c32 = arith.constant 32 : index
    %c0_80 = arith.constant 0 : index
    %121 = vector.load %arg8[%c32, %c0_80] : memref<56x256xf32, #tpu.memory_space<vmem>>, vector<2x256xf32>
    tpu.vector_store %arg8[%c32, %c0_80], %120 {strides = array<i32>} : memref<56x256xf32, #tpu.memory_space<vmem>>, vector<2x256xf32>,
    %c17 = arith.constant 17 : index
    %c0_81 = arith.constant 0 : index
    %c0_82 = arith.constant 0 : index
    %122 = vector.load %arg0[%c17, %c0_81, %c0_82] : memref<28x2x256xf32, #tpu.memory_space<vmem>>, vector<1x2x256xf32>
    %123 = vector.shape_cast %122 : vector<1x2x256xf32> to vector<2x256xf32>
    %124 = arith.truncf %120 : vector<2x256xf32> to vector<2x256xbf16>
    %cst_83 = arith.constant dense<0.000000e+00> : vector<2x256xf32>
    %125 = tpu.matmul %124, %0, %cst_83 {dimension_numbers = #tpu.dot_dimension_numbers<[1], [0], [0], [1], [0, 0, 1, 1], [], []>} : vector<2x256xbf16>, vector<256x256xbf16>, vector<2x256xf32> -> vector<2x256xf32>
    %126 = arith.addf %123, %125 : vector<2x256xf32>
    %127 = math.tanh %126 : vector<2x256xf32>
    %c34 = arith.constant 34 : index
    %c0_84 = arith.constant 0 : index
    %128 = vector.load %arg8[%c34, %c0_84] : memref<56x256xf32, #tpu.memory_space<vmem>>, vector<2x256xf32>
    tpu.vector_store %arg8[%c34, %c0_84], %127 {strides = array<i32>} : memref<56x256xf32, #tpu.memory_space<vmem>>, vector<2x256xf32>,
    %c18_85 = arith.constant 18 : index
    %c0_86 = arith.constant 0 : index
    %c0_87 = arith.constant 0 : index
    %129 = vector.load %arg0[%c18_85, %c0_86, %c0_87] : memref<28x2x256xf32, #tpu.memory_space<vmem>>, vector<1x2x256xf32>
    %130 = vector.shape_cast %129 : vector<1x2x256xf32> to vector<2x256xf32>
    %131 = arith.truncf %127 : vector<2x256xf32> to vector<2x256xbf16>
    %cst_88 = arith.constant dense<0.000000e+00> : vector<2x256xf32>
    %132 = tpu.matmul %131, %0, %cst_88 {dimension_numbers = #tpu.dot_dimension_numbers<[1], [0], [0], [1], [0, 0, 1, 1], [], []>} : vector<2x256xbf16>, vector<256x256xbf16>, vector<2x256xf32> -> vector<2x256xf32>
    %133 = arith.addf %130, %132 : vector<2x256xf32>
    %134 = math.tanh %133 : vector<2x256xf32>
    %c36 = arith.constant 36 : index
    %c0_89 = arith.constant 0 : index
    %135 = vector.load %arg8[%c36, %c0_89] : memref<56x256xf32, #tpu.memory_space<vmem>>, vector<2x256xf32>
    tpu.vector_store %arg8[%c36, %c0_89], %134 {strides = array<i32>} : memref<56x256xf32, #tpu.memory_space<vmem>>, vector<2x256xf32>,
    %c19 = arith.constant 19 : index
    %c0_90 = arith.constant 0 : index
    %c0_91 = arith.constant 0 : index
    %136 = vector.load %arg0[%c19, %c0_90, %c0_91] : memref<28x2x256xf32, #tpu.memory_space<vmem>>, vector<1x2x256xf32>
    %137 = vector.shape_cast %136 : vector<1x2x256xf32> to vector<2x256xf32>
    %138 = arith.truncf %134 : vector<2x256xf32> to vector<2x256xbf16>
    %cst_92 = arith.constant dense<0.000000e+00> : vector<2x256xf32>
    %139 = tpu.matmul %138, %0, %cst_92 {dimension_numbers = #tpu.dot_dimension_numbers<[1], [0], [0], [1], [0, 0, 1, 1], [], []>} : vector<2x256xbf16>, vector<256x256xbf16>, vector<2x256xf32> -> vector<2x256xf32>
    %140 = arith.addf %137, %139 : vector<2x256xf32>
    %141 = math.tanh %140 : vector<2x256xf32>
    %c38 = arith.constant 38 : index
    %c0_93 = arith.constant 0 : index
    %142 = vector.load %arg8[%c38, %c0_93] : memref<56x256xf32, #tpu.memory_space<vmem>>, vector<2x256xf32>
    tpu.vector_store %arg8[%c38, %c0_93], %141 {strides = array<i32>} : memref<56x256xf32, #tpu.memory_space<vmem>>, vector<2x256xf32>,
    %c20_94 = arith.constant 20 : index
    %c0_95 = arith.constant 0 : index
    %c0_96 = arith.constant 0 : index
    %143 = vector.load %arg0[%c20_94, %c0_95, %c0_96] : memref<28x2x256xf32, #tpu.memory_space<vmem>>, vector<1x2x256xf32>
    %144 = vector.shape_cast %143 : vector<1x2x256xf32> to vector<2x256xf32>
    %145 = arith.truncf %141 : vector<2x256xf32> to vector<2x256xbf16>
    %cst_97 = arith.constant dense<0.000000e+00> : vector<2x256xf32>
    %146 = tpu.matmul %145, %0, %cst_97 {dimension_numbers = #tpu.dot_dimension_numbers<[1], [0], [0], [1], [0, 0, 1, 1], [], []>} : vector<2x256xbf16>, vector<256x256xbf16>, vector<2x256xf32> -> vector<2x256xf32>
    %147 = arith.addf %144, %146 : vector<2x256xf32>
    %148 = math.tanh %147 : vector<2x256xf32>
    %c40 = arith.constant 40 : index
    %c0_98 = arith.constant 0 : index
    %149 = vector.load %arg8[%c40, %c0_98] : memref<56x256xf32, #tpu.memory_space<vmem>>, vector<2x256xf32>
    tpu.vector_store %arg8[%c40, %c0_98], %148 {strides = array<i32>} : memref<56x256xf32, #tpu.memory_space<vmem>>, vector<2x256xf32>,
    %c21 = arith.constant 21 : index
    %c0_99 = arith.constant 0 : index
    %c0_100 = arith.constant 0 : index
    %150 = vector.load %arg0[%c21, %c0_99, %c0_100] : memref<28x2x256xf32, #tpu.memory_space<vmem>>, vector<1x2x256xf32>
    %151 = vector.shape_cast %150 : vector<1x2x256xf32> to vector<2x256xf32>
    %152 = arith.truncf %148 : vector<2x256xf32> to vector<2x256xbf16>
    %cst_101 = arith.constant dense<0.000000e+00> : vector<2x256xf32>
    %153 = tpu.matmul %152, %0, %cst_101 {dimension_numbers = #tpu.dot_dimension_numbers<[1], [0], [0], [1], [0, 0, 1, 1], [], []>} : vector<2x256xbf16>, vector<256x256xbf16>, vector<2x256xf32> -> vector<2x256xf32>
    %154 = arith.addf %151, %153 : vector<2x256xf32>
    %155 = math.tanh %154 : vector<2x256xf32>
    %c42 = arith.constant 42 : index
    %c0_102 = arith.constant 0 : index
    %156 = vector.load %arg8[%c42, %c0_102] : memref<56x256xf32, #tpu.memory_space<vmem>>, vector<2x256xf32>
    tpu.vector_store %arg8[%c42, %c0_102], %155 {strides = array<i32>} : memref<56x256xf32, #tpu.memory_space<vmem>>, vector<2x256xf32>,
    %c22_103 = arith.constant 22 : index
    %c0_104 = arith.constant 0 : index
    %c0_105 = arith.constant 0 : index
    %157 = vector.load %arg0[%c22_103, %c0_104, %c0_105] : memref<28x2x256xf32, #tpu.memory_space<vmem>>, vector<1x2x256xf32>
    %158 = vector.shape_cast %157 : vector<1x2x256xf32> to vector<2x256xf32>
    %159 = arith.truncf %155 : vector<2x256xf32> to vector<2x256xbf16>
    %cst_106 = arith.constant dense<0.000000e+00> : vector<2x256xf32>
    %160 = tpu.matmul %159, %0, %cst_106 {dimension_numbers = #tpu.dot_dimension_numbers<[1], [0], [0], [1], [0, 0, 1, 1], [], []>} : vector<2x256xbf16>, vector<256x256xbf16>, vector<2x256xf32> -> vector<2x256xf32>
    %161 = arith.addf %158, %160 : vector<2x256xf32>
    %162 = math.tanh %161 : vector<2x256xf32>
    %c44 = arith.constant 44 : index
    %c0_107 = arith.constant 0 : index
    %163 = vector.load %arg8[%c44, %c0_107] : memref<56x256xf32, #tpu.memory_space<vmem>>, vector<2x256xf32>
    tpu.vector_store %arg8[%c44, %c0_107], %162 {strides = array<i32>} : memref<56x256xf32, #tpu.memory_space<vmem>>, vector<2x256xf32>,
    %c23 = arith.constant 23 : index
    %c0_108 = arith.constant 0 : index
    %c0_109 = arith.constant 0 : index
    %164 = vector.load %arg0[%c23, %c0_108, %c0_109] : memref<28x2x256xf32, #tpu.memory_space<vmem>>, vector<1x2x256xf32>
    %165 = vector.shape_cast %164 : vector<1x2x256xf32> to vector<2x256xf32>
    %166 = arith.truncf %162 : vector<2x256xf32> to vector<2x256xbf16>
    %cst_110 = arith.constant dense<0.000000e+00> : vector<2x256xf32>
    %167 = tpu.matmul %166, %0, %cst_110 {dimension_numbers = #tpu.dot_dimension_numbers<[1], [0], [0], [1], [0, 0, 1, 1], [], []>} : vector<2x256xbf16>, vector<256x256xbf16>, vector<2x256xf32> -> vector<2x256xf32>
    %168 = arith.addf %165, %167 : vector<2x256xf32>
    %169 = math.tanh %168 : vector<2x256xf32>
    %c46 = arith.constant 46 : index
    %c0_111 = arith.constant 0 : index
    %170 = vector.load %arg8[%c46, %c0_111] : memref<56x256xf32, #tpu.memory_space<vmem>>, vector<2x256xf32>
    tpu.vector_store %arg8[%c46, %c0_111], %169 {strides = array<i32>} : memref<56x256xf32, #tpu.memory_space<vmem>>, vector<2x256xf32>,
    %c24_112 = arith.constant 24 : index
    %c0_113 = arith.constant 0 : index
    %c0_114 = arith.constant 0 : index
    %171 = vector.load %arg0[%c24_112, %c0_113, %c0_114] : memref<28x2x256xf32, #tpu.memory_space<vmem>>, vector<1x2x256xf32>
    %172 = vector.shape_cast %171 : vector<1x2x256xf32> to vector<2x256xf32>
    %173 = arith.truncf %169 : vector<2x256xf32> to vector<2x256xbf16>
    %cst_115 = arith.constant dense<0.000000e+00> : vector<2x256xf32>
    %174 = tpu.matmul %173, %0, %cst_115 {dimension_numbers = #tpu.dot_dimension_numbers<[1], [0], [0], [1], [0, 0, 1, 1], [], []>} : vector<2x256xbf16>, vector<256x256xbf16>, vector<2x256xf32> -> vector<2x256xf32>
    %175 = arith.addf %172, %174 : vector<2x256xf32>
    %176 = math.tanh %175 : vector<2x256xf32>
    %c48 = arith.constant 48 : index
    %c0_116 = arith.constant 0 : index
    %177 = vector.load %arg8[%c48, %c0_116] : memref<56x256xf32, #tpu.memory_space<vmem>>, vector<2x256xf32>
    tpu.vector_store %arg8[%c48, %c0_116], %176 {strides = array<i32>} : memref<56x256xf32, #tpu.memory_space<vmem>>, vector<2x256xf32>,
    %c25 = arith.constant 25 : index
    %c0_117 = arith.constant 0 : index
    %c0_118 = arith.constant 0 : index
    %178 = vector.load %arg0[%c25, %c0_117, %c0_118] : memref<28x2x256xf32, #tpu.memory_space<vmem>>, vector<1x2x256xf32>
    %179 = vector.shape_cast %178 : vector<1x2x256xf32> to vector<2x256xf32>
    %180 = arith.truncf %176 : vector<2x256xf32> to vector<2x256xbf16>
    %cst_119 = arith.constant dense<0.000000e+00> : vector<2x256xf32>
    %181 = tpu.matmul %180, %0, %cst_119 {dimension_numbers = #tpu.dot_dimension_numbers<[1], [0], [0], [1], [0, 0, 1, 1], [], []>} : vector<2x256xbf16>, vector<256x256xbf16>, vector<2x256xf32> -> vector<2x256xf32>
    %182 = arith.addf %179, %181 : vector<2x256xf32>
    %183 = math.tanh %182 : vector<2x256xf32>
    %c50 = arith.constant 50 : index
    %c0_120 = arith.constant 0 : index
    %184 = vector.load %arg8[%c50, %c0_120] : memref<56x256xf32, #tpu.memory_space<vmem>>, vector<2x256xf32>
    tpu.vector_store %arg8[%c50, %c0_120], %183 {strides = array<i32>} : memref<56x256xf32, #tpu.memory_space<vmem>>, vector<2x256xf32>,
    %c26_121 = arith.constant 26 : index
    %c0_122 = arith.constant 0 : index
    %c0_123 = arith.constant 0 : index
    %185 = vector.load %arg0[%c26_121, %c0_122, %c0_123] : memref<28x2x256xf32, #tpu.memory_space<vmem>>, vector<1x2x256xf32>
    %186 = vector.shape_cast %185 : vector<1x2x256xf32> to vector<2x256xf32>
    %187 = arith.truncf %183 : vector<2x256xf32> to vector<2x256xbf16>
    %cst_124 = arith.constant dense<0.000000e+00> : vector<2x256xf32>
    %188 = tpu.matmul %187, %0, %cst_124 {dimension_numbers = #tpu.dot_dimension_numbers<[1], [0], [0], [1], [0, 0, 1, 1], [], []>} : vector<2x256xbf16>, vector<256x256xbf16>, vector<2x256xf32> -> vector<2x256xf32>
    %189 = arith.addf %186, %188 : vector<2x256xf32>
    %190 = math.tanh %189 : vector<2x256xf32>
    %c52 = arith.constant 52 : index
    %c0_125 = arith.constant 0 : index
    %191 = vector.load %arg8[%c52, %c0_125] : memref<56x256xf32, #tpu.memory_space<vmem>>, vector<2x256xf32>
    tpu.vector_store %arg8[%c52, %c0_125], %190 {strides = array<i32>} : memref<56x256xf32, #tpu.memory_space<vmem>>, vector<2x256xf32>,
    %c27 = arith.constant 27 : index
    %c0_126 = arith.constant 0 : index
    %c0_127 = arith.constant 0 : index
    %192 = vector.load %arg0[%c27, %c0_126, %c0_127] : memref<28x2x256xf32, #tpu.memory_space<vmem>>, vector<1x2x256xf32>
    %193 = vector.shape_cast %192 : vector<1x2x256xf32> to vector<2x256xf32>
    %194 = arith.truncf %190 : vector<2x256xf32> to vector<2x256xbf16>
    %cst_128 = arith.constant dense<0.000000e+00> : vector<2x256xf32>
    %195 = tpu.matmul %194, %0, %cst_128 {dimension_numbers = #tpu.dot_dimension_numbers<[1], [0], [0], [1], [0, 0, 1, 1], [], []>} : vector<2x256xbf16>, vector<256x256xbf16>, vector<2x256xf32> -> vector<2x256xf32>
    %196 = arith.addf %193, %195 : vector<2x256xf32>
    %197 = math.tanh %196 : vector<2x256xf32>
    %c54 = arith.constant 54 : index
    %c0_129 = arith.constant 0 : index
    %198 = vector.load %arg8[%c54, %c0_129] : memref<56x256xf32, #tpu.memory_space<vmem>>, vector<2x256xf32>
    tpu.vector_store %arg8[%c54, %c0_129], %197 {strides = array<i32>} : memref<56x256xf32, #tpu.memory_space<vmem>>, vector<2x256xf32>,
    %c0_130 = arith.constant 0 : index
    %c0_131 = arith.constant 0 : index
    %199 = vector.load %arg8[%c0_130, %c0_131] : memref<56x256xf32, #tpu.memory_space<vmem>>, vector<56x256xf32>
    %200 = arith.truncf %199 : vector<56x256xf32> to vector<56x256xbf16>
    %c0_132 = arith.constant 0 : index
    %c0_133 = arith.constant 0 : index
    %201 = vector.load %arg2[%c0_132, %c0_133] : memref<256x256xbf16, #tpu.memory_space<vmem>>, vector<256x256xbf16>
    %cst_134 = arith.constant dense<0.000000e+00> : vector<56x256xf32>
    %202 = tpu.matmul %200, %201, %cst_134 {dimension_numbers = #tpu.dot_dimension_numbers<[1], [0], [0], [1], [0, 0, 1, 1], [], []>} : vector<56x256xbf16>, vector<256x256xbf16>, vector<56x256xf32> -> vector<56x256xf32>
    %c0_135 = arith.constant 0 : index
    %c0_136 = arith.constant 0 : index
    %203 = vector.load %arg3[%c0_135, %c0_136] : memref<1x256xf32, #tpu.memory_space<vmem>>, vector<1x256xf32>
    %204 = vector.broadcast %203 : vector<1x256xf32> to vector<56x256xf32>
    %205 = arith.addf %202, %204 : vector<56x256xf32>
    %c0_137 = arith.constant 0 : index
    %c0_138 = arith.constant 0 : index
    %206 = vector.load %arg9[%c0_137, %c0_138] : memref<56x256xf32, #tpu.memory_space<vmem>>, vector<56x256xf32>
    tpu.vector_store %arg9[%c0_137, %c0_138], %205 {strides = array<i32>} : memref<56x256xf32, #tpu.memory_space<vmem>>, vector<56x256xf32>,
    %cst_139 = arith.constant 0.000000e+00 : f32
    %207 = vector.broadcast %cst_139 : f32 to vector<2x256xf32>
    %c0_140 = arith.constant 0 : index
    %c0_141 = arith.constant 0 : index
    %208 = vector.load %arg9[%c0_140, %c0_141] : memref<56x256xf32, #tpu.memory_space<vmem>>, vector<2x256xf32>
    %209 = arith.truncf %207 : vector<2x256xf32> to vector<2x256xbf16>
    %cst_142 = arith.constant dense<0.000000e+00> : vector<2x256xf32>
    %210 = tpu.matmul %209, %1, %cst_142 {dimension_numbers = #tpu.dot_dimension_numbers<[1], [0], [0], [1], [0, 0, 1, 1], [], []>} : vector<2x256xbf16>, vector<256x256xbf16>, vector<2x256xf32> -> vector<2x256xf32>
    %211 = arith.addf %208, %210 : vector<2x256xf32>
    %212 = math.tanh %211 : vector<2x256xf32>
    %c0_143 = arith.constant 0 : index
    %c0_144 = arith.constant 0 : index
    %213 = vector.load %arg10[%c0_143, %c0_144] : memref<2x7168xf32, #tpu.memory_space<vmem>>, vector<2x256xf32>
    tpu.vector_store %arg10[%c0_143, %c0_144], %212 {strides = array<i32>} : memref<2x7168xf32, #tpu.memory_space<vmem>>, vector<2x256xf32>,
    %c2_145 = arith.constant 2 : index
    %c0_146 = arith.constant 0 : index
    %214 = vector.load %arg9[%c2_145, %c0_146] : memref<56x256xf32, #tpu.memory_space<vmem>>, vector<2x256xf32>
    %215 = arith.truncf %212 : vector<2x256xf32> to vector<2x256xbf16>
    %cst_147 = arith.constant dense<0.000000e+00> : vector<2x256xf32>
    %216 = tpu.matmul %215, %1, %cst_147 {dimension_numbers = #tpu.dot_dimension_numbers<[1], [0], [0], [1], [0, 0, 1, 1], [], []>} : vector<2x256xbf16>, vector<256x256xbf16>, vector<2x256xf32> -> vector<2x256xf32>
    %217 = arith.addf %214, %216 : vector<2x256xf32>
    %218 = math.tanh %217 : vector<2x256xf32>
    %c0_148 = arith.constant 0 : index
    %c256 = arith.constant 256 : index
    %219 = vector.load %arg10[%c0_148, %c256] : memref<2x7168xf32, #tpu.memory_space<vmem>>, vector<2x256xf32>
    tpu.vector_store %arg10[%c0_148, %c256], %218 {strides = array<i32>} : memref<2x7168xf32, #tpu.memory_space<vmem>>, vector<2x256xf32>,
    %c4_149 = arith.constant 4 : index
    %c0_150 = arith.constant 0 : index
    %220 = vector.load %arg9[%c4_149, %c0_150] : memref<56x256xf32, #tpu.memory_space<vmem>>, vector<2x256xf32>
    %221 = arith.truncf %218 : vector<2x256xf32> to vector<2x256xbf16>
    %cst_151 = arith.constant dense<0.000000e+00> : vector<2x256xf32>
    %222 = tpu.matmul %221, %1, %cst_151 {dimension_numbers = #tpu.dot_dimension_numbers<[1], [0], [0], [1], [0, 0, 1, 1], [], []>} : vector<2x256xbf16>, vector<256x256xbf16>, vector<2x256xf32> -> vector<2x256xf32>
    %223 = arith.addf %220, %222 : vector<2x256xf32>
    %224 = math.tanh %223 : vector<2x256xf32>
    %c0_152 = arith.constant 0 : index
    %c512 = arith.constant 512 : index
    %225 = vector.load %arg10[%c0_152, %c512] : memref<2x7168xf32, #tpu.memory_space<vmem>>, vector<2x256xf32>
    tpu.vector_store %arg10[%c0_152, %c512], %224 {strides = array<i32>} : memref<2x7168xf32, #tpu.memory_space<vmem>>, vector<2x256xf32>,
    %c6_153 = arith.constant 6 : index
    %c0_154 = arith.constant 0 : index
    %226 = vector.load %arg9[%c6_153, %c0_154] : memref<56x256xf32, #tpu.memory_space<vmem>>, vector<2x256xf32>
    %227 = arith.truncf %224 : vector<2x256xf32> to vector<2x256xbf16>
    %cst_155 = arith.constant dense<0.000000e+00> : vector<2x256xf32>
    %228 = tpu.matmul %227, %1, %cst_155 {dimension_numbers = #tpu.dot_dimension_numbers<[1], [0], [0], [1], [0, 0, 1, 1], [], []>} : vector<2x256xbf16>, vector<256x256xbf16>, vector<2x256xf32> -> vector<2x256xf32>
    %229 = arith.addf %226, %228 : vector<2x256xf32>
    %230 = math.tanh %229 : vector<2x256xf32>
    %c0_156 = arith.constant 0 : index
    %c768 = arith.constant 768 : index
    %231 = vector.load %arg10[%c0_156, %c768] : memref<2x7168xf32, #tpu.memory_space<vmem>>, vector<2x256xf32>
    tpu.vector_store %arg10[%c0_156, %c768], %230 {strides = array<i32>} : memref<2x7168xf32, #tpu.memory_space<vmem>>, vector<2x256xf32>,
    %c8_157 = arith.constant 8 : index
    %c0_158 = arith.constant 0 : index
    %232 = vector.load %arg9[%c8_157, %c0_158] : memref<56x256xf32, #tpu.memory_space<vmem>>, vector<2x256xf32>
    %233 = arith.truncf %230 : vector<2x256xf32> to vector<2x256xbf16>
    %cst_159 = arith.constant dense<0.000000e+00> : vector<2x256xf32>
    %234 = tpu.matmul %233, %1, %cst_159 {dimension_numbers = #tpu.dot_dimension_numbers<[1], [0], [0], [1], [0, 0, 1, 1], [], []>} : vector<2x256xbf16>, vector<256x256xbf16>, vector<2x256xf32> -> vector<2x256xf32>
    %235 = arith.addf %232, %234 : vector<2x256xf32>
    %236 = math.tanh %235 : vector<2x256xf32>
    %c0_160 = arith.constant 0 : index
    %c1024 = arith.constant 1024 : index
    %237 = vector.load %arg10[%c0_160, %c1024] : memref<2x7168xf32, #tpu.memory_space<vmem>>, vector<2x256xf32>
    tpu.vector_store %arg10[%c0_160, %c1024], %236 {strides = array<i32>} : memref<2x7168xf32, #tpu.memory_space<vmem>>, vector<2x256xf32>,
    %c10_161 = arith.constant 10 : index
    %c0_162 = arith.constant 0 : index
    %238 = vector.load %arg9[%c10_161, %c0_162] : memref<56x256xf32, #tpu.memory_space<vmem>>, vector<2x256xf32>
    %239 = arith.truncf %236 : vector<2x256xf32> to vector<2x256xbf16>
    %cst_163 = arith.constant dense<0.000000e+00> : vector<2x256xf32>
    %240 = tpu.matmul %239, %1, %cst_163 {dimension_numbers = #tpu.dot_dimension_numbers<[1], [0], [0], [1], [0, 0, 1, 1], [], []>} : vector<2x256xbf16>, vector<256x256xbf16>, vector<2x256xf32> -> vector<2x256xf32>
    %241 = arith.addf %238, %240 : vector<2x256xf32>
    %242 = math.tanh %241 : vector<2x256xf32>
    %c0_164 = arith.constant 0 : index
    %c1280 = arith.constant 1280 : index
    %243 = vector.load %arg10[%c0_164, %c1280] : memref<2x7168xf32, #tpu.memory_space<vmem>>, vector<2x256xf32>
    tpu.vector_store %arg10[%c0_164, %c1280], %242 {strides = array<i32>} : memref<2x7168xf32, #tpu.memory_space<vmem>>, vector<2x256xf32>,
    %c12_165 = arith.constant 12 : index
    %c0_166 = arith.constant 0 : index
    %244 = vector.load %arg9[%c12_165, %c0_166] : memref<56x256xf32, #tpu.memory_space<vmem>>, vector<2x256xf32>
    %245 = arith.truncf %242 : vector<2x256xf32> to vector<2x256xbf16>
    %cst_167 = arith.constant dense<0.000000e+00> : vector<2x256xf32>
    %246 = tpu.matmul %245, %1, %cst_167 {dimension_numbers = #tpu.dot_dimension_numbers<[1], [0], [0], [1], [0, 0, 1, 1], [], []>} : vector<2x256xbf16>, vector<256x256xbf16>, vector<2x256xf32> -> vector<2x256xf32>
    %247 = arith.addf %244, %246 : vector<2x256xf32>
    %248 = math.tanh %247 : vector<2x256xf32>
    %c0_168 = arith.constant 0 : index
    %c1536 = arith.constant 1536 : index
    %249 = vector.load %arg10[%c0_168, %c1536] : memref<2x7168xf32, #tpu.memory_space<vmem>>, vector<2x256xf32>
    tpu.vector_store %arg10[%c0_168, %c1536], %248 {strides = array<i32>} : memref<2x7168xf32, #tpu.memory_space<vmem>>, vector<2x256xf32>,
    %c14_169 = arith.constant 14 : index
    %c0_170 = arith.constant 0 : index
    %250 = vector.load %arg9[%c14_169, %c0_170] : memref<56x256xf32, #tpu.memory_space<vmem>>, vector<2x256xf32>
    %251 = arith.truncf %248 : vector<2x256xf32> to vector<2x256xbf16>
    %cst_171 = arith.constant dense<0.000000e+00> : vector<2x256xf32>
    %252 = tpu.matmul %251, %1, %cst_171 {dimension_numbers = #tpu.dot_dimension_numbers<[1], [0], [0], [1], [0, 0, 1, 1], [], []>} : vector<2x256xbf16>, vector<256x256xbf16>, vector<2x256xf32> -> vector<2x256xf32>
    %253 = arith.addf %250, %252 : vector<2x256xf32>
    %254 = math.tanh %253 : vector<2x256xf32>
    %c0_172 = arith.constant 0 : index
    %c1792 = arith.constant 1792 : index
    %255 = vector.load %arg10[%c0_172, %c1792] : memref<2x7168xf32, #tpu.memory_space<vmem>>, vector<2x256xf32>
    tpu.vector_store %arg10[%c0_172, %c1792], %254 {strides = array<i32>} : memref<2x7168xf32, #tpu.memory_space<vmem>>, vector<2x256xf32>,
    %c16_173 = arith.constant 16 : index
    %c0_174 = arith.constant 0 : index
    %256 = vector.load %arg9[%c16_173, %c0_174] : memref<56x256xf32, #tpu.memory_space<vmem>>, vector<2x256xf32>
    %257 = arith.truncf %254 : vector<2x256xf32> to vector<2x256xbf16>
    %cst_175 = arith.constant dense<0.000000e+00> : vector<2x256xf32>
    %258 = tpu.matmul %257, %1, %cst_175 {dimension_numbers = #tpu.dot_dimension_numbers<[1], [0], [0], [1], [0, 0, 1, 1], [], []>} : vector<2x256xbf16>, vector<256x256xbf16>, vector<2x256xf32> -> vector<2x256xf32>
    %259 = arith.addf %256, %258 : vector<2x256xf32>
    %260 = math.tanh %259 : vector<2x256xf32>
    %c0_176 = arith.constant 0 : index
    %c2048 = arith.constant 2048 : index
    %261 = vector.load %arg10[%c0_176, %c2048] : memref<2x7168xf32, #tpu.memory_space<vmem>>, vector<2x256xf32>
    tpu.vector_store %arg10[%c0_176, %c2048], %260 {strides = array<i32>} : memref<2x7168xf32, #tpu.memory_space<vmem>>, vector<2x256xf32>,
    %c18_177 = arith.constant 18 : index
    %c0_178 = arith.constant 0 : index
    %262 = vector.load %arg9[%c18_177, %c0_178] : memref<56x256xf32, #tpu.memory_space<vmem>>, vector<2x256xf32>
    %263 = arith.truncf %260 : vector<2x256xf32> to vector<2x256xbf16>
    %cst_179 = arith.constant dense<0.000000e+00> : vector<2x256xf32>
    %264 = tpu.matmul %263, %1, %cst_179 {dimension_numbers = #tpu.dot_dimension_numbers<[1], [0], [0], [1], [0, 0, 1, 1], [], []>} : vector<2x256xbf16>, vector<256x256xbf16>, vector<2x256xf32> -> vector<2x256xf32>
    %265 = arith.addf %262, %264 : vector<2x256xf32>
    %266 = math.tanh %265 : vector<2x256xf32>
    %c0_180 = arith.constant 0 : index
    %c2304 = arith.constant 2304 : index
    %267 = vector.load %arg10[%c0_180, %c2304] : memref<2x7168xf32, #tpu.memory_space<vmem>>, vector<2x256xf32>
    tpu.vector_store %arg10[%c0_180, %c2304], %266 {strides = array<i32>} : memref<2x7168xf32, #tpu.memory_space<vmem>>, vector<2x256xf32>,
    %c20_181 = arith.constant 20 : index
    %c0_182 = arith.constant 0 : index
    %268 = vector.load %arg9[%c20_181, %c0_182] : memref<56x256xf32, #tpu.memory_space<vmem>>, vector<2x256xf32>
    %269 = arith.truncf %266 : vector<2x256xf32> to vector<2x256xbf16>
    %cst_183 = arith.constant dense<0.000000e+00> : vector<2x256xf32>
    %270 = tpu.matmul %269, %1, %cst_183 {dimension_numbers = #tpu.dot_dimension_numbers<[1], [0], [0], [1], [0, 0, 1, 1], [], []>} : vector<2x256xbf16>, vector<256x256xbf16>, vector<2x256xf32> -> vector<2x256xf32>
    %271 = arith.addf %268, %270 : vector<2x256xf32>
    %272 = math.tanh %271 : vector<2x256xf32>
    %c0_184 = arith.constant 0 : index
    %c2560 = arith.constant 2560 : index
    %273 = vector.load %arg10[%c0_184, %c2560] : memref<2x7168xf32, #tpu.memory_space<vmem>>, vector<2x256xf32>
    tpu.vector_store %arg10[%c0_184, %c2560], %272 {strides = array<i32>} : memref<2x7168xf32, #tpu.memory_space<vmem>>, vector<2x256xf32>,
    %c22_185 = arith.constant 22 : index
    %c0_186 = arith.constant 0 : index
    %274 = vector.load %arg9[%c22_185, %c0_186] : memref<56x256xf32, #tpu.memory_space<vmem>>, vector<2x256xf32>
    %275 = arith.truncf %272 : vector<2x256xf32> to vector<2x256xbf16>
    %cst_187 = arith.constant dense<0.000000e+00> : vector<2x256xf32>
    %276 = tpu.matmul %275, %1, %cst_187 {dimension_numbers = #tpu.dot_dimension_numbers<[1], [0], [0], [1], [0, 0, 1, 1], [], []>} : vector<2x256xbf16>, vector<256x256xbf16>, vector<2x256xf32> -> vector<2x256xf32>
    %277 = arith.addf %274, %276 : vector<2x256xf32>
    %278 = math.tanh %277 : vector<2x256xf32>
    %c0_188 = arith.constant 0 : index
    %c2816 = arith.constant 2816 : index
    %279 = vector.load %arg10[%c0_188, %c2816] : memref<2x7168xf32, #tpu.memory_space<vmem>>, vector<2x256xf32>
    tpu.vector_store %arg10[%c0_188, %c2816], %278 {strides = array<i32>} : memref<2x7168xf32, #tpu.memory_space<vmem>>, vector<2x256xf32>,
    %c24_189 = arith.constant 24 : index
    %c0_190 = arith.constant 0 : index
    %280 = vector.load %arg9[%c24_189, %c0_190] : memref<56x256xf32, #tpu.memory_space<vmem>>, vector<2x256xf32>
    %281 = arith.truncf %278 : vector<2x256xf32> to vector<2x256xbf16>
    %cst_191 = arith.constant dense<0.000000e+00> : vector<2x256xf32>
    %282 = tpu.matmul %281, %1, %cst_191 {dimension_numbers = #tpu.dot_dimension_numbers<[1], [0], [0], [1], [0, 0, 1, 1], [], []>} : vector<2x256xbf16>, vector<256x256xbf16>, vector<2x256xf32> -> vector<2x256xf32>
    %283 = arith.addf %280, %282 : vector<2x256xf32>
    %284 = math.tanh %283 : vector<2x256xf32>
    %c0_192 = arith.constant 0 : index
    %c3072 = arith.constant 3072 : index
    %285 = vector.load %arg10[%c0_192, %c3072] : memref<2x7168xf32, #tpu.memory_space<vmem>>, vector<2x256xf32>
    tpu.vector_store %arg10[%c0_192, %c3072], %284 {strides = array<i32>} : memref<2x7168xf32, #tpu.memory_space<vmem>>, vector<2x256xf32>,
    %c26_193 = arith.constant 26 : index
    %c0_194 = arith.constant 0 : index
    %286 = vector.load %arg9[%c26_193, %c0_194] : memref<56x256xf32, #tpu.memory_space<vmem>>, vector<2x256xf32>
    %287 = arith.truncf %284 : vector<2x256xf32> to vector<2x256xbf16>
    %cst_195 = arith.constant dense<0.000000e+00> : vector<2x256xf32>
    %288 = tpu.matmul %287, %1, %cst_195 {dimension_numbers = #tpu.dot_dimension_numbers<[1], [0], [0], [1], [0, 0, 1, 1], [], []>} : vector<2x256xbf16>, vector<256x256xbf16>, vector<2x256xf32> -> vector<2x256xf32>
    %289 = arith.addf %286, %288 : vector<2x256xf32>
    %290 = math.tanh %289 : vector<2x256xf32>
    %c0_196 = arith.constant 0 : index
    %c3328 = arith.constant 3328 : index
    %291 = vector.load %arg10[%c0_196, %c3328] : memref<2x7168xf32, #tpu.memory_space<vmem>>, vector<2x256xf32>
    tpu.vector_store %arg10[%c0_196, %c3328], %290 {strides = array<i32>} : memref<2x7168xf32, #tpu.memory_space<vmem>>, vector<2x256xf32>,
    %c28_197 = arith.constant 28 : index
    %c0_198 = arith.constant 0 : index
    %292 = vector.load %arg9[%c28_197, %c0_198] : memref<56x256xf32, #tpu.memory_space<vmem>>, vector<2x256xf32>
    %293 = arith.truncf %290 : vector<2x256xf32> to vector<2x256xbf16>
    %cst_199 = arith.constant dense<0.000000e+00> : vector<2x256xf32>
    %294 = tpu.matmul %293, %1, %cst_199 {dimension_numbers = #tpu.dot_dimension_numbers<[1], [0], [0], [1], [0, 0, 1, 1], [], []>} : vector<2x256xbf16>, vector<256x256xbf16>, vector<2x256xf32> -> vector<2x256xf32>
    %295 = arith.addf %292, %294 : vector<2x256xf32>
    %296 = math.tanh %295 : vector<2x256xf32>
    %c0_200 = arith.constant 0 : index
    %c3584 = arith.constant 3584 : index
    %297 = vector.load %arg10[%c0_200, %c3584] : memref<2x7168xf32, #tpu.memory_space<vmem>>, vector<2x256xf32>
    tpu.vector_store %arg10[%c0_200, %c3584], %296 {strides = array<i32>} : memref<2x7168xf32, #tpu.memory_space<vmem>>, vector<2x256xf32>,
    %c30_201 = arith.constant 30 : index
    %c0_202 = arith.constant 0 : index
    %298 = vector.load %arg9[%c30_201, %c0_202] : memref<56x256xf32, #tpu.memory_space<vmem>>, vector<2x256xf32>
    %299 = arith.truncf %296 : vector<2x256xf32> to vector<2x256xbf16>
    %cst_203 = arith.constant dense<0.000000e+00> : vector<2x256xf32>
    %300 = tpu.matmul %299, %1, %cst_203 {dimension_numbers = #tpu.dot_dimension_numbers<[1], [0], [0], [1], [0, 0, 1, 1], [], []>} : vector<2x256xbf16>, vector<256x256xbf16>, vector<2x256xf32> -> vector<2x256xf32>
    %301 = arith.addf %298, %300 : vector<2x256xf32>
    %302 = math.tanh %301 : vector<2x256xf32>
    %c0_204 = arith.constant 0 : index
    %c3840 = arith.constant 3840 : index
    %303 = vector.load %arg10[%c0_204, %c3840] : memref<2x7168xf32, #tpu.memory_space<vmem>>, vector<2x256xf32>
    tpu.vector_store %arg10[%c0_204, %c3840], %302 {strides = array<i32>} : memref<2x7168xf32, #tpu.memory_space<vmem>>, vector<2x256xf32>,
    %c32_205 = arith.constant 32 : index
    %c0_206 = arith.constant 0 : index
    %304 = vector.load %arg9[%c32_205, %c0_206] : memref<56x256xf32, #tpu.memory_space<vmem>>, vector<2x256xf32>
    %305 = arith.truncf %302 : vector<2x256xf32> to vector<2x256xbf16>
    %cst_207 = arith.constant dense<0.000000e+00> : vector<2x256xf32>
    %306 = tpu.matmul %305, %1, %cst_207 {dimension_numbers = #tpu.dot_dimension_numbers<[1], [0], [0], [1], [0, 0, 1, 1], [], []>} : vector<2x256xbf16>, vector<256x256xbf16>, vector<2x256xf32> -> vector<2x256xf32>
    %307 = arith.addf %304, %306 : vector<2x256xf32>
    %308 = math.tanh %307 : vector<2x256xf32>
    %c0_208 = arith.constant 0 : index
    %c4096 = arith.constant 4096 : index
    %309 = vector.load %arg10[%c0_208, %c4096] : memref<2x7168xf32, #tpu.memory_space<vmem>>, vector<2x256xf32>
    tpu.vector_store %arg10[%c0_208, %c4096], %308 {strides = array<i32>} : memref<2x7168xf32, #tpu.memory_space<vmem>>, vector<2x256xf32>,
    %c34_209 = arith.constant 34 : index
    %c0_210 = arith.constant 0 : index
    %310 = vector.load %arg9[%c34_209, %c0_210] : memref<56x256xf32, #tpu.memory_space<vmem>>, vector<2x256xf32>
    %311 = arith.truncf %308 : vector<2x256xf32> to vector<2x256xbf16>
    %cst_211 = arith.constant dense<0.000000e+00> : vector<2x256xf32>
    %312 = tpu.matmul %311, %1, %cst_211 {dimension_numbers = #tpu.dot_dimension_numbers<[1], [0], [0], [1], [0, 0, 1, 1], [], []>} : vector<2x256xbf16>, vector<256x256xbf16>, vector<2x256xf32> -> vector<2x256xf32>
    %313 = arith.addf %310, %312 : vector<2x256xf32>
    %314 = math.tanh %313 : vector<2x256xf32>
    %c0_212 = arith.constant 0 : index
    %c4352 = arith.constant 4352 : index
    %315 = vector.load %arg10[%c0_212, %c4352] : memref<2x7168xf32, #tpu.memory_space<vmem>>, vector<2x256xf32>
    tpu.vector_store %arg10[%c0_212, %c4352], %314 {strides = array<i32>} : memref<2x7168xf32, #tpu.memory_space<vmem>>, vector<2x256xf32>,
    %c36_213 = arith.constant 36 : index
    %c0_214 = arith.constant 0 : index
    %316 = vector.load %arg9[%c36_213, %c0_214] : memref<56x256xf32, #tpu.memory_space<vmem>>, vector<2x256xf32>
    %317 = arith.truncf %314 : vector<2x256xf32> to vector<2x256xbf16>
    %cst_215 = arith.constant dense<0.000000e+00> : vector<2x256xf32>
    %318 = tpu.matmul %317, %1, %cst_215 {dimension_numbers = #tpu.dot_dimension_numbers<[1], [0], [0], [1], [0, 0, 1, 1], [], []>} : vector<2x256xbf16>, vector<256x256xbf16>, vector<2x256xf32> -> vector<2x256xf32>
    %319 = arith.addf %316, %318 : vector<2x256xf32>
    %320 = math.tanh %319 : vector<2x256xf32>
    %c0_216 = arith.constant 0 : index
    %c4608 = arith.constant 4608 : index
    %321 = vector.load %arg10[%c0_216, %c4608] : memref<2x7168xf32, #tpu.memory_space<vmem>>, vector<2x256xf32>
    tpu.vector_store %arg10[%c0_216, %c4608], %320 {strides = array<i32>} : memref<2x7168xf32, #tpu.memory_space<vmem>>, vector<2x256xf32>,
    %c38_217 = arith.constant 38 : index
    %c0_218 = arith.constant 0 : index
    %322 = vector.load %arg9[%c38_217, %c0_218] : memref<56x256xf32, #tpu.memory_space<vmem>>, vector<2x256xf32>
    %323 = arith.truncf %320 : vector<2x256xf32> to vector<2x256xbf16>
    %cst_219 = arith.constant dense<0.000000e+00> : vector<2x256xf32>
    %324 = tpu.matmul %323, %1, %cst_219 {dimension_numbers = #tpu.dot_dimension_numbers<[1], [0], [0], [1], [0, 0, 1, 1], [], []>} : vector<2x256xbf16>, vector<256x256xbf16>, vector<2x256xf32> -> vector<2x256xf32>
    %325 = arith.addf %322, %324 : vector<2x256xf32>
    %326 = math.tanh %325 : vector<2x256xf32>
    %c0_220 = arith.constant 0 : index
    %c4864 = arith.constant 4864 : index
    %327 = vector.load %arg10[%c0_220, %c4864] : memref<2x7168xf32, #tpu.memory_space<vmem>>, vector<2x256xf32>
    tpu.vector_store %arg10[%c0_220, %c4864], %326 {strides = array<i32>} : memref<2x7168xf32, #tpu.memory_space<vmem>>, vector<2x256xf32>,
    %c40_221 = arith.constant 40 : index
    %c0_222 = arith.constant 0 : index
    %328 = vector.load %arg9[%c40_221, %c0_222] : memref<56x256xf32, #tpu.memory_space<vmem>>, vector<2x256xf32>
    %329 = arith.truncf %326 : vector<2x256xf32> to vector<2x256xbf16>
    %cst_223 = arith.constant dense<0.000000e+00> : vector<2x256xf32>
    %330 = tpu.matmul %329, %1, %cst_223 {dimension_numbers = #tpu.dot_dimension_numbers<[1], [0], [0], [1], [0, 0, 1, 1], [], []>} : vector<2x256xbf16>, vector<256x256xbf16>, vector<2x256xf32> -> vector<2x256xf32>
    %331 = arith.addf %328, %330 : vector<2x256xf32>
    %332 = math.tanh %331 : vector<2x256xf32>
    %c0_224 = arith.constant 0 : index
    %c5120 = arith.constant 5120 : index
    %333 = vector.load %arg10[%c0_224, %c5120] : memref<2x7168xf32, #tpu.memory_space<vmem>>, vector<2x256xf32>
    tpu.vector_store %arg10[%c0_224, %c5120], %332 {strides = array<i32>} : memref<2x7168xf32, #tpu.memory_space<vmem>>, vector<2x256xf32>,
    %c42_225 = arith.constant 42 : index
    %c0_226 = arith.constant 0 : index
    %334 = vector.load %arg9[%c42_225, %c0_226] : memref<56x256xf32, #tpu.memory_space<vmem>>, vector<2x256xf32>
    %335 = arith.truncf %332 : vector<2x256xf32> to vector<2x256xbf16>
    %cst_227 = arith.constant dense<0.000000e+00> : vector<2x256xf32>
    %336 = tpu.matmul %335, %1, %cst_227 {dimension_numbers = #tpu.dot_dimension_numbers<[1], [0], [0], [1], [0, 0, 1, 1], [], []>} : vector<2x256xbf16>, vector<256x256xbf16>, vector<2x256xf32> -> vector<2x256xf32>
    %337 = arith.addf %334, %336 : vector<2x256xf32>
    %338 = math.tanh %337 : vector<2x256xf32>
    %c0_228 = arith.constant 0 : index
    %c5376 = arith.constant 5376 : index
    %339 = vector.load %arg10[%c0_228, %c5376] : memref<2x7168xf32, #tpu.memory_space<vmem>>, vector<2x256xf32>
    tpu.vector_store %arg10[%c0_228, %c5376], %338 {strides = array<i32>} : memref<2x7168xf32, #tpu.memory_space<vmem>>, vector<2x256xf32>,
    %c44_229 = arith.constant 44 : index
    %c0_230 = arith.constant 0 : index
    %340 = vector.load %arg9[%c44_229, %c0_230] : memref<56x256xf32, #tpu.memory_space<vmem>>, vector<2x256xf32>
    %341 = arith.truncf %338 : vector<2x256xf32> to vector<2x256xbf16>
    %cst_231 = arith.constant dense<0.000000e+00> : vector<2x256xf32>
    %342 = tpu.matmul %341, %1, %cst_231 {dimension_numbers = #tpu.dot_dimension_numbers<[1], [0], [0], [1], [0, 0, 1, 1], [], []>} : vector<2x256xbf16>, vector<256x256xbf16>, vector<2x256xf32> -> vector<2x256xf32>
    %343 = arith.addf %340, %342 : vector<2x256xf32>
    %344 = math.tanh %343 : vector<2x256xf32>
    %c0_232 = arith.constant 0 : index
    %c5632 = arith.constant 5632 : index
    %345 = vector.load %arg10[%c0_232, %c5632] : memref<2x7168xf32, #tpu.memory_space<vmem>>, vector<2x256xf32>
    tpu.vector_store %arg10[%c0_232, %c5632], %344 {strides = array<i32>} : memref<2x7168xf32, #tpu.memory_space<vmem>>, vector<2x256xf32>,
    %c46_233 = arith.constant 46 : index
    %c0_234 = arith.constant 0 : index
    %346 = vector.load %arg9[%c46_233, %c0_234] : memref<56x256xf32, #tpu.memory_space<vmem>>, vector<2x256xf32>
    %347 = arith.truncf %344 : vector<2x256xf32> to vector<2x256xbf16>
    %cst_235 = arith.constant dense<0.000000e+00> : vector<2x256xf32>
    %348 = tpu.matmul %347, %1, %cst_235 {dimension_numbers = #tpu.dot_dimension_numbers<[1], [0], [0], [1], [0, 0, 1, 1], [], []>} : vector<2x256xbf16>, vector<256x256xbf16>, vector<2x256xf32> -> vector<2x256xf32>
    %349 = arith.addf %346, %348 : vector<2x256xf32>
    %350 = math.tanh %349 : vector<2x256xf32>
    %c0_236 = arith.constant 0 : index
    %c5888 = arith.constant 5888 : index
    %351 = vector.load %arg10[%c0_236, %c5888] : memref<2x7168xf32, #tpu.memory_space<vmem>>, vector<2x256xf32>
    tpu.vector_store %arg10[%c0_236, %c5888], %350 {strides = array<i32>} : memref<2x7168xf32, #tpu.memory_space<vmem>>, vector<2x256xf32>,
    %c48_237 = arith.constant 48 : index
    %c0_238 = arith.constant 0 : index
    %352 = vector.load %arg9[%c48_237, %c0_238] : memref<56x256xf32, #tpu.memory_space<vmem>>, vector<2x256xf32>
    %353 = arith.truncf %350 : vector<2x256xf32> to vector<2x256xbf16>
    %cst_239 = arith.constant dense<0.000000e+00> : vector<2x256xf32>
    %354 = tpu.matmul %353, %1, %cst_239 {dimension_numbers = #tpu.dot_dimension_numbers<[1], [0], [0], [1], [0, 0, 1, 1], [], []>} : vector<2x256xbf16>, vector<256x256xbf16>, vector<2x256xf32> -> vector<2x256xf32>
    %355 = arith.addf %352, %354 : vector<2x256xf32>
    %356 = math.tanh %355 : vector<2x256xf32>
    %c0_240 = arith.constant 0 : index
    %c6144 = arith.constant 6144 : index
    %357 = vector.load %arg10[%c0_240, %c6144] : memref<2x7168xf32, #tpu.memory_space<vmem>>, vector<2x256xf32>
    tpu.vector_store %arg10[%c0_240, %c6144], %356 {strides = array<i32>} : memref<2x7168xf32, #tpu.memory_space<vmem>>, vector<2x256xf32>,
    %c50_241 = arith.constant 50 : index
    %c0_242 = arith.constant 0 : index
    %358 = vector.load %arg9[%c50_241, %c0_242] : memref<56x256xf32, #tpu.memory_space<vmem>>, vector<2x256xf32>
    %359 = arith.truncf %356 : vector<2x256xf32> to vector<2x256xbf16>
    %cst_243 = arith.constant dense<0.000000e+00> : vector<2x256xf32>
    %360 = tpu.matmul %359, %1, %cst_243 {dimension_numbers = #tpu.dot_dimension_numbers<[1], [0], [0], [1], [0, 0, 1, 1], [], []>} : vector<2x256xbf16>, vector<256x256xbf16>, vector<2x256xf32> -> vector<2x256xf32>
    %361 = arith.addf %358, %360 : vector<2x256xf32>
    %362 = math.tanh %361 : vector<2x256xf32>
    %c0_244 = arith.constant 0 : index
    %c6400 = arith.constant 6400 : index
    %363 = vector.load %arg10[%c0_244, %c6400] : memref<2x7168xf32, #tpu.memory_space<vmem>>, vector<2x256xf32>
    tpu.vector_store %arg10[%c0_244, %c6400], %362 {strides = array<i32>} : memref<2x7168xf32, #tpu.memory_space<vmem>>, vector<2x256xf32>,
    %c52_245 = arith.constant 52 : index
    %c0_246 = arith.constant 0 : index
    %364 = vector.load %arg9[%c52_245, %c0_246] : memref<56x256xf32, #tpu.memory_space<vmem>>, vector<2x256xf32>
    %365 = arith.truncf %362 : vector<2x256xf32> to vector<2x256xbf16>
    %cst_247 = arith.constant dense<0.000000e+00> : vector<2x256xf32>
    %366 = tpu.matmul %365, %1, %cst_247 {dimension_numbers = #tpu.dot_dimension_numbers<[1], [0], [0], [1], [0, 0, 1, 1], [], []>} : vector<2x256xbf16>, vector<256x256xbf16>, vector<2x256xf32> -> vector<2x256xf32>
    %367 = arith.addf %364, %366 : vector<2x256xf32>
    %368 = math.tanh %367 : vector<2x256xf32>
    %c0_248 = arith.constant 0 : index
    %c6656 = arith.constant 6656 : index
    %369 = vector.load %arg10[%c0_248, %c6656] : memref<2x7168xf32, #tpu.memory_space<vmem>>, vector<2x256xf32>
    tpu.vector_store %arg10[%c0_248, %c6656], %368 {strides = array<i32>} : memref<2x7168xf32, #tpu.memory_space<vmem>>, vector<2x256xf32>,
    %c54_249 = arith.constant 54 : index
    %c0_250 = arith.constant 0 : index
    %370 = vector.load %arg9[%c54_249, %c0_250] : memref<56x256xf32, #tpu.memory_space<vmem>>, vector<2x256xf32>
    %371 = arith.truncf %368 : vector<2x256xf32> to vector<2x256xbf16>
    %cst_251 = arith.constant dense<0.000000e+00> : vector<2x256xf32>
    %372 = tpu.matmul %371, %1, %cst_251 {dimension_numbers = #tpu.dot_dimension_numbers<[1], [0], [0], [1], [0, 0, 1, 1], [], []>} : vector<2x256xbf16>, vector<256x256xbf16>, vector<2x256xf32> -> vector<2x256xf32>
    %373 = arith.addf %370, %372 : vector<2x256xf32>
    %374 = math.tanh %373 : vector<2x256xf32>
    %c0_252 = arith.constant 0 : index
    %c6912 = arith.constant 6912 : index
    %375 = vector.load %arg10[%c0_252, %c6912] : memref<2x7168xf32, #tpu.memory_space<vmem>>, vector<2x256xf32>
    tpu.vector_store %arg10[%c0_252, %c6912], %374 {strides = array<i32>} : memref<2x7168xf32, #tpu.memory_space<vmem>>, vector<2x256xf32>,
    %c0_253 = arith.constant 0 : index
    %c0_254 = arith.constant 0 : index
    %376 = vector.load %arg10[%c0_253, %c0_254] : memref<2x7168xf32, #tpu.memory_space<vmem>>, vector<2x7168xf32>
    %c0_255 = arith.constant 0 : index
    %c0_256 = arith.constant 0 : index
    %377 = vector.load %arg5[%c0_255, %c0_256] : memref<10x7168xf32, #tpu.memory_space<vmem>>, vector<10x7168xf32>
    %cst_257 = arith.constant dense<0.000000e+00> : vector<2x10xf32>
    %378 = tpu.matmul %376, %377, %cst_257 {dimension_numbers = #tpu.dot_dimension_numbers<[1], [1], [0], [0], [0, 0, 1, 0], [], []>} : vector<2x7168xf32>, vector<10x7168xf32>, vector<2x10xf32> -> vector<2x10xf32>
    %c0_258 = arith.constant 0 : index
    %c0_259 = arith.constant 0 : index
    %379 = vector.load %arg6[%c0_258, %c0_259] : memref<1x10xf32, #tpu.memory_space<vmem>>, vector<1x10xf32>
    %380 = vector.broadcast %379 : vector<1x10xf32> to vector<2x10xf32>
    %381 = arith.addf %378, %380 : vector<2x10xf32>
    %c0_260 = arith.constant 0 : index
    %c0_261 = arith.constant 0 : index
    %382 = vector.load %arg7[%c0_260, %c0_261] : memref<2x10xf32, #tpu.memory_space<vmem>>, vector<2x10xf32>
    tpu.vector_store %arg7[%c0_260, %c0_261], %381 {strides = array<i32>} : memref<2x10xf32, #tpu.memory_space<vmem>>, vector<2x10xf32>,
    return
  }
}

</mosaic_0001>

<bundles_post_ra>
// kernel: tpu_custom_call.1
= control target key start
LH: loop header
LB: loop body
LE: loop exit
PB: predicated region body
PF: predicated region fallthrough
CT: control target
= control target key end

     0   :  { %12 = vsyncpa [#allocation6], 0  ;;  %s10533_s0 = inlined_call_operand.hbm [shape: f32[28,2,256], index: 0, kind: input, shape index: {}]   ;;  %s10534_s1 = inlined_call_operand.hbm [shape: bf16[256,256], index: 1, kind: input, shape index: {}]   ;;  %s10535_s2 = inlined_call_operand.hbm [shape: bf16[256,256], index: 2, kind: input, shape index: {}]   ;;  %s10536_s3 = inlined_call_operand.vmem [shape: f32[1,256], index: 3, kind: input, shape index: {}]   ;;  %s10537_s4 = inlined_call_operand.hbm [shape: bf16[256,256], index: 4, kind: input, shape index: {}]   ;;  %s10538_s5 = inlined_call_operand.hbm [shape: f32[10,7168], index: 5, kind: input, shape index: {}]   ;;  %s10539_s6 = inlined_call_operand.vmem [shape: f32[1,10], index: 6, kind: input, shape index: {}]   ;;  %s10540_s7 = inlined_call_operand.hbm [shape: f32[2,10], index: 7, kind: output, shape index: {}]  }
   0x1   :  { %13 = vsyncpa [#allocation9], 0 }
   0x2   :  { %14 = vsyncpa [#allocation12], 0 }
   0x3   :  { %15 = vsyncpa [#allocation7], 0  ;;  %s8055_s24 = smov [#allocation8]  }
   0x4   :  { %s33_s25 = sshll.u32 %s8055_s24, 4  ;;  %s34_s25 = int_to_ptr.vmem [resolvable:$true] %s33_s25 }
   0x5   :  { %s7935_s26 = scalar_lea.vmem %s34_s25, 4096  ;;  %p7940_p1 = scmp.lt.s32.totalorder %s34_s25, %s34_s25 }
   0x6   :  { %p7936_p0 = scmp.ne.s32.totalorder %s34_s25, %s7935_s26  ;;  %p7941_p2 = scmp.lt.s32.totalorder %s7935_s26, %s7935_s26 }
   0x8   :  { %p7942_p3 = por %p7941_p2, %p7940_p1 }
   0xa   :  { %p7943_p4 = pnand %p7942_p3, %p7936_p0 }
   0xc   :  { %7946 = shalt.err (!%p7943_p4)
}
   0xd   :  { %s8056_s27 = smov 128   ;;  %s8057_s28 = smov 8  }
   0xe   :  { %39 = dma.hbm_to_vmem [thread:$0]  %s10534_s1, 4096, %s34_s25, [#allocation9], %s8056_s27, %s8056_s27, %s8057_s28  }
   0xf   :  { %s8058_s8 = smov [#allocation11]   ;;  %s8059_s10 = smov [#allocation5]  }
  0x10   :  { %s59_s9 = sshll.u32 %s8058_s8, 4  ;;  %s21_s11 = sshll.u32 %s8059_s10, 4  ;;  %s60_s9 = int_to_ptr.vmem [resolvable:$true] %s59_s9  ;;  %s22_s11 = int_to_ptr.vmem [resolvable:$true] %s21_s11 }
  0x11   :  { %s7955_s12 = scalar_lea.vmem %s60_s9, 4096  ;;  %p7960_p6 = scmp.lt.s32.totalorder %s60_s9, %s60_s9 }
  0x12   :  { %p7956_p5 = scmp.ne.s32.totalorder %s60_s9, %s7955_s12  ;;  %p7961_p7 = scmp.lt.s32.totalorder %s7955_s12, %s7955_s12 }
  0x14   :  { %p7962_p8 = por %p7961_p7, %p7960_p6 }
  0x16   :  { %p7963_p9 = pnand %p7962_p8, %p7956_p5 }
  0x18   :  { %7966 = shalt.err (!%p7963_p9)
}
  0x19   :  { %65 = dma.hbm_to_vmem [thread:$0]  %s10537_s4, 4096, %s60_s9, [#allocation12], %s8056_s27, %s8056_s27, %s8057_s28  }
  0x1a   :  { %s7975_s1 = scalar_lea.vmem %s22_s11, 1792  ;;  %p7980_p11 = scmp.lt.s32.totalorder %s22_s11, %s22_s11 }
  0x1b   :  { %p7976_p10 = scmp.ne.s32.totalorder %s22_s11, %s7975_s1  ;;  %p7981_p12 = scmp.lt.s32.totalorder %s7975_s1, %s7975_s1 }
  0x1d   :  { %p7982_p13 = por %p7981_p12, %p7980_p11 }
  0x1f   :  { %p7983_p0 = pnand %p7982_p13, %p7976_p10 }
  0x21   :  { %7986 = shalt.err (!%p7983_p0)
}
  0x22   :  { %s8060_s15 = smov 64   ;;  %s8061_s16 = smov 4  }
  0x23   :  { %27 = dma.hbm_to_vmem [thread:$0]  %s10533_s0, 1792, %s22_s11, [#allocation6], %s8060_s15, %s8060_s15, %s8061_s16  }
  0x24   :  { %s8062_s19 = smov [#allocation10]   ;;  %s8063_s21 = smov [#allocation13]  }
  0x25   :  { %s45_s20 = sshll.u32 %s8062_s19, 4  ;;  %s71_s22 = sshll.u32 %s8063_s21, 4  ;;  %s46_s20 = int_to_ptr.vmem [resolvable:$true] %s45_s20  ;;  %s72_s22 = int_to_ptr.vmem [resolvable:$true] %s71_s22 }
  0x26   :  { %s7995_s4 = scalar_lea.vmem %s46_s20, 4096  ;;  %p8000_p2 = scmp.lt.s32.totalorder %s46_s20, %s46_s20 }
  0x27   :  { %p7996_p1 = scmp.ne.s32.totalorder %s46_s20, %s7995_s4  ;;  %p8001_p3 = scmp.lt.s32.totalorder %s7995_s4, %s7995_s4 }
  0x29   :  { %p8002_p4 = por %p8001_p3, %p8000_p2 }
  0x2b   :  { %p8003_p5 = pnand %p8002_p4, %p7996_p1 }
  0x2d   :  { %8006 = shalt.err (!%p8003_p5)
}
  0x2e   :  { %51 = dma.hbm_to_vmem [thread:$0]  %s10535_s2, 4096, %s46_s20, [#allocation9], %s8056_s27, %s8056_s27, %s8057_s28  }
  0x2f   :  { %s8015_s0 = scalar_lea.vmem %s72_s22, 14336  ;;  %p8020_p7 = scmp.lt.s32.totalorder %s72_s22, %s72_s22 }
  0x30   :  { %p8016_p6 = scmp.ne.s32.totalorder %s72_s22, %s8015_s0  ;;  %p8021_p8 = scmp.lt.s32.totalorder %s8015_s0, %s8015_s0 }
  0x32   :  { %p8022_p9 = por %p8021_p8, %p8020_p7 }
  0x34   :  { %p8023_p10 = pnand %p8022_p9, %p8016_p6 }
  0x36   :  { %8026 = shalt.err (!%p8023_p10)
}
  0x37   :  { %s8064_s25 = smov 7168   ;;  %s8065_s26 = smov 448  }
  0x38   :  { %77 = dma.hbm_to_vmem [thread:$0]  %s10538_s5, 14336, %s72_s22, [#allocation12], %s8064_s25, %s8064_s25, %s8065_s26  }
  0x39   :  { %8047 = dma.done.wait [#allocation6], 1792  }
  0x3a   :  { %8048 = vsyncadd [#allocation6], 4294965504 }
  0x3b   :  { %8049 = dma.done.wait [#allocation9], 8192  }
  0x3c   :  { %8050 = vsyncadd [#allocation9], 4294959104 }
  0x3d   :  { %8051 = dma.done.wait [#allocation12], 18432  }
  0x3e   :  { %8052 = vsyncadd [#allocation12], 4294948864  ;;  %v8066_v0 = vmov 0   ;;  %v8134_v1 = vld [vmem:[#allocation8 + $0x74] ss:$8 sps:$4 sm:$0xff]   ;;  %v368_v35 = vlaneseq  ;;  %vm7301_vm0 = vcmask 74752  }
  0x3f   :  { %353 = vmatprep.mubr.bf16.mxu0 %v8066_v0  ;;  %v8136_v2 = vld [vmem:[#allocation8 + $0x70] ss:$8 sps:$4 sm:$0xff]   ;;  %321 = vmatprep.subr.bf16.mxu0 %v8134_v1  ;;  %v8139_v3 = vld [vmem:[#allocation8 + $0x64] ss:$8 sps:$4 sm:$0xff]   ;;  %v8143_v4 = vld [vmem:[#allocation8 + $0x60] ss:$8 sps:$4 sm:$0xff]  }
  0x40   :  { %392 = vmatprep.subr.bf16.mxu1 %v8134_v1  ;;  %322 = vmatpush1.bf16.msra.mxu0 %v8136_v2  ;;  %v8147_v5 = vld [vmem:[#allocation8 + $0x54] ss:$8 sps:$4 sm:$0xff]   ;;  %v8151_v6 = vld [vmem:[#allocation8 + $0x50] ss:$8 sps:$4 sm:$0xff]   ;;  %v8155_v7 = vld [vmem:[#allocation8 + $0x44] ss:$8 sps:$4 sm:$0xff]  }
  0x41   :  { %393 = vmatpush1.bf16.msra.mxu1 %v8136_v2  ;;  %323 = vmatprep.subr.bf16.mxu0 %v8139_v3  ;;  %v8159_v8 = vld [vmem:[#allocation8 + $0x40] ss:$8 sps:$4 sm:$0xff]   ;;  %v8163_v9 = vld [vmem:[#allocation8 + $0x34] ss:$8 sps:$4 sm:$0xff]   ;;  %v8167_v10 = vld [vmem:[#allocation8 + $0x30] ss:$8 sps:$4 sm:$0xff]  }
  0x42   :  { %394 = vmatprep.subr.bf16.mxu1 %v8139_v3  ;;  %v8171_v11 = vld [vmem:[#allocation8 + $0x24] ss:$8 sps:$4 sm:$0xff]   ;;  %v8175_v12 = vld [vmem:[#allocation8 + $0x20] ss:$8 sps:$4 sm:$0xff]   ;;  %v8179_v13 = vld [vmem:[#allocation8 + $0x14] ss:$8 sps:$4 sm:$0xff]  }
  0x43   :  { %v8182_v14 = vld [vmem:[#allocation8 + $0x10] ss:$8 sps:$4 sm:$0xff]   ;;  %v8184_v15 = vld [vmem:[#allocation8 + $0x4] ss:$8 sps:$4 sm:$0xff]   ;;  %v8190_v16 = vld [vmem:[#allocation8] ss:$8 sps:$4 sm:$0xff]  }
  0x44   :  { %324 = vmatpush1.bf16.msra.mxu0 %v8143_v4  ;;  %v8192_v17 = vld [vmem:[#allocation8 + $0xf4] ss:$8 sps:$4 sm:$0xff]   ;;  %v8198_v18 = vld [vmem:[#allocation8 + $0xf0] ss:$8 sps:$4 sm:$0xff]   ;;  %v8200_v19 = vld [vmem:[#allocation8 + $0xe4] ss:$8 sps:$4 sm:$0xff]  }
  0x45   :  { %395 = vmatpush1.bf16.msra.mxu1 %v8143_v4  ;;  %325 = vmatprep.subr.bf16.mxu0 %v8147_v5  ;;  %v8206_v20 = vld [vmem:[#allocation8 + $0xe0] ss:$8 sps:$4 sm:$0xff]   ;;  %v8208_v21 = vld [vmem:[#allocation8 + $0xd4] ss:$8 sps:$4 sm:$0xff]   ;;  %v8214_v22 = vld [vmem:[#allocation8 + $0xd0] ss:$8 sps:$4 sm:$0xff]  }
  0x46   :  { %396 = vmatprep.subr.bf16.mxu1 %v8147_v5  ;;  %v8216_v23 = vld [vmem:[#allocation8 + $0xc4] ss:$8 sps:$4 sm:$0xff]   ;;  %v8223_v24 = vld [vmem:[#allocation8 + $0xc0] ss:$8 sps:$4 sm:$0xff]   ;;  %v8227_v25 = vld [vmem:[#allocation8 + $0xb4] ss:$8 sps:$4 sm:$0xff]  }
  0x47   :  { %v8231_v26 = vld [vmem:[#allocation8 + $0xb0] ss:$8 sps:$4 sm:$0xff]   ;;  %v8235_v27 = vld [vmem:[#allocation8 + $0xa4] ss:$8 sps:$4 sm:$0xff]   ;;  %v8239_v28 = vld [vmem:[#allocation8 + $0xa0] ss:$8 sps:$4 sm:$0xff]  }
  0x48   :  { %326 = vmatpush1.bf16.msra.mxu0 %v8151_v6  ;;  %v8243_v29 = vld [vmem:[#allocation8 + $0x94] ss:$8 sps:$4 sm:$0xff]   ;;  %v8247_v30 = vld [vmem:[#allocation8 + $0x90] ss:$8 sps:$4 sm:$0xff]   ;;  %v8251_v31 = vld [vmem:[#allocation8 + $0x84] ss:$8 sps:$4 sm:$0xff]  }
  0x49   :  { %397 = vmatpush1.bf16.msra.mxu1 %v8151_v6  ;;  %327 = vmatprep.subr.bf16.mxu0 %v8155_v7  ;;  %v8255_v32 = vld [vmem:[#allocation8 + $0x80] ss:$8 sps:$4 sm:$0xff]   ;;  %v8067_v33 = vmov 1983009808   ;;  %v8297_v37 = vshrl.u32 %v368_v35, 7 }
  0x4a   :  { %398 = vmatprep.subr.bf16.mxu1 %v8155_v7  ;;  %v366_v34 = vunpack.c.l.s4 %v8067_v33  ;;  %v160_v42 = vld [vmem:[#allocation5] sm:$0xf]  ;;  %v389_v55 = vld [vmem:[#allocation5 + $0x4] sm:$0xf] }
  0x4c   :  { %328 = vmatpush1.bf16.msra.mxu0 %v8159_v8  ;;  %v367_v36 = vunpack.c.0.s8 %v366_v34 }
  0x4d   :  { %399 = vmatpush1.bf16.msra.mxu1 %v8159_v8  ;;  %329 = vmatprep.subr.bf16.mxu0 %v8163_v9 }
  0x4e   :  { %400 = vmatprep.subr.bf16.mxu1 %v8163_v9  ;;  %v8300_v39 = vsub.s32 %v367_v36, %v8297_v37 }
  0x50   :  { %330 = vmatpush1.bf16.msra.mxu0 %v8167_v10 }
  0x51   :  { %401 = vmatpush1.bf16.msra.mxu1 %v8167_v10  ;;  %331 = vmatprep.subr.bf16.mxu0 %v8171_v11 }
  0x52   :  { %402 = vmatprep.subr.bf16.mxu1 %v8171_v11 }
  0x54   :  { %332 = vmatpush1.bf16.msra.mxu0 %v8175_v12 }
  0x55   :  { %403 = vmatpush1.bf16.msra.mxu1 %v8175_v12  ;;  %333 = vmatprep.subr.bf16.mxu0 %v8179_v13 }
  0x56   :  { %404 = vmatprep.subr.bf16.mxu1 %v8179_v13 }
  0x58   :  { %334 = vmatpush1.bf16.msra.mxu0 %v8182_v14 }
  0x59   :  { %405 = vmatpush1.bf16.msra.mxu1 %v8182_v14  ;;  %335 = vmatprep.subr.bf16.mxu0 %v8184_v15 }
  0x5a   :  { %406 = vmatprep.subr.bf16.mxu1 %v8184_v15 }
  0x5c   :  { %336 = vmatpush1.bf16.msra.mxu0 %v8190_v16 }
  0x5d   :  { %407 = vmatpush1.bf16.msra.mxu1 %v8190_v16  ;;  %337 = vmatprep.subr.bf16.mxu0 %v8192_v17 }
  0x5e   :  { %408 = vmatprep.subr.bf16.mxu1 %v8192_v17 }
  0x60   :  { %338 = vmatpush2.bf16.msra.mxu0 %v8198_v18 }
  0x61   :  { %409 = vmatpush2.bf16.msra.mxu1 %v8198_v18  ;;  %339 = vmatprep.subr.bf16.mxu0 %v8200_v19 }
  0x62   :  { %410 = vmatprep.subr.bf16.mxu1 %v8200_v19 }
  0x64   :  { %340 = vmatpush2.bf16.msra.mxu0 %v8206_v20 }
  0x65   :  { %411 = vmatpush2.bf16.msra.mxu1 %v8206_v20  ;;  %341 = vmatprep.subr.bf16.mxu0 %v8208_v21 }
  0x66   :  { %412 = vmatprep.subr.bf16.mxu1 %v8208_v21 }
  0x68   :  { %342 = vmatpush2.bf16.msra.mxu0 %v8214_v22 }
  0x69   :  { %413 = vmatpush2.bf16.msra.mxu1 %v8214_v22  ;;  %343 = vmatprep.subr.bf16.mxu0 %v8216_v23 }
  0x6a   :  { %414 = vmatprep.subr.bf16.mxu1 %v8216_v23 }
  0x6c   :  { %344 = vmatpush2.bf16.msra.mxu0 %v8223_v24 }
  0x6d   :  { %415 = vmatpush2.bf16.msra.mxu1 %v8223_v24  ;;  %345 = vmatprep.subr.bf16.mxu0 %v8227_v25 }
  0x6e   :  { %416 = vmatprep.subr.bf16.mxu1 %v8227_v25 }
  0x70   :  { %346 = vmatpush2.bf16.msra.mxu0 %v8231_v26 }
  0x71   :  { %417 = vmatpush2.bf16.msra.mxu1 %v8231_v26  ;;  %347 = vmatprep.subr.bf16.mxu0 %v8235_v27 }
  0x72   :  { %418 = vmatprep.subr.bf16.mxu1 %v8235_v27 }
  0x74   :  { %348 = vmatpush2.bf16.msra.mxu0 %v8239_v28 }
  0x75   :  { %419 = vmatpush2.bf16.msra.mxu1 %v8239_v28  ;;  %349 = vmatprep.subr.bf16.mxu0 %v8243_v29 }
  0x76   :  { %420 = vmatprep.subr.bf16.mxu1 %v8243_v29 }
  0x78   :  { %350 = vmatpush2.bf16.msra.mxu0 %v8247_v30 }
  0x79   :  { %421 = vmatpush2.bf16.msra.mxu1 %v8247_v30  ;;  %351 = vmatprep.subr.bf16.mxu0 %v8251_v31 }
  0x7a   :  { %422 = vmatprep.subr.bf16.mxu1 %v8251_v31 }
  0x7c   :  { %352 = vmatpush2.bf16.msra.mxu0 %v8255_v32 }
  0x7d   :  { %423 = vmatpush2.bf16.msra.mxu1 %v8255_v32  ;;  %474 = vmatprep.subr.bf16.mxu0 %v8134_v1 }
  0x7e   :  { %547 = vmatprep.subr.bf16.mxu1 %v8134_v1 }
  0x7f   :  { %354 = vmatmul.mubr.bf16.vlgmr.msra.gmra.mxu0 %v8066_v0 }
  0x80   :  { %475 = vmatpush1.bf16.msra.mxu0 %v8136_v2 }
  0x81   :  { %476 = vmatprep.subr.bf16.mxu0 %v8139_v3 }
  0x84   :  { %477 = vmatpush1.bf16.msra.mxu0 %v8143_v4 }
  0x85   :  { %478 = vmatprep.subr.bf16.mxu0 %v8147_v5 }
  0x88   :  { %479 = vmatpush1.bf16.msra.mxu0 %v8151_v6 }
  0x89   :  { %480 = vmatprep.subr.bf16.mxu0 %v8155_v7 }
  0x8c   :  { %481 = vmatpush1.bf16.msra.mxu0 %v8159_v8 }
  0x8d   :  { %482 = vmatprep.subr.bf16.mxu0 %v8163_v9 }
  0x90   :  { %483 = vmatpush1.bf16.msra.mxu0 %v8167_v10 }
  0x91   :  { %484 = vmatprep.subr.bf16.mxu0 %v8171_v11 }
  0x94   :  { %485 = vmatpush1.bf16.msra.mxu0 %v8175_v12 }
  0x95   :  { %486 = vmatprep.subr.bf16.mxu0 %v8179_v13 }
  0x98   :  { %487 = vmatpush1.bf16.msra.mxu0 %v8182_v14 }
  0x99   :  { %488 = vmatprep.subr.bf16.mxu0 %v8184_v15 }
  0x9c   :  { %489 = vmatpush1.bf16.msra.mxu0 %v8190_v16 }
  0x9d   :  { %490 = vmatprep.subr.bf16.mxu0 %v8192_v17 }
  0xa0   :  { %491 = vmatpush2.bf16.msra.mxu0 %v8198_v18 }
  0xa1   :  { %492 = vmatprep.subr.bf16.mxu0 %v8200_v19 }
  0xa4   :  { %493 = vmatpush2.bf16.msra.mxu0 %v8206_v20 }
  0xa5   :  { %494 = vmatprep.subr.bf16.mxu0 %v8208_v21 }
  0xa8   :  { %495 = vmatpush2.bf16.msra.mxu0 %v8214_v22 }
  0xa9   :  { %496 = vmatprep.subr.bf16.mxu0 %v8216_v23 }
  0xac   :  { %497 = vmatpush2.bf16.msra.mxu0 %v8223_v24 }
  0xad   :  { %498 = vmatprep.subr.bf16.mxu0 %v8227_v25 }
  0xb0   :  { %499 = vmatpush2.bf16.msra.mxu0 %v8231_v26 }
  0xb1   :  { %500 = vmatprep.subr.bf16.mxu0 %v8235_v27 }
  0xb4   :  { %501 = vmatpush2.bf16.msra.mxu0 %v8239_v28 }
  0xb5   :  { %502 = vmatprep.subr.bf16.mxu0 %v8243_v29 }
  0xb8   :  { %503 = vmatpush2.bf16.msra.mxu0 %v8247_v30 }
  0xb9   :  { %504 = vmatprep.subr.bf16.mxu0 %v8251_v31 }
  0xbc   :  { %505 = vmatpush2.bf16.msra.mxu0 %v8255_v32 }
  0xbd   :  { %629 = vmatprep.subr.bf16.mxu0 %v8134_v1 }
 0x13f   :  { %v355_v38 = vpop.f32.mrf.mxu0 }
 0x141   :  { %v357_v40 = vpop.f32.mrf.mxu0 }
 0x142   :  { %v364_v41 = vcombine.low %v355_v38, %v357_v40 }
 0x143   :  { %v359_v43 = vpop.f32.mrf.mxu0 }
 0x144   :  { %v371_v44 = vrot.slane %v364_v41, %v8300_v39 }
 0x145   :  { %v360_v45 = vpop.f32.mrf.mxu0 }
 0x146   :  { %v373_v46 = vadd.f32 %v371_v44, %v160_v42  ;;  %v468_v42 = vld [vmem:[#allocation5 + $0x8] sm:$0xf] }
 0x148   :  { %7631 = vtanh.f32 %v373_v46 }
 0x155   :  { %v7632_v47 = vpop.eup %7631 }
 0x156   :  { %7352 = vst.sshfl [vmem:[#allocation2] sm:$0x3 pattern:$0x76325410] %v7632_v47  ;;  %v382_v48 = vrot.slane %v7632_v47, %v8300_v39 }
 0x158   :  { %v383_v49 = vcombine.high %v382_v48, %v382_v48  ;;  %v390_v51 = vpack.c.bf16 %v382_v48, %v382_v48 }
 0x15a   :  { %387 = vst [vmem:[#allocation2 + $0x8] sm:$0x3] %v383_v49  ;;  %v391_v50 = vpack.c.bf16 %v383_v49, %v383_v49 }
 0x15c   :  { %424 = vmatprep.mubr.bf16.mxu1 %v391_v50 }
 0x15d   :  { %425 = vmatmul.mubr.bf16.vlgmr.msra.gmra.mxu1 %v390_v51 }
 0x15e   :  { %548 = vmatpush1.bf16.msra.mxu1 %v8136_v2 }
 0x15f   :  { %549 = vmatprep.subr.bf16.mxu1 %v8139_v3 }
 0x162   :  { %550 = vmatpush1.bf16.msra.mxu1 %v8143_v4 }
 0x163   :  { %551 = vmatprep.subr.bf16.mxu1 %v8147_v5 }
 0x166   :  { %552 = vmatpush1.bf16.msra.mxu1 %v8151_v6 }
 0x167   :  { %553 = vmatprep.subr.bf16.mxu1 %v8155_v7 }
 0x16a   :  { %554 = vmatpush1.bf16.msra.mxu1 %v8159_v8 }
 0x16b   :  { %555 = vmatprep.subr.bf16.mxu1 %v8163_v9 }
 0x16e   :  { %556 = vmatpush1.bf16.msra.mxu1 %v8167_v10 }
 0x16f   :  { %557 = vmatprep.subr.bf16.mxu1 %v8171_v11 }
 0x172   :  { %558 = vmatpush1.bf16.msra.mxu1 %v8175_v12 }
 0x173   :  { %559 = vmatprep.subr.bf16.mxu1 %v8179_v13 }
 0x176   :  { %560 = vmatpush1.bf16.msra.mxu1 %v8182_v14 }
 0x177   :  { %561 = vmatprep.subr.bf16.mxu1 %v8184_v15 }
 0x17a   :  { %562 = vmatpush1.bf16.msra.mxu1 %v8190_v16 }
 0x17b   :  { %563 = vmatprep.subr.bf16.mxu1 %v8192_v17 }
 0x17e   :  { %564 = vmatpush2.bf16.msra.mxu1 %v8198_v18 }
 0x17f   :  { %565 = vmatprep.subr.bf16.mxu1 %v8200_v19 }
 0x182   :  { %566 = vmatpush2.bf16.msra.mxu1 %v8206_v20 }
 0x183   :  { %567 = vmatprep.subr.bf16.mxu1 %v8208_v21 }
 0x186   :  { %568 = vmatpush2.bf16.msra.mxu1 %v8214_v22 }
 0x187   :  { %569 = vmatprep.subr.bf16.mxu1 %v8216_v23 }
 0x18a   :  { %570 = vmatpush2.bf16.msra.mxu1 %v8223_v24 }
 0x18b   :  { %571 = vmatprep.subr.bf16.mxu1 %v8227_v25 }
 0x18e   :  { %572 = vmatpush2.bf16.msra.mxu1 %v8231_v26 }
 0x18f   :  { %573 = vmatprep.subr.bf16.mxu1 %v8235_v27 }
 0x192   :  { %574 = vmatpush2.bf16.msra.mxu1 %v8239_v28 }
 0x193   :  { %575 = vmatprep.subr.bf16.mxu1 %v8243_v29 }
 0x196   :  { %576 = vmatpush2.bf16.msra.mxu1 %v8247_v30 }
 0x197   :  { %577 = vmatprep.subr.bf16.mxu1 %v8251_v31 }
 0x19a   :  { %578 = vmatpush2.bf16.msra.mxu1 %v8255_v32 }
 0x19b   :  { %700 = vmatprep.subr.bf16.mxu1 %v8134_v1 }
 0x21d   :  { %v426_v52 = vpop.f32.mrf.mxu1 }
 0x21f   :  { %v428_v53 = vpop.f32.mrf.mxu1 }
 0x220   :  { %v435_v54 = vcombine.low %v426_v52, %v428_v53 }
 0x221   :  { %v430_v56 = vpop.f32.mrf.mxu1 }
 0x222   :  { %v442_v57 = vrot.slane %v435_v54, %v8300_v39  ;;  %v542_v56 = vld [vmem:[#allocation5 + $0xc] sm:$0xf] }
 0x223   :  { %v431_v58 = vpop.f32.mrf.mxu1 }
 0x224   :  { %v444_v59 = vadd.f32 %v442_v57, %v389_v55 }
 0x226   :  { %7633 = vtanh.f32 %v444_v59 }
 0x233   :  { %v7634_v60 = vpop.eup %7633 }
 0x234   :  { %v447_v61 = vcombine.low %v7634_v60, %v7634_v60  ;;  %v461_v62 = vrot.slane %v7634_v60, %v8300_v39 }
 0x236   :  { %v454_v63 = vrot.slane %v447_v61, %v8300_v39  ;;  %7353 = vst.sshfl [vmem:[#allocation2] sm:$0x30 pattern:$0x76325410] %v447_v61  ;;  %v469_v33 = vcombine.high %v461_v62, %v461_v62  ;;  %v472_v36 = vpack.c.bf16 %v461_v62, %v461_v62 }
 0x238   :  { %v462_v34 = vcombine.high %v454_v63, %v454_v63  ;;  %v473_v35 = vpack.c.bf16 %v469_v33, %v469_v33 }
 0x23a   :  { %466 = vst [vmem:[#allocation2 + $0x8] sm:$0xc] %v462_v34  ;;  %506 = vmatprep.mubr.bf16.mxu0 %v473_v35 }
 0x23b   :  { %507 = vmatmul.mubr.bf16.vlgmr.msra.gmra.mxu0 %v472_v36 }
 0x23c   :  { %630 = vmatpush1.bf16.msra.mxu0 %v8136_v2 }
 0x23d   :  { %631 = vmatprep.subr.bf16.mxu0 %v8139_v3 }
 0x240   :  { %632 = vmatpush1.bf16.msra.mxu0 %v8143_v4 }
 0x241   :  { %633 = vmatprep.subr.bf16.mxu0 %v8147_v5 }
 0x244   :  { %634 = vmatpush1.bf16.msra.mxu0 %v8151_v6 }
 0x245   :  { %635 = vmatprep.subr.bf16.mxu0 %v8155_v7 }
 0x248   :  { %636 = vmatpush1.bf16.msra.mxu0 %v8159_v8 }
 0x249   :  { %637 = vmatprep.subr.bf16.mxu0 %v8163_v9 }
 0x24c   :  { %638 = vmatpush1.bf16.msra.mxu0 %v8167_v10 }
 0x24d   :  { %639 = vmatprep.subr.bf16.mxu0 %v8171_v11 }
 0x250   :  { %640 = vmatpush1.bf16.msra.mxu0 %v8175_v12 }
 0x251   :  { %641 = vmatprep.subr.bf16.mxu0 %v8179_v13 }
 0x254   :  { %642 = vmatpush1.bf16.msra.mxu0 %v8182_v14 }
 0x255   :  { %643 = vmatprep.subr.bf16.mxu0 %v8184_v15 }
 0x258   :  { %644 = vmatpush1.bf16.msra.mxu0 %v8190_v16 }
 0x259   :  { %645 = vmatprep.subr.bf16.mxu0 %v8192_v17 }
 0x25c   :  { %646 = vmatpush2.bf16.msra.mxu0 %v8198_v18 }
 0x25d   :  { %647 = vmatprep.subr.bf16.mxu0 %v8200_v19 }
 0x260   :  { %648 = vmatpush2.bf16.msra.mxu0 %v8206_v20 }
 0x261   :  { %649 = vmatprep.subr.bf16.mxu0 %v8208_v21 }
 0x264   :  { %650 = vmatpush2.bf16.msra.mxu0 %v8214_v22 }
 0x265   :  { %651 = vmatprep.subr.bf16.mxu0 %v8216_v23 }
 0x268   :  { %652 = vmatpush2.bf16.msra.mxu0 %v8223_v24 }
 0x269   :  { %653 = vmatprep.subr.bf16.mxu0 %v8227_v25 }
 0x26c   :  { %654 = vmatpush2.bf16.msra.mxu0 %v8231_v26 }
 0x26d   :  { %655 = vmatprep.subr.bf16.mxu0 %v8235_v27 }
 0x270   :  { %656 = vmatpush2.bf16.msra.mxu0 %v8239_v28 }
 0x271   :  { %657 = vmatprep.subr.bf16.mxu0 %v8243_v29 }
 0x274   :  { %658 = vmatpush2.bf16.msra.mxu0 %v8247_v30 }
 0x275   :  { %659 = vmatprep.subr.bf16.mxu0 %v8251_v31 }
 0x278   :  { %660 = vmatpush2.bf16.msra.mxu0 %v8255_v32 }
 0x279   :  { %782 = vmatprep.subr.bf16.mxu0 %v8134_v1 }
 0x2fb   :  { %v508_v38 = vpop.f32.mrf.mxu0 }
 0x2fd   :  { %v510_v40 = vpop.f32.mrf.mxu0 }
 0x2fe   :  { %v517_v41 = vcombine.low %v508_v38, %v510_v40 }
 0x2ff   :  { %v512_v43 = vpop.f32.mrf.mxu0 }
 0x300   :  { %v524_v44 = vrot.slane %v517_v41, %v8300_v39  ;;  %v623_v43 = vld [vmem:[#allocation5 + $0x10] sm:$0xf] }
 0x301   :  { %v513_v45 = vpop.f32.mrf.mxu0 }
 0x302   :  { %v526_v46 = vadd.f32 %v524_v44, %v468_v42 }
 0x304   :  { %7635 = vtanh.f32 %v526_v46 }
 0x311   :  { %v7636_v47 = vpop.eup %7635 }
 0x312   :  { %7354 = vst.sshfl [vmem:[#allocation2 + $0x8] sm:$0xc pattern:$0x76325410] %v7636_v47  ;;  %v535_v48 = vrot.slane %v7636_v47, %v8300_v39 }
 0x314   :  { %v536_v49 = vcombine.low %v535_v48, %v535_v48  ;;  %v543_v50 = vcombine.high %v535_v48, %v535_v48  ;;  %v545_v52 = vpack.c.bf16 %v535_v48, %v535_v48 }
 0x316   :  { %539 = vst [vmem:[#allocation2] sm:$0x30] %v536_v49  ;;  %v546_v51 = vpack.c.bf16 %v543_v50, %v543_v50 }
 0x318   :  { %579 = vmatprep.mubr.bf16.mxu1 %v546_v51 }
 0x319   :  { %580 = vmatmul.mubr.bf16.vlgmr.msra.gmra.mxu1 %v545_v52 }
 0x31a   :  { %701 = vmatpush1.bf16.msra.mxu1 %v8136_v2 }
 0x31b   :  { %702 = vmatprep.subr.bf16.mxu1 %v8139_v3 }
 0x31e   :  { %703 = vmatpush1.bf16.msra.mxu1 %v8143_v4 }
 0x31f   :  { %704 = vmatprep.subr.bf16.mxu1 %v8147_v5 }
 0x322   :  { %705 = vmatpush1.bf16.msra.mxu1 %v8151_v6 }
 0x323   :  { %706 = vmatprep.subr.bf16.mxu1 %v8155_v7 }
 0x326   :  { %707 = vmatpush1.bf16.msra.mxu1 %v8159_v8 }
 0x327   :  { %708 = vmatprep.subr.bf16.mxu1 %v8163_v9 }
 0x32a   :  { %709 = vmatpush1.bf16.msra.mxu1 %v8167_v10 }
 0x32b   :  { %710 = vmatprep.subr.bf16.mxu1 %v8171_v11 }
 0x32e   :  { %711 = vmatpush1.bf16.msra.mxu1 %v8175_v12 }
 0x32f   :  { %712 = vmatprep.subr.bf16.mxu1 %v8179_v13 }
 0x332   :  { %713 = vmatpush1.bf16.msra.mxu1 %v8182_v14 }
 0x333   :  { %714 = vmatprep.subr.bf16.mxu1 %v8184_v15 }
 0x336   :  { %715 = vmatpush1.bf16.msra.mxu1 %v8190_v16 }
 0x337   :  { %716 = vmatprep.subr.bf16.mxu1 %v8192_v17 }
 0x33a   :  { %717 = vmatpush2.bf16.msra.mxu1 %v8198_v18 }
 0x33b   :  { %718 = vmatprep.subr.bf16.mxu1 %v8200_v19 }
 0x33e   :  { %719 = vmatpush2.bf16.msra.mxu1 %v8206_v20 }
 0x33f   :  { %720 = vmatprep.subr.bf16.mxu1 %v8208_v21 }
 0x342   :  { %721 = vmatpush2.bf16.msra.mxu1 %v8214_v22 }
 0x343   :  { %722 = vmatprep.subr.bf16.mxu1 %v8216_v23 }
 0x346   :  { %723 = vmatpush2.bf16.msra.mxu1 %v8223_v24 }
 0x347   :  { %724 = vmatprep.subr.bf16.mxu1 %v8227_v25 }
 0x34a   :  { %725 = vmatpush2.bf16.msra.mxu1 %v8231_v26 }
 0x34b   :  { %726 = vmatprep.subr.bf16.mxu1 %v8235_v27 }
 0x34e   :  { %727 = vmatpush2.bf16.msra.mxu1 %v8239_v28 }
 0x34f   :  { %728 = vmatprep.subr.bf16.mxu1 %v8243_v29 }
 0x352   :  { %729 = vmatpush2.bf16.msra.mxu1 %v8247_v30 }
 0x353   :  { %730 = vmatprep.subr.bf16.mxu1 %v8251_v31 }
 0x356   :  { %731 = vmatpush2.bf16.msra.mxu1 %v8255_v32 }
 0x357   :  { %855 = vmatprep.subr.bf16.mxu1 %v8134_v1 }
 0x3d9   :  { %v581_v53 = vpop.f32.mrf.mxu1 }
 0x3db   :  { %v583_v54 = vpop.f32.mrf.mxu1 }
 0x3dc   :  { %v590_v55 = vcombine.low %v581_v53, %v583_v54 }
 0x3dd   :  { %v585_v57 = vpop.f32.mrf.mxu1 }
 0x3de   :  { %v597_v58 = vrot.slane %v590_v55, %v8300_v39 }
 0x3df   :  { %v586_v59 = vpop.f32.mrf.mxu1 }
 0x3e0   :  { %v599_v60 = vadd.f32 %v597_v58, %v542_v56  ;;  %v697_v56 = vld [vmem:[#allocation5 + $0x14] sm:$0xf] }
 0x3e2   :  { %7637 = vtanh.f32 %v599_v60 }
 0x3ef   :  { %v7638_v61 = vpop.eup %7637 }
 0x3f0   :  { %v602_v62 = vcombine.low %v7638_v61, %v7638_v61  ;;  %v616_v63 = vrot.slane %v7638_v61, %v8300_v39 }
 0x3f2   :  { %v609_v33 = vrot.slane %v602_v62, %v8300_v39  ;;  %7355 = vst.sshfl [vmem:[#allocation2 + $0x8] sm:$0xc0 pattern:$0x76325410] %v602_v62  ;;  %v624_v34 = vcombine.high %v616_v63, %v616_v63  ;;  %v627_v38 = vpack.c.bf16 %v616_v63, %v616_v63 }
 0x3f4   :  { %v617_v35 = vcombine.low %v609_v33, %v609_v33  ;;  %v628_v36 = vpack.c.bf16 %v624_v34, %v624_v34 }
 0x3f6   :  { %620 = vst [vmem:[#allocation2] sm:$0xc0] %v617_v35  ;;  %661 = vmatprep.mubr.bf16.mxu0 %v628_v36 }
 0x3f7   :  { %662 = vmatmul.mubr.bf16.vlgmr.msra.gmra.mxu0 %v627_v38 }
 0x3f8   :  { %783 = vmatpush1.bf16.msra.mxu0 %v8136_v2 }
 0x3f9   :  { %784 = vmatprep.subr.bf16.mxu0 %v8139_v3 }
 0x3fc   :  { %785 = vmatpush1.bf16.msra.mxu0 %v8143_v4 }
 0x3fd   :  { %786 = vmatprep.subr.bf16.mxu0 %v8147_v5 }
 0x400   :  { %787 = vmatpush1.bf16.msra.mxu0 %v8151_v6 }
 0x401   :  { %788 = vmatprep.subr.bf16.mxu0 %v8155_v7 }
 0x404   :  { %789 = vmatpush1.bf16.msra.mxu0 %v8159_v8 }
 0x405   :  { %790 = vmatprep.subr.bf16.mxu0 %v8163_v9 }
 0x408   :  { %791 = vmatpush1.bf16.msra.mxu0 %v8167_v10 }
 0x409   :  { %792 = vmatprep.subr.bf16.mxu0 %v8171_v11 }
 0x40c   :  { %793 = vmatpush1.bf16.msra.mxu0 %v8175_v12 }
 0x40d   :  { %794 = vmatprep.subr.bf16.mxu0 %v8179_v13 }
 0x410   :  { %795 = vmatpush1.bf16.msra.mxu0 %v8182_v14 }
 0x411   :  { %796 = vmatprep.subr.bf16.mxu0 %v8184_v15 }
 0x414   :  { %797 = vmatpush1.bf16.msra.mxu0 %v8190_v16 }
 0x415   :  { %798 = vmatprep.subr.bf16.mxu0 %v8192_v17 }
 0x418   :  { %799 = vmatpush2.bf16.msra.mxu0 %v8198_v18 }
 0x419   :  { %800 = vmatprep.subr.bf16.mxu0 %v8200_v19 }
 0x41c   :  { %801 = vmatpush2.bf16.msra.mxu0 %v8206_v20 }
 0x41d   :  { %802 = vmatprep.subr.bf16.mxu0 %v8208_v21 }
 0x420   :  { %803 = vmatpush2.bf16.msra.mxu0 %v8214_v22 }
 0x421   :  { %804 = vmatprep.subr.bf16.mxu0 %v8216_v23 }
 0x424   :  { %805 = vmatpush2.bf16.msra.mxu0 %v8223_v24 }
 0x425   :  { %806 = vmatprep.subr.bf16.mxu0 %v8227_v25 }
 0x428   :  { %807 = vmatpush2.bf16.msra.mxu0 %v8231_v26 }
 0x429   :  { %808 = vmatprep.subr.bf16.mxu0 %v8235_v27 }
 0x42c   :  { %809 = vmatpush2.bf16.msra.mxu0 %v8239_v28 }
 0x42d   :  { %810 = vmatprep.subr.bf16.mxu0 %v8243_v29 }
 0x430   :  { %811 = vmatpush2.bf16.msra.mxu0 %v8247_v30 }
 0x431   :  { %812 = vmatprep.subr.bf16.mxu0 %v8251_v31 }
 0x434   :  { %813 = vmatpush2.bf16.msra.mxu0 %v8255_v32 }
 0x435   :  { %937 = vmatprep.subr.bf16.mxu0 %v8134_v1 }
 0x4b7   :  { %v663_v40 = vpop.f32.mrf.mxu0 }
 0x4b9   :  { %v665_v41 = vpop.f32.mrf.mxu0 }
 0x4ba   :  { %v672_v42 = vcombine.low %v663_v40, %v665_v41 }
 0x4bb   :  { %v667_v44 = vpop.f32.mrf.mxu0 }
 0x4bc   :  { %v679_v45 = vrot.slane %v672_v42, %v8300_v39  ;;  %v8516_v44 = vld [vmem:[#allocation8 + $0x64] ss:$8 sps:$4 sm:$0xff]  }
 0x4bd   :  { %v668_v46 = vpop.f32.mrf.mxu0 }
 0x4be   :  { %v681_v47 = vadd.f32 %v679_v45, %v623_v43  ;;  %v8513_v43 = vld [vmem:[#allocation8 + $0x70] ss:$8 sps:$4 sm:$0xff]   ;;  %v8519_v45 = vld [vmem:[#allocation8 + $0x60] ss:$8 sps:$4 sm:$0xff]   ;;  %v8522_v46 = vld [vmem:[#allocation8 + $0x54] ss:$8 sps:$4 sm:$0xff]  }
 0x4c0   :  { %7639 = vtanh.f32 %v681_v47  ;;  %v8525_v47 = vld [vmem:[#allocation8 + $0x50] ss:$8 sps:$4 sm:$0xff]  }
 0x4cd   :  { %v7640_v48 = vpop.eup %7639 }
 0x4ce   :  { %7356 = vst.sshfl [vmem:[#allocation2 + $0x10] sm:$0x3 pattern:$0x76325410] %v7640_v48  ;;  %v690_v49 = vrot.slane %v7640_v48, %v8300_v39  ;;  %v8528_v48 = vld [vmem:[#allocation8 + $0x44] ss:$8 sps:$4 sm:$0xff]  }
 0x4d0   :  { %v691_v50 = vcombine.high %v690_v49, %v690_v49  ;;  %v698_v52 = vpack.c.bf16 %v690_v49, %v690_v49  ;;  %v8531_v49 = vld [vmem:[#allocation8 + $0x40] ss:$8 sps:$4 sm:$0xff]  }
 0x4d2   :  { %695 = vst [vmem:[#allocation2 + $0x18] sm:$0x3] %v691_v50  ;;  %v699_v51 = vpack.c.bf16 %v691_v50, %v691_v50  ;;  %v8534_v50 = vld [vmem:[#allocation8 + $0x34] ss:$8 sps:$4 sm:$0xff]  }
 0x4d4   :  { %732 = vmatprep.mubr.bf16.mxu1 %v699_v51  ;;  %v8537_v51 = vld [vmem:[#allocation8 + $0x30] ss:$8 sps:$4 sm:$0xff]  }
 0x4d5   :  { %733 = vmatmul.mubr.bf16.vlgmr.msra.gmra.mxu1 %v698_v52  ;;  %v8540_v52 = vld [vmem:[#allocation8 + $0x24] ss:$8 sps:$4 sm:$0xff]  }
 0x4d6   :  { %856 = vmatpush1.bf16.msra.mxu1 %v8136_v2 }
 0x4d7   :  { %857 = vmatprep.subr.bf16.mxu1 %v8139_v3 }
 0x4da   :  { %858 = vmatpush1.bf16.msra.mxu1 %v8143_v4 }
 0x4db   :  { %859 = vmatprep.subr.bf16.mxu1 %v8147_v5 }
 0x4de   :  { %860 = vmatpush1.bf16.msra.mxu1 %v8151_v6 }
 0x4df   :  { %861 = vmatprep.subr.bf16.mxu1 %v8155_v7 }
 0x4e2   :  { %862 = vmatpush1.bf16.msra.mxu1 %v8159_v8 }
 0x4e3   :  { %863 = vmatprep.subr.bf16.mxu1 %v8163_v9 }
 0x4e6   :  { %864 = vmatpush1.bf16.msra.mxu1 %v8167_v10 }
 0x4e7   :  { %865 = vmatprep.subr.bf16.mxu1 %v8171_v11 }
 0x4ea   :  { %866 = vmatpush1.bf16.msra.mxu1 %v8175_v12 }
 0x4eb   :  { %867 = vmatprep.subr.bf16.mxu1 %v8179_v13 }
 0x4ee   :  { %868 = vmatpush1.bf16.msra.mxu1 %v8182_v14 }
 0x4ef   :  { %869 = vmatprep.subr.bf16.mxu1 %v8184_v15 }
 0x4f2   :  { %870 = vmatpush1.bf16.msra.mxu1 %v8190_v16 }
 0x4f3   :  { %871 = vmatprep.subr.bf16.mxu1 %v8192_v17 }
 0x4f6   :  { %872 = vmatpush2.bf16.msra.mxu1 %v8198_v18 }
 0x4f7   :  { %873 = vmatprep.subr.bf16.mxu1 %v8200_v19 }
 0x4fa   :  { %874 = vmatpush2.bf16.msra.mxu1 %v8206_v20 }
 0x4fb   :  { %875 = vmatprep.subr.bf16.mxu1 %v8208_v21 }
 0x4fe   :  { %876 = vmatpush2.bf16.msra.mxu1 %v8214_v22 }
 0x4ff   :  { %877 = vmatprep.subr.bf16.mxu1 %v8216_v23 }
 0x502   :  { %878 = vmatpush2.bf16.msra.mxu1 %v8223_v24 }
 0x503   :  { %879 = vmatprep.subr.bf16.mxu1 %v8227_v25 }
 0x506   :  { %880 = vmatpush2.bf16.msra.mxu1 %v8231_v26 }
 0x507   :  { %881 = vmatprep.subr.bf16.mxu1 %v8235_v27 }
 0x50a   :  { %882 = vmatpush2.bf16.msra.mxu1 %v8239_v28 }
 0x50b   :  { %883 = vmatprep.subr.bf16.mxu1 %v8243_v29 }
 0x50e   :  { %884 = vmatpush2.bf16.msra.mxu1 %v8247_v30 }
 0x50f   :  { %885 = vmatprep.subr.bf16.mxu1 %v8251_v31 }
 0x512   :  { %886 = vmatpush2.bf16.msra.mxu1 %v8255_v32 }
 0x513   :  { %1008 = vmatprep.subr.bf16.mxu1 %v8134_v1 }
 0x595   :  { %v734_v53 = vpop.f32.mrf.mxu1 }
 0x597   :  { %v736_v54 = vpop.f32.mrf.mxu1 }
 0x598   :  { %v743_v55 = vcombine.low %v734_v53, %v736_v54  ;;  %v8543_v53 = vld [vmem:[#allocation8 + $0x20] ss:$8 sps:$4 sm:$0xff]  }
 0x599   :  { %v738_v57 = vpop.f32.mrf.mxu1 }
 0x59a   :  { %v750_v58 = vrot.slane %v743_v55, %v8300_v39 }
 0x59b   :  { %v739_v59 = vpop.f32.mrf.mxu1 }
 0x59c   :  { %v752_v60 = vadd.f32 %v750_v58, %v697_v56 }
 0x59e   :  { %7641 = vtanh.f32 %v752_v60 }
 0x5ab   :  { %v7642_v61 = vpop.eup %7641 }
 0x5ac   :  { %v755_v62 = vcombine.low %v7642_v61, %v7642_v61  ;;  %v769_v63 = vrot.slane %v7642_v61, %v8300_v39 }
 0x5ae   :  { %v762_v33 = vrot.slane %v755_v62, %v8300_v39  ;;  %7357 = vst.sshfl [vmem:[#allocation2 + $0x10] sm:$0x30 pattern:$0x76325410] %v755_v62  ;;  %v777_v34 = vcombine.high %v769_v63, %v769_v63  ;;  %v780_v36 = vpack.c.bf16 %v769_v63, %v769_v63  ;;  %v8581_v62 = vld [vmem:[#allocation8 + $0x14] ss:$8 sps:$4 sm:$0xff]  }
 0x5af   :  { %v8584_v63 = vld [vmem:[#allocation8 + $0x10] ss:$8 sps:$4 sm:$0xff]  }
 0x5b0   :  { %v770_v35 = vcombine.high %v762_v33, %v762_v33  ;;  %v781_v1 = vpack.c.bf16 %v777_v34, %v777_v34  ;;  %v8587_v33 = vld [vmem:[#allocation8 + $0x4] ss:$8 sps:$4 sm:$0xff]   ;;  %v8590_v34 = vld [vmem:[#allocation8] ss:$8 sps:$4 sm:$0xff]  }
 0x5b2   :  { %774 = vst [vmem:[#allocation2 + $0x18] sm:$0xc] %v770_v35  ;;  %814 = vmatprep.mubr.bf16.mxu0 %v781_v1  ;;  %v8593_v35 = vld [vmem:[#allocation8 + $0xf4] ss:$8 sps:$4 sm:$0xff]   ;;  %v8596_v1 = vld [vmem:[#allocation8 + $0xf0] ss:$8 sps:$4 sm:$0xff]  }
 0x5b3   :  { %815 = vmatmul.mubr.bf16.vlgmr.msra.gmra.mxu0 %v780_v36  ;;  %v8599_v36 = vld [vmem:[#allocation8 + $0xe4] ss:$8 sps:$4 sm:$0xff]  }
 0x5b4   :  { %938 = vmatpush1.bf16.msra.mxu0 %v8136_v2  ;;  %v8508_v2 = vld [vmem:[#allocation8 + $0x74] ss:$8 sps:$4 sm:$0xff]  }
 0x5b5   :  { %939 = vmatprep.subr.bf16.mxu0 %v8139_v3 }
 0x5b8   :  { %940 = vmatpush1.bf16.msra.mxu0 %v8143_v4 }
 0x5b9   :  { %941 = vmatprep.subr.bf16.mxu0 %v8147_v5 }
 0x5bc   :  { %942 = vmatpush1.bf16.msra.mxu0 %v8151_v6  ;;  %v776_v6 = vld [vmem:[#allocation5 + $0x18] sm:$0xf] }
 0x5bd   :  { %943 = vmatprep.subr.bf16.mxu0 %v8155_v7 }
 0x5c0   :  { %944 = vmatpush1.bf16.msra.mxu0 %v8159_v8 }
 0x5c1   :  { %945 = vmatprep.subr.bf16.mxu0 %v8163_v9 }
 0x5c4   :  { %946 = vmatpush1.bf16.msra.mxu0 %v8167_v10 }
 0x5c5   :  { %947 = vmatprep.subr.bf16.mxu0 %v8171_v11 }
 0x5c8   :  { %948 = vmatpush1.bf16.msra.mxu0 %v8175_v12 }
 0x5c9   :  { %949 = vmatprep.subr.bf16.mxu0 %v8179_v13 }
 0x5cc   :  { %950 = vmatpush1.bf16.msra.mxu0 %v8182_v14 }
 0x5cd   :  { %951 = vmatprep.subr.bf16.mxu0 %v8184_v15 }
 0x5d0   :  { %952 = vmatpush1.bf16.msra.mxu0 %v8190_v16 }
 0x5d1   :  { %953 = vmatprep.subr.bf16.mxu0 %v8192_v17 }
 0x5d4   :  { %954 = vmatpush2.bf16.msra.mxu0 %v8198_v18 }
 0x5d5   :  { %955 = vmatprep.subr.bf16.mxu0 %v8200_v19 }
 0x5d8   :  { %956 = vmatpush2.bf16.msra.mxu0 %v8206_v20 }
 0x5d9   :  { %957 = vmatprep.subr.bf16.mxu0 %v8208_v21 }
 0x5dc   :  { %958 = vmatpush2.bf16.msra.mxu0 %v8214_v22 }
 0x5dd   :  { %959 = vmatprep.subr.bf16.mxu0 %v8216_v23 }
 0x5e0   :  { %960 = vmatpush2.bf16.msra.mxu0 %v8223_v24 }
 0x5e1   :  { %961 = vmatprep.subr.bf16.mxu0 %v8227_v25 }
 0x5e4   :  { %962 = vmatpush2.bf16.msra.mxu0 %v8231_v26 }
 0x5e5   :  { %963 = vmatprep.subr.bf16.mxu0 %v8235_v27 }
 0x5e8   :  { %964 = vmatpush2.bf16.msra.mxu0 %v8239_v28 }
 0x5e9   :  { %965 = vmatprep.subr.bf16.mxu0 %v8243_v29 }
 0x5ec   :  { %966 = vmatpush2.bf16.msra.mxu0 %v8247_v30 }
 0x5ed   :  { %967 = vmatprep.subr.bf16.mxu0 %v8251_v31 }
 0x5f0   :  { %968 = vmatpush2.bf16.msra.mxu0 %v8255_v32 }
 0x5f1   :  { %1090 = vmatprep.subr.bf16.mxu0 %v8508_v2 }
 0x673   :  { %v816_v3 = vpop.f32.mrf.mxu0 }
 0x675   :  { %v818_v4 = vpop.f32.mrf.mxu0 }
 0x676   :  { %v825_v5 = vcombine.low %v816_v3, %v818_v4  ;;  %v8602_v3 = vld [vmem:[#allocation8 + $0xe0] ss:$8 sps:$4 sm:$0xff]  }
 0x677   :  { %v820_v7 = vpop.f32.mrf.mxu0 }
 0x678   :  { %v832_v8 = vrot.slane %v825_v5, %v8300_v39  ;;  %v8639_v7 = vld [vmem:[#allocation8 + $0xd4] ss:$8 sps:$4 sm:$0xff]  }
 0x679   :  { %v821_v9 = vpop.f32.mrf.mxu0 }
 0x67a   :  { %v834_v10 = vadd.f32 %v832_v8, %v776_v6  ;;  %v8642_v8 = vld [vmem:[#allocation8 + $0xd0] ss:$8 sps:$4 sm:$0xff]   ;;  %v8645_v9 = vld [vmem:[#allocation8 + $0xc4] ss:$8 sps:$4 sm:$0xff]  }
 0x67c   :  { %7643 = vtanh.f32 %v834_v10  ;;  %v8648_v10 = vld [vmem:[#allocation8 + $0xc0] ss:$8 sps:$4 sm:$0xff]  }
 0x689   :  { %v7644_v11 = vpop.eup %7643 }
 0x68a   :  { %7358 = vst.sshfl [vmem:[#allocation2 + $0x18] sm:$0xc pattern:$0x76325410] %v7644_v11  ;;  %v843_v12 = vrot.slane %v7644_v11, %v8300_v39  ;;  %v8651_v11 = vld [vmem:[#allocation8 + $0xb4] ss:$8 sps:$4 sm:$0xff]  }
 0x68c   :  { %v844_v38 = vcombine.low %v843_v12, %v843_v12  ;;  %v851_v40 = vcombine.high %v843_v12, %v843_v12  ;;  %v853_v42 = vpack.c.bf16 %v843_v12, %v843_v12  ;;  %v8654_v12 = vld [vmem:[#allocation8 + $0xb0] ss:$8 sps:$4 sm:$0xff]  }
 0x68e   :  { %847 = vst [vmem:[#allocation2 + $0x10] sm:$0x30] %v844_v38  ;;  %v854_v41 = vpack.c.bf16 %v851_v40, %v851_v40  ;;  %v8657_v38 = vld [vmem:[#allocation8 + $0xa4] ss:$8 sps:$4 sm:$0xff]   ;;  %v8660_v40 = vld [vmem:[#allocation8 + $0xa0] ss:$8 sps:$4 sm:$0xff]  }
 0x690   :  { %887 = vmatprep.mubr.bf16.mxu1 %v854_v41  ;;  %v8663_v41 = vld [vmem:[#allocation8 + $0x94] ss:$8 sps:$4 sm:$0xff]  }
 0x691   :  { %888 = vmatmul.mubr.bf16.vlgmr.msra.gmra.mxu1 %v853_v42  ;;  %v8666_v42 = vld [vmem:[#allocation8 + $0x90] ss:$8 sps:$4 sm:$0xff]  }
 0x692   :  { %1009 = vmatpush1.bf16.msra.mxu1 %v8513_v43 }
 0x693   :  { %1010 = vmatprep.subr.bf16.mxu1 %v8516_v44 }
 0x696   :  { %1011 = vmatpush1.bf16.msra.mxu1 %v8519_v45 }
 0x697   :  { %1012 = vmatprep.subr.bf16.mxu1 %v8522_v46 }
 0x69a   :  { %1013 = vmatpush1.bf16.msra.mxu1 %v8525_v47 }
 0x69b   :  { %1014 = vmatprep.subr.bf16.mxu1 %v8528_v48 }
 0x69e   :  { %1015 = vmatpush1.bf16.msra.mxu1 %v8531_v49 }
 0x69f   :  { %1016 = vmatprep.subr.bf16.mxu1 %v8534_v50 }
 0x6a2   :  { %1017 = vmatpush1.bf16.msra.mxu1 %v8537_v51 }
 0x6a3   :  { %1018 = vmatprep.subr.bf16.mxu1 %v8540_v52 }
 0x6a6   :  { %1019 = vmatpush1.bf16.msra.mxu1 %v8543_v53 }
 0x6a7   :  { %1020 = vmatprep.subr.bf16.mxu1 %v8179_v13 }
 0x6aa   :  { %1021 = vmatpush1.bf16.msra.mxu1 %v8182_v14 }
 0x6ab   :  { %1022 = vmatprep.subr.bf16.mxu1 %v8184_v15 }
 0x6ae   :  { %1023 = vmatpush1.bf16.msra.mxu1 %v8190_v16  ;;  %v850_v16 = vld [vmem:[#allocation5 + $0x1c] sm:$0xf] }
 0x6af   :  { %1024 = vmatprep.subr.bf16.mxu1 %v8192_v17 }
 0x6b2   :  { %1025 = vmatpush2.bf16.msra.mxu1 %v8198_v18 }
 0x6b3   :  { %1026 = vmatprep.subr.bf16.mxu1 %v8200_v19 }
 0x6b6   :  { %1027 = vmatpush2.bf16.msra.mxu1 %v8206_v20 }
 0x6b7   :  { %1028 = vmatprep.subr.bf16.mxu1 %v8208_v21 }
 0x6ba   :  { %1029 = vmatpush2.bf16.msra.mxu1 %v8214_v22 }
 0x6bb   :  { %1030 = vmatprep.subr.bf16.mxu1 %v8216_v23 }
 0x6be   :  { %1031 = vmatpush2.bf16.msra.mxu1 %v8223_v24 }
 0x6bf   :  { %1032 = vmatprep.subr.bf16.mxu1 %v8227_v25 }
 0x6c2   :  { %1033 = vmatpush2.bf16.msra.mxu1 %v8231_v26 }
 0x6c3   :  { %1034 = vmatprep.subr.bf16.mxu1 %v8235_v27 }
 0x6c6   :  { %1035 = vmatpush2.bf16.msra.mxu1 %v8239_v28 }
 0x6c7   :  { %1036 = vmatprep.subr.bf16.mxu1 %v8243_v29 }
 0x6ca   :  { %1037 = vmatpush2.bf16.msra.mxu1 %v8247_v30 }
 0x6cb   :  { %1038 = vmatprep.subr.bf16.mxu1 %v8251_v31 }
 0x6ce   :  { %1039 = vmatpush2.bf16.msra.mxu1 %v8255_v32 }
 0x6cf   :  { %1163 = vmatprep.subr.bf16.mxu1 %v8508_v2 }
 0x751   :  { %v889_v13 = vpop.f32.mrf.mxu1 }
 0x753   :  { %v891_v14 = vpop.f32.mrf.mxu1 }
 0x754   :  { %v898_v15 = vcombine.low %v889_v13, %v891_v14 }
 0x755   :  { %v893_v17 = vpop.f32.mrf.mxu1 }
 0x756   :  { %v905_v18 = vrot.slane %v898_v15, %v8300_v39 }
 0x757   :  { %v894_v19 = vpop.f32.mrf.mxu1 }
 0x758   :  { %v907_v20 = vadd.f32 %v905_v18, %v850_v16  ;;  %v1005_v16 = vld [vmem:[#allocation5 + $0x24] sm:$0xf] }
 0x75a   :  { %7645 = vtanh.f32 %v907_v20 }
 0x767   :  { %v7646_v54 = vpop.eup %7645 }
 0x768   :  { %v910_v55 = vcombine.low %v7646_v54, %v7646_v54  ;;  %v924_v56 = vrot.slane %v7646_v54, %v8300_v39 }
 0x76a   :  { %v917_v57 = vrot.slane %v910_v55, %v8300_v39  ;;  %7359 = vst.sshfl [vmem:[#allocation2 + $0x18] sm:$0xc0 pattern:$0x76325410] %v910_v55  ;;  %v932_v58 = vcombine.high %v924_v56, %v924_v56  ;;  %v935_v61 = vpack.c.bf16 %v924_v56, %v924_v56 }
 0x76c   :  { %v925_v59 = vcombine.low %v917_v57, %v917_v57  ;;  %v936_v60 = vpack.c.bf16 %v932_v58, %v932_v58 }
 0x76e   :  { %928 = vst [vmem:[#allocation2 + $0x10] sm:$0xc0] %v925_v59  ;;  %969 = vmatprep.mubr.bf16.mxu0 %v936_v60  ;;  %v8704_v60 = vld [vmem:[#allocation8 + $0x84] ss:$8 sps:$4 sm:$0xff]  }
 0x76f   :  { %970 = vmatmul.mubr.bf16.vlgmr.msra.gmra.mxu0 %v935_v61  ;;  %v8707_v61 = vld [vmem:[#allocation8 + $0x80] ss:$8 sps:$4 sm:$0xff]  }
 0x770   :  { %1091 = vmatpush1.bf16.msra.mxu0 %v8513_v43 }
 0x771   :  { %1092 = vmatprep.subr.bf16.mxu0 %v8516_v44 }
 0x774   :  { %1093 = vmatpush1.bf16.msra.mxu0 %v8519_v45 }
 0x775   :  { %1094 = vmatprep.subr.bf16.mxu0 %v8522_v46 }
 0x778   :  { %1095 = vmatpush1.bf16.msra.mxu0 %v8525_v47 }
 0x779   :  { %1096 = vmatprep.subr.bf16.mxu0 %v8528_v48 }
 0x77c   :  { %1097 = vmatpush1.bf16.msra.mxu0 %v8531_v49 }
 0x77d   :  { %1098 = vmatprep.subr.bf16.mxu0 %v8534_v50 }
 0x780   :  { %1099 = vmatpush1.bf16.msra.mxu0 %v8537_v51 }
 0x781   :  { %1100 = vmatprep.subr.bf16.mxu0 %v8540_v52 }
 0x784   :  { %1101 = vmatpush1.bf16.msra.mxu0 %v8543_v53 }
 0x785   :  { %1102 = vmatprep.subr.bf16.mxu0 %v8581_v62 }
 0x788   :  { %1103 = vmatpush1.bf16.msra.mxu0 %v8584_v63 }
 0x789   :  { %1104 = vmatprep.subr.bf16.mxu0 %v8587_v33 }
 0x78c   :  { %1105 = vmatpush1.bf16.msra.mxu0 %v8590_v34 }
 0x78d   :  { %1106 = vmatprep.subr.bf16.mxu0 %v8593_v35 }
 0x790   :  { %1107 = vmatpush2.bf16.msra.mxu0 %v8596_v1 }
 0x791   :  { %1108 = vmatprep.subr.bf16.mxu0 %v8599_v36 }
 0x794   :  { %1109 = vmatpush2.bf16.msra.mxu0 %v8602_v3 }
 0x795   :  { %1110 = vmatprep.subr.bf16.mxu0 %v8208_v21 }
 0x798   :  { %1111 = vmatpush2.bf16.msra.mxu0 %v8214_v22 }
 0x799   :  { %1112 = vmatprep.subr.bf16.mxu0 %v8216_v23 }
 0x79c   :  { %1113 = vmatpush2.bf16.msra.mxu0 %v8223_v24  ;;  %v931_v24 = vld [vmem:[#allocation5 + $0x20] sm:$0xf] }
 0x79d   :  { %1114 = vmatprep.subr.bf16.mxu0 %v8227_v25 }
 0x7a0   :  { %1115 = vmatpush2.bf16.msra.mxu0 %v8231_v26 }
 0x7a1   :  { %1116 = vmatprep.subr.bf16.mxu0 %v8235_v27 }
 0x7a4   :  { %1117 = vmatpush2.bf16.msra.mxu0 %v8239_v28 }
 0x7a5   :  { %1118 = vmatprep.subr.bf16.mxu0 %v8243_v29 }
 0x7a8   :  { %1119 = vmatpush2.bf16.msra.mxu0 %v8247_v30 }
 0x7a9   :  { %1120 = vmatprep.subr.bf16.mxu0 %v8251_v31 }
 0x7ac   :  { %1121 = vmatpush2.bf16.msra.mxu0 %v8255_v32 }
 0x7ad   :  { %1245 = vmatprep.subr.bf16.mxu0 %v8508_v2 }
 0x82f   :  { %v971_v21 = vpop.f32.mrf.mxu0 }
 0x831   :  { %v973_v22 = vpop.f32.mrf.mxu0 }
 0x832   :  { %v980_v23 = vcombine.low %v971_v21, %v973_v22 }
 0x833   :  { %v975_v25 = vpop.f32.mrf.mxu0 }
 0x834   :  { %v987_v26 = vrot.slane %v980_v23, %v8300_v39 }
 0x835   :  { %v976_v27 = vpop.f32.mrf.mxu0 }
 0x836   :  { %v989_v4 = vadd.f32 %v987_v26, %v931_v24  ;;  %v1084_v24 = vld [vmem:[#allocation5 + $0x28] sm:$0xf] }
 0x838   :  { %7647 = vtanh.f32 %v989_v4 }
 0x845   :  { %v7648_v28 = vpop.eup %7647 }
 0x846   :  { %7360 = vst.sshfl [vmem:[#allocation2 + $0x20] sm:$0x3 pattern:$0x76325410] %v7648_v28  ;;  %v998_v29 = vrot.slane %v7648_v28, %v8300_v39 }
 0x848   :  { %v999_v30 = vcombine.high %v998_v29, %v998_v29  ;;  %v1006_v6 = vpack.c.bf16 %v998_v29, %v998_v29 }
 0x84a   :  { %1003 = vst [vmem:[#allocation2 + $0x28] sm:$0x3] %v999_v30  ;;  %v1007_v5 = vpack.c.bf16 %v999_v30, %v999_v30 }
 0x84c   :  { %1040 = vmatprep.mubr.bf16.mxu1 %v1007_v5 }
 0x84d   :  { %1041 = vmatmul.mubr.bf16.vlgmr.msra.gmra.mxu1 %v1006_v6 }
 0x84e   :  { %1164 = vmatpush1.bf16.msra.mxu1 %v8513_v43 }
 0x84f   :  { %1165 = vmatprep.subr.bf16.mxu1 %v8516_v44 }
 0x852   :  { %1166 = vmatpush1.bf16.msra.mxu1 %v8519_v45 }
 0x853   :  { %1167 = vmatprep.subr.bf16.mxu1 %v8522_v46 }
 0x856   :  { %1168 = vmatpush1.bf16.msra.mxu1 %v8525_v47 }
 0x857   :  { %1169 = vmatprep.subr.bf16.mxu1 %v8528_v48 }
 0x85a   :  { %1170 = vmatpush1.bf16.msra.mxu1 %v8531_v49 }
 0x85b   :  { %1171 = vmatprep.subr.bf16.mxu1 %v8534_v50 }
 0x85e   :  { %1172 = vmatpush1.bf16.msra.mxu1 %v8537_v51 }
 0x85f   :  { %1173 = vmatprep.subr.bf16.mxu1 %v8540_v52 }
 0x862   :  { %1174 = vmatpush1.bf16.msra.mxu1 %v8543_v53 }
 0x863   :  { %1175 = vmatprep.subr.bf16.mxu1 %v8581_v62 }
 0x866   :  { %1176 = vmatpush1.bf16.msra.mxu1 %v8584_v63 }
 0x867   :  { %1177 = vmatprep.subr.bf16.mxu1 %v8587_v33 }
 0x86a   :  { %1178 = vmatpush1.bf16.msra.mxu1 %v8590_v34 }
 0x86b   :  { %1179 = vmatprep.subr.bf16.mxu1 %v8593_v35 }
 0x86e   :  { %1180 = vmatpush2.bf16.msra.mxu1 %v8596_v1 }
 0x86f   :  { %1181 = vmatprep.subr.bf16.mxu1 %v8599_v36 }
 0x872   :  { %1182 = vmatpush2.bf16.msra.mxu1 %v8602_v3 }
 0x873   :  { %1183 = vmatprep.subr.bf16.mxu1 %v8639_v7 }
 0x876   :  { %1184 = vmatpush2.bf16.msra.mxu1 %v8642_v8 }
 0x877   :  { %1185 = vmatprep.subr.bf16.mxu1 %v8645_v9 }
 0x87a   :  { %1186 = vmatpush2.bf16.msra.mxu1 %v8648_v10 }
 0x87b   :  { %1187 = vmatprep.subr.bf16.mxu1 %v8651_v11 }
 0x87e   :  { %1188 = vmatpush2.bf16.msra.mxu1 %v8654_v12 }
 0x87f   :  { %1189 = vmatprep.subr.bf16.mxu1 %v8657_v38 }
 0x882   :  { %1190 = vmatpush2.bf16.msra.mxu1 %v8660_v40 }
 0x883   :  { %1191 = vmatprep.subr.bf16.mxu1 %v8663_v41 }
 0x886   :  { %1192 = vmatpush2.bf16.msra.mxu1 %v8666_v42 }
 0x887   :  { %1193 = vmatprep.subr.bf16.mxu1 %v8251_v31 }
 0x88a   :  { %1194 = vmatpush2.bf16.msra.mxu1 %v8255_v32 }
 0x88b   :  { %1316 = vmatprep.subr.bf16.mxu1 %v8508_v2 }
 0x90d   :  { %v1042_v13 = vpop.f32.mrf.mxu1 }
 0x90f   :  { %v1044_v14 = vpop.f32.mrf.mxu1 }
 0x910   :  { %v1051_v15 = vcombine.low %v1042_v13, %v1044_v14 }
 0x911   :  { %v1046_v17 = vpop.f32.mrf.mxu1 }
 0x912   :  { %v1058_v18 = vrot.slane %v1051_v15, %v8300_v39  ;;  %v1158_v17 = vld [vmem:[#allocation5 + $0x2c] sm:$0xf] }
 0x913   :  { %v1047_v19 = vpop.f32.mrf.mxu1 }
 0x914   :  { %v1060_v20 = vadd.f32 %v1058_v18, %v1005_v16 }
 0x916   :  { %7649 = vtanh.f32 %v1060_v20 }
 0x923   :  { %v7650_v54 = vpop.eup %7649 }
 0x924   :  { %v1063_v55 = vcombine.low %v7650_v54, %v7650_v54  ;;  %v1077_v56 = vrot.slane %v7650_v54, %v8300_v39 }
 0x926   :  { %v1070_v31 = vrot.slane %v1063_v55, %v8300_v39  ;;  %7361 = vst.sshfl [vmem:[#allocation2 + $0x20] sm:$0x30 pattern:$0x76325410] %v1063_v55  ;;  %v1085_v32 = vcombine.high %v1077_v56, %v1077_v56  ;;  %v1088_v59 = vpack.c.bf16 %v1077_v56, %v1077_v56 }
 0x928   :  { %v1078_v57 = vcombine.high %v1070_v31, %v1070_v31  ;;  %v1089_v58 = vpack.c.bf16 %v1085_v32, %v1085_v32 }
 0x92a   :  { %1082 = vst [vmem:[#allocation2 + $0x28] sm:$0xc] %v1078_v57  ;;  %1122 = vmatprep.mubr.bf16.mxu0 %v1089_v58 }
 0x92b   :  { %1123 = vmatmul.mubr.bf16.vlgmr.msra.gmra.mxu0 %v1088_v59 }
 0x92c   :  { %1246 = vmatpush1.bf16.msra.mxu0 %v8513_v43 }
 0x92d   :  { %1247 = vmatprep.subr.bf16.mxu0 %v8516_v44 }
 0x930   :  { %1248 = vmatpush1.bf16.msra.mxu0 %v8519_v45 }
 0x931   :  { %1249 = vmatprep.subr.bf16.mxu0 %v8522_v46 }
 0x934   :  { %1250 = vmatpush1.bf16.msra.mxu0 %v8525_v47 }
 0x935   :  { %1251 = vmatprep.subr.bf16.mxu0 %v8528_v48 }
 0x938   :  { %1252 = vmatpush1.bf16.msra.mxu0 %v8531_v49 }
 0x939   :  { %1253 = vmatprep.subr.bf16.mxu0 %v8534_v50 }
 0x93c   :  { %1254 = vmatpush1.bf16.msra.mxu0 %v8537_v51 }
 0x93d   :  { %1255 = vmatprep.subr.bf16.mxu0 %v8540_v52 }
 0x940   :  { %1256 = vmatpush1.bf16.msra.mxu0 %v8543_v53 }
 0x941   :  { %1257 = vmatprep.subr.bf16.mxu0 %v8581_v62 }
 0x944   :  { %1258 = vmatpush1.bf16.msra.mxu0 %v8584_v63 }
 0x945   :  { %1259 = vmatprep.subr.bf16.mxu0 %v8587_v33 }
 0x948   :  { %1260 = vmatpush1.bf16.msra.mxu0 %v8590_v34 }
 0x949   :  { %1261 = vmatprep.subr.bf16.mxu0 %v8593_v35 }
 0x94c   :  { %1262 = vmatpush2.bf16.msra.mxu0 %v8596_v1 }
 0x94d   :  { %1263 = vmatprep.subr.bf16.mxu0 %v8599_v36 }
 0x950   :  { %1264 = vmatpush2.bf16.msra.mxu0 %v8602_v3 }
 0x951   :  { %1265 = vmatprep.subr.bf16.mxu0 %v8639_v7 }
 0x954   :  { %1266 = vmatpush2.bf16.msra.mxu0 %v8642_v8 }
 0x955   :  { %1267 = vmatprep.subr.bf16.mxu0 %v8645_v9 }
 0x958   :  { %1268 = vmatpush2.bf16.msra.mxu0 %v8648_v10 }
 0x959   :  { %1269 = vmatprep.subr.bf16.mxu0 %v8651_v11 }
 0x95c   :  { %1270 = vmatpush2.bf16.msra.mxu0 %v8654_v12 }
 0x95d   :  { %1271 = vmatprep.subr.bf16.mxu0 %v8657_v38 }
 0x960   :  { %1272 = vmatpush2.bf16.msra.mxu0 %v8660_v40 }
 0x961   :  { %1273 = vmatprep.subr.bf16.mxu0 %v8663_v41 }
 0x964   :  { %1274 = vmatpush2.bf16.msra.mxu0 %v8666_v42 }
 0x965   :  { %1275 = vmatprep.subr.bf16.mxu0 %v8704_v60 }
 0x968   :  { %1276 = vmatpush2.bf16.msra.mxu0 %v8707_v61 }
 0x969   :  { %1398 = vmatprep.subr.bf16.mxu0 %v8508_v2 }
 0x9eb   :  { %v1124_v21 = vpop.f32.mrf.mxu0 }
 0x9ed   :  { %v1126_v22 = vpop.f32.mrf.mxu0 }
 0x9ee   :  { %v1133_v23 = vcombine.low %v1124_v21, %v1126_v22 }
 0x9ef   :  { %v1128_v25 = vpop.f32.mrf.mxu0 }
 0x9f0   :  { %v1140_v26 = vrot.slane %v1133_v23, %v8300_v39  ;;  %v1239_v25 = vld [vmem:[#allocation5 + $0x30] sm:$0xf] }
 0x9f1   :  { %v1129_v27 = vpop.f32.mrf.mxu0 }
 0x9f2   :  { %v1142_v4 = vadd.f32 %v1140_v26, %v1084_v24 }
 0x9f4   :  { %7651 = vtanh.f32 %v1142_v4 }
 0xa01   :  { %v7652_v28 = vpop.eup %7651 }
 0xa02   :  { %7362 = vst.sshfl [vmem:[#allocation2 + $0x28] sm:$0xc pattern:$0x76325410] %v7652_v28  ;;  %v1151_v29 = vrot.slane %v7652_v28, %v8300_v39 }
 0xa04   :  { %v1152_v30 = vcombine.low %v1151_v29, %v1151_v29  ;;  %v1159_v5 = vcombine.high %v1151_v29, %v1151_v29  ;;  %v1161_v13 = vpack.c.bf16 %v1151_v29, %v1151_v29 }
 0xa06   :  { %1155 = vst [vmem:[#allocation2 + $0x20] sm:$0x30] %v1152_v30  ;;  %v1162_v6 = vpack.c.bf16 %v1159_v5, %v1159_v5 }
 0xa08   :  { %1195 = vmatprep.mubr.bf16.mxu1 %v1162_v6 }
 0xa09   :  { %1196 = vmatmul.mubr.bf16.vlgmr.msra.gmra.mxu1 %v1161_v13 }
 0xa0a   :  { %1317 = vmatpush1.bf16.msra.mxu1 %v8513_v43 }
 0xa0b   :  { %1318 = vmatprep.subr.bf16.mxu1 %v8516_v44 }
 0xa0e   :  { %1319 = vmatpush1.bf16.msra.mxu1 %v8519_v45 }
 0xa0f   :  { %1320 = vmatprep.subr.bf16.mxu1 %v8522_v46 }
 0xa12   :  { %1321 = vmatpush1.bf16.msra.mxu1 %v8525_v47 }
 0xa13   :  { %1322 = vmatprep.subr.bf16.mxu1 %v8528_v48 }
 0xa16   :  { %1323 = vmatpush1.bf16.msra.mxu1 %v8531_v49 }
 0xa17   :  { %1324 = vmatprep.subr.bf16.mxu1 %v8534_v50 }
 0xa1a   :  { %1325 = vmatpush1.bf16.msra.mxu1 %v8537_v51 }
 0xa1b   :  { %1326 = vmatprep.subr.bf16.mxu1 %v8540_v52 }
 0xa1e   :  { %1327 = vmatpush1.bf16.msra.mxu1 %v8543_v53 }
 0xa1f   :  { %1328 = vmatprep.subr.bf16.mxu1 %v8581_v62 }
 0xa22   :  { %1329 = vmatpush1.bf16.msra.mxu1 %v8584_v63 }
 0xa23   :  { %1330 = vmatprep.subr.bf16.mxu1 %v8587_v33 }
 0xa26   :  { %1331 = vmatpush1.bf16.msra.mxu1 %v8590_v34 }
 0xa27   :  { %1332 = vmatprep.subr.bf16.mxu1 %v8593_v35 }
 0xa2a   :  { %1333 = vmatpush2.bf16.msra.mxu1 %v8596_v1 }
 0xa2b   :  { %1334 = vmatprep.subr.bf16.mxu1 %v8599_v36 }
 0xa2e   :  { %1335 = vmatpush2.bf16.msra.mxu1 %v8602_v3 }
 0xa2f   :  { %1336 = vmatprep.subr.bf16.mxu1 %v8639_v7 }
 0xa32   :  { %1337 = vmatpush2.bf16.msra.mxu1 %v8642_v8 }
 0xa33   :  { %1338 = vmatprep.subr.bf16.mxu1 %v8645_v9 }
 0xa36   :  { %1339 = vmatpush2.bf16.msra.mxu1 %v8648_v10 }
 0xa37   :  { %1340 = vmatprep.subr.bf16.mxu1 %v8651_v11 }
 0xa3a   :  { %1341 = vmatpush2.bf16.msra.mxu1 %v8654_v12 }
 0xa3b   :  { %1342 = vmatprep.subr.bf16.mxu1 %v8657_v38 }
 0xa3e   :  { %1343 = vmatpush2.bf16.msra.mxu1 %v8660_v40 }
 0xa3f   :  { %1344 = vmatprep.subr.bf16.mxu1 %v8663_v41 }
 0xa42   :  { %1345 = vmatpush2.bf16.msra.mxu1 %v8666_v42 }
 0xa43   :  { %1346 = vmatprep.subr.bf16.mxu1 %v8704_v60 }
 0xa46   :  { %1347 = vmatpush2.bf16.msra.mxu1 %v8707_v61 }
 0xa47   :  { %1471 = vmatprep.subr.bf16.mxu1 %v8508_v2 }
 0xac9   :  { %v1197_v14 = vpop.f32.mrf.mxu1 }
 0xacb   :  { %v1199_v15 = vpop.f32.mrf.mxu1 }
 0xacc   :  { %v1206_v16 = vcombine.low %v1197_v14, %v1199_v15 }
 0xacd   :  { %v1201_v18 = vpop.f32.mrf.mxu1 }
 0xace   :  { %v1213_v19 = vrot.slane %v1206_v16, %v8300_v39 }
 0xacf   :  { %v1202_v20 = vpop.f32.mrf.mxu1 }
 0xad0   :  { %v1215_v54 = vadd.f32 %v1213_v19, %v1158_v17  ;;  %v1313_v17 = vld [vmem:[#allocation5 + $0x34] sm:$0xf] }
 0xad2   :  { %7653 = vtanh.f32 %v1215_v54 }
 0xadf   :  { %v7654_v55 = vpop.eup %7653 }
 0xae0   :  { %v1218_v56 = vcombine.low %v7654_v55, %v7654_v55  ;;  %v1232_v31 = vrot.slane %v7654_v55, %v8300_v39 }
 0xae2   :  { %v1225_v32 = vrot.slane %v1218_v56, %v8300_v39  ;;  %7363 = vst.sshfl [vmem:[#allocation2 + $0x28] sm:$0xc0 pattern:$0x76325410] %v1218_v56  ;;  %v1240_v57 = vcombine.high %v1232_v31, %v1232_v31  ;;  %v1243_v21 = vpack.c.bf16 %v1232_v31, %v1232_v31 }
 0xae4   :  { %v1233_v58 = vcombine.low %v1225_v32, %v1225_v32  ;;  %v1244_v59 = vpack.c.bf16 %v1240_v57, %v1240_v57 }
 0xae6   :  { %1236 = vst [vmem:[#allocation2 + $0x20] sm:$0xc0] %v1233_v58  ;;  %1277 = vmatprep.mubr.bf16.mxu0 %v1244_v59 }
 0xae7   :  { %1278 = vmatmul.mubr.bf16.vlgmr.msra.gmra.mxu0 %v1243_v21 }
 0xae8   :  { %1399 = vmatpush1.bf16.msra.mxu0 %v8513_v43 }
 0xae9   :  { %1400 = vmatprep.subr.bf16.mxu0 %v8516_v44 }
 0xaec   :  { %1401 = vmatpush1.bf16.msra.mxu0 %v8519_v45 }
 0xaed   :  { %1402 = vmatprep.subr.bf16.mxu0 %v8522_v46 }
 0xaf0   :  { %1403 = vmatpush1.bf16.msra.mxu0 %v8525_v47 }
 0xaf1   :  { %1404 = vmatprep.subr.bf16.mxu0 %v8528_v48 }
 0xaf4   :  { %1405 = vmatpush1.bf16.msra.mxu0 %v8531_v49 }
 0xaf5   :  { %1406 = vmatprep.subr.bf16.mxu0 %v8534_v50 }
 0xaf8   :  { %1407 = vmatpush1.bf16.msra.mxu0 %v8537_v51 }
 0xaf9   :  { %1408 = vmatprep.subr.bf16.mxu0 %v8540_v52 }
 0xafc   :  { %1409 = vmatpush1.bf16.msra.mxu0 %v8543_v53 }
 0xafd   :  { %1410 = vmatprep.subr.bf16.mxu0 %v8581_v62 }
 0xb00   :  { %1411 = vmatpush1.bf16.msra.mxu0 %v8584_v63 }
 0xb01   :  { %1412 = vmatprep.subr.bf16.mxu0 %v8587_v33 }
 0xb04   :  { %1413 = vmatpush1.bf16.msra.mxu0 %v8590_v34 }
 0xb05   :  { %1414 = vmatprep.subr.bf16.mxu0 %v8593_v35 }
 0xb08   :  { %1415 = vmatpush2.bf16.msra.mxu0 %v8596_v1 }
 0xb09   :  { %1416 = vmatprep.subr.bf16.mxu0 %v8599_v36 }
 0xb0c   :  { %1417 = vmatpush2.bf16.msra.mxu0 %v8602_v3 }
 0xb0d   :  { %1418 = vmatprep.subr.bf16.mxu0 %v8639_v7 }
 0xb10   :  { %1419 = vmatpush2.bf16.msra.mxu0 %v8642_v8 }
 0xb11   :  { %1420 = vmatprep.subr.bf16.mxu0 %v8645_v9 }
 0xb14   :  { %1421 = vmatpush2.bf16.msra.mxu0 %v8648_v10 }
 0xb15   :  { %1422 = vmatprep.subr.bf16.mxu0 %v8651_v11 }
 0xb18   :  { %1423 = vmatpush2.bf16.msra.mxu0 %v8654_v12 }
 0xb19   :  { %1424 = vmatprep.subr.bf16.mxu0 %v8657_v38 }
 0xb1c   :  { %1425 = vmatpush2.bf16.msra.mxu0 %v8660_v40 }
 0xb1d   :  { %1426 = vmatprep.subr.bf16.mxu0 %v8663_v41 }
 0xb20   :  { %1427 = vmatpush2.bf16.msra.mxu0 %v8666_v42 }
 0xb21   :  { %1428 = vmatprep.subr.bf16.mxu0 %v8704_v60 }
 0xb24   :  { %1429 = vmatpush2.bf16.msra.mxu0 %v8707_v61 }
 0xb25   :  { %1553 = vmatprep.subr.bf16.mxu0 %v8508_v2 }
 0xba7   :  { %v1279_v22 = vpop.f32.mrf.mxu0 }
 0xba9   :  { %v1281_v23 = vpop.f32.mrf.mxu0 }
 0xbaa   :  { %v1288_v24 = vcombine.low %v1279_v22, %v1281_v23 }
 0xbab   :  { %v1283_v26 = vpop.f32.mrf.mxu0 }
 0xbac   :  { %v1295_v27 = vrot.slane %v1288_v24, %v8300_v39 }
 0xbad   :  { %v1284_v4 = vpop.f32.mrf.mxu0 }
 0xbae   :  { %v1297_v28 = vadd.f32 %v1295_v27, %v1239_v25  ;;  %v1392_v25 = vld [vmem:[#allocation5 + $0x38] sm:$0xf] }
 0xbb0   :  { %7655 = vtanh.f32 %v1297_v28 }
 0xbbd   :  { %v7656_v29 = vpop.eup %7655 }
 0xbbe   :  { %7364 = vst.sshfl [vmem:[#allocation2 + $0x30] sm:$0x3 pattern:$0x76325410] %v7656_v29  ;;  %v1306_v30 = vrot.slane %v7656_v29, %v8300_v39 }
 0xbc0   :  { %v1307_v5 = vcombine.high %v1306_v30, %v1306_v30  ;;  %v1314_v13 = vpack.c.bf16 %v1306_v30, %v1306_v30 }
 0xbc2   :  { %1311 = vst [vmem:[#allocation2 + $0x38] sm:$0x3] %v1307_v5  ;;  %v1315_v6 = vpack.c.bf16 %v1307_v5, %v1307_v5 }
 0xbc4   :  { %1348 = vmatprep.mubr.bf16.mxu1 %v1315_v6 }
 0xbc5   :  { %1349 = vmatmul.mubr.bf16.vlgmr.msra.gmra.mxu1 %v1314_v13 }
 0xbc6   :  { %1472 = vmatpush1.bf16.msra.mxu1 %v8513_v43 }
 0xbc7   :  { %1473 = vmatprep.subr.bf16.mxu1 %v8516_v44 }
 0xbca   :  { %1474 = vmatpush1.bf16.msra.mxu1 %v8519_v45 }
 0xbcb   :  { %1475 = vmatprep.subr.bf16.mxu1 %v8522_v46 }
 0xbce   :  { %1476 = vmatpush1.bf16.msra.mxu1 %v8525_v47 }
 0xbcf   :  { %1477 = vmatprep.subr.bf16.mxu1 %v8528_v48 }
 0xbd2   :  { %1478 = vmatpush1.bf16.msra.mxu1 %v8531_v49 }
 0xbd3   :  { %1479 = vmatprep.subr.bf16.mxu1 %v8534_v50 }
 0xbd6   :  { %1480 = vmatpush1.bf16.msra.mxu1 %v8537_v51 }
 0xbd7   :  { %1481 = vmatprep.subr.bf16.mxu1 %v8540_v52 }
 0xbda   :  { %1482 = vmatpush1.bf16.msra.mxu1 %v8543_v53 }
 0xbdb   :  { %1483 = vmatprep.subr.bf16.mxu1 %v8581_v62 }
 0xbde   :  { %1484 = vmatpush1.bf16.msra.mxu1 %v8584_v63 }
 0xbdf   :  { %1485 = vmatprep.subr.bf16.mxu1 %v8587_v33 }
 0xbe2   :  { %1486 = vmatpush1.bf16.msra.mxu1 %v8590_v34 }
 0xbe3   :  { %1487 = vmatprep.subr.bf16.mxu1 %v8593_v35 }
 0xbe6   :  { %1488 = vmatpush2.bf16.msra.mxu1 %v8596_v1 }
 0xbe7   :  { %1489 = vmatprep.subr.bf16.mxu1 %v8599_v36 }
 0xbea   :  { %1490 = vmatpush2.bf16.msra.mxu1 %v8602_v3 }
 0xbeb   :  { %1491 = vmatprep.subr.bf16.mxu1 %v8639_v7 }
 0xbee   :  { %1492 = vmatpush2.bf16.msra.mxu1 %v8642_v8 }
 0xbef   :  { %1493 = vmatprep.subr.bf16.mxu1 %v8645_v9 }
 0xbf2   :  { %1494 = vmatpush2.bf16.msra.mxu1 %v8648_v10 }
 0xbf3   :  { %1495 = vmatprep.subr.bf16.mxu1 %v8651_v11 }
 0xbf6   :  { %1496 = vmatpush2.bf16.msra.mxu1 %v8654_v12 }
 0xbf7   :  { %1497 = vmatprep.subr.bf16.mxu1 %v8657_v38 }
 0xbfa   :  { %1498 = vmatpush2.bf16.msra.mxu1 %v8660_v40 }
 0xbfb   :  { %1499 = vmatprep.subr.bf16.mxu1 %v8663_v41 }
 0xbfe   :  { %1500 = vmatpush2.bf16.msra.mxu1 %v8666_v42 }
 0xbff   :  { %1501 = vmatprep.subr.bf16.mxu1 %v8704_v60 }
 0xc02   :  { %1502 = vmatpush2.bf16.msra.mxu1 %v8707_v61 }
 0xc03   :  { %1624 = vmatprep.subr.bf16.mxu1 %v8508_v2 }
 0xc85   :  { %v1350_v14 = vpop.f32.mrf.mxu1 }
 0xc87   :  { %v1352_v15 = vpop.f32.mrf.mxu1 }
 0xc88   :  { %v1359_v16 = vcombine.low %v1350_v14, %v1352_v15 }
 0xc89   :  { %v1354_v18 = vpop.f32.mrf.mxu1 }
 0xc8a   :  { %v1366_v19 = vrot.slane %v1359_v16, %v8300_v39  ;;  %v1466_v18 = vld [vmem:[#allocation5 + $0x3c] sm:$0xf] }
 0xc8b   :  { %v1355_v20 = vpop.f32.mrf.mxu1 }
 0xc8c   :  { %v1368_v54 = vadd.f32 %v1366_v19, %v1313_v17 }
 0xc8e   :  { %7657 = vtanh.f32 %v1368_v54 }
 0xc9b   :  { %v7658_v55 = vpop.eup %7657 }
 0xc9c   :  { %v1371_v56 = vcombine.low %v7658_v55, %v7658_v55  ;;  %v1385_v31 = vrot.slane %v7658_v55, %v8300_v39 }
 0xc9e   :  { %v1378_v32 = vrot.slane %v1371_v56, %v8300_v39  ;;  %7365 = vst.sshfl [vmem:[#allocation2 + $0x30] sm:$0x30 pattern:$0x76325410] %v1371_v56  ;;  %v1393_v57 = vcombine.high %v1385_v31, %v1385_v31  ;;  %v1396_v21 = vpack.c.bf16 %v1385_v31, %v1385_v31 }
 0xca0   :  { %v1386_v58 = vcombine.high %v1378_v32, %v1378_v32  ;;  %v1397_v59 = vpack.c.bf16 %v1393_v57, %v1393_v57 }
 0xca2   :  { %1390 = vst [vmem:[#allocation2 + $0x38] sm:$0xc] %v1386_v58  ;;  %1430 = vmatprep.mubr.bf16.mxu0 %v1397_v59 }
 0xca3   :  { %1431 = vmatmul.mubr.bf16.vlgmr.msra.gmra.mxu0 %v1396_v21 }
 0xca4   :  { %1554 = vmatpush1.bf16.msra.mxu0 %v8513_v43 }
 0xca5   :  { %1555 = vmatprep.subr.bf16.mxu0 %v8516_v44 }
 0xca8   :  { %1556 = vmatpush1.bf16.msra.mxu0 %v8519_v45 }
 0xca9   :  { %1557 = vmatprep.subr.bf16.mxu0 %v8522_v46 }
 0xcac   :  { %1558 = vmatpush1.bf16.msra.mxu0 %v8525_v47 }
 0xcad   :  { %1559 = vmatprep.subr.bf16.mxu0 %v8528_v48 }
 0xcb0   :  { %1560 = vmatpush1.bf16.msra.mxu0 %v8531_v49 }
 0xcb1   :  { %1561 = vmatprep.subr.bf16.mxu0 %v8534_v50 }
 0xcb4   :  { %1562 = vmatpush1.bf16.msra.mxu0 %v8537_v51 }
 0xcb5   :  { %1563 = vmatprep.subr.bf16.mxu0 %v8540_v52 }
 0xcb8   :  { %1564 = vmatpush1.bf16.msra.mxu0 %v8543_v53 }
 0xcb9   :  { %1565 = vmatprep.subr.bf16.mxu0 %v8581_v62 }
 0xcbc   :  { %1566 = vmatpush1.bf16.msra.mxu0 %v8584_v63 }
 0xcbd   :  { %1567 = vmatprep.subr.bf16.mxu0 %v8587_v33 }
 0xcc0   :  { %1568 = vmatpush1.bf16.msra.mxu0 %v8590_v34 }
 0xcc1   :  { %1569 = vmatprep.subr.bf16.mxu0 %v8593_v35 }
 0xcc4   :  { %1570 = vmatpush2.bf16.msra.mxu0 %v8596_v1 }
 0xcc5   :  { %1571 = vmatprep.subr.bf16.mxu0 %v8599_v36 }
 0xcc8   :  { %1572 = vmatpush2.bf16.msra.mxu0 %v8602_v3 }
 0xcc9   :  { %1573 = vmatprep.subr.bf16.mxu0 %v8639_v7 }
 0xccc   :  { %1574 = vmatpush2.bf16.msra.mxu0 %v8642_v8 }
 0xccd   :  { %1575 = vmatprep.subr.bf16.mxu0 %v8645_v9 }
 0xcd0   :  { %1576 = vmatpush2.bf16.msra.mxu0 %v8648_v10 }
 0xcd1   :  { %1577 = vmatprep.subr.bf16.mxu0 %v8651_v11 }
 0xcd4   :  { %1578 = vmatpush2.bf16.msra.mxu0 %v8654_v12 }
 0xcd5   :  { %1579 = vmatprep.subr.bf16.mxu0 %v8657_v38 }
 0xcd8   :  { %1580 = vmatpush2.bf16.msra.mxu0 %v8660_v40 }
 0xcd9   :  { %1581 = vmatprep.subr.bf16.mxu0 %v8663_v41 }
 0xcdc   :  { %1582 = vmatpush2.bf16.msra.mxu0 %v8666_v42 }
 0xcdd   :  { %1583 = vmatprep.subr.bf16.mxu0 %v8704_v60 }
 0xce0   :  { %1584 = vmatpush2.bf16.msra.mxu0 %v8707_v61 }
 0xce1   :  { %1706 = vmatprep.subr.bf16.mxu0 %v8508_v2 }
 0xd63   :  { %v1432_v22 = vpop.f32.mrf.mxu0 }
 0xd65   :  { %v1434_v23 = vpop.f32.mrf.mxu0 }
 0xd66   :  { %v1441_v24 = vcombine.low %v1432_v22, %v1434_v23 }
 0xd67   :  { %v1436_v26 = vpop.f32.mrf.mxu0 }
 0xd68   :  { %v1448_v27 = vrot.slane %v1441_v24, %v8300_v39  ;;  %v8925_v26 = vld [vmem:[#allocation8 + $0x64] ss:$8 sps:$4 sm:$0xff]  }
 0xd69   :  { %v1437_v4 = vpop.f32.mrf.mxu0 }
 0xd6a   :  { %v1450_v28 = vadd.f32 %v1448_v27, %v1392_v25  ;;  %v8922_v25 = vld [vmem:[#allocation8 + $0x70] ss:$8 sps:$4 sm:$0xff]   ;;  %v8928_v27 = vld [vmem:[#allocation8 + $0x60] ss:$8 sps:$4 sm:$0xff]   ;;  %v8931_v4 = vld [vmem:[#allocation8 + $0x54] ss:$8 sps:$4 sm:$0xff]  }
 0xd6c   :  { %7659 = vtanh.f32 %v1450_v28  ;;  %v8934_v28 = vld [vmem:[#allocation8 + $0x50] ss:$8 sps:$4 sm:$0xff]  }
 0xd79   :  { %v7660_v29 = vpop.eup %7659 }
 0xd7a   :  { %7366 = vst.sshfl [vmem:[#allocation2 + $0x38] sm:$0xc pattern:$0x76325410] %v7660_v29  ;;  %v1459_v30 = vrot.slane %v7660_v29, %v8300_v39  ;;  %v8937_v29 = vld [vmem:[#allocation8 + $0x44] ss:$8 sps:$4 sm:$0xff]  }
 0xd7c   :  { %v1460_v5 = vcombine.low %v1459_v30, %v1459_v30  ;;  %v1467_v6 = vcombine.high %v1459_v30, %v1459_v30  ;;  %v1469_v14 = vpack.c.bf16 %v1459_v30, %v1459_v30  ;;  %v8940_v30 = vld [vmem:[#allocation8 + $0x40] ss:$8 sps:$4 sm:$0xff]  }
 0xd7e   :  { %1463 = vst [vmem:[#allocation2 + $0x30] sm:$0x30] %v1460_v5  ;;  %v1470_v13 = vpack.c.bf16 %v1467_v6, %v1467_v6  ;;  %v8943_v5 = vld [vmem:[#allocation8 + $0x34] ss:$8 sps:$4 sm:$0xff]   ;;  %v8946_v6 = vld [vmem:[#allocation8 + $0x30] ss:$8 sps:$4 sm:$0xff]  }
 0xd80   :  { %1503 = vmatprep.mubr.bf16.mxu1 %v1470_v13  ;;  %v8949_v13 = vld [vmem:[#allocation8 + $0x24] ss:$8 sps:$4 sm:$0xff]  }
 0xd81   :  { %1504 = vmatmul.mubr.bf16.vlgmr.msra.gmra.mxu1 %v1469_v14  ;;  %v8952_v14 = vld [vmem:[#allocation8 + $0x20] ss:$8 sps:$4 sm:$0xff]  }
 0xd82   :  { %1625 = vmatpush1.bf16.msra.mxu1 %v8513_v43 }
 0xd83   :  { %1626 = vmatprep.subr.bf16.mxu1 %v8516_v44 }
 0xd86   :  { %1627 = vmatpush1.bf16.msra.mxu1 %v8519_v45 }
 0xd87   :  { %1628 = vmatprep.subr.bf16.mxu1 %v8522_v46 }
 0xd8a   :  { %1629 = vmatpush1.bf16.msra.mxu1 %v8525_v47 }
 0xd8b   :  { %1630 = vmatprep.subr.bf16.mxu1 %v8528_v48 }
 0xd8e   :  { %1631 = vmatpush1.bf16.msra.mxu1 %v8531_v49 }
 0xd8f   :  { %1632 = vmatprep.subr.bf16.mxu1 %v8534_v50 }
 0xd92   :  { %1633 = vmatpush1.bf16.msra.mxu1 %v8537_v51 }
 0xd93   :  { %1634 = vmatprep.subr.bf16.mxu1 %v8540_v52 }
 0xd96   :  { %1635 = vmatpush1.bf16.msra.mxu1 %v8543_v53 }
 0xd97   :  { %1636 = vmatprep.subr.bf16.mxu1 %v8581_v62 }
 0xd9a   :  { %1637 = vmatpush1.bf16.msra.mxu1 %v8584_v63 }
 0xd9b   :  { %1638 = vmatprep.subr.bf16.mxu1 %v8587_v33 }
 0xd9e   :  { %1639 = vmatpush1.bf16.msra.mxu1 %v8590_v34 }
 0xd9f   :  { %1640 = vmatprep.subr.bf16.mxu1 %v8593_v35 }
 0xda2   :  { %1641 = vmatpush2.bf16.msra.mxu1 %v8596_v1 }
 0xda3   :  { %1642 = vmatprep.subr.bf16.mxu1 %v8599_v36 }
 0xda6   :  { %1643 = vmatpush2.bf16.msra.mxu1 %v8602_v3 }
 0xda7   :  { %1644 = vmatprep.subr.bf16.mxu1 %v8639_v7 }
 0xdaa   :  { %1645 = vmatpush2.bf16.msra.mxu1 %v8642_v8 }
 0xdab   :  { %1646 = vmatprep.subr.bf16.mxu1 %v8645_v9 }
 0xdae   :  { %1647 = vmatpush2.bf16.msra.mxu1 %v8648_v10 }
 0xdaf   :  { %1648 = vmatprep.subr.bf16.mxu1 %v8651_v11 }
 0xdb2   :  { %1649 = vmatpush2.bf16.msra.mxu1 %v8654_v12 }
 0xdb3   :  { %1650 = vmatprep.subr.bf16.mxu1 %v8657_v38 }
 0xdb6   :  { %1651 = vmatpush2.bf16.msra.mxu1 %v8660_v40 }
 0xdb7   :  { %1652 = vmatprep.subr.bf16.mxu1 %v8663_v41 }
 0xdba   :  { %1653 = vmatpush2.bf16.msra.mxu1 %v8666_v42 }
 0xdbb   :  { %1654 = vmatprep.subr.bf16.mxu1 %v8704_v60 }
 0xdbe   :  { %1655 = vmatpush2.bf16.msra.mxu1 %v8707_v61 }
 0xdbf   :  { %1779 = vmatprep.subr.bf16.mxu1 %v8508_v2 }
 0xe41   :  { %v1505_v15 = vpop.f32.mrf.mxu1 }
 0xe43   :  { %v1507_v16 = vpop.f32.mrf.mxu1 }
 0xe44   :  { %v1514_v17 = vcombine.low %v1505_v15, %v1507_v16 }
 0xe45   :  { %v1509_v19 = vpop.f32.mrf.mxu1 }
 0xe46   :  { %v1521_v20 = vrot.slane %v1514_v17, %v8300_v39 }
 0xe47   :  { %v1510_v54 = vpop.f32.mrf.mxu1 }
 0xe48   :  { %v1523_v55 = vadd.f32 %v1521_v20, %v1466_v18 }
 0xe4a   :  { %7661 = vtanh.f32 %v1523_v55 }
 0xe57   :  { %v7662_v56 = vpop.eup %7661 }
 0xe58   :  { %v1526_v31 = vcombine.low %v7662_v56, %v7662_v56  ;;  %v1540_v32 = vrot.slane %v7662_v56, %v8300_v39  ;;  %v8990_v56 = vld [vmem:[#allocation8 + $0x14] ss:$8 sps:$4 sm:$0xff]  }
 0xe5a   :  { %v1533_v57 = vrot.slane %v1526_v31, %v8300_v39  ;;  %7367 = vst.sshfl [vmem:[#allocation2 + $0x38] sm:$0xc0 pattern:$0x76325410] %v1526_v31  ;;  %v1548_v58 = vcombine.high %v1540_v32, %v1540_v32  ;;  %v1551_v21 = vpack.c.bf16 %v1540_v32, %v1540_v32  ;;  %v8993_v31 = vld [vmem:[#allocation8 + $0x10] ss:$8 sps:$4 sm:$0xff]  }
 0xe5b   :  { %v8996_v32 = vld [vmem:[#allocation8 + $0x4] ss:$8 sps:$4 sm:$0xff]  }
 0xe5c   :  { %v1541_v59 = vcombine.low %v1533_v57, %v1533_v57  ;;  %v1552_v2 = vpack.c.bf16 %v1548_v58, %v1548_v58  ;;  %v8999_v57 = vld [vmem:[#allocation8] ss:$8 sps:$4 sm:$0xff]   ;;  %v9002_v58 = vld [vmem:[#allocation8 + $0xf4] ss:$8 sps:$4 sm:$0xff]  }
 0xe5e   :  { %1544 = vst [vmem:[#allocation2 + $0x30] sm:$0xc0] %v1541_v59  ;;  %1585 = vmatprep.mubr.bf16.mxu0 %v1552_v2  ;;  %v9005_v59 = vld [vmem:[#allocation8 + $0xf0] ss:$8 sps:$4 sm:$0xff]   ;;  %v9008_v2 = vld [vmem:[#allocation8 + $0xe4] ss:$8 sps:$4 sm:$0xff]  }
 0xe5f   :  { %1586 = vmatmul.mubr.bf16.vlgmr.msra.gmra.mxu0 %v1551_v21  ;;  %v9011_v21 = vld [vmem:[#allocation8 + $0xe0] ss:$8 sps:$4 sm:$0xff]  }
 0xe60   :  { %1707 = vmatpush1.bf16.msra.mxu0 %v8513_v43  ;;  %v8917_v43 = vld [vmem:[#allocation8 + $0x74] ss:$8 sps:$4 sm:$0xff]  }
 0xe61   :  { %1708 = vmatprep.subr.bf16.mxu0 %v8516_v44 }
 0xe64   :  { %1709 = vmatpush1.bf16.msra.mxu0 %v8519_v45 }
 0xe65   :  { %1710 = vmatprep.subr.bf16.mxu0 %v8522_v46 }
 0xe68   :  { %1711 = vmatpush1.bf16.msra.mxu0 %v8525_v47  ;;  %v1547_v47 = vld [vmem:[#allocation5 + $0x40] sm:$0xf] }
 0xe69   :  { %1712 = vmatprep.subr.bf16.mxu0 %v8528_v48 }
 0xe6c   :  { %1713 = vmatpush1.bf16.msra.mxu0 %v8531_v49 }
 0xe6d   :  { %1714 = vmatprep.subr.bf16.mxu0 %v8534_v50 }
 0xe70   :  { %1715 = vmatpush1.bf16.msra.mxu0 %v8537_v51 }
 0xe71   :  { %1716 = vmatprep.subr.bf16.mxu0 %v8540_v52 }
 0xe74   :  { %1717 = vmatpush1.bf16.msra.mxu0 %v8543_v53 }
 0xe75   :  { %1718 = vmatprep.subr.bf16.mxu0 %v8581_v62 }
 0xe78   :  { %1719 = vmatpush1.bf16.msra.mxu0 %v8584_v63 }
 0xe79   :  { %1720 = vmatprep.subr.bf16.mxu0 %v8587_v33 }
 0xe7c   :  { %1721 = vmatpush1.bf16.msra.mxu0 %v8590_v34 }
 0xe7d   :  { %1722 = vmatprep.subr.bf16.mxu0 %v8593_v35 }
 0xe80   :  { %1723 = vmatpush2.bf16.msra.mxu0 %v8596_v1 }
 0xe81   :  { %1724 = vmatprep.subr.bf16.mxu0 %v8599_v36 }
 0xe84   :  { %1725 = vmatpush2.bf16.msra.mxu0 %v8602_v3 }
 0xe85   :  { %1726 = vmatprep.subr.bf16.mxu0 %v8639_v7 }
 0xe88   :  { %1727 = vmatpush2.bf16.msra.mxu0 %v8642_v8 }
 0xe89   :  { %1728 = vmatprep.subr.bf16.mxu0 %v8645_v9 }
 0xe8c   :  { %1729 = vmatpush2.bf16.msra.mxu0 %v8648_v10 }
 0xe8d   :  { %1730 = vmatprep.subr.bf16.mxu0 %v8651_v11 }
 0xe90   :  { %1731 = vmatpush2.bf16.msra.mxu0 %v8654_v12 }
 0xe91   :  { %1732 = vmatprep.subr.bf16.mxu0 %v8657_v38 }
 0xe94   :  { %1733 = vmatpush2.bf16.msra.mxu0 %v8660_v40 }
 0xe95   :  { %1734 = vmatprep.subr.bf16.mxu0 %v8663_v41 }
 0xe98   :  { %1735 = vmatpush2.bf16.msra.mxu0 %v8666_v42 }
 0xe99   :  { %1736 = vmatprep.subr.bf16.mxu0 %v8704_v60 }
 0xe9c   :  { %1737 = vmatpush2.bf16.msra.mxu0 %v8707_v61 }
 0xe9d   :  { %1861 = vmatprep.subr.bf16.mxu0 %v8917_v43 }
 0xf1f   :  { %v1587_v44 = vpop.f32.mrf.mxu0 }
 0xf21   :  { %v1589_v45 = vpop.f32.mrf.mxu0 }
 0xf22   :  { %v1596_v46 = vcombine.low %v1587_v44, %v1589_v45 }
 0xf23   :  { %v1591_v48 = vpop.f32.mrf.mxu0 }
 0xf24   :  { %v1603_v49 = vrot.slane %v1596_v46, %v8300_v39  ;;  %v9048_v48 = vld [vmem:[#allocation8 + $0xd4] ss:$8 sps:$4 sm:$0xff]  }
 0xf25   :  { %v1592_v50 = vpop.f32.mrf.mxu0 }
 0xf26   :  { %v1605_v51 = vadd.f32 %v1603_v49, %v1547_v47  ;;  %v9051_v49 = vld [vmem:[#allocation8 + $0xd0] ss:$8 sps:$4 sm:$0xff]   ;;  %v9054_v50 = vld [vmem:[#allocation8 + $0xc4] ss:$8 sps:$4 sm:$0xff]  }
 0xf28   :  { %7663 = vtanh.f32 %v1605_v51  ;;  %v9057_v51 = vld [vmem:[#allocation8 + $0xc0] ss:$8 sps:$4 sm:$0xff]  }
 0xf35   :  { %v7664_v52 = vpop.eup %7663 }
 0xf36   :  { %7368 = vst.sshfl [vmem:[#allocation2 + $0x40] sm:$0x3 pattern:$0x76325410] %v7664_v52  ;;  %v1614_v53 = vrot.slane %v7664_v52, %v8300_v39  ;;  %v9060_v52 = vld [vmem:[#allocation8 + $0xb4] ss:$8 sps:$4 sm:$0xff]  }
 0xf38   :  { %v1615_v22 = vcombine.high %v1614_v53, %v1614_v53  ;;  %v1622_v24 = vpack.c.bf16 %v1614_v53, %v1614_v53  ;;  %v9063_v53 = vld [vmem:[#allocation8 + $0xb0] ss:$8 sps:$4 sm:$0xff]  }
 0xf3a   :  { %1619 = vst [vmem:[#allocation2 + $0x48] sm:$0x3] %v1615_v22  ;;  %v1623_v23 = vpack.c.bf16 %v1615_v22, %v1615_v22  ;;  %v9066_v22 = vld [vmem:[#allocation8 + $0xa4] ss:$8 sps:$4 sm:$0xff]  }
 0xf3c   :  { %1656 = vmatprep.mubr.bf16.mxu1 %v1623_v23  ;;  %v9069_v23 = vld [vmem:[#allocation8 + $0xa0] ss:$8 sps:$4 sm:$0xff]  }
 0xf3d   :  { %1657 = vmatmul.mubr.bf16.vlgmr.msra.gmra.mxu1 %v1622_v24  ;;  %v9072_v24 = vld [vmem:[#allocation8 + $0x94] ss:$8 sps:$4 sm:$0xff]  }
 0xf3e   :  { %1780 = vmatpush1.bf16.msra.mxu1 %v8922_v25 }
 0xf3f   :  { %1781 = vmatprep.subr.bf16.mxu1 %v8925_v26 }
 0xf42   :  { %1782 = vmatpush1.bf16.msra.mxu1 %v8928_v27 }
 0xf43   :  { %1783 = vmatprep.subr.bf16.mxu1 %v8931_v4 }
 0xf46   :  { %1784 = vmatpush1.bf16.msra.mxu1 %v8934_v28 }
 0xf47   :  { %1785 = vmatprep.subr.bf16.mxu1 %v8937_v29 }
 0xf4a   :  { %1786 = vmatpush1.bf16.msra.mxu1 %v8940_v30 }
 0xf4b   :  { %1787 = vmatprep.subr.bf16.mxu1 %v8943_v5 }
 0xf4e   :  { %1788 = vmatpush1.bf16.msra.mxu1 %v8946_v6 }
 0xf4f   :  { %1789 = vmatprep.subr.bf16.mxu1 %v8949_v13 }
 0xf52   :  { %1790 = vmatpush1.bf16.msra.mxu1 %v8952_v14 }
 0xf53   :  { %1791 = vmatprep.subr.bf16.mxu1 %v8581_v62 }
 0xf56   :  { %1792 = vmatpush1.bf16.msra.mxu1 %v8584_v63 }
 0xf57   :  { %1793 = vmatprep.subr.bf16.mxu1 %v8587_v33 }
 0xf5a   :  { %1794 = vmatpush1.bf16.msra.mxu1 %v8590_v34  ;;  %v1621_v34 = vld [vmem:[#allocation5 + $0x44] sm:$0xf] }
 0xf5b   :  { %1795 = vmatprep.subr.bf16.mxu1 %v8593_v35 }
 0xf5e   :  { %1796 = vmatpush2.bf16.msra.mxu1 %v8596_v1 }
 0xf5f   :  { %1797 = vmatprep.subr.bf16.mxu1 %v8599_v36 }
 0xf62   :  { %1798 = vmatpush2.bf16.msra.mxu1 %v8602_v3 }
 0xf63   :  { %1799 = vmatprep.subr.bf16.mxu1 %v8639_v7 }
 0xf66   :  { %1800 = vmatpush2.bf16.msra.mxu1 %v8642_v8 }
 0xf67   :  { %1801 = vmatprep.subr.bf16.mxu1 %v8645_v9 }
 0xf6a   :  { %1802 = vmatpush2.bf16.msra.mxu1 %v8648_v10 }
 0xf6b   :  { %1803 = vmatprep.subr.bf16.mxu1 %v8651_v11 }
 0xf6e   :  { %1804 = vmatpush2.bf16.msra.mxu1 %v8654_v12 }
 0xf6f   :  { %1805 = vmatprep.subr.bf16.mxu1 %v8657_v38 }
 0xf72   :  { %1806 = vmatpush2.bf16.msra.mxu1 %v8660_v40 }
 0xf73   :  { %1807 = vmatprep.subr.bf16.mxu1 %v8663_v41 }
 0xf76   :  { %1808 = vmatpush2.bf16.msra.mxu1 %v8666_v42 }
 0xf77   :  { %1809 = vmatprep.subr.bf16.mxu1 %v8704_v60 }
 0xf7a   :  { %1810 = vmatpush2.bf16.msra.mxu1 %v8707_v61 }
 0xf7b   :  { %1932 = vmatprep.subr.bf16.mxu1 %v8917_v43 }
 0xffd   :  { %v1658_v62 = vpop.f32.mrf.mxu1 }
 0xfff   :  { %v1660_v63 = vpop.f32.mrf.mxu1 }
0x1000   :  { %v1667_v33 = vcombine.low %v1658_v62, %v1660_v63  ;;  %v9075_v62 = vld [vmem:[#allocation8 + $0x90] ss:$8 sps:$4 sm:$0xff]  }
0x1001   :  { %v1662_v35 = vpop.f32.mrf.mxu1 }
0x1002   :  { %v1674_v1 = vrot.slane %v1667_v33, %v8300_v39  ;;  %v1774_v35 = vld [vmem:[#allocation5 + $0x4c] sm:$0xf] }
0x1003   :  { %v1663_v36 = vpop.f32.mrf.mxu1 }
0x1004   :  { %v1676_v3 = vadd.f32 %v1674_v1, %v1621_v34 }
0x1006   :  { %7665 = vtanh.f32 %v1676_v3 }
0x1013   :  { %v7666_v15 = vpop.eup %7665 }
0x1014   :  { %v1679_v16 = vcombine.low %v7666_v15, %v7666_v15  ;;  %v1693_v17 = vrot.slane %v7666_v15, %v8300_v39 }
0x1016   :  { %v1686_v18 = vrot.slane %v1679_v16, %v8300_v39  ;;  %7369 = vst.sshfl [vmem:[#allocation2 + $0x40] sm:$0x30 pattern:$0x76325410] %v1679_v16  ;;  %v1701_v19 = vcombine.high %v1693_v17, %v1693_v17  ;;  %v1704_v55 = vpack.c.bf16 %v1693_v17, %v1693_v17 }
0x1018   :  { %v1694_v20 = vcombine.high %v1686_v18, %v1686_v18  ;;  %v1705_v54 = vpack.c.bf16 %v1701_v19, %v1701_v19 }
0x101a   :  { %1698 = vst [vmem:[#allocation2 + $0x48] sm:$0xc] %v1694_v20  ;;  %1738 = vmatprep.mubr.bf16.mxu0 %v1705_v54 }
0x101b   :  { %1739 = vmatmul.mubr.bf16.vlgmr.msra.gmra.mxu0 %v1704_v55  ;;  %v9113_v55 = vld [vmem:[#allocation8 + $0x84] ss:$8 sps:$4 sm:$0xff]  }
0x101c   :  { %1862 = vmatpush1.bf16.msra.mxu0 %v8922_v25 }
0x101d   :  { %1863 = vmatprep.subr.bf16.mxu0 %v8925_v26 }
0x1020   :  { %1864 = vmatpush1.bf16.msra.mxu0 %v8928_v27 }
0x1021   :  { %1865 = vmatprep.subr.bf16.mxu0 %v8931_v4 }
0x1024   :  { %1866 = vmatpush1.bf16.msra.mxu0 %v8934_v28 }
0x1025   :  { %1867 = vmatprep.subr.bf16.mxu0 %v8937_v29 }
0x1028   :  { %1868 = vmatpush1.bf16.msra.mxu0 %v8940_v30 }
0x1029   :  { %1869 = vmatprep.subr.bf16.mxu0 %v8943_v5 }
0x102c   :  { %1870 = vmatpush1.bf16.msra.mxu0 %v8946_v6 }
0x102d   :  { %1871 = vmatprep.subr.bf16.mxu0 %v8949_v13 }
0x1030   :  { %1872 = vmatpush1.bf16.msra.mxu0 %v8952_v14 }
0x1031   :  { %1873 = vmatprep.subr.bf16.mxu0 %v8990_v56 }
0x1034   :  { %1874 = vmatpush1.bf16.msra.mxu0 %v8993_v31 }
0x1035   :  { %1875 = vmatprep.subr.bf16.mxu0 %v8996_v32 }
0x1038   :  { %1876 = vmatpush1.bf16.msra.mxu0 %v8999_v57 }
0x1039   :  { %1877 = vmatprep.subr.bf16.mxu0 %v9002_v58 }
0x103c   :  { %1878 = vmatpush2.bf16.msra.mxu0 %v9005_v59 }
0x103d   :  { %1879 = vmatprep.subr.bf16.mxu0 %v9008_v2 }
0x1040   :  { %1880 = vmatpush2.bf16.msra.mxu0 %v9011_v21 }
0x1041   :  { %1881 = vmatprep.subr.bf16.mxu0 %v8639_v7 }
0x1044   :  { %1882 = vmatpush2.bf16.msra.mxu0 %v8642_v8 }
0x1045   :  { %1883 = vmatprep.subr.bf16.mxu0 %v8645_v9 }
0x1048   :  { %1884 = vmatpush2.bf16.msra.mxu0 %v8648_v10  ;;  %v1700_v10 = vld [vmem:[#allocation5 + $0x48] sm:$0xf] }
0x1049   :  { %1885 = vmatprep.subr.bf16.mxu0 %v8651_v11 }
0x104c   :  { %1886 = vmatpush2.bf16.msra.mxu0 %v8654_v12 }
0x104d   :  { %1887 = vmatprep.subr.bf16.mxu0 %v8657_v38 }
0x1050   :  { %1888 = vmatpush2.bf16.msra.mxu0 %v8660_v40 }
0x1051   :  { %1889 = vmatprep.subr.bf16.mxu0 %v8663_v41 }
0x1054   :  { %1890 = vmatpush2.bf16.msra.mxu0 %v8666_v42 }
0x1055   :  { %1891 = vmatprep.subr.bf16.mxu0 %v8704_v60 }
0x1058   :  { %1892 = vmatpush2.bf16.msra.mxu0 %v8707_v61 }
0x1059   :  { %2014 = vmatprep.subr.bf16.mxu0 %v8917_v43 }
0x10db   :  { %v1740_v7 = vpop.f32.mrf.mxu0 }
0x10dd   :  { %v1742_v8 = vpop.f32.mrf.mxu0 }
0x10de   :  { %v1749_v9 = vcombine.low %v1740_v7, %v1742_v8  ;;  %v9116_v7 = vld [vmem:[#allocation8 + $0x80] ss:$8 sps:$4 sm:$0xff]  }
0x10df   :  { %v1744_v11 = vpop.f32.mrf.mxu0 }
0x10e0   :  { %v1756_v12 = vrot.slane %v1749_v9, %v8300_v39  ;;  %v1855_v11 = vld [vmem:[#allocation5 + $0x50] sm:$0xf] }
0x10e1   :  { %v1745_v38 = vpop.f32.mrf.mxu0 }
0x10e2   :  { %v1758_v44 = vadd.f32 %v1756_v12, %v1700_v10 }
0x10e4   :  { %7667 = vtanh.f32 %v1758_v44 }
0x10f1   :  { %v7668_v40 = vpop.eup %7667 }
0x10f2   :  { %7370 = vst.sshfl [vmem:[#allocation2 + $0x48] sm:$0xc pattern:$0x76325410] %v7668_v40  ;;  %v1767_v41 = vrot.slane %v7668_v40, %v8300_v39 }
0x10f4   :  { %v1768_v42 = vcombine.low %v1767_v41, %v1767_v41  ;;  %v1775_v45 = vcombine.high %v1767_v41, %v1767_v41  ;;  %v1777_v47 = vpack.c.bf16 %v1767_v41, %v1767_v41 }
0x10f6   :  { %1771 = vst [vmem:[#allocation2 + $0x40] sm:$0x30] %v1768_v42  ;;  %v1778_v46 = vpack.c.bf16 %v1775_v45, %v1775_v45 }
0x10f8   :  { %1811 = vmatprep.mubr.bf16.mxu1 %v1778_v46 }
0x10f9   :  { %1812 = vmatmul.mubr.bf16.vlgmr.msra.gmra.mxu1 %v1777_v47 }
0x10fa   :  { %1933 = vmatpush1.bf16.msra.mxu1 %v8922_v25 }
0x10fb   :  { %1934 = vmatprep.subr.bf16.mxu1 %v8925_v26 }
0x10fe   :  { %1935 = vmatpush1.bf16.msra.mxu1 %v8928_v27 }
0x10ff   :  { %1936 = vmatprep.subr.bf16.mxu1 %v8931_v4 }
0x1102   :  { %1937 = vmatpush1.bf16.msra.mxu1 %v8934_v28 }
0x1103   :  { %1938 = vmatprep.subr.bf16.mxu1 %v8937_v29 }
0x1106   :  { %1939 = vmatpush1.bf16.msra.mxu1 %v8940_v30 }
0x1107   :  { %1940 = vmatprep.subr.bf16.mxu1 %v8943_v5 }
0x110a   :  { %1941 = vmatpush1.bf16.msra.mxu1 %v8946_v6 }
0x110b   :  { %1942 = vmatprep.subr.bf16.mxu1 %v8949_v13 }
0x110e   :  { %1943 = vmatpush1.bf16.msra.mxu1 %v8952_v14 }
0x110f   :  { %1944 = vmatprep.subr.bf16.mxu1 %v8990_v56 }
0x1112   :  { %1945 = vmatpush1.bf16.msra.mxu1 %v8993_v31 }
0x1113   :  { %1946 = vmatprep.subr.bf16.mxu1 %v8996_v32 }
0x1116   :  { %1947 = vmatpush1.bf16.msra.mxu1 %v8999_v57 }
0x1117   :  { %1948 = vmatprep.subr.bf16.mxu1 %v9002_v58 }
0x111a   :  { %1949 = vmatpush2.bf16.msra.mxu1 %v9005_v59 }
0x111b   :  { %1950 = vmatprep.subr.bf16.mxu1 %v9008_v2 }
0x111e   :  { %1951 = vmatpush2.bf16.msra.mxu1 %v9011_v21 }
0x111f   :  { %1952 = vmatprep.subr.bf16.mxu1 %v9048_v48 }
0x1122   :  { %1953 = vmatpush2.bf16.msra.mxu1 %v9051_v49 }
0x1123   :  { %1954 = vmatprep.subr.bf16.mxu1 %v9054_v50 }
0x1126   :  { %1955 = vmatpush2.bf16.msra.mxu1 %v9057_v51 }
0x1127   :  { %1956 = vmatprep.subr.bf16.mxu1 %v9060_v52 }
0x112a   :  { %1957 = vmatpush2.bf16.msra.mxu1 %v9063_v53 }
0x112b   :  { %1958 = vmatprep.subr.bf16.mxu1 %v9066_v22 }
0x112e   :  { %1959 = vmatpush2.bf16.msra.mxu1 %v9069_v23 }
0x112f   :  { %1960 = vmatprep.subr.bf16.mxu1 %v9072_v24 }
0x1132   :  { %1961 = vmatpush2.bf16.msra.mxu1 %v9075_v62 }
0x1133   :  { %1962 = vmatprep.subr.bf16.mxu1 %v8704_v60 }
0x1136   :  { %1963 = vmatpush2.bf16.msra.mxu1 %v8707_v61 }
0x1137   :  { %2087 = vmatprep.subr.bf16.mxu1 %v8917_v43 }
0x11b9   :  { %v1813_v63 = vpop.f32.mrf.mxu1 }
0x11bb   :  { %v1815_v33 = vpop.f32.mrf.mxu1 }
0x11bc   :  { %v1822_v34 = vcombine.low %v1813_v63, %v1815_v33 }
0x11bd   :  { %v1817_v1 = vpop.f32.mrf.mxu1 }
0x11be   :  { %v1829_v36 = vrot.slane %v1822_v34, %v8300_v39 }
0x11bf   :  { %v1818_v3 = vpop.f32.mrf.mxu1 }
0x11c0   :  { %v1831_v15 = vadd.f32 %v1829_v36, %v1774_v35  ;;  %v1929_v35 = vld [vmem:[#allocation5 + $0x54] sm:$0xf] }
0x11c2   :  { %7669 = vtanh.f32 %v1831_v15 }
0x11cf   :  { %v7670_v16 = vpop.eup %7669 }
0x11d0   :  { %v1834_v17 = vcombine.low %v7670_v16, %v7670_v16  ;;  %v1848_v18 = vrot.slane %v7670_v16, %v8300_v39 }
0x11d2   :  { %v1841_v60 = vrot.slane %v1834_v17, %v8300_v39  ;;  %7371 = vst.sshfl [vmem:[#allocation2 + $0x48] sm:$0xc0 pattern:$0x76325410] %v1834_v17  ;;  %v1856_v61 = vcombine.high %v1848_v18, %v1848_v18  ;;  %v1859_v54 = vpack.c.bf16 %v1848_v18, %v1848_v18 }
0x11d4   :  { %v1849_v19 = vcombine.low %v1841_v60, %v1841_v60  ;;  %v1860_v20 = vpack.c.bf16 %v1856_v61, %v1856_v61 }
0x11d6   :  { %1852 = vst [vmem:[#allocation2 + $0x40] sm:$0xc0] %v1849_v19  ;;  %1893 = vmatprep.mubr.bf16.mxu0 %v1860_v20 }
0x11d7   :  { %1894 = vmatmul.mubr.bf16.vlgmr.msra.gmra.mxu0 %v1859_v54 }
0x11d8   :  { %2015 = vmatpush1.bf16.msra.mxu0 %v8922_v25 }
0x11d9   :  { %2016 = vmatprep.subr.bf16.mxu0 %v8925_v26 }
0x11dc   :  { %2017 = vmatpush1.bf16.msra.mxu0 %v8928_v27 }
0x11dd   :  { %2018 = vmatprep.subr.bf16.mxu0 %v8931_v4 }
0x11e0   :  { %2019 = vmatpush1.bf16.msra.mxu0 %v8934_v28 }
0x11e1   :  { %2020 = vmatprep.subr.bf16.mxu0 %v8937_v29 }
0x11e4   :  { %2021 = vmatpush1.bf16.msra.mxu0 %v8940_v30 }
0x11e5   :  { %2022 = vmatprep.subr.bf16.mxu0 %v8943_v5 }
0x11e8   :  { %2023 = vmatpush1.bf16.msra.mxu0 %v8946_v6 }
0x11e9   :  { %2024 = vmatprep.subr.bf16.mxu0 %v8949_v13 }
0x11ec   :  { %2025 = vmatpush1.bf16.msra.mxu0 %v8952_v14 }
0x11ed   :  { %2026 = vmatprep.subr.bf16.mxu0 %v8990_v56 }
0x11f0   :  { %2027 = vmatpush1.bf16.msra.mxu0 %v8993_v31 }
0x11f1   :  { %2028 = vmatprep.subr.bf16.mxu0 %v8996_v32 }
0x11f4   :  { %2029 = vmatpush1.bf16.msra.mxu0 %v8999_v57 }
0x11f5   :  { %2030 = vmatprep.subr.bf16.mxu0 %v9002_v58 }
0x11f8   :  { %2031 = vmatpush2.bf16.msra.mxu0 %v9005_v59 }
0x11f9   :  { %2032 = vmatprep.subr.bf16.mxu0 %v9008_v2 }
0x11fc   :  { %2033 = vmatpush2.bf16.msra.mxu0 %v9011_v21 }
0x11fd   :  { %2034 = vmatprep.subr.bf16.mxu0 %v9048_v48 }
0x1200   :  { %2035 = vmatpush2.bf16.msra.mxu0 %v9051_v49 }
0x1201   :  { %2036 = vmatprep.subr.bf16.mxu0 %v9054_v50 }
0x1204   :  { %2037 = vmatpush2.bf16.msra.mxu0 %v9057_v51 }
0x1205   :  { %2038 = vmatprep.subr.bf16.mxu0 %v9060_v52 }
0x1208   :  { %2039 = vmatpush2.bf16.msra.mxu0 %v9063_v53 }
0x1209   :  { %2040 = vmatprep.subr.bf16.mxu0 %v9066_v22 }
0x120c   :  { %2041 = vmatpush2.bf16.msra.mxu0 %v9069_v23 }
0x120d   :  { %2042 = vmatprep.subr.bf16.mxu0 %v9072_v24 }
0x1210   :  { %2043 = vmatpush2.bf16.msra.mxu0 %v9075_v62 }
0x1211   :  { %2044 = vmatprep.subr.bf16.mxu0 %v9113_v55 }
0x1214   :  { %2045 = vmatpush2.bf16.msra.mxu0 %v9116_v7 }
0x1215   :  { %2169 = vmatprep.subr.bf16.mxu0 %v8917_v43 }
0x1297   :  { %v1895_v8 = vpop.f32.mrf.mxu0 }
0x1299   :  { %v1897_v9 = vpop.f32.mrf.mxu0 }
0x129a   :  { %v1904_v10 = vcombine.low %v1895_v8, %v1897_v9 }
0x129b   :  { %v1899_v12 = vpop.f32.mrf.mxu0 }
0x129c   :  { %v1911_v38 = vrot.slane %v1904_v10, %v8300_v39 }
0x129d   :  { %v1900_v44 = vpop.f32.mrf.mxu0 }
0x129e   :  { %v1913_v40 = vadd.f32 %v1911_v38, %v1855_v11  ;;  %v2008_v11 = vld [vmem:[#allocation5 + $0x58] sm:$0xf] }
0x12a0   :  { %7671 = vtanh.f32 %v1913_v40 }
0x12ad   :  { %v7672_v41 = vpop.eup %7671 }
0x12ae   :  { %7372 = vst.sshfl [vmem:[#allocation2 + $0x50] sm:$0x3 pattern:$0x76325410] %v7672_v41  ;;  %v1922_v42 = vrot.slane %v7672_v41, %v8300_v39 }
0x12b0   :  { %v1923_v45 = vcombine.high %v1922_v42, %v1922_v42  ;;  %v1930_v47 = vpack.c.bf16 %v1922_v42, %v1922_v42 }
0x12b2   :  { %1927 = vst [vmem:[#allocation2 + $0x58] sm:$0x3] %v1923_v45  ;;  %v1931_v46 = vpack.c.bf16 %v1923_v45, %v1923_v45 }
0x12b4   :  { %1964 = vmatprep.mubr.bf16.mxu1 %v1931_v46 }
0x12b5   :  { %1965 = vmatmul.mubr.bf16.vlgmr.msra.gmra.mxu1 %v1930_v47 }
0x12b6   :  { %2088 = vmatpush1.bf16.msra.mxu1 %v8922_v25 }
0x12b7   :  { %2089 = vmatprep.subr.bf16.mxu1 %v8925_v26 }
0x12ba   :  { %2090 = vmatpush1.bf16.msra.mxu1 %v8928_v27 }
0x12bb   :  { %2091 = vmatprep.subr.bf16.mxu1 %v8931_v4 }
0x12be   :  { %2092 = vmatpush1.bf16.msra.mxu1 %v8934_v28 }
0x12bf   :  { %2093 = vmatprep.subr.bf16.mxu1 %v8937_v29 }
0x12c2   :  { %2094 = vmatpush1.bf16.msra.mxu1 %v8940_v30 }
0x12c3   :  { %2095 = vmatprep.subr.bf16.mxu1 %v8943_v5 }
0x12c6   :  { %2096 = vmatpush1.bf16.msra.mxu1 %v8946_v6 }
0x12c7   :  { %2097 = vmatprep.subr.bf16.mxu1 %v8949_v13 }
0x12ca   :  { %2098 = vmatpush1.bf16.msra.mxu1 %v8952_v14 }
0x12cb   :  { %2099 = vmatprep.subr.bf16.mxu1 %v8990_v56 }
0x12ce   :  { %2100 = vmatpush1.bf16.msra.mxu1 %v8993_v31 }
0x12cf   :  { %2101 = vmatprep.subr.bf16.mxu1 %v8996_v32 }
0x12d2   :  { %2102 = vmatpush1.bf16.msra.mxu1 %v8999_v57 }
0x12d3   :  { %2103 = vmatprep.subr.bf16.mxu1 %v9002_v58 }
0x12d6   :  { %2104 = vmatpush2.bf16.msra.mxu1 %v9005_v59 }
0x12d7   :  { %2105 = vmatprep.subr.bf16.mxu1 %v9008_v2 }
0x12da   :  { %2106 = vmatpush2.bf16.msra.mxu1 %v9011_v21 }
0x12db   :  { %2107 = vmatprep.subr.bf16.mxu1 %v9048_v48 }
0x12de   :  { %2108 = vmatpush2.bf16.msra.mxu1 %v9051_v49 }
0x12df   :  { %2109 = vmatprep.subr.bf16.mxu1 %v9054_v50 }
0x12e2   :  { %2110 = vmatpush2.bf16.msra.mxu1 %v9057_v51 }
0x12e3   :  { %2111 = vmatprep.subr.bf16.mxu1 %v9060_v52 }
0x12e6   :  { %2112 = vmatpush2.bf16.msra.mxu1 %v9063_v53 }
0x12e7   :  { %2113 = vmatprep.subr.bf16.mxu1 %v9066_v22 }
0x12ea   :  { %2114 = vmatpush2.bf16.msra.mxu1 %v9069_v23 }
0x12eb   :  { %2115 = vmatprep.subr.bf16.mxu1 %v9072_v24 }
0x12ee   :  { %2116 = vmatpush2.bf16.msra.mxu1 %v9075_v62 }
0x12ef   :  { %2117 = vmatprep.subr.bf16.mxu1 %v9113_v55 }
0x12f2   :  { %2118 = vmatpush2.bf16.msra.mxu1 %v9116_v7 }
0x12f3   :  { %2240 = vmatprep.subr.bf16.mxu1 %v8917_v43 }
0x1375   :  { %v1966_v63 = vpop.f32.mrf.mxu1 }
0x1377   :  { %v1968_v33 = vpop.f32.mrf.mxu1 }
0x1378   :  { %v1975_v34 = vcombine.low %v1966_v63, %v1968_v33 }
0x1379   :  { %v1970_v1 = vpop.f32.mrf.mxu1 }
0x137a   :  { %v1982_v36 = vrot.slane %v1975_v34, %v8300_v39  ;;  %v2082_v1 = vld [vmem:[#allocation5 + $0x5c] sm:$0xf] }
0x137b   :  { %v1971_v3 = vpop.f32.mrf.mxu1 }
0x137c   :  { %v1984_v15 = vadd.f32 %v1982_v36, %v1929_v35 }
0x137e   :  { %7673 = vtanh.f32 %v1984_v15 }
0x138b   :  { %v7674_v16 = vpop.eup %7673 }
0x138c   :  { %v1987_v17 = vcombine.low %v7674_v16, %v7674_v16  ;;  %v2001_v18 = vrot.slane %v7674_v16, %v8300_v39 }
0x138e   :  { %v1994_v60 = vrot.slane %v1987_v17, %v8300_v39  ;;  %7373 = vst.sshfl [vmem:[#allocation2 + $0x50] sm:$0x30 pattern:$0x76325410] %v1987_v17  ;;  %v2009_v61 = vcombine.high %v2001_v18, %v2001_v18  ;;  %v2012_v54 = vpack.c.bf16 %v2001_v18, %v2001_v18 }
0x1390   :  { %v2002_v19 = vcombine.high %v1994_v60, %v1994_v60  ;;  %v2013_v20 = vpack.c.bf16 %v2009_v61, %v2009_v61 }
0x1392   :  { %2006 = vst [vmem:[#allocation2 + $0x58] sm:$0xc] %v2002_v19  ;;  %2046 = vmatprep.mubr.bf16.mxu0 %v2013_v20 }
0x1393   :  { %2047 = vmatmul.mubr.bf16.vlgmr.msra.gmra.mxu0 %v2012_v54 }
0x1394   :  { %2170 = vmatpush1.bf16.msra.mxu0 %v8922_v25 }
0x1395   :  { %2171 = vmatprep.subr.bf16.mxu0 %v8925_v26 }
0x1398   :  { %2172 = vmatpush1.bf16.msra.mxu0 %v8928_v27 }
0x1399   :  { %2173 = vmatprep.subr.bf16.mxu0 %v8931_v4 }
0x139c   :  { %2174 = vmatpush1.bf16.msra.mxu0 %v8934_v28 }
0x139d   :  { %2175 = vmatprep.subr.bf16.mxu0 %v8937_v29 }
0x13a0   :  { %2176 = vmatpush1.bf16.msra.mxu0 %v8940_v30 }
0x13a1   :  { %2177 = vmatprep.subr.bf16.mxu0 %v8943_v5 }
0x13a4   :  { %2178 = vmatpush1.bf16.msra.mxu0 %v8946_v6 }
0x13a5   :  { %2179 = vmatprep.subr.bf16.mxu0 %v8949_v13 }
0x13a8   :  { %2180 = vmatpush1.bf16.msra.mxu0 %v8952_v14 }
0x13a9   :  { %2181 = vmatprep.subr.bf16.mxu0 %v8990_v56 }
0x13ac   :  { %2182 = vmatpush1.bf16.msra.mxu0 %v8993_v31 }
0x13ad   :  { %2183 = vmatprep.subr.bf16.mxu0 %v8996_v32 }
0x13b0   :  { %2184 = vmatpush1.bf16.msra.mxu0 %v8999_v57 }
0x13b1   :  { %2185 = vmatprep.subr.bf16.mxu0 %v9002_v58 }
0x13b4   :  { %2186 = vmatpush2.bf16.msra.mxu0 %v9005_v59 }
0x13b5   :  { %2187 = vmatprep.subr.bf16.mxu0 %v9008_v2 }
0x13b8   :  { %2188 = vmatpush2.bf16.msra.mxu0 %v9011_v21 }
0x13b9   :  { %2189 = vmatprep.subr.bf16.mxu0 %v9048_v48 }
0x13bc   :  { %2190 = vmatpush2.bf16.msra.mxu0 %v9051_v49 }
0x13bd   :  { %2191 = vmatprep.subr.bf16.mxu0 %v9054_v50 }
0x13c0   :  { %2192 = vmatpush2.bf16.msra.mxu0 %v9057_v51 }
0x13c1   :  { %2193 = vmatprep.subr.bf16.mxu0 %v9060_v52 }
0x13c4   :  { %2194 = vmatpush2.bf16.msra.mxu0 %v9063_v53 }
0x13c5   :  { %2195 = vmatprep.subr.bf16.mxu0 %v9066_v22 }
0x13c8   :  { %2196 = vmatpush2.bf16.msra.mxu0 %v9069_v23 }
0x13c9   :  { %2197 = vmatprep.subr.bf16.mxu0 %v9072_v24 }
0x13cc   :  { %2198 = vmatpush2.bf16.msra.mxu0 %v9075_v62 }
0x13cd   :  { %2199 = vmatprep.subr.bf16.mxu0 %v9113_v55 }
0x13d0   :  { %2200 = vmatpush2.bf16.msra.mxu0 %v9116_v7 }
0x13d1   :  { %2322 = vmatprep.subr.bf16.mxu0 %v8917_v43 }
0x1453   :  { %v2048_v8 = vpop.f32.mrf.mxu0 }
0x1455   :  { %v2050_v9 = vpop.f32.mrf.mxu0 }
0x1456   :  { %v2057_v10 = vcombine.low %v2048_v8, %v2050_v9 }
0x1457   :  { %v2052_v12 = vpop.f32.mrf.mxu0 }
0x1458   :  { %v2064_v38 = vrot.slane %v2057_v10, %v8300_v39 }
0x1459   :  { %v2053_v44 = vpop.f32.mrf.mxu0 }
0x145a   :  { %v2066_v40 = vadd.f32 %v2064_v38, %v2008_v11  ;;  %v2163_v11 = vld [vmem:[#allocation5 + $0x60] sm:$0xf] }
0x145c   :  { %7675 = vtanh.f32 %v2066_v40 }
0x1469   :  { %v7676_v41 = vpop.eup %7675 }
0x146a   :  { %7374 = vst.sshfl [vmem:[#allocation2 + $0x58] sm:$0xc pattern:$0x76325410] %v7676_v41  ;;  %v2075_v42 = vrot.slane %v7676_v41, %v8300_v39 }
0x146c   :  { %v2076_v45 = vcombine.low %v2075_v42, %v2075_v42  ;;  %v2083_v46 = vcombine.high %v2075_v42, %v2075_v42  ;;  %v2085_v63 = vpack.c.bf16 %v2075_v42, %v2075_v42 }
0x146e   :  { %2079 = vst [vmem:[#allocation2 + $0x50] sm:$0x30] %v2076_v45  ;;  %v2086_v47 = vpack.c.bf16 %v2083_v46, %v2083_v46 }
0x1470   :  { %2119 = vmatprep.mubr.bf16.mxu1 %v2086_v47 }
0x1471   :  { %2120 = vmatmul.mubr.bf16.vlgmr.msra.gmra.mxu1 %v2085_v63  ;;  %v7541_v63 = vld [vmem:[#allocation10 + $0x14] ss:$8 sps:$4 sm:$0xff]  }
0x1472   :  { %2241 = vmatpush1.bf16.msra.mxu1 %v8922_v25 }
0x1473   :  { %2242 = vmatprep.subr.bf16.mxu1 %v8925_v26 }
0x1476   :  { %2243 = vmatpush1.bf16.msra.mxu1 %v8928_v27 }
0x1477   :  { %2244 = vmatprep.subr.bf16.mxu1 %v8931_v4 }
0x147a   :  { %2245 = vmatpush1.bf16.msra.mxu1 %v8934_v28 }
0x147b   :  { %2246 = vmatprep.subr.bf16.mxu1 %v8937_v29 }
0x147e   :  { %2247 = vmatpush1.bf16.msra.mxu1 %v8940_v30 }
0x147f   :  { %2248 = vmatprep.subr.bf16.mxu1 %v8943_v5 }
0x1482   :  { %2249 = vmatpush1.bf16.msra.mxu1 %v8946_v6 }
0x1483   :  { %2250 = vmatprep.subr.bf16.mxu1 %v8949_v13 }
0x1486   :  { %2251 = vmatpush1.bf16.msra.mxu1 %v8952_v14 }
0x1487   :  { %2252 = vmatprep.subr.bf16.mxu1 %v8990_v56 }
0x148a   :  { %2253 = vmatpush1.bf16.msra.mxu1 %v8993_v31 }
0x148b   :  { %2254 = vmatprep.subr.bf16.mxu1 %v8996_v32 }
0x148e   :  { %2255 = vmatpush1.bf16.msra.mxu1 %v8999_v57 }
0x148f   :  { %2256 = vmatprep.subr.bf16.mxu1 %v9002_v58 }
0x1492   :  { %2257 = vmatpush2.bf16.msra.mxu1 %v9005_v59 }
0x1493   :  { %2258 = vmatprep.subr.bf16.mxu1 %v9008_v2 }
0x1496   :  { %2259 = vmatpush2.bf16.msra.mxu1 %v9011_v21 }
0x1497   :  { %2260 = vmatprep.subr.bf16.mxu1 %v9048_v48 }
0x149a   :  { %2261 = vmatpush2.bf16.msra.mxu1 %v9051_v49 }
0x149b   :  { %2262 = vmatprep.subr.bf16.mxu1 %v9054_v50 }
0x149e   :  { %2263 = vmatpush2.bf16.msra.mxu1 %v9057_v51 }
0x149f   :  { %2264 = vmatprep.subr.bf16.mxu1 %v9060_v52 }
0x14a2   :  { %2265 = vmatpush2.bf16.msra.mxu1 %v9063_v53 }
0x14a3   :  { %2266 = vmatprep.subr.bf16.mxu1 %v9066_v22 }
0x14a6   :  { %2267 = vmatpush2.bf16.msra.mxu1 %v9069_v23 }
0x14a7   :  { %2268 = vmatprep.subr.bf16.mxu1 %v9072_v24 }
0x14aa   :  { %2269 = vmatpush2.bf16.msra.mxu1 %v9075_v62 }
0x14ab   :  { %2270 = vmatprep.subr.bf16.mxu1 %v9113_v55 }
0x14ae   :  { %2271 = vmatpush2.bf16.msra.mxu1 %v9116_v7 }
0x14af   :  { %2395 = vmatprep.subr.bf16.mxu1 %v8917_v43 }
0x1531   :  { %v2121_v33 = vpop.f32.mrf.mxu1 }
0x1533   :  { %v2123_v34 = vpop.f32.mrf.mxu1 }
0x1534   :  { %v2130_v35 = vcombine.low %v2121_v33, %v2123_v34  ;;  %v7539_v33 = vld [vmem:[#allocation10 + $0x10] ss:$8 sps:$4 sm:$0xff]   ;;  %v7544_v34 = vld [vmem:[#allocation10 + $0x4] ss:$8 sps:$4 sm:$0xff]  }
0x1535   :  { %v2125_v36 = vpop.f32.mrf.mxu1 }
0x1536   :  { %v2137_v3 = vrot.slane %v2130_v35, %v8300_v39  ;;  %v7542_v35 = vld [vmem:[#allocation10] ss:$8 sps:$4 sm:$0xff]   ;;  %v7545_v36 = vld [vmem:[#allocation10 + $0xf0] ss:$8 sps:$4 sm:$0xff]  }
0x1537   :  { %v2126_v15 = vpop.f32.mrf.mxu1 }
0x1538   :  { %v2139_v16 = vadd.f32 %v2137_v3, %v2082_v1  ;;  %v7547_v1 = vld [vmem:[#allocation10 + $0xf4] ss:$8 sps:$4 sm:$0xff]   ;;  %v7550_v3 = vld [vmem:[#allocation10 + $0xe4] ss:$8 sps:$4 sm:$0xff]   ;;  %v7548_v15 = vld [vmem:[#allocation10 + $0xe0] ss:$8 sps:$4 sm:$0xff]  }
0x153a   :  { %7677 = vtanh.f32 %v2139_v16  ;;  %v7553_v16 = vld [vmem:[#allocation10 + $0xd4] ss:$8 sps:$4 sm:$0xff]  }
0x1547   :  { %v7678_v17 = vpop.eup %7677 }
0x1548   :  { %v2142_v18 = vcombine.low %v7678_v17, %v7678_v17  ;;  %v2156_v60 = vrot.slane %v7678_v17, %v8300_v39  ;;  %v7551_v17 = vld [vmem:[#allocation10 + $0xd0] ss:$8 sps:$4 sm:$0xff]  }
0x154a   :  { %v2149_v61 = vrot.slane %v2142_v18, %v8300_v39  ;;  %7375 = vst.sshfl [vmem:[#allocation2 + $0x58] sm:$0xc0 pattern:$0x76325410] %v2142_v18  ;;  %v2164_v19 = vcombine.high %v2156_v60, %v2156_v60  ;;  %v2167_v54 = vpack.c.bf16 %v2156_v60, %v2156_v60  ;;  %v7556_v18 = vld [vmem:[#allocation10 + $0xc4] ss:$8 sps:$4 sm:$0xff]  }
0x154b   :  { %v7554_v60 = vld [vmem:[#allocation10 + $0xc0] ss:$8 sps:$4 sm:$0xff]  }
0x154c   :  { %v2157_v20 = vcombine.low %v2149_v61, %v2149_v61  ;;  %v2168_v43 = vpack.c.bf16 %v2164_v19, %v2164_v19  ;;  %v7559_v61 = vld [vmem:[#allocation10 + $0xb4] ss:$8 sps:$4 sm:$0xff]   ;;  %v7557_v19 = vld [vmem:[#allocation10 + $0xb0] ss:$8 sps:$4 sm:$0xff]  }
0x154e   :  { %2160 = vst [vmem:[#allocation2 + $0x50] sm:$0xc0] %v2157_v20  ;;  %2201 = vmatprep.mubr.bf16.mxu0 %v2168_v43  ;;  %v7562_v20 = vld [vmem:[#allocation10 + $0xa4] ss:$8 sps:$4 sm:$0xff]   ;;  %v7560_v43 = vld [vmem:[#allocation10 + $0xa0] ss:$8 sps:$4 sm:$0xff]  }
0x154f   :  { %2202 = vmatmul.mubr.bf16.vlgmr.msra.gmra.mxu0 %v2167_v54  ;;  %v7565_v54 = vld [vmem:[#allocation10 + $0x94] ss:$8 sps:$4 sm:$0xff]  }
0x1550   :  { %2323 = vmatpush1.bf16.msra.mxu0 %v8922_v25 }
0x1551   :  { %2324 = vmatprep.subr.bf16.mxu0 %v8925_v26 }
0x1554   :  { %2325 = vmatpush1.bf16.msra.mxu0 %v8928_v27 }
0x1555   :  { %2326 = vmatprep.subr.bf16.mxu0 %v8931_v4 }
0x1558   :  { %2327 = vmatpush1.bf16.msra.mxu0 %v8934_v28 }
0x1559   :  { %2328 = vmatprep.subr.bf16.mxu0 %v8937_v29 }
0x155c   :  { %2329 = vmatpush1.bf16.msra.mxu0 %v8940_v30 }
0x155d   :  { %2330 = vmatprep.subr.bf16.mxu0 %v8943_v5 }
0x1560   :  { %2331 = vmatpush1.bf16.msra.mxu0 %v8946_v6 }
0x1561   :  { %2332 = vmatprep.subr.bf16.mxu0 %v8949_v13 }
0x1564   :  { %2333 = vmatpush1.bf16.msra.mxu0 %v8952_v14 }
0x1565   :  { %2334 = vmatprep.subr.bf16.mxu0 %v8990_v56 }
0x1568   :  { %2335 = vmatpush1.bf16.msra.mxu0 %v8993_v31 }
0x1569   :  { %2336 = vmatprep.subr.bf16.mxu0 %v8996_v32 }
0x156c   :  { %2337 = vmatpush1.bf16.msra.mxu0 %v8999_v57 }
0x156d   :  { %2338 = vmatprep.subr.bf16.mxu0 %v9002_v58 }
0x1570   :  { %2339 = vmatpush2.bf16.msra.mxu0 %v9005_v59 }
0x1571   :  { %2340 = vmatprep.subr.bf16.mxu0 %v9008_v2 }
0x1574   :  { %2341 = vmatpush2.bf16.msra.mxu0 %v9011_v21 }
0x1575   :  { %2342 = vmatprep.subr.bf16.mxu0 %v9048_v48 }
0x1578   :  { %2343 = vmatpush2.bf16.msra.mxu0 %v9051_v49 }
0x1579   :  { %2344 = vmatprep.subr.bf16.mxu0 %v9054_v50 }
0x157c   :  { %2345 = vmatpush2.bf16.msra.mxu0 %v9057_v51 }
0x157d   :  { %2346 = vmatprep.subr.bf16.mxu0 %v9060_v52 }
0x1580   :  { %2347 = vmatpush2.bf16.msra.mxu0 %v9063_v53 }
0x1581   :  { %2348 = vmatprep.subr.bf16.mxu0 %v9066_v22 }
0x1584   :  { %2349 = vmatpush2.bf16.msra.mxu0 %v9069_v23 }
0x1585   :  { %2350 = vmatprep.subr.bf16.mxu0 %v9072_v24 }
0x1588   :  { %2351 = vmatpush2.bf16.msra.mxu0 %v9075_v62 }
0x1589   :  { %2352 = vmatprep.subr.bf16.mxu0 %v9113_v55 }
0x158c   :  { %2353 = vmatpush2.bf16.msra.mxu0 %v9116_v7 }
0x160f   :  { %v2203_v8 = vpop.f32.mrf.mxu0 }
0x1611   :  { %v2205_v9 = vpop.f32.mrf.mxu0 }
0x1612   :  { %v2212_v10 = vcombine.low %v2203_v8, %v2205_v9  ;;  %v7563_v8 = vld [vmem:[#allocation10 + $0x90] ss:$8 sps:$4 sm:$0xff]   ;;  %v7568_v9 = vld [vmem:[#allocation10 + $0x84] ss:$8 sps:$4 sm:$0xff]  }
0x1613   :  { %v2207_v12 = vpop.f32.mrf.mxu0 }
0x1614   :  { %v2219_v38 = vrot.slane %v2212_v10, %v8300_v39  ;;  %v7566_v10 = vld [vmem:[#allocation10 + $0x80] ss:$8 sps:$4 sm:$0xff]   ;;  %v2470_v12 = vld [vmem:[#allocation2 + $0x38] sm:$0xff] }
0x1615   :  { %v2208_v44 = vpop.f32.mrf.mxu0 }
0x1616   :  { %v2221_v40 = vadd.f32 %v2219_v38, %v2163_v11  ;;  %v2465_v11 = vld [vmem:[#allocation2 + $0x10] sm:$0xff]  ;;  %v2463_v38 = vld [vmem:[#allocation2] sm:$0xff] }
0x1617   :  { %v2477_v44 = vpack.c.bf16 %v2465_v11, %v2463_v38  ;;  %v2521_v11 = vsub.s32 0, %v8297_v37  ;;  %v2525_v38 = vsub.s32 1, %v8297_v37 }
0x1618   :  { %7679 = vtanh.f32 %v2221_v40  ;;  %v2468_v40 = vld [vmem:[#allocation2 + $0x28] sm:$0xff] }
0x1625   :  { %v7680_v41 = vpop.eup %7679 }
0x1626   :  { %7376 = vst.sshfl [vmem:[#allocation2 + $0x60] sm:$0x3 pattern:$0x76325410] %v7680_v41  ;;  %v2230_v42 = vrot.slane %v7680_v41, %v8300_v39  ;;  %v2480_v41 = vpack.c.bf16 %v2470_v12, %v2468_v40  ;;  %v2517_v12 = vld [vmem:[%s10536_s3] sm:$0x3] }
0x1627   :  { %v9418_v40 = vrot.slane %v2517_v12, %v2525_v38 }
0x1628   :  { %v2231_v45 = vcombine.high %v2230_v42, %v2230_v42  ;;  %v2238_v47 = vpack.c.bf16 %v2230_v42, %v2230_v42  ;;  %v2469_v42 = vld [vmem:[#allocation2 + $0x30] sm:$0xff] }
0x162a   :  { %2235 = vst [vmem:[#allocation2 + $0x68] sm:$0x3] %v2231_v45  ;;  %v2239_v46 = vpack.c.bf16 %v2231_v45, %v2231_v45  ;;  %v2474_v45 = vld [vmem:[#allocation2 + $0x58] sm:$0xff] }
0x162c   :  { %2272 = vmatprep.mubr.bf16.mxu1 %v2239_v46  ;;  %v2467_v46 = vld [vmem:[#allocation2 + $0x20] sm:$0xff] }
0x162d   :  { %2273 = vmatmul.mubr.bf16.vlgmr.msra.gmra.mxu1 %v2238_v47  ;;  %v2479_v47 = vpack.c.bf16 %v2469_v42, %v2467_v46 }
0x162e   :  { %2396 = vmatpush1.bf16.msra.mxu1 %v8922_v25  ;;  %v7523_v25 = vld [vmem:[#allocation10 + $0x74] ss:$8 sps:$4 sm:$0xff]  }
0x162f   :  { %2397 = vmatprep.subr.bf16.mxu1 %v8925_v26  ;;  %2689 = vmatprep.subr.bf16.mxu0 %v7523_v25  ;;  %v2472_v25 = vld [vmem:[#allocation2 + $0x48] sm:$0xff] }
0x1632   :  { %2398 = vmatpush1.bf16.msra.mxu1 %v8928_v27 }
0x1633   :  { %2399 = vmatprep.subr.bf16.mxu1 %v8931_v4 }
0x1636   :  { %2400 = vmatpush1.bf16.msra.mxu1 %v8934_v28  ;;  %v2237_v28 = vld [vmem:[#allocation5 + $0x64] sm:$0xf] }
0x1637   :  { %2401 = vmatprep.subr.bf16.mxu1 %v8937_v29 }
0x163a   :  { %2402 = vmatpush1.bf16.msra.mxu1 %v8940_v30 }
0x163b   :  { %2403 = vmatprep.subr.bf16.mxu1 %v8943_v5 }
0x163e   :  { %2404 = vmatpush1.bf16.msra.mxu1 %v8946_v6 }
0x163f   :  { %2405 = vmatprep.subr.bf16.mxu1 %v8949_v13 }
0x1642   :  { %2406 = vmatpush1.bf16.msra.mxu1 %v8952_v14 }
0x1643   :  { %2407 = vmatprep.subr.bf16.mxu1 %v8990_v56 }
0x1646   :  { %2408 = vmatpush1.bf16.msra.mxu1 %v8993_v31 }
0x1647   :  { %2409 = vmatprep.subr.bf16.mxu1 %v8996_v32 }
0x164a   :  { %2410 = vmatpush1.bf16.msra.mxu1 %v8999_v57  ;;  %v2466_v57 = vld [vmem:[#allocation2 + $0x18] sm:$0xff] }
0x164b   :  { %2411 = vmatprep.subr.bf16.mxu1 %v9002_v58 }
0x164e   :  { %2412 = vmatpush2.bf16.msra.mxu1 %v9005_v59 }
0x164f   :  { %2413 = vmatprep.subr.bf16.mxu1 %v9008_v2  ;;  %v7521_v2 = vld [vmem:[#allocation10 + $0x70] ss:$8 sps:$4 sm:$0xff]  }
0x1652   :  { %2414 = vmatpush2.bf16.msra.mxu1 %v9011_v21 }
0x1653   :  { %2415 = vmatprep.subr.bf16.mxu1 %v9048_v48  ;;  %v2464_v48 = vld [vmem:[#allocation2 + $0x8] sm:$0xff] }
0x1656   :  { %2416 = vmatpush2.bf16.msra.mxu1 %v9051_v49  ;;  %v7526_v49 = vld [vmem:[#allocation10 + $0x64] ss:$8 sps:$4 sm:$0xff]  }
0x1657   :  { %2417 = vmatprep.subr.bf16.mxu1 %v9054_v50  ;;  %v2478_v50 = vpack.c.bf16 %v2466_v57, %v2464_v48  ;;  %v9320_v57 = vld [vmem:[#allocation11 + $0x30] ss:$8 sps:$4 sm:$0xff]   ;;  %v9335_v48 = vld [vmem:[#allocation11 + $0x4] ss:$8 sps:$4 sm:$0xff]  }
0x165a   :  { %2418 = vmatpush2.bf16.msra.mxu1 %v9057_v51  ;;  %v7524_v51 = vld [vmem:[#allocation10 + $0x60] ss:$8 sps:$4 sm:$0xff]  }
0x165b   :  { %2419 = vmatprep.subr.bf16.mxu1 %v9060_v52  ;;  %v7529_v52 = vld [vmem:[#allocation10 + $0x54] ss:$8 sps:$4 sm:$0xff]  }
0x165e   :  { %2420 = vmatpush2.bf16.msra.mxu1 %v9063_v53  ;;  %v7527_v53 = vld [vmem:[#allocation10 + $0x50] ss:$8 sps:$4 sm:$0xff]  }
0x165f   :  { %2421 = vmatprep.subr.bf16.mxu1 %v9066_v22  ;;  %v7532_v22 = vld [vmem:[#allocation10 + $0x44] ss:$8 sps:$4 sm:$0xff]  }
0x1662   :  { %2422 = vmatpush2.bf16.msra.mxu1 %v9069_v23  ;;  %v7530_v23 = vld [vmem:[#allocation10 + $0x40] ss:$8 sps:$4 sm:$0xff]  }
0x1663   :  { %2423 = vmatprep.subr.bf16.mxu1 %v9072_v24  ;;  %v7535_v24 = vld [vmem:[#allocation10 + $0x34] ss:$8 sps:$4 sm:$0xff]  }
0x1666   :  { %2424 = vmatpush2.bf16.msra.mxu1 %v9075_v62  ;;  %v7533_v62 = vld [vmem:[#allocation10 + $0x30] ss:$8 sps:$4 sm:$0xff]  }
0x1667   :  { %2425 = vmatprep.subr.bf16.mxu1 %v9113_v55  ;;  %v7538_v55 = vld [vmem:[#allocation10 + $0x24] ss:$8 sps:$4 sm:$0xff]  }
0x166a   :  { %2426 = vmatpush2.bf16.msra.mxu1 %v9116_v7  ;;  %v7536_v7 = vld [vmem:[#allocation10 + $0x20] ss:$8 sps:$4 sm:$0xff]  }
0x16ed   :  { %v2274_v26 = vpop.f32.mrf.mxu1 }
0x16ef   :  { %v2276_v27 = vpop.f32.mrf.mxu1 }
0x16f0   :  { %v2283_v4 = vcombine.low %v2274_v26, %v2276_v27  ;;  %v2482_v26 = vpack.c.bf16 %v2474_v45, %v2472_v25  ;;  %v2473_v27 = vld [vmem:[#allocation2 + $0x50] sm:$0xff] }
0x16f1   :  { %v2278_v29 = vpop.f32.mrf.mxu1 }
0x16f2   :  { %v2290_v30 = vrot.slane %v2283_v4, %v8300_v39  ;;  %v2471_v4 = vld [vmem:[#allocation2 + $0x40] sm:$0xff]  ;;  %v9293_v29 = vld [vmem:[#allocation11 + $0x74] ss:$8 sps:$4 sm:$0xff]  }
0x16f3   :  { %v2279_v5 = vpop.f32.mrf.mxu1  ;;  %2936 = vmatprep.subr.bf16.mxu1 %v9293_v29 }
0x16f4   :  { %v2292_v6 = vadd.f32 %v2290_v30, %v2237_v28  ;;  %v2481_v28 = vpack.c.bf16 %v2473_v27, %v2471_v4  ;;  %v9295_v30 = vld [vmem:[#allocation11 + $0x70] ss:$8 sps:$4 sm:$0xff]   ;;  %v9299_v5 = vld [vmem:[#allocation11 + $0x64] ss:$8 sps:$4 sm:$0xff]  }
0x16f6   :  { %7681 = vtanh.f32 %v2292_v6  ;;  %v9302_v6 = vld [vmem:[#allocation11 + $0x60] ss:$8 sps:$4 sm:$0xff]  }
0x1703   :  { %v7682_v13 = vpop.eup %7681 }
0x1704   :  { %v2295_v14 = vcombine.low %v7682_v13, %v7682_v13  ;;  %v2309_v56 = vrot.slane %v7682_v13, %v8300_v39  ;;  %v9305_v13 = vld [vmem:[#allocation11 + $0x54] ss:$8 sps:$4 sm:$0xff]  }
0x1706   :  { %v2302_v31 = vrot.slane %v2295_v14, %v8300_v39  ;;  %7377 = vst.sshfl [vmem:[#allocation2 + $0x60] sm:$0x30 pattern:$0x76325410] %v2295_v14  ;;  %v2317_v32 = vcombine.high %v2309_v56, %v2309_v56  ;;  %v2320_v21 = vpack.c.bf16 %v2309_v56, %v2309_v56  ;;  %v9308_v14 = vld [vmem:[#allocation11 + $0x50] ss:$8 sps:$4 sm:$0xff]  }
0x1707   :  { %v9311_v56 = vld [vmem:[#allocation11 + $0x44] ss:$8 sps:$4 sm:$0xff]  }
0x1708   :  { %v2310_v58 = vcombine.high %v2302_v31, %v2302_v31  ;;  %v2321_v59 = vpack.c.bf16 %v2317_v32, %v2317_v32  ;;  %v9314_v31 = vld [vmem:[#allocation11 + $0x40] ss:$8 sps:$4 sm:$0xff]   ;;  %v9317_v32 = vld [vmem:[#allocation11 + $0x34] ss:$8 sps:$4 sm:$0xff]  }
0x170a   :  { %2314 = vst [vmem:[#allocation2 + $0x68] sm:$0xc] %v2310_v58  ;;  %2354 = vmatprep.mubr.bf16.mxu0 %v2321_v59  ;;  %v9323_v58 = vld [vmem:[#allocation11 + $0x24] ss:$8 sps:$4 sm:$0xff]   ;;  %v9326_v59 = vld [vmem:[#allocation11 + $0x20] ss:$8 sps:$4 sm:$0xff]  }
0x170b   :  { %2355 = vmatmul.mubr.bf16.vlgmr.msra.gmra.mxu0 %v2320_v21  ;;  %v9332_v21 = vld [vmem:[#allocation11 + $0x10] ss:$8 sps:$4 sm:$0xff]  }
0x170c   :  { %2690 = vmatpush1.bf16.msra.mxu0 %v7521_v2  ;;  %2721 = vmatprep.mubr.bf16.mxu0 %v2478_v50  ;;  %v9329_v2 = vld [vmem:[#allocation11 + $0x14] ss:$8 sps:$4 sm:$0xff]  }
0x170d   :  { %2691 = vmatprep.subr.bf16.mxu0 %v7526_v49  ;;  %v9338_v49 = vld [vmem:[#allocation11] ss:$8 sps:$4 sm:$0xff]   ;;  %v9341_v50 = vld [vmem:[#allocation11 + $0xf4] ss:$8 sps:$4 sm:$0xff]  }
0x1710   :  { %2692 = vmatpush1.bf16.msra.mxu0 %v7524_v51  ;;  %v9344_v51 = vld [vmem:[#allocation11 + $0xf0] ss:$8 sps:$4 sm:$0xff]  }
0x1711   :  { %2693 = vmatprep.subr.bf16.mxu0 %v7529_v52  ;;  %v9348_v52 = vld [vmem:[#allocation11 + $0xe4] ss:$8 sps:$4 sm:$0xff]  }
0x1714   :  { %2694 = vmatpush1.bf16.msra.mxu0 %v7527_v53  ;;  %v9350_v53 = vld [vmem:[#allocation11 + $0xe0] ss:$8 sps:$4 sm:$0xff]  }
0x1715   :  { %2695 = vmatprep.subr.bf16.mxu0 %v7532_v22  ;;  %v9354_v22 = vld [vmem:[#allocation11 + $0xd4] ss:$8 sps:$4 sm:$0xff]  }
0x1718   :  { %2696 = vmatpush1.bf16.msra.mxu0 %v7530_v23  ;;  %v9356_v23 = vld [vmem:[#allocation11 + $0xd0] ss:$8 sps:$4 sm:$0xff]  }
0x1719   :  { %2697 = vmatprep.subr.bf16.mxu0 %v7535_v24  ;;  %v9360_v24 = vld [vmem:[#allocation11 + $0xc4] ss:$8 sps:$4 sm:$0xff]  }
0x171c   :  { %2698 = vmatpush1.bf16.msra.mxu0 %v7533_v62  ;;  %v9362_v62 = vld [vmem:[#allocation11 + $0xc0] ss:$8 sps:$4 sm:$0xff]  }
0x171d   :  { %2699 = vmatprep.subr.bf16.mxu0 %v7538_v55  ;;  %v9366_v55 = vld [vmem:[#allocation11 + $0xb4] ss:$8 sps:$4 sm:$0xff]  }
0x1720   :  { %2700 = vmatpush1.bf16.msra.mxu0 %v7536_v7  ;;  %v9368_v7 = vld [vmem:[#allocation11 + $0xb0] ss:$8 sps:$4 sm:$0xff]  }
0x1721   :  { %2701 = vmatprep.subr.bf16.mxu0 %v7541_v63  ;;  %v9372_v63 = vld [vmem:[#allocation11 + $0xa4] ss:$8 sps:$4 sm:$0xff]  }
0x1724   :  { %2702 = vmatpush1.bf16.msra.mxu0 %v7539_v33  ;;  %v9374_v33 = vld [vmem:[#allocation11 + $0xa0] ss:$8 sps:$4 sm:$0xff]  }
0x1725   :  { %2703 = vmatprep.subr.bf16.mxu0 %v7544_v34  ;;  %v9378_v34 = vld [vmem:[#allocation11 + $0x94] ss:$8 sps:$4 sm:$0xff]  }
0x1728   :  { %2704 = vmatpush1.bf16.msra.mxu0 %v7542_v35  ;;  %v9380_v35 = vld [vmem:[#allocation11 + $0x90] ss:$8 sps:$4 sm:$0xff]  }
0x1729   :  { %2705 = vmatprep.subr.bf16.mxu0 %v7547_v1  ;;  %v9384_v1 = vld [vmem:[#allocation11 + $0x84] ss:$8 sps:$4 sm:$0xff]  }
0x172c   :  { %2706 = vmatpush2.bf16.msra.mxu0 %v7545_v36  ;;  %v9386_v36 = vld [vmem:[#allocation11 + $0x80] ss:$8 sps:$4 sm:$0xff]  }
0x172d   :  { %2707 = vmatprep.subr.bf16.mxu0 %v7550_v3 }
0x1730   :  { %2708 = vmatpush2.bf16.msra.mxu0 %v7548_v15 }
0x1731   :  { %2709 = vmatprep.subr.bf16.mxu0 %v7553_v16 }
0x1734   :  { %2710 = vmatpush2.bf16.msra.mxu0 %v7551_v17  ;;  %v2316_v17 = vld [vmem:[#allocation5 + $0x68] sm:$0xf] }
0x1735   :  { %2711 = vmatprep.subr.bf16.mxu0 %v7556_v18 }
0x1738   :  { %2712 = vmatpush2.bf16.msra.mxu0 %v7554_v60 }
0x1739   :  { %2713 = vmatprep.subr.bf16.mxu0 %v7559_v61 }
0x173c   :  { %2714 = vmatpush2.bf16.msra.mxu0 %v7557_v19 }
0x173d   :  { %2715 = vmatprep.subr.bf16.mxu0 %v7562_v20 }
0x1740   :  { %2716 = vmatpush2.bf16.msra.mxu0 %v7560_v43 }
0x1741   :  { %2717 = vmatprep.subr.bf16.mxu0 %v7565_v54 }
0x1744   :  { %2718 = vmatpush2.bf16.msra.mxu0 %v7563_v8 }
0x1745   :  { %2719 = vmatprep.subr.bf16.mxu0 %v7568_v9 }
0x1748   :  { %2720 = vmatpush2.bf16.msra.mxu0 %v7566_v10 }
0x1749   :  { %2997 = vmatprep.subr.bf16.mxu0 %v9293_v29 }
0x174b   :  { %2722 = vmatmul.mubr.bf16.vlgmr.msra.gmra.mxu0 %v2477_v44  ;;  %v9415_v44 = vrot.slane %v2517_v12, %v2521_v11  ;;  %v2390_v12 = vld [vmem:[#allocation5 + $0x6c] sm:$0xf] }
0x174c   :  { %2731 = vmatprep.mubr.bf16.mxu0 %v2480_v41  ;;  %2998 = vmatpush1.bf16.msra.mxu0 %v9295_v30 }
0x174d   :  { %2999 = vmatprep.subr.bf16.mxu0 %v9299_v5 }
0x1750   :  { %3000 = vmatpush1.bf16.msra.mxu0 %v9302_v6 }
0x1751   :  { %3001 = vmatprep.subr.bf16.mxu0 %v9305_v13 }
0x1753   :  { %2732 = vmatmul.mubr.bf16.gmra.mxu0 %v2479_v47 }
0x1754   :  { %2741 = vmatprep.mubr.bf16.mxu0 %v2482_v26  ;;  %3002 = vmatpush1.bf16.msra.mxu0 %v9308_v14 }
0x1755   :  { %3003 = vmatprep.subr.bf16.mxu0 %v9311_v56 }
0x1758   :  { %3004 = vmatpush1.bf16.msra.mxu0 %v9314_v31 }
0x1759   :  { %3005 = vmatprep.subr.bf16.mxu0 %v9317_v32 }
0x175b   :  { %2742 = vmatmul.mubr.bf16.gmra.mxu0 %v2481_v28 }
0x175c   :  { %3006 = vmatpush1.bf16.msra.mxu0 %v9320_v57 }
0x175d   :  { %3007 = vmatprep.subr.bf16.mxu0 %v9323_v58 }
0x1760   :  { %3008 = vmatpush1.bf16.msra.mxu0 %v9326_v59 }
0x1761   :  { %3009 = vmatprep.subr.bf16.mxu0 %v9329_v2 }
0x1764   :  { %3010 = vmatpush1.bf16.msra.mxu0 %v9332_v21 }
0x1765   :  { %3011 = vmatprep.subr.bf16.mxu0 %v9335_v48 }
0x1768   :  { %3012 = vmatpush1.bf16.msra.mxu0 %v9338_v49 }
0x1769   :  { %3013 = vmatprep.subr.bf16.mxu0 %v9341_v50 }
0x176c   :  { %3014 = vmatpush2.bf16.msra.mxu0 %v9344_v51 }
0x176d   :  { %3015 = vmatprep.subr.bf16.mxu0 %v9348_v52 }
0x1770   :  { %3016 = vmatpush2.bf16.msra.mxu0 %v9350_v53 }
0x1771   :  { %3017 = vmatprep.subr.bf16.mxu0 %v9354_v22 }
0x1774   :  { %3018 = vmatpush2.bf16.msra.mxu0 %v9356_v23 }
0x1775   :  { %3019 = vmatprep.subr.bf16.mxu0 %v9360_v24 }
0x1778   :  { %3020 = vmatpush2.bf16.msra.mxu0 %v9362_v62 }
0x1779   :  { %3021 = vmatprep.subr.bf16.mxu0 %v9366_v55 }
0x177c   :  { %3022 = vmatpush2.bf16.msra.mxu0 %v9368_v7 }
0x177d   :  { %3023 = vmatprep.subr.bf16.mxu0 %v9372_v63 }
0x1780   :  { %3024 = vmatpush2.bf16.msra.mxu0 %v9374_v33 }
0x1781   :  { %3025 = vmatprep.subr.bf16.mxu0 %v9378_v34 }
0x1784   :  { %3026 = vmatpush2.bf16.msra.mxu0 %v9380_v35 }
0x1785   :  { %3027 = vmatprep.subr.bf16.mxu0 %v9384_v1 }
0x1788   :  { %3028 = vmatpush2.bf16.msra.mxu0 %v9386_v36 }
0x1789   :  { %3144 = vmatprep.subr.bf16.mxu0 %v9293_v29 }
0x17cb   :  { %v2356_v3 = vpop.f32.mrf.mxu0 }
0x17cd   :  { %v2358_v15 = vpop.f32.mrf.mxu0 }
0x17ce   :  { %v2365_v16 = vcombine.low %v2356_v3, %v2358_v15 }
0x17cf   :  { %v2360_v18 = vpop.f32.mrf.mxu0 }
0x17d0   :  { %v2372_v60 = vrot.slane %v2365_v16, %v8300_v39 }
0x17d1   :  { %v2361_v61 = vpop.f32.mrf.mxu0 }
0x17d2   :  { %v2374_v19 = vadd.f32 %v2372_v60, %v2316_v17 }
0x17d4   :  { %7683 = vtanh.f32 %v2374_v19 }
0x17e1   :  { %v7684_v20 = vpop.eup %7683 }
0x17e2   :  { %7378 = vst.sshfl [vmem:[#allocation2 + $0x68] sm:$0xc pattern:$0x76325410] %v7684_v20  ;;  %v2383_v43 = vrot.slane %v7684_v20, %v8300_v39 }
0x17e4   :  { %v2384_v54 = vcombine.low %v2383_v43, %v2383_v43  ;;  %v2391_v8 = vcombine.high %v2383_v43, %v2383_v43  ;;  %v2393_v10 = vpack.c.bf16 %v2383_v43, %v2383_v43 }
0x17e6   :  { %2387 = vst [vmem:[#allocation2 + $0x60] sm:$0x30] %v2384_v54  ;;  %v2394_v9 = vpack.c.bf16 %v2391_v8, %v2391_v8 }
0x17e8   :  { %2427 = vmatprep.mubr.bf16.mxu1 %v2394_v9 }
0x17e9   :  { %2428 = vmatmul.mubr.bf16.vlgmr.msra.gmra.mxu1 %v2393_v10 }
0x17ea   :  { %2937 = vmatpush1.bf16.msra.mxu1 %v9295_v30  ;;  %2968 = vmatprep.mubr.bf16.mxu1 %v8066_v0 }
0x17eb   :  { %2938 = vmatprep.subr.bf16.mxu1 %v9299_v5 }
0x17ee   :  { %2939 = vmatpush1.bf16.msra.mxu1 %v9302_v6 }
0x17ef   :  { %2940 = vmatprep.subr.bf16.mxu1 %v9305_v13 }
0x17f2   :  { %2941 = vmatpush1.bf16.msra.mxu1 %v9308_v14 }
0x17f3   :  { %2942 = vmatprep.subr.bf16.mxu1 %v9311_v56 }
0x17f6   :  { %2943 = vmatpush1.bf16.msra.mxu1 %v9314_v31 }
0x17f7   :  { %2944 = vmatprep.subr.bf16.mxu1 %v9317_v32 }
0x17fa   :  { %2945 = vmatpush1.bf16.msra.mxu1 %v9320_v57 }
0x17fb   :  { %2946 = vmatprep.subr.bf16.mxu1 %v9323_v58 }
0x17fe   :  { %2947 = vmatpush1.bf16.msra.mxu1 %v9326_v59 }
0x17ff   :  { %2948 = vmatprep.subr.bf16.mxu1 %v9329_v2 }
0x1802   :  { %2949 = vmatpush1.bf16.msra.mxu1 %v9332_v21 }
0x1803   :  { %2950 = vmatprep.subr.bf16.mxu1 %v9335_v48 }
0x1806   :  { %2951 = vmatpush1.bf16.msra.mxu1 %v9338_v49 }
0x1807   :  { %2952 = vmatprep.subr.bf16.mxu1 %v9341_v50 }
0x180a   :  { %2953 = vmatpush2.bf16.msra.mxu1 %v9344_v51 }
0x180b   :  { %v2723_v41 = vpop.f32.mrf.mxu0  ;;  %2954 = vmatprep.subr.bf16.mxu1 %v9348_v52 }
0x180c   :  { %v2724_v42 = vadd.f32 %v2723_v41, %v9415_v44 }
0x180d   :  { %v2725_v45 = vpop.f32.mrf.mxu0 }
0x180e   :  { %2760 = vst [vmem:[#allocation3 + $0x30] sm:$0xff] %v2724_v42  ;;  %v2726_v46 = vadd.f32 %v2725_v45, %v9418_v40  ;;  %2955 = vmatpush2.bf16.msra.mxu1 %v9350_v53 }
0x180f   :  { %v2727_v37 = vpop.f32.mrf.mxu0  ;;  %2956 = vmatprep.subr.bf16.mxu1 %v9354_v22 }
0x1810   :  { %2761 = vst [vmem:[#allocation3] sm:$0xff] %v2726_v46  ;;  %v2728_v47 = vadd.f32 %v2727_v37, %v9415_v44 }
0x1811   :  { %v2729_v25 = vpop.f32.mrf.mxu0 }
0x1812   :  { %2762 = vst [vmem:[#allocation3 + $0x58] sm:$0xff] %v2728_v47  ;;  %v2730_v26 = vadd.f32 %v2729_v25, %v9418_v40  ;;  %2957 = vmatpush2.bf16.msra.mxu1 %v9356_v23 }
0x1813   :  { %v2733_v27 = vpop.f32.mrf.mxu0  ;;  %2958 = vmatprep.subr.bf16.mxu1 %v9360_v24 }
0x1814   :  { %2763 = vst [vmem:[#allocation3 + $0x18] sm:$0xff] %v2730_v26  ;;  %v2734_v4 = vadd.f32 %v2733_v27, %v9415_v44 }
0x1815   :  { %v2735_v28 = vpop.f32.mrf.mxu0 }
0x1816   :  { %2764 = vst [vmem:[#allocation3 + $0x50] sm:$0xff] %v2734_v4  ;;  %v2736_v3 = vadd.f32 %v2735_v28, %v9418_v40  ;;  %2959 = vmatpush2.bf16.msra.mxu1 %v9362_v62 }
0x1817   :  { %v2737_v15 = vpop.f32.mrf.mxu0  ;;  %2960 = vmatprep.subr.bf16.mxu1 %v9366_v55 }
0x1818   :  { %2765 = vst [vmem:[#allocation3 + $0x68] sm:$0xff] %v2736_v3  ;;  %v2738_v16 = vadd.f32 %v2737_v15, %v9415_v44  ;;  %v2774_v3 = vld [vmem:[#allocation3 + $0x30] sm:$0x3] }
0x1819   :  { %v2739_v17 = vpop.f32.mrf.mxu0 }
0x181a   :  { %2766 = vst [vmem:[#allocation3 + $0x8] sm:$0xff] %v2738_v16  ;;  %v2740_v18 = vadd.f32 %v2739_v17, %v9418_v40  ;;  %2961 = vmatpush2.bf16.msra.mxu1 %v9368_v7  ;;  %v2775_v17 = vld [vmem:[#allocation3] sm:$0x3] }
0x181b   :  { %v2743_v60 = vpop.f32.mrf.mxu0  ;;  %2962 = vmatprep.subr.bf16.mxu1 %v9372_v63 }
0x181c   :  { %2767 = vst [vmem:[#allocation3 + $0x48] sm:$0xff] %v2740_v18  ;;  %v2744_v61 = vadd.f32 %v2743_v60, %v9415_v44 }
0x181d   :  { %v2745_v19 = vpop.f32.mrf.mxu0 }
0x181e   :  { %2768 = vst [vmem:[#allocation3 + $0x40] sm:$0xff] %v2744_v61  ;;  %v2746_v20 = vadd.f32 %v2745_v19, %v9418_v40  ;;  %2963 = vmatpush2.bf16.msra.mxu1 %v9374_v33 }
0x181f   :  { %v2747_v43 = vpop.f32.mrf.mxu0  ;;  %2964 = vmatprep.subr.bf16.mxu1 %v9378_v34 }
0x1820   :  { %2769 = vst [vmem:[#allocation3 + $0x20] sm:$0xff] %v2746_v20  ;;  %v2748_v54 = vadd.f32 %v2747_v43, %v9415_v44 }
0x1821   :  { %v2749_v8 = vpop.f32.mrf.mxu0 }
0x1822   :  { %2770 = vst [vmem:[#allocation3 + $0x10] sm:$0xff] %v2748_v54  ;;  %v2750_v9 = vadd.f32 %v2749_v8, %v9418_v40  ;;  %2965 = vmatpush2.bf16.msra.mxu1 %v9380_v35 }
0x1823   :  { %2966 = vmatprep.subr.bf16.mxu1 %v9384_v1 }
0x1824   :  { %2771 = vst [vmem:[#allocation3 + $0x38] sm:$0xff] %v2750_v9 }
0x1826   :  { %2967 = vmatpush2.bf16.msra.mxu1 %v9386_v36 }
0x1827   :  { %3071 = vmatprep.subr.bf16.mxu1 %v9293_v29 }
0x1829   :  { %2969 = vmatmul.mubr.bf16.vlgmr.msra.gmra.mxu1 %v8066_v0 }
0x182a   :  { %3072 = vmatpush1.bf16.msra.mxu1 %v9295_v30 }
0x182b   :  { %3073 = vmatprep.subr.bf16.mxu1 %v9299_v5 }
0x182e   :  { %3074 = vmatpush1.bf16.msra.mxu1 %v9302_v6 }
0x182f   :  { %3075 = vmatprep.subr.bf16.mxu1 %v9305_v13 }
0x1832   :  { %3076 = vmatpush1.bf16.msra.mxu1 %v9308_v14 }
0x1833   :  { %3077 = vmatprep.subr.bf16.mxu1 %v9311_v56 }
0x1836   :  { %3078 = vmatpush1.bf16.msra.mxu1 %v9314_v31 }
0x1837   :  { %3079 = vmatprep.subr.bf16.mxu1 %v9317_v32 }
0x183a   :  { %3080 = vmatpush1.bf16.msra.mxu1 %v9320_v57 }
0x183b   :  { %3081 = vmatprep.subr.bf16.mxu1 %v9323_v58 }
0x183e   :  { %3082 = vmatpush1.bf16.msra.mxu1 %v9326_v59 }
0x183f   :  { %3083 = vmatprep.subr.bf16.mxu1 %v9329_v2 }
0x1842   :  { %3084 = vmatpush1.bf16.msra.mxu1 %v9332_v21 }
0x1843   :  { %3085 = vmatprep.subr.bf16.mxu1 %v9335_v48 }
0x1846   :  { %3086 = vmatpush1.bf16.msra.mxu1 %v9338_v49 }
0x1847   :  { %3087 = vmatprep.subr.bf16.mxu1 %v9341_v50 }
0x184a   :  { %3088 = vmatpush2.bf16.msra.mxu1 %v9344_v51 }
0x184b   :  { %3089 = vmatprep.subr.bf16.mxu1 %v9348_v52 }
0x184e   :  { %3090 = vmatpush2.bf16.msra.mxu1 %v9350_v53 }
0x184f   :  { %3091 = vmatprep.subr.bf16.mxu1 %v9354_v22 }
0x1852   :  { %3092 = vmatpush2.bf16.msra.mxu1 %v9356_v23 }
0x1853   :  { %3093 = vmatprep.subr.bf16.mxu1 %v9360_v24 }
0x1856   :  { %3094 = vmatpush2.bf16.msra.mxu1 %v9362_v62 }
0x1857   :  { %3095 = vmatprep.subr.bf16.mxu1 %v9366_v55 }
0x185a   :  { %3096 = vmatpush2.bf16.msra.mxu1 %v9368_v7 }
0x185b   :  { %3097 = vmatprep.subr.bf16.mxu1 %v9372_v63 }
0x185e   :  { %3098 = vmatpush2.bf16.msra.mxu1 %v9374_v33 }
0x185f   :  { %3099 = vmatprep.subr.bf16.mxu1 %v9378_v34 }
0x1862   :  { %3100 = vmatpush2.bf16.msra.mxu1 %v9380_v35 }
0x1863   :  { %3101 = vmatprep.subr.bf16.mxu1 %v9384_v1 }
0x1866   :  { %3102 = vmatpush2.bf16.msra.mxu1 %v9386_v36 }
0x1867   :  { %3218 = vmatprep.subr.bf16.mxu1 %v9293_v29 }
0x18a9   :  { %v2429_v0 = vpop.f32.mrf.mxu1 }
0x18ab   :  { %v2431_v10 = vpop.f32.mrf.mxu1 }
0x18ac   :  { %v2438_v11 = vcombine.low %v2429_v0, %v2431_v10 }
0x18ad   :  { %v2433_v38 = vpop.f32.mrf.mxu1 }
0x18ae   :  { %v2445_v41 = vrot.slane %v2438_v11, %v8300_v39 }
0x18af   :  { %v2434_v42 = vpop.f32.mrf.mxu1 }
0x18b0   :  { %v2447_v45 = vadd.f32 %v2445_v41, %v2390_v12 }
0x18b2   :  { %7685 = vtanh.f32 %v2447_v45 }
0x18bf   :  { %v7686_v46 = vpop.eup %7685 }
0x18c0   :  { %v2450_v37 = vcombine.low %v7686_v46, %v7686_v46  ;;  %v2993_v46 = vld [vmem:[#allocation3 + $0x30] sm:$0xc] }
0x18c2   :  { %v2457_v47 = vrot.slane %v2450_v37, %v8300_v39  ;;  %7379 = vst.sshfl [vmem:[#allocation2 + $0x68] sm:$0xc0 pattern:$0x76325410] %v2450_v37 }
0x18c4   :  { %v2458_v25 = vcombine.low %v2457_v47, %v2457_v47 }
0x18c6   :  { %2461 = vst [vmem:[#allocation2 + $0x60] sm:$0xc0] %v2458_v25 }
0x18c9   :  { %v2476_v26 = vld [vmem:[#allocation2 + $0x68] sm:$0xff] }
0x18ca   :  { %v2484_v27 = vpack.c.bf16 %v2476_v26, %v2476_v26  ;;  %v2994_v26 = vld [vmem:[#allocation3] sm:$0xc] }
0x18cc   :  { %2751 = vmatprep.mubr.bf16.mxu0 %v2484_v27 }
0x18cd   :  { %v2475_v4 = vld [vmem:[#allocation2 + $0x60] sm:$0xff] }
0x18ce   :  { %v2483_v28 = vpack.c.bf16 %v2475_v4, %v2475_v4 }
0x18d0   :  { %2752 = vmatmul.mubr.bf16.gmra.mxu0 %v2483_v28 }
0x18e9   :  { %v2970_v15 = vpop.f32.mrf.mxu1 }
0x18ea   :  { %v2977_v16 = vadd.f32 %v2970_v15, %v2774_v3 }
0x18eb   :  { %v2972_v18 = vpop.f32.mrf.mxu1 }
0x18ec   :  { %v2978_v60 = vadd.f32 %v2972_v18, %v2775_v17  ;;  %7687 = vtanh.f32 %v2977_v16 }
0x18ed   :  { %v2974_v61 = vpop.f32.mrf.mxu1 }
0x18ee   :  { %7689 = vtanh.f32 %v2978_v60 }
0x18ef   :  { %v2975_v19 = vpop.f32.mrf.mxu1 }
0x18f9   :  { %v7688_v20 = vpop.eup %7687 }
0x18fa   :  { %v2995_v9 = vpack.c.bf16 %v7688_v20, %v7688_v20 }
0x18fb   :  { %v7690_v43 = vpop.eup %7689 }
0x18fc   :  { %v2983_v54 = vcombine.low %v7688_v20, %v7690_v43  ;;  %v2996_v8 = vpack.c.bf16 %v7690_v43, %v7690_v43  ;;  %v3061_v43 = vld [vmem:[#allocation3 + $0x30] sm:$0x30] }
0x18fe   :  { %7444 = vst.sshfl [vmem:[#allocation4] sm:$0x33 pattern:$0x76325410] %v2983_v54  ;;  %3029 = vmatprep.mubr.bf16.mxu0 %v2996_v8 }
0x18ff   :  { %3030 = vmatmul.mubr.bf16.vlgmr.msra.gmra.mxu0 %v2995_v9 }
0x1900   :  { %3145 = vmatpush1.bf16.msra.mxu0 %v9295_v30 }
0x1901   :  { %3146 = vmatprep.subr.bf16.mxu0 %v9299_v5 }
0x1904   :  { %3147 = vmatpush1.bf16.msra.mxu0 %v9302_v6 }
0x1905   :  { %3148 = vmatprep.subr.bf16.mxu0 %v9305_v13 }
0x1908   :  { %3149 = vmatpush1.bf16.msra.mxu0 %v9308_v14 }
0x1909   :  { %3150 = vmatprep.subr.bf16.mxu0 %v9311_v56 }
0x190c   :  { %3151 = vmatpush1.bf16.msra.mxu0 %v9314_v31 }
0x190d   :  { %3152 = vmatprep.subr.bf16.mxu0 %v9317_v32 }
0x1910   :  { %3153 = vmatpush1.bf16.msra.mxu0 %v9320_v57 }
0x1911   :  { %3154 = vmatprep.subr.bf16.mxu0 %v9323_v58 }
0x1914   :  { %3155 = vmatpush1.bf16.msra.mxu0 %v9326_v59 }
0x1915   :  { %3156 = vmatprep.subr.bf16.mxu0 %v9329_v2 }
0x1918   :  { %3157 = vmatpush1.bf16.msra.mxu0 %v9332_v21 }
0x1919   :  { %3158 = vmatprep.subr.bf16.mxu0 %v9335_v48 }
0x191c   :  { %3159 = vmatpush1.bf16.msra.mxu0 %v9338_v49 }
0x191d   :  { %3160 = vmatprep.subr.bf16.mxu0 %v9341_v50 }
0x1920   :  { %3161 = vmatpush2.bf16.msra.mxu0 %v9344_v51 }
0x1921   :  { %3162 = vmatprep.subr.bf16.mxu0 %v9348_v52 }
0x1924   :  { %3163 = vmatpush2.bf16.msra.mxu0 %v9350_v53 }
0x1925   :  { %3164 = vmatprep.subr.bf16.mxu0 %v9354_v22 }
0x1928   :  { %3165 = vmatpush2.bf16.msra.mxu0 %v9356_v23 }
0x1929   :  { %3166 = vmatprep.subr.bf16.mxu0 %v9360_v24 }
0x192c   :  { %3167 = vmatpush2.bf16.msra.mxu0 %v9362_v62 }
0x192d   :  { %3168 = vmatprep.subr.bf16.mxu0 %v9366_v55 }
0x1930   :  { %3169 = vmatpush2.bf16.msra.mxu0 %v9368_v7 }
0x1931   :  { %3170 = vmatprep.subr.bf16.mxu0 %v9372_v63 }
0x1934   :  { %3171 = vmatpush2.bf16.msra.mxu0 %v9374_v33 }
0x1935   :  { %3172 = vmatprep.subr.bf16.mxu0 %v9378_v34 }
0x1938   :  { %3173 = vmatpush2.bf16.msra.mxu0 %v9380_v35 }
0x1939   :  { %3174 = vmatprep.subr.bf16.mxu0 %v9384_v1 }
0x193c   :  { %3175 = vmatpush2.bf16.msra.mxu0 %v9386_v36 }
0x193d   :  { %3279 = vmatprep.subr.bf16.mxu0 %v9293_v29 }
0x1990   :  { %v2753_v0 = vpop.f32.mrf.mxu0 }
0x1991   :  { %v2754_v10 = vadd.f32 %v2753_v0, %v9415_v44  ;;  %v3062_v0 = vld [vmem:[#allocation3] sm:$0x30] }
0x1992   :  { %v2755_v11 = vpop.f32.mrf.mxu0 }
0x1993   :  { %2772 = vst [vmem:[#allocation3 + $0x60] sm:$0xff] %v2754_v10  ;;  %v2756_v12 = vadd.f32 %v2755_v11, %v9418_v40 }
0x1994   :  { %v2757_v38 = vpop.f32.mrf.mxu0 }
0x1995   :  { %2773 = vst [vmem:[#allocation3 + $0x28] sm:$0xff] %v2756_v12 }
0x1996   :  { %v2758_v41 = vpop.f32.mrf.mxu0 }
0x19bf   :  { %v3031_v42 = vpop.f32.mrf.mxu0 }
0x19c0   :  { %v3040_v45 = vrot.slane %v3031_v42, 6 }
0x19c1   :  { %v3033_v37 = vpop.f32.mrf.mxu0 }
0x19c2   :  { %v3044_v47 = vadd.f32 %v3040_v45, %v2993_v46  ;;  %v3041_v25 = vrot.slane %v3033_v37, 6 }
0x19c3   :  { %v3035_v27 = vpop.f32.mrf.mxu0 }
0x19c4   :  { %7691 = vtanh.f32 %v3044_v47  ;;  %v3045_v4 = vadd.f32 %v3041_v25, %v2994_v26  ;;  %v3134_v27 = vld [vmem:[#allocation3 + $0x30] sm:$0xc0] }
0x19c5   :  { %v3036_v28 = vpop.f32.mrf.mxu0 }
0x19c6   :  { %7693 = vtanh.f32 %v3045_v4 }
0x19d1   :  { %v7692_v44 = vpop.eup %7691 }
0x19d2   :  { %v3063_v15 = vpack.c.bf16 %v7692_v44, %v7692_v44 }
0x19d3   :  { %v7694_v3 = vpop.eup %7693 }
0x19d4   :  { %v3050_v16 = vcombine.low %v7692_v44, %v7694_v3  ;;  %v3064_v40 = vpack.c.bf16 %v7694_v3, %v7694_v3  ;;  %v3067_v60 = vrot.slane %v3063_v15, 1  ;;  %v3135_v3 = vld [vmem:[#allocation3] sm:$0xc0] }
0x19d6   :  { %v3057_v17 = vrot.slane %v3050_v16, %v8300_v39  ;;  %v3068_v18 = vrot.slane %v3064_v40, 1 }
0x19d8   :  { %v3058_v61 = vcombine.high %v3057_v17, %v3057_v17  ;;  %3103 = vmatprep.mubr.bf16.mxu1 %v3068_v18 }
0x19d9   :  { %3104 = vmatmul.mubr.bf16.vlgmr.msra.gmra.mxu1 %v3067_v60 }
0x19da   :  { %3060 = vst [vmem:[#allocation4 + $0x4] sm:$0xf] %v3058_v61  ;;  %3219 = vmatpush1.bf16.msra.mxu1 %v9295_v30 }
0x19db   :  { %3220 = vmatprep.subr.bf16.mxu1 %v9299_v5 }
0x19de   :  { %3221 = vmatpush1.bf16.msra.mxu1 %v9302_v6 }
0x19df   :  { %3222 = vmatprep.subr.bf16.mxu1 %v9305_v13 }
0x19e2   :  { %3223 = vmatpush1.bf16.msra.mxu1 %v9308_v14 }
0x19e3   :  { %3224 = vmatprep.subr.bf16.mxu1 %v9311_v56 }
0x19e6   :  { %3225 = vmatpush1.bf16.msra.mxu1 %v9314_v31 }
0x19e7   :  { %3226 = vmatprep.subr.bf16.mxu1 %v9317_v32 }
0x19ea   :  { %3227 = vmatpush1.bf16.msra.mxu1 %v9320_v57 }
0x19eb   :  { %3228 = vmatprep.subr.bf16.mxu1 %v9323_v58 }
0x19ee   :  { %3229 = vmatpush1.bf16.msra.mxu1 %v9326_v59 }
0x19ef   :  { %3230 = vmatprep.subr.bf16.mxu1 %v9329_v2 }
0x19f2   :  { %3231 = vmatpush1.bf16.msra.mxu1 %v9332_v21 }
0x19f3   :  { %3232 = vmatprep.subr.bf16.mxu1 %v9335_v48 }
0x19f6   :  { %3233 = vmatpush1.bf16.msra.mxu1 %v9338_v49 }
0x19f7   :  { %3234 = vmatprep.subr.bf16.mxu1 %v9341_v50 }
0x19fa   :  { %3235 = vmatpush2.bf16.msra.mxu1 %v9344_v51 }
0x19fb   :  { %3236 = vmatprep.subr.bf16.mxu1 %v9348_v52 }
0x19fe   :  { %3237 = vmatpush2.bf16.msra.mxu1 %v9350_v53 }
0x19ff   :  { %3238 = vmatprep.subr.bf16.mxu1 %v9354_v22 }
0x1a02   :  { %3239 = vmatpush2.bf16.msra.mxu1 %v9356_v23 }
0x1a03   :  { %3240 = vmatprep.subr.bf16.mxu1 %v9360_v24 }
0x1a06   :  { %3241 = vmatpush2.bf16.msra.mxu1 %v9362_v62 }
0x1a07   :  { %3242 = vmatprep.subr.bf16.mxu1 %v9366_v55 }
0x1a0a   :  { %3243 = vmatpush2.bf16.msra.mxu1 %v9368_v7 }
0x1a0b   :  { %3244 = vmatprep.subr.bf16.mxu1 %v9372_v63 }
0x1a0e   :  { %3245 = vmatpush2.bf16.msra.mxu1 %v9374_v33 }
0x1a0f   :  { %3246 = vmatprep.subr.bf16.mxu1 %v9378_v34 }
0x1a12   :  { %3247 = vmatpush2.bf16.msra.mxu1 %v9380_v35 }
0x1a13   :  { %3248 = vmatprep.subr.bf16.mxu1 %v9384_v1 }
0x1a16   :  { %3249 = vmatpush2.bf16.msra.mxu1 %v9386_v36 }
0x1a17   :  { %3353 = vmatprep.subr.bf16.mxu1 %v9293_v29 }
0x1a99   :  { %v3105_v19 = vpop.f32.mrf.mxu1 }
0x1a9a   :  { %v3114_v20 = vrot.slane %v3105_v19, 4 }
0x1a9b   :  { %v3107_v54 = vpop.f32.mrf.mxu1 }
0x1a9c   :  { %v3118_v8 = vadd.f32 %v3114_v20, %v3061_v43  ;;  %v3115_v9 = vrot.slane %v3107_v54, 4 }
0x1a9d   :  { %v3109_v10 = vpop.f32.mrf.mxu1 }
0x1a9e   :  { %7695 = vtanh.f32 %v3118_v8  ;;  %v3119_v11 = vadd.f32 %v3115_v9, %v3062_v0  ;;  %v3208_v9 = vld [vmem:[#allocation3 + $0x58] sm:$0x3] }
0x1a9f   :  { %v3110_v12 = vpop.f32.mrf.mxu1 }
0x1aa0   :  { %7697 = vtanh.f32 %v3119_v11  ;;  %v3209_v11 = vld [vmem:[#allocation3 + $0x18] sm:$0x3] }
0x1aab   :  { %v7696_v38 = vpop.eup %7695 }
0x1aac   :  { %v3136_v42 = vpack.c.bf16 %v7696_v38, %v7696_v38 }
0x1aad   :  { %v7698_v41 = vpop.eup %7697 }
0x1aae   :  { %v3124_v45 = vcombine.high %v7696_v38, %v7698_v41  ;;  %v3137_v46 = vpack.c.bf16 %v7698_v41, %v7698_v41  ;;  %v3140_v47 = vrot.slane %v3136_v42, 2 }
0x1ab0   :  { %7445 = vst.sshfl [vmem:[#allocation4 + $0x8] sm:$0x33 pattern:$0x76325410] %v3124_v45  ;;  %v3141_v37 = vrot.slane %v3137_v46, 2 }
0x1ab2   :  { %3176 = vmatprep.mubr.bf16.mxu0 %v3141_v37 }
0x1ab3   :  { %3177 = vmatmul.mubr.bf16.vlgmr.msra.gmra.mxu0 %v3140_v47 }
0x1ab4   :  { %3280 = vmatpush1.bf16.msra.mxu0 %v9295_v30 }
0x1ab5   :  { %3281 = vmatprep.subr.bf16.mxu0 %v9299_v5 }
0x1ab8   :  { %3282 = vmatpush1.bf16.msra.mxu0 %v9302_v6 }
0x1ab9   :  { %3283 = vmatprep.subr.bf16.mxu0 %v9305_v13 }
0x1abc   :  { %3284 = vmatpush1.bf16.msra.mxu0 %v9308_v14 }
0x1abd   :  { %3285 = vmatprep.subr.bf16.mxu0 %v9311_v56 }
0x1ac0   :  { %3286 = vmatpush1.bf16.msra.mxu0 %v9314_v31 }
0x1ac1   :  { %3287 = vmatprep.subr.bf16.mxu0 %v9317_v32 }
0x1ac4   :  { %3288 = vmatpush1.bf16.msra.mxu0 %v9320_v57 }
0x1ac5   :  { %3289 = vmatprep.subr.bf16.mxu0 %v9323_v58 }
0x1ac8   :  { %3290 = vmatpush1.bf16.msra.mxu0 %v9326_v59 }
0x1ac9   :  { %3291 = vmatprep.subr.bf16.mxu0 %v9329_v2 }
0x1acc   :  { %3292 = vmatpush1.bf16.msra.mxu0 %v9332_v21 }
0x1acd   :  { %3293 = vmatprep.subr.bf16.mxu0 %v9335_v48 }
0x1ad0   :  { %3294 = vmatpush1.bf16.msra.mxu0 %v9338_v49 }
0x1ad1   :  { %3295 = vmatprep.subr.bf16.mxu0 %v9341_v50 }
0x1ad4   :  { %3296 = vmatpush2.bf16.msra.mxu0 %v9344_v51 }
0x1ad5   :  { %3297 = vmatprep.subr.bf16.mxu0 %v9348_v52 }
0x1ad8   :  { %3298 = vmatpush2.bf16.msra.mxu0 %v9350_v53 }
0x1ad9   :  { %3299 = vmatprep.subr.bf16.mxu0 %v9354_v22 }
0x1adc   :  { %3300 = vmatpush2.bf16.msra.mxu0 %v9356_v23 }
0x1add   :  { %3301 = vmatprep.subr.bf16.mxu0 %v9360_v24 }
0x1ae0   :  { %3302 = vmatpush2.bf16.msra.mxu0 %v9362_v62 }
0x1ae1   :  { %3303 = vmatprep.subr.bf16.mxu0 %v9366_v55 }
0x1ae4   :  { %3304 = vmatpush2.bf16.msra.mxu0 %v9368_v7 }
0x1ae5   :  { %3305 = vmatprep.subr.bf16.mxu0 %v9372_v63 }
0x1ae8   :  { %3306 = vmatpush2.bf16.msra.mxu0 %v9374_v33 }
0x1ae9   :  { %3307 = vmatprep.subr.bf16.mxu0 %v9378_v34 }
0x1aec   :  { %3308 = vmatpush2.bf16.msra.mxu0 %v9380_v35 }
0x1aed   :  { %3309 = vmatprep.subr.bf16.mxu0 %v9384_v1 }
0x1af0   :  { %3310 = vmatpush2.bf16.msra.mxu0 %v9386_v36 }
0x1af1   :  { %3426 = vmatprep.subr.bf16.mxu0 %v9293_v29 }
0x1b73   :  { %v3178_v25 = vpop.f32.mrf.mxu0 }
0x1b74   :  { %v3187_v26 = vrot.slane %v3178_v25, 2 }
0x1b75   :  { %v3180_v4 = vpop.f32.mrf.mxu0 }
0x1b76   :  { %v3191_v28 = vadd.f32 %v3187_v26, %v3134_v27  ;;  %v3188_v44 = vrot.slane %v3180_v4, 2  ;;  %v3275_v4 = vld [vmem:[#allocation3 + $0x58] sm:$0xc] }
0x1b77   :  { %v3182_v15 = vpop.f32.mrf.mxu0 }
0x1b78   :  { %7699 = vtanh.f32 %v3191_v28  ;;  %v3192_v16 = vadd.f32 %v3188_v44, %v3135_v3  ;;  %v3276_v15 = vld [vmem:[#allocation3 + $0x18] sm:$0xc] }
0x1b79   :  { %v3183_v40 = vpop.f32.mrf.mxu0 }
0x1b7a   :  { %7701 = vtanh.f32 %v3192_v16 }
0x1b85   :  { %v7700_v17 = vpop.eup %7699 }
0x1b86   :  { %v3210_v60 = vpack.c.bf16 %v7700_v17, %v7700_v17 }
0x1b87   :  { %v7702_v18 = vpop.eup %7701 }
0x1b88   :  { %v3197_v61 = vcombine.high %v7700_v17, %v7702_v18  ;;  %v3211_v19 = vpack.c.bf16 %v7702_v18, %v7702_v18  ;;  %v3214_v54 = vrot.slane %v3210_v60, 3 }
0x1b8a   :  { %v3204_v20 = vrot.slane %v3197_v61, %v8300_v39  ;;  %v3215_v43 = vrot.slane %v3211_v19, 3 }
0x1b8c   :  { %v3205_v8 = vcombine.high %v3204_v20, %v3204_v20  ;;  %3250 = vmatprep.mubr.bf16.mxu1 %v3215_v43 }
0x1b8d   :  { %3251 = vmatmul.mubr.bf16.vlgmr.msra.gmra.mxu1 %v3214_v54 }
0x1b8e   :  { %3207 = vst [vmem:[#allocation4 + $0xc] sm:$0xf] %v3205_v8  ;;  %3354 = vmatpush1.bf16.msra.mxu1 %v9295_v30 }
0x1b8f   :  { %3355 = vmatprep.subr.bf16.mxu1 %v9299_v5 }
0x1b92   :  { %3356 = vmatpush1.bf16.msra.mxu1 %v9302_v6 }
0x1b93   :  { %3357 = vmatprep.subr.bf16.mxu1 %v9305_v13 }
0x1b96   :  { %3358 = vmatpush1.bf16.msra.mxu1 %v9308_v14 }
0x1b97   :  { %3359 = vmatprep.subr.bf16.mxu1 %v9311_v56 }
0x1b9a   :  { %3360 = vmatpush1.bf16.msra.mxu1 %v9314_v31 }
0x1b9b   :  { %3361 = vmatprep.subr.bf16.mxu1 %v9317_v32 }
0x1b9e   :  { %3362 = vmatpush1.bf16.msra.mxu1 %v9320_v57 }
0x1b9f   :  { %3363 = vmatprep.subr.bf16.mxu1 %v9323_v58 }
0x1ba2   :  { %3364 = vmatpush1.bf16.msra.mxu1 %v9326_v59 }
0x1ba3   :  { %3365 = vmatprep.subr.bf16.mxu1 %v9329_v2 }
0x1ba6   :  { %3366 = vmatpush1.bf16.msra.mxu1 %v9332_v21 }
0x1ba7   :  { %3367 = vmatprep.subr.bf16.mxu1 %v9335_v48 }
0x1baa   :  { %3368 = vmatpush1.bf16.msra.mxu1 %v9338_v49 }
0x1bab   :  { %3369 = vmatprep.subr.bf16.mxu1 %v9341_v50 }
0x1bae   :  { %3370 = vmatpush2.bf16.msra.mxu1 %v9344_v51 }
0x1baf   :  { %3371 = vmatprep.subr.bf16.mxu1 %v9348_v52 }
0x1bb2   :  { %3372 = vmatpush2.bf16.msra.mxu1 %v9350_v53 }
0x1bb3   :  { %3373 = vmatprep.subr.bf16.mxu1 %v9354_v22 }
0x1bb6   :  { %3374 = vmatpush2.bf16.msra.mxu1 %v9356_v23 }
0x1bb7   :  { %3375 = vmatprep.subr.bf16.mxu1 %v9360_v24 }
0x1bba   :  { %3376 = vmatpush2.bf16.msra.mxu1 %v9362_v62 }
0x1bbb   :  { %3377 = vmatprep.subr.bf16.mxu1 %v9366_v55 }
0x1bbe   :  { %3378 = vmatpush2.bf16.msra.mxu1 %v9368_v7 }
0x1bbf   :  { %3379 = vmatprep.subr.bf16.mxu1 %v9372_v63 }
0x1bc2   :  { %3380 = vmatpush2.bf16.msra.mxu1 %v9374_v33 }
0x1bc3   :  { %3381 = vmatprep.subr.bf16.mxu1 %v9378_v34 }
0x1bc6   :  { %3382 = vmatpush2.bf16.msra.mxu1 %v9380_v35 }
0x1bc7   :  { %3383 = vmatprep.subr.bf16.mxu1 %v9384_v1 }
0x1bca   :  { %3384 = vmatpush2.bf16.msra.mxu1 %v9386_v36 }
0x1bcb   :  { %3500 = vmatprep.subr.bf16.mxu1 %v9293_v29 }
0x1c4d   :  { %v3252_v0 = vpop.f32.mrf.mxu1 }
0x1c4e   :  { %v3259_v10 = vadd.f32 %v3252_v0, %v3208_v9  ;;  %v9720_v9 = vld [vmem:[#allocation11 + $0x4] ss:$8 sps:$4 sm:$0xff]   ;;  %v9723_v0 = vld [vmem:[#allocation11] ss:$8 sps:$4 sm:$0xff]  }
0x1c4f   :  { %v3254_v12 = vpop.f32.mrf.mxu1 }
0x1c50   :  { %v3260_v38 = vadd.f32 %v3254_v12, %v3209_v11  ;;  %7703 = vtanh.f32 %v3259_v10  ;;  %v9726_v10 = vld [vmem:[#allocation11 + $0xf4] ss:$8 sps:$4 sm:$0xff]   ;;  %v9729_v11 = vld [vmem:[#allocation11 + $0xf0] ss:$8 sps:$4 sm:$0xff]   ;;  %v9732_v12 = vld [vmem:[#allocation11 + $0xe4] ss:$8 sps:$4 sm:$0xff]  }
0x1c51   :  { %v3256_v41 = vpop.f32.mrf.mxu1 }
0x1c52   :  { %7705 = vtanh.f32 %v3260_v38  ;;  %v9735_v38 = vld [vmem:[#allocation11 + $0xe0] ss:$8 sps:$4 sm:$0xff]   ;;  %v9738_v41 = vld [vmem:[#allocation11 + $0xd4] ss:$8 sps:$4 sm:$0xff]  }
0x1c53   :  { %v3257_v42 = vpop.f32.mrf.mxu1 }
0x1c54   :  { %v9741_v42 = vld [vmem:[#allocation11 + $0xd0] ss:$8 sps:$4 sm:$0xff]  }
0x1c5d   :  { %v7704_v45 = vpop.eup %7703 }
0x1c5e   :  { %v3277_v25 = vpack.c.bf16 %v7704_v45, %v7704_v45 }
0x1c5f   :  { %v7706_v46 = vpop.eup %7705 }
0x1c60   :  { %v3265_v37 = vcombine.low %v7704_v45, %v7706_v46  ;;  %v3278_v47 = vpack.c.bf16 %v7706_v46, %v7706_v46  ;;  %v9744_v45 = vld [vmem:[#allocation11 + $0xc4] ss:$8 sps:$4 sm:$0xff]   ;;  %v9747_v46 = vld [vmem:[#allocation11 + $0xc0] ss:$8 sps:$4 sm:$0xff]  }
0x1c62   :  { %7446 = vst.sshfl [vmem:[#allocation4 + $0x10] sm:$0x33 pattern:$0x76325410] %v3265_v37  ;;  %3311 = vmatprep.mubr.bf16.mxu0 %v3278_v47  ;;  %v9750_v37 = vld [vmem:[#allocation11 + $0xb4] ss:$8 sps:$4 sm:$0xff]  }
0x1c63   :  { %3312 = vmatmul.mubr.bf16.vlgmr.msra.gmra.mxu0 %v3277_v25  ;;  %v9753_v47 = vld [vmem:[#allocation11 + $0xb0] ss:$8 sps:$4 sm:$0xff]   ;;  %v9756_v25 = vld [vmem:[#allocation11 + $0xa4] ss:$8 sps:$4 sm:$0xff]  }
0x1c64   :  { %3427 = vmatpush1.bf16.msra.mxu0 %v9295_v30 }
0x1c65   :  { %3428 = vmatprep.subr.bf16.mxu0 %v9299_v5 }
0x1c68   :  { %3429 = vmatpush1.bf16.msra.mxu0 %v9302_v6 }
0x1c69   :  { %3430 = vmatprep.subr.bf16.mxu0 %v9305_v13 }
0x1c6c   :  { %3431 = vmatpush1.bf16.msra.mxu0 %v9308_v14 }
0x1c6d   :  { %3432 = vmatprep.subr.bf16.mxu0 %v9311_v56 }
0x1c70   :  { %3433 = vmatpush1.bf16.msra.mxu0 %v9314_v31 }
0x1c71   :  { %3434 = vmatprep.subr.bf16.mxu0 %v9317_v32 }
0x1c74   :  { %3435 = vmatpush1.bf16.msra.mxu0 %v9320_v57 }
0x1c75   :  { %3436 = vmatprep.subr.bf16.mxu0 %v9323_v58 }
0x1c78   :  { %3437 = vmatpush1.bf16.msra.mxu0 %v9326_v59 }
0x1c79   :  { %3438 = vmatprep.subr.bf16.mxu0 %v9329_v2 }
0x1c7c   :  { %3439 = vmatpush1.bf16.msra.mxu0 %v9332_v21 }
0x1c7d   :  { %3440 = vmatprep.subr.bf16.mxu0 %v9335_v48 }
0x1c80   :  { %3441 = vmatpush1.bf16.msra.mxu0 %v9338_v49 }
0x1c81   :  { %3442 = vmatprep.subr.bf16.mxu0 %v9341_v50 }
0x1c84   :  { %3443 = vmatpush2.bf16.msra.mxu0 %v9344_v51 }
0x1c85   :  { %3444 = vmatprep.subr.bf16.mxu0 %v9348_v52 }
0x1c88   :  { %3445 = vmatpush2.bf16.msra.mxu0 %v9350_v53 }
0x1c89   :  { %3446 = vmatprep.subr.bf16.mxu0 %v9354_v22 }
0x1c8c   :  { %3447 = vmatpush2.bf16.msra.mxu0 %v9356_v23 }
0x1c8d   :  { %3448 = vmatprep.subr.bf16.mxu0 %v9360_v24 }
0x1c90   :  { %3449 = vmatpush2.bf16.msra.mxu0 %v9362_v62 }
0x1c91   :  { %3450 = vmatprep.subr.bf16.mxu0 %v9366_v55 }
0x1c94   :  { %3451 = vmatpush2.bf16.msra.mxu0 %v9368_v7 }
0x1c95   :  { %3452 = vmatprep.subr.bf16.mxu0 %v9372_v63 }
0x1c98   :  { %3453 = vmatpush2.bf16.msra.mxu0 %v9374_v33 }
0x1c99   :  { %3454 = vmatprep.subr.bf16.mxu0 %v9378_v34 }
0x1c9c   :  { %3455 = vmatpush2.bf16.msra.mxu0 %v9380_v35 }
0x1c9d   :  { %3456 = vmatprep.subr.bf16.mxu0 %v9384_v1 }
0x1ca0   :  { %3457 = vmatpush2.bf16.msra.mxu0 %v9386_v36 }
0x1ca1   :  { %3561 = vmatprep.subr.bf16.mxu0 %v9293_v29 }
0x1d23   :  { %v3313_v26 = vpop.f32.mrf.mxu0 }
0x1d24   :  { %v3322_v27 = vrot.slane %v3313_v26, 6  ;;  %v9759_v26 = vld [vmem:[#allocation11 + $0xa0] ss:$8 sps:$4 sm:$0xff]  }
0x1d25   :  { %v3315_v28 = vpop.f32.mrf.mxu0 }
0x1d26   :  { %v3326_v44 = vadd.f32 %v3322_v27, %v3275_v4  ;;  %v3323_v3 = vrot.slane %v3315_v28, 6  ;;  %v9762_v27 = vld [vmem:[#allocation11 + $0x94] ss:$8 sps:$4 sm:$0xff]   ;;  %v9765_v4 = vld [vmem:[#allocation11 + $0x90] ss:$8 sps:$4 sm:$0xff]  }
0x1d27   :  { %v3317_v16 = vpop.f32.mrf.mxu0  ;;  %v9768_v28 = vld [vmem:[#allocation11 + $0x84] ss:$8 sps:$4 sm:$0xff]  }
0x1d28   :  { %7707 = vtanh.f32 %v3326_v44  ;;  %v3327_v40 = vadd.f32 %v3323_v3, %v3276_v15  ;;  %v9771_v44 = vld [vmem:[#allocation11 + $0x80] ss:$8 sps:$4 sm:$0xff]   ;;  %v3416_v16 = vld [vmem:[#allocation3 + $0x58] sm:$0xc0] }
0x1d29   :  { %v3318_v17 = vpop.f32.mrf.mxu0 }
0x1d2a   :  { %7709 = vtanh.f32 %v3327_v40 }
0x1d35   :  { %v7708_v18 = vpop.eup %7707 }
0x1d36   :  { %v3345_v61 = vpack.c.bf16 %v7708_v18, %v7708_v18 }
0x1d37   :  { %v7710_v60 = vpop.eup %7709 }
0x1d38   :  { %v3332_v19 = vcombine.low %v7708_v18, %v7710_v60  ;;  %v3346_v20 = vpack.c.bf16 %v7710_v60, %v7710_v60  ;;  %v3349_v54 = vrot.slane %v3345_v61, 1  ;;  %v3417_v60 = vld [vmem:[#allocation3 + $0x18] sm:$0xc0] }
0x1d3a   :  { %v3339_v43 = vrot.slane %v3332_v19, %v8300_v39  ;;  %v3350_v29 = vrot.slane %v3346_v20, 1 }
0x1d3c   :  { %v3340_v8 = vcombine.high %v3339_v43, %v3339_v43  ;;  %3385 = vmatprep.mubr.bf16.mxu1 %v3350_v29 }
0x1d3d   :  { %3386 = vmatmul.mubr.bf16.vlgmr.msra.gmra.mxu1 %v3349_v54 }
0x1d3e   :  { %3342 = vst [vmem:[#allocation4 + $0x14] sm:$0xf] %v3340_v8  ;;  %3501 = vmatpush1.bf16.msra.mxu1 %v9295_v30  ;;  %v9678_v30 = vld [vmem:[#allocation11 + $0x74] ss:$8 sps:$4 sm:$0xff]  }
0x1d3f   :  { %3502 = vmatprep.subr.bf16.mxu1 %v9299_v5 }
0x1d42   :  { %3503 = vmatpush1.bf16.msra.mxu1 %v9302_v6 }
0x1d43   :  { %3504 = vmatprep.subr.bf16.mxu1 %v9305_v13  ;;  %v3343_v13 = vld [vmem:[#allocation3 + $0x58] sm:$0x30] }
0x1d46   :  { %3505 = vmatpush1.bf16.msra.mxu1 %v9308_v14 }
0x1d47   :  { %3506 = vmatprep.subr.bf16.mxu1 %v9311_v56 }
0x1d4a   :  { %3507 = vmatpush1.bf16.msra.mxu1 %v9314_v31 }
0x1d4b   :  { %3508 = vmatprep.subr.bf16.mxu1 %v9317_v32  ;;  %v3344_v32 = vld [vmem:[#allocation3 + $0x18] sm:$0x30] }
0x1d4e   :  { %3509 = vmatpush1.bf16.msra.mxu1 %v9320_v57 }
0x1d4f   :  { %3510 = vmatprep.subr.bf16.mxu1 %v9323_v58 }
0x1d52   :  { %3511 = vmatpush1.bf16.msra.mxu1 %v9326_v59 }
0x1d53   :  { %3512 = vmatprep.subr.bf16.mxu1 %v9329_v2 }
0x1d56   :  { %3513 = vmatpush1.bf16.msra.mxu1 %v9332_v21 }
0x1d57   :  { %3514 = vmatprep.subr.bf16.mxu1 %v9335_v48 }
0x1d5a   :  { %3515 = vmatpush1.bf16.msra.mxu1 %v9338_v49 }
0x1d5b   :  { %3516 = vmatprep.subr.bf16.mxu1 %v9341_v50 }
0x1d5e   :  { %3517 = vmatpush2.bf16.msra.mxu1 %v9344_v51 }
0x1d5f   :  { %3518 = vmatprep.subr.bf16.mxu1 %v9348_v52 }
0x1d62   :  { %3519 = vmatpush2.bf16.msra.mxu1 %v9350_v53  ;;  %v9681_v53 = vld [vmem:[#allocation11 + $0x70] ss:$8 sps:$4 sm:$0xff]  }
0x1d63   :  { %3520 = vmatprep.subr.bf16.mxu1 %v9354_v22  ;;  %v9684_v22 = vld [vmem:[#allocation11 + $0x64] ss:$8 sps:$4 sm:$0xff]  }
0x1d66   :  { %3521 = vmatpush2.bf16.msra.mxu1 %v9356_v23  ;;  %v9687_v23 = vld [vmem:[#allocation11 + $0x60] ss:$8 sps:$4 sm:$0xff]  }
0x1d67   :  { %3522 = vmatprep.subr.bf16.mxu1 %v9360_v24  ;;  %v9690_v24 = vld [vmem:[#allocation11 + $0x54] ss:$8 sps:$4 sm:$0xff]  }
0x1d6a   :  { %3523 = vmatpush2.bf16.msra.mxu1 %v9362_v62  ;;  %v9693_v62 = vld [vmem:[#allocation11 + $0x50] ss:$8 sps:$4 sm:$0xff]  }
0x1d6b   :  { %3524 = vmatprep.subr.bf16.mxu1 %v9366_v55  ;;  %v9696_v55 = vld [vmem:[#allocation11 + $0x44] ss:$8 sps:$4 sm:$0xff]  }
0x1d6e   :  { %3525 = vmatpush2.bf16.msra.mxu1 %v9368_v7  ;;  %v9699_v7 = vld [vmem:[#allocation11 + $0x40] ss:$8 sps:$4 sm:$0xff]  }
0x1d6f   :  { %3526 = vmatprep.subr.bf16.mxu1 %v9372_v63  ;;  %v9702_v63 = vld [vmem:[#allocation11 + $0x34] ss:$8 sps:$4 sm:$0xff]  }
0x1d72   :  { %3527 = vmatpush2.bf16.msra.mxu1 %v9374_v33  ;;  %v9705_v33 = vld [vmem:[#allocation11 + $0x30] ss:$8 sps:$4 sm:$0xff]  }
0x1d73   :  { %3528 = vmatprep.subr.bf16.mxu1 %v9378_v34  ;;  %v9708_v34 = vld [vmem:[#allocation11 + $0x24] ss:$8 sps:$4 sm:$0xff]  }
0x1d76   :  { %3529 = vmatpush2.bf16.msra.mxu1 %v9380_v35  ;;  %v9711_v35 = vld [vmem:[#allocation11 + $0x20] ss:$8 sps:$4 sm:$0xff]  }
0x1d77   :  { %3530 = vmatprep.subr.bf16.mxu1 %v9384_v1  ;;  %v9714_v1 = vld [vmem:[#allocation11 + $0x14] ss:$8 sps:$4 sm:$0xff]  }
0x1d7a   :  { %3531 = vmatpush2.bf16.msra.mxu1 %v9386_v36  ;;  %v9717_v36 = vld [vmem:[#allocation11 + $0x10] ss:$8 sps:$4 sm:$0xff]  }
0x1d7b   :  { %3635 = vmatprep.subr.bf16.mxu1 %v9678_v30 }
0x1dfd   :  { %v3387_v5 = vpop.f32.mrf.mxu1 }
0x1dfe   :  { %v3396_v6 = vrot.slane %v3387_v5, 4 }
0x1dff   :  { %v3389_v14 = vpop.f32.mrf.mxu1 }
0x1e00   :  { %v3400_v56 = vadd.f32 %v3396_v6, %v3343_v13  ;;  %v3397_v31 = vrot.slane %v3389_v14, 4 }
0x1e01   :  { %v3391_v57 = vpop.f32.mrf.mxu1 }
0x1e02   :  { %7711 = vtanh.f32 %v3400_v56  ;;  %v3401_v58 = vadd.f32 %v3397_v31, %v3344_v32  ;;  %v3490_v31 = vld [vmem:[#allocation3 + $0x50] sm:$0x3] }
0x1e03   :  { %v3392_v59 = vpop.f32.mrf.mxu1 }
0x1e04   :  { %7713 = vtanh.f32 %v3401_v58  ;;  %v3491_v58 = vld [vmem:[#allocation3 + $0x68] sm:$0x3] }
0x1e0f   :  { %v7712_v2 = vpop.eup %7711 }
0x1e10   :  { %v3418_v48 = vpack.c.bf16 %v7712_v2, %v7712_v2 }
0x1e11   :  { %v7714_v21 = vpop.eup %7713 }
0x1e12   :  { %v3406_v49 = vcombine.high %v7712_v2, %v7714_v21  ;;  %v3419_v50 = vpack.c.bf16 %v7714_v21, %v7714_v21  ;;  %v3422_v52 = vrot.slane %v3418_v48, 2 }
0x1e14   :  { %7447 = vst.sshfl [vmem:[#allocation4 + $0x18] sm:$0x33 pattern:$0x76325410] %v3406_v49  ;;  %v3423_v51 = vrot.slane %v3419_v50, 2 }
0x1e16   :  { %3458 = vmatprep.mubr.bf16.mxu0 %v3423_v51 }
0x1e17   :  { %3459 = vmatmul.mubr.bf16.vlgmr.msra.gmra.mxu0 %v3422_v52 }
0x1e18   :  { %3562 = vmatpush1.bf16.msra.mxu0 %v9681_v53 }
0x1e19   :  { %3563 = vmatprep.subr.bf16.mxu0 %v9684_v22 }
0x1e1c   :  { %3564 = vmatpush1.bf16.msra.mxu0 %v9687_v23 }
0x1e1d   :  { %3565 = vmatprep.subr.bf16.mxu0 %v9690_v24 }
0x1e20   :  { %3566 = vmatpush1.bf16.msra.mxu0 %v9693_v62 }
0x1e21   :  { %3567 = vmatprep.subr.bf16.mxu0 %v9696_v55 }
0x1e24   :  { %3568 = vmatpush1.bf16.msra.mxu0 %v9699_v7 }
0x1e25   :  { %3569 = vmatprep.subr.bf16.mxu0 %v9702_v63 }
0x1e28   :  { %3570 = vmatpush1.bf16.msra.mxu0 %v9705_v33 }
0x1e29   :  { %3571 = vmatprep.subr.bf16.mxu0 %v9708_v34 }
0x1e2c   :  { %3572 = vmatpush1.bf16.msra.mxu0 %v9711_v35 }
0x1e2d   :  { %3573 = vmatprep.subr.bf16.mxu0 %v9714_v1 }
0x1e30   :  { %3574 = vmatpush1.bf16.msra.mxu0 %v9717_v36 }
0x1e31   :  { %3575 = vmatprep.subr.bf16.mxu0 %v9720_v9 }
0x1e34   :  { %3576 = vmatpush1.bf16.msra.mxu0 %v9723_v0 }
0x1e35   :  { %3577 = vmatprep.subr.bf16.mxu0 %v9726_v10 }
0x1e38   :  { %3578 = vmatpush2.bf16.msra.mxu0 %v9729_v11 }
0x1e39   :  { %3579 = vmatprep.subr.bf16.mxu0 %v9732_v12 }
0x1e3c   :  { %3580 = vmatpush2.bf16.msra.mxu0 %v9735_v38 }
0x1e3d   :  { %3581 = vmatprep.subr.bf16.mxu0 %v9738_v41 }
0x1e40   :  { %3582 = vmatpush2.bf16.msra.mxu0 %v9741_v42 }
0x1e41   :  { %3583 = vmatprep.subr.bf16.mxu0 %v9744_v45 }
0x1e44   :  { %3584 = vmatpush2.bf16.msra.mxu0 %v9747_v46 }
0x1e45   :  { %3585 = vmatprep.subr.bf16.mxu0 %v9750_v37 }
0x1e48   :  { %3586 = vmatpush2.bf16.msra.mxu0 %v9753_v47 }
0x1e49   :  { %3587 = vmatprep.subr.bf16.mxu0 %v9756_v25 }
0x1e4c   :  { %3588 = vmatpush2.bf16.msra.mxu0 %v9759_v26 }
0x1e4d   :  { %3589 = vmatprep.subr.bf16.mxu0 %v9762_v27 }
0x1e50   :  { %3590 = vmatpush2.bf16.msra.mxu0 %v9765_v4 }
0x1e51   :  { %3591 = vmatprep.subr.bf16.mxu0 %v9768_v28 }
0x1e54   :  { %3592 = vmatpush2.bf16.msra.mxu0 %v9771_v44 }
0x1e55   :  { %3708 = vmatprep.subr.bf16.mxu0 %v9678_v30 }
0x1ed7   :  { %v3460_v3 = vpop.f32.mrf.mxu0 }
0x1ed8   :  { %v3469_v15 = vrot.slane %v3460_v3, 2 }
0x1ed9   :  { %v3462_v40 = vpop.f32.mrf.mxu0 }
0x1eda   :  { %v3473_v17 = vadd.f32 %v3469_v15, %v3416_v16  ;;  %v3470_v18 = vrot.slane %v3462_v40, 2  ;;  %v3557_v40 = vld [vmem:[#allocation3 + $0x50] sm:$0xc] }
0x1edb   :  { %v3464_v61 = vpop.f32.mrf.mxu0 }
0x1edc   :  { %7715 = vtanh.f32 %v3473_v17  ;;  %v3474_v19 = vadd.f32 %v3470_v18, %v3417_v60  ;;  %v3558_v61 = vld [vmem:[#allocation3 + $0x68] sm:$0xc] }
0x1edd   :  { %v3465_v20 = vpop.f32.mrf.mxu0 }
0x1ede   :  { %7717 = vtanh.f32 %v3474_v19 }
0x1ee9   :  { %v7716_v43 = vpop.eup %7715 }
0x1eea   :  { %v3492_v54 = vpack.c.bf16 %v7716_v43, %v7716_v43 }
0x1eeb   :  { %v7718_v29 = vpop.eup %7717 }
0x1eec   :  { %v3479_v8 = vcombine.high %v7716_v43, %v7718_v29  ;;  %v3493_v5 = vpack.c.bf16 %v7718_v29, %v7718_v29  ;;  %v3496_v14 = vrot.slane %v3492_v54, 3 }
0x1eee   :  { %v3486_v6 = vrot.slane %v3479_v8, %v8300_v39  ;;  %v3497_v13 = vrot.slane %v3493_v5, 3 }
0x1ef0   :  { %v3487_v56 = vcombine.high %v3486_v6, %v3486_v6  ;;  %3532 = vmatprep.mubr.bf16.mxu1 %v3497_v13 }
0x1ef1   :  { %3533 = vmatmul.mubr.bf16.vlgmr.msra.gmra.mxu1 %v3496_v14 }
0x1ef2   :  { %3489 = vst [vmem:[#allocation4 + $0x1c] sm:$0xf] %v3487_v56  ;;  %3636 = vmatpush1.bf16.msra.mxu1 %v9681_v53 }
0x1ef3   :  { %3637 = vmatprep.subr.bf16.mxu1 %v9684_v22 }
0x1ef6   :  { %3638 = vmatpush1.bf16.msra.mxu1 %v9687_v23 }
0x1ef7   :  { %3639 = vmatprep.subr.bf16.mxu1 %v9690_v24 }
0x1efa   :  { %3640 = vmatpush1.bf16.msra.mxu1 %v9693_v62 }
0x1efb   :  { %3641 = vmatprep.subr.bf16.mxu1 %v9696_v55 }
0x1efe   :  { %3642 = vmatpush1.bf16.msra.mxu1 %v9699_v7 }
0x1eff   :  { %3643 = vmatprep.subr.bf16.mxu1 %v9702_v63 }
0x1f02   :  { %3644 = vmatpush1.bf16.msra.mxu1 %v9705_v33 }
0x1f03   :  { %3645 = vmatprep.subr.bf16.mxu1 %v9708_v34 }
0x1f06   :  { %3646 = vmatpush1.bf16.msra.mxu1 %v9711_v35 }
0x1f07   :  { %3647 = vmatprep.subr.bf16.mxu1 %v9714_v1 }
0x1f0a   :  { %3648 = vmatpush1.bf16.msra.mxu1 %v9717_v36 }
0x1f0b   :  { %3649 = vmatprep.subr.bf16.mxu1 %v9720_v9 }
0x1f0e   :  { %3650 = vmatpush1.bf16.msra.mxu1 %v9723_v0 }
0x1f0f   :  { %3651 = vmatprep.subr.bf16.mxu1 %v9726_v10 }
0x1f12   :  { %3652 = vmatpush2.bf16.msra.mxu1 %v9729_v11 }
0x1f13   :  { %3653 = vmatprep.subr.bf16.mxu1 %v9732_v12 }
0x1f16   :  { %3654 = vmatpush2.bf16.msra.mxu1 %v9735_v38 }
0x1f17   :  { %3655 = vmatprep.subr.bf16.mxu1 %v9738_v41 }
0x1f1a   :  { %3656 = vmatpush2.bf16.msra.mxu1 %v9741_v42 }
0x1f1b   :  { %3657 = vmatprep.subr.bf16.mxu1 %v9744_v45 }
0x1f1e   :  { %3658 = vmatpush2.bf16.msra.mxu1 %v9747_v46 }
0x1f1f   :  { %3659 = vmatprep.subr.bf16.mxu1 %v9750_v37 }
0x1f22   :  { %3660 = vmatpush2.bf16.msra.mxu1 %v9753_v47 }
0x1f23   :  { %3661 = vmatprep.subr.bf16.mxu1 %v9756_v25 }
0x1f26   :  { %3662 = vmatpush2.bf16.msra.mxu1 %v9759_v26 }
0x1f27   :  { %3663 = vmatprep.subr.bf16.mxu1 %v9762_v27 }
0x1f2a   :  { %3664 = vmatpush2.bf16.msra.mxu1 %v9765_v4 }
0x1f2b   :  { %3665 = vmatprep.subr.bf16.mxu1 %v9768_v28 }
0x1f2e   :  { %3666 = vmatpush2.bf16.msra.mxu1 %v9771_v44 }
0x1f2f   :  { %3782 = vmatprep.subr.bf16.mxu1 %v9678_v30 }
0x1fb1   :  { %v3534_v32 = vpop.f32.mrf.mxu1 }
0x1fb2   :  { %v3541_v57 = vadd.f32 %v3534_v32, %v3490_v31 }
0x1fb3   :  { %v3536_v59 = vpop.f32.mrf.mxu1 }
0x1fb4   :  { %v3542_v2 = vadd.f32 %v3536_v59, %v3491_v58  ;;  %7719 = vtanh.f32 %v3541_v57  ;;  %v3625_v58 = vld [vmem:[#allocation3 + $0x50] sm:$0x30] }
0x1fb5   :  { %v3538_v21 = vpop.f32.mrf.mxu1 }
0x1fb6   :  { %7721 = vtanh.f32 %v3542_v2 }
0x1fb7   :  { %v3539_v48 = vpop.f32.mrf.mxu1 }
0x1fb8   :  { %v3626_v48 = vld [vmem:[#allocation3 + $0x68] sm:$0x30] }
0x1fc1   :  { %v7720_v49 = vpop.eup %7719 }
0x1fc2   :  { %v3559_v3 = vpack.c.bf16 %v7720_v49, %v7720_v49 }
0x1fc3   :  { %v7722_v50 = vpop.eup %7721 }
0x1fc4   :  { %v3547_v51 = vcombine.low %v7720_v49, %v7722_v50  ;;  %v3560_v52 = vpack.c.bf16 %v7722_v50, %v7722_v50 }
0x1fc6   :  { %7448 = vst.sshfl [vmem:[#allocation4 + $0x20] sm:$0x33 pattern:$0x76325410] %v3547_v51  ;;  %3593 = vmatprep.mubr.bf16.mxu0 %v3560_v52 }
0x1fc7   :  { %3594 = vmatmul.mubr.bf16.vlgmr.msra.gmra.mxu0 %v3559_v3 }
0x1fc8   :  { %3709 = vmatpush1.bf16.msra.mxu0 %v9681_v53 }
0x1fc9   :  { %3710 = vmatprep.subr.bf16.mxu0 %v9684_v22 }
0x1fcc   :  { %3711 = vmatpush1.bf16.msra.mxu0 %v9687_v23 }
0x1fcd   :  { %3712 = vmatprep.subr.bf16.mxu0 %v9690_v24 }
0x1fd0   :  { %3713 = vmatpush1.bf16.msra.mxu0 %v9693_v62 }
0x1fd1   :  { %3714 = vmatprep.subr.bf16.mxu0 %v9696_v55 }
0x1fd4   :  { %3715 = vmatpush1.bf16.msra.mxu0 %v9699_v7 }
0x1fd5   :  { %3716 = vmatprep.subr.bf16.mxu0 %v9702_v63 }
0x1fd8   :  { %3717 = vmatpush1.bf16.msra.mxu0 %v9705_v33 }
0x1fd9   :  { %3718 = vmatprep.subr.bf16.mxu0 %v9708_v34 }
0x1fdc   :  { %3719 = vmatpush1.bf16.msra.mxu0 %v9711_v35 }
0x1fdd   :  { %3720 = vmatprep.subr.bf16.mxu0 %v9714_v1 }
0x1fe0   :  { %3721 = vmatpush1.bf16.msra.mxu0 %v9717_v36 }
0x1fe1   :  { %3722 = vmatprep.subr.bf16.mxu0 %v9720_v9 }
0x1fe4   :  { %3723 = vmatpush1.bf16.msra.mxu0 %v9723_v0 }
0x1fe5   :  { %3724 = vmatprep.subr.bf16.mxu0 %v9726_v10 }
0x1fe8   :  { %3725 = vmatpush2.bf16.msra.mxu0 %v9729_v11 }
0x1fe9   :  { %3726 = vmatprep.subr.bf16.mxu0 %v9732_v12 }
0x1fec   :  { %3727 = vmatpush2.bf16.msra.mxu0 %v9735_v38 }
0x1fed   :  { %3728 = vmatprep.subr.bf16.mxu0 %v9738_v41 }
0x1ff0   :  { %3729 = vmatpush2.bf16.msra.mxu0 %v9741_v42 }
0x1ff1   :  { %3730 = vmatprep.subr.bf16.mxu0 %v9744_v45 }
0x1ff4   :  { %3731 = vmatpush2.bf16.msra.mxu0 %v9747_v46 }
0x1ff5   :  { %3732 = vmatprep.subr.bf16.mxu0 %v9750_v37 }
0x1ff8   :  { %3733 = vmatpush2.bf16.msra.mxu0 %v9753_v47 }
0x1ff9   :  { %3734 = vmatprep.subr.bf16.mxu0 %v9756_v25 }
0x1ffc   :  { %3735 = vmatpush2.bf16.msra.mxu0 %v9759_v26 }
0x1ffd   :  { %3736 = vmatprep.subr.bf16.mxu0 %v9762_v27 }
0x2000   :  { %3737 = vmatpush2.bf16.msra.mxu0 %v9765_v4 }
0x2001   :  { %3738 = vmatprep.subr.bf16.mxu0 %v9768_v28 }
0x2004   :  { %3739 = vmatpush2.bf16.msra.mxu0 %v9771_v44 }
0x2005   :  { %3843 = vmatprep.subr.bf16.mxu0 %v9678_v30 }
0x2087   :  { %v3595_v15 = vpop.f32.mrf.mxu0 }
0x2088   :  { %v3604_v16 = vrot.slane %v3595_v15, 6 }
0x2089   :  { %v3597_v17 = vpop.f32.mrf.mxu0 }
0x208a   :  { %v3608_v18 = vadd.f32 %v3604_v16, %v3557_v40  ;;  %v3605_v60 = vrot.slane %v3597_v17, 6 }
0x208b   :  { %v3599_v19 = vpop.f32.mrf.mxu0 }
0x208c   :  { %7723 = vtanh.f32 %v3608_v18  ;;  %v3609_v20 = vadd.f32 %v3605_v60, %v3558_v61  ;;  %v3698_v19 = vld [vmem:[#allocation3 + $0x50] sm:$0xc0] }
0x208d   :  { %v3600_v43 = vpop.f32.mrf.mxu0 }
0x208e   :  { %7725 = vtanh.f32 %v3609_v20 }
0x2099   :  { %v7724_v29 = vpop.eup %7723 }
0x209a   :  { %v3627_v8 = vpack.c.bf16 %v7724_v29, %v7724_v29 }
0x209b   :  { %v7726_v54 = vpop.eup %7725 }
0x209c   :  { %v3614_v5 = vcombine.low %v7724_v29, %v7726_v54  ;;  %v3628_v6 = vpack.c.bf16 %v7726_v54, %v7726_v54  ;;  %v3631_v56 = vrot.slane %v3627_v8, 1  ;;  %v3699_v54 = vld [vmem:[#allocation3 + $0x68] sm:$0xc0] }
0x209e   :  { %v3621_v13 = vrot.slane %v3614_v5, %v8300_v39  ;;  %v3632_v14 = vrot.slane %v3628_v6, 1 }
0x20a0   :  { %v3622_v31 = vcombine.high %v3621_v13, %v3621_v13  ;;  %3667 = vmatprep.mubr.bf16.mxu1 %v3632_v14 }
0x20a1   :  { %3668 = vmatmul.mubr.bf16.vlgmr.msra.gmra.mxu1 %v3631_v56 }
0x20a2   :  { %3624 = vst [vmem:[#allocation4 + $0x24] sm:$0xf] %v3622_v31  ;;  %3783 = vmatpush1.bf16.msra.mxu1 %v9681_v53 }
0x20a3   :  { %3784 = vmatprep.subr.bf16.mxu1 %v9684_v22 }
0x20a6   :  { %3785 = vmatpush1.bf16.msra.mxu1 %v9687_v23 }
0x20a7   :  { %3786 = vmatprep.subr.bf16.mxu1 %v9690_v24 }
0x20aa   :  { %3787 = vmatpush1.bf16.msra.mxu1 %v9693_v62 }
0x20ab   :  { %3788 = vmatprep.subr.bf16.mxu1 %v9696_v55 }
0x20ae   :  { %3789 = vmatpush1.bf16.msra.mxu1 %v9699_v7 }
0x20af   :  { %3790 = vmatprep.subr.bf16.mxu1 %v9702_v63 }
0x20b2   :  { %3791 = vmatpush1.bf16.msra.mxu1 %v9705_v33 }
0x20b3   :  { %3792 = vmatprep.subr.bf16.mxu1 %v9708_v34 }
0x20b6   :  { %3793 = vmatpush1.bf16.msra.mxu1 %v9711_v35 }
0x20b7   :  { %3794 = vmatprep.subr.bf16.mxu1 %v9714_v1 }
0x20ba   :  { %3795 = vmatpush1.bf16.msra.mxu1 %v9717_v36 }
0x20bb   :  { %3796 = vmatprep.subr.bf16.mxu1 %v9720_v9 }
0x20be   :  { %3797 = vmatpush1.bf16.msra.mxu1 %v9723_v0 }
0x20bf   :  { %3798 = vmatprep.subr.bf16.mxu1 %v9726_v10 }
0x20c2   :  { %3799 = vmatpush2.bf16.msra.mxu1 %v9729_v11 }
0x20c3   :  { %3800 = vmatprep.subr.bf16.mxu1 %v9732_v12 }
0x20c6   :  { %3801 = vmatpush2.bf16.msra.mxu1 %v9735_v38 }
0x20c7   :  { %3802 = vmatprep.subr.bf16.mxu1 %v9738_v41 }
0x20ca   :  { %3803 = vmatpush2.bf16.msra.mxu1 %v9741_v42 }
0x20cb   :  { %3804 = vmatprep.subr.bf16.mxu1 %v9744_v45 }
0x20ce   :  { %3805 = vmatpush2.bf16.msra.mxu1 %v9747_v46 }
0x20cf   :  { %3806 = vmatprep.subr.bf16.mxu1 %v9750_v37 }
0x20d2   :  { %3807 = vmatpush2.bf16.msra.mxu1 %v9753_v47 }
0x20d3   :  { %3808 = vmatprep.subr.bf16.mxu1 %v9756_v25 }
0x20d6   :  { %3809 = vmatpush2.bf16.msra.mxu1 %v9759_v26 }
0x20d7   :  { %3810 = vmatprep.subr.bf16.mxu1 %v9762_v27 }
0x20da   :  { %3811 = vmatpush2.bf16.msra.mxu1 %v9765_v4 }
0x20db   :  { %3812 = vmatprep.subr.bf16.mxu1 %v9768_v28 }
0x20de   :  { %3813 = vmatpush2.bf16.msra.mxu1 %v9771_v44 }
0x20df   :  { %3917 = vmatprep.subr.bf16.mxu1 %v9678_v30 }
0x2161   :  { %v3669_v32 = vpop.f32.mrf.mxu1 }
0x2162   :  { %v3678_v57 = vrot.slane %v3669_v32, 4 }
0x2163   :  { %v3671_v59 = vpop.f32.mrf.mxu1 }
0x2164   :  { %v3682_v2 = vadd.f32 %v3678_v57, %v3625_v58  ;;  %v3679_v21 = vrot.slane %v3671_v59, 4 }
0x2165   :  { %v3673_v49 = vpop.f32.mrf.mxu1 }
0x2166   :  { %7727 = vtanh.f32 %v3682_v2  ;;  %v3683_v50 = vadd.f32 %v3679_v21, %v3626_v48  ;;  %v3772_v21 = vld [vmem:[#allocation3 + $0x8] sm:$0x3] }
0x2167   :  { %v3674_v51 = vpop.f32.mrf.mxu1 }
0x2168   :  { %7729 = vtanh.f32 %v3683_v50  ;;  %v3773_v50 = vld [vmem:[#allocation3 + $0x48] sm:$0x3] }
0x2173   :  { %v7728_v52 = vpop.eup %7727 }
0x2174   :  { %v3700_v15 = vpack.c.bf16 %v7728_v52, %v7728_v52 }
0x2175   :  { %v7730_v3 = vpop.eup %7729 }
0x2176   :  { %v3688_v16 = vcombine.high %v7728_v52, %v7730_v3  ;;  %v3701_v40 = vpack.c.bf16 %v7730_v3, %v7730_v3  ;;  %v3704_v18 = vrot.slane %v3700_v15, 2 }
0x2178   :  { %7449 = vst.sshfl [vmem:[#allocation4 + $0x28] sm:$0x33 pattern:$0x76325410] %v3688_v16  ;;  %v3705_v17 = vrot.slane %v3701_v40, 2 }
0x217a   :  { %3740 = vmatprep.mubr.bf16.mxu0 %v3705_v17 }
0x217b   :  { %3741 = vmatmul.mubr.bf16.vlgmr.msra.gmra.mxu0 %v3704_v18 }
0x217c   :  { %3844 = vmatpush1.bf16.msra.mxu0 %v9681_v53 }
0x217d   :  { %3845 = vmatprep.subr.bf16.mxu0 %v9684_v22 }
0x2180   :  { %3846 = vmatpush1.bf16.msra.mxu0 %v9687_v23 }
0x2181   :  { %3847 = vmatprep.subr.bf16.mxu0 %v9690_v24 }
0x2184   :  { %3848 = vmatpush1.bf16.msra.mxu0 %v9693_v62 }
0x2185   :  { %3849 = vmatprep.subr.bf16.mxu0 %v9696_v55 }
0x2188   :  { %3850 = vmatpush1.bf16.msra.mxu0 %v9699_v7 }
0x2189   :  { %3851 = vmatprep.subr.bf16.mxu0 %v9702_v63 }
0x218c   :  { %3852 = vmatpush1.bf16.msra.mxu0 %v9705_v33 }
0x218d   :  { %3853 = vmatprep.subr.bf16.mxu0 %v9708_v34 }
0x2190   :  { %3854 = vmatpush1.bf16.msra.mxu0 %v9711_v35 }
0x2191   :  { %3855 = vmatprep.subr.bf16.mxu0 %v9714_v1 }
0x2194   :  { %3856 = vmatpush1.bf16.msra.mxu0 %v9717_v36 }
0x2195   :  { %3857 = vmatprep.subr.bf16.mxu0 %v9720_v9 }
0x2198   :  { %3858 = vmatpush1.bf16.msra.mxu0 %v9723_v0 }
0x2199   :  { %3859 = vmatprep.subr.bf16.mxu0 %v9726_v10 }
0x219c   :  { %3860 = vmatpush2.bf16.msra.mxu0 %v9729_v11 }
0x219d   :  { %3861 = vmatprep.subr.bf16.mxu0 %v9732_v12 }
0x21a0   :  { %3862 = vmatpush2.bf16.msra.mxu0 %v9735_v38 }
0x21a1   :  { %3863 = vmatprep.subr.bf16.mxu0 %v9738_v41 }
0x21a4   :  { %3864 = vmatpush2.bf16.msra.mxu0 %v9741_v42 }
0x21a5   :  { %3865 = vmatprep.subr.bf16.mxu0 %v9744_v45 }
0x21a8   :  { %3866 = vmatpush2.bf16.msra.mxu0 %v9747_v46 }
0x21a9   :  { %3867 = vmatprep.subr.bf16.mxu0 %v9750_v37 }
0x21ac   :  { %3868 = vmatpush2.bf16.msra.mxu0 %v9753_v47 }
0x21ad   :  { %3869 = vmatprep.subr.bf16.mxu0 %v9756_v25 }
0x21b0   :  { %3870 = vmatpush2.bf16.msra.mxu0 %v9759_v26 }
0x21b1   :  { %3871 = vmatprep.subr.bf16.mxu0 %v9762_v27 }
0x21b4   :  { %3872 = vmatpush2.bf16.msra.mxu0 %v9765_v4 }
0x21b5   :  { %3873 = vmatprep.subr.bf16.mxu0 %v9768_v28 }
0x21b8   :  { %3874 = vmatpush2.bf16.msra.mxu0 %v9771_v44 }
0x21b9   :  { %3990 = vmatprep.subr.bf16.mxu0 %v9678_v30 }
0x223b   :  { %v3742_v60 = vpop.f32.mrf.mxu0 }
0x223c   :  { %v3751_v61 = vrot.slane %v3742_v60, 2 }
0x223d   :  { %v3744_v20 = vpop.f32.mrf.mxu0 }
0x223e   :  { %v3755_v43 = vadd.f32 %v3751_v61, %v3698_v19  ;;  %v3752_v29 = vrot.slane %v3744_v20, 2  ;;  %v3839_v20 = vld [vmem:[#allocation3 + $0x8] sm:$0xc] }
0x223f   :  { %v3746_v8 = vpop.f32.mrf.mxu0 }
0x2240   :  { %7731 = vtanh.f32 %v3755_v43  ;;  %v3756_v5 = vadd.f32 %v3752_v29, %v3699_v54  ;;  %v3840_v8 = vld [vmem:[#allocation3 + $0x48] sm:$0xc] }
0x2241   :  { %v3747_v6 = vpop.f32.mrf.mxu0 }
0x2242   :  { %7733 = vtanh.f32 %v3756_v5 }
0x224d   :  { %v7732_v13 = vpop.eup %7731 }
0x224e   :  { %v3774_v56 = vpack.c.bf16 %v7732_v13, %v7732_v13 }
0x224f   :  { %v7734_v14 = vpop.eup %7733 }
0x2250   :  { %v3761_v31 = vcombine.high %v7732_v13, %v7734_v14  ;;  %v3775_v32 = vpack.c.bf16 %v7734_v14, %v7734_v14  ;;  %v3778_v59 = vrot.slane %v3774_v56, 3 }
0x2252   :  { %v3768_v57 = vrot.slane %v3761_v31, %v8300_v39  ;;  %v3779_v58 = vrot.slane %v3775_v32, 3 }
0x2254   :  { %v3769_v2 = vcombine.high %v3768_v57, %v3768_v57  ;;  %3814 = vmatprep.mubr.bf16.mxu1 %v3779_v58 }
0x2255   :  { %3815 = vmatmul.mubr.bf16.vlgmr.msra.gmra.mxu1 %v3778_v59 }
0x2256   :  { %3771 = vst [vmem:[#allocation4 + $0x2c] sm:$0xf] %v3769_v2  ;;  %3918 = vmatpush1.bf16.msra.mxu1 %v9681_v53 }
0x2257   :  { %3919 = vmatprep.subr.bf16.mxu1 %v9684_v22 }
0x225a   :  { %3920 = vmatpush1.bf16.msra.mxu1 %v9687_v23 }
0x225b   :  { %3921 = vmatprep.subr.bf16.mxu1 %v9690_v24 }
0x225e   :  { %3922 = vmatpush1.bf16.msra.mxu1 %v9693_v62 }
0x225f   :  { %3923 = vmatprep.subr.bf16.mxu1 %v9696_v55 }
0x2262   :  { %3924 = vmatpush1.bf16.msra.mxu1 %v9699_v7 }
0x2263   :  { %3925 = vmatprep.subr.bf16.mxu1 %v9702_v63 }
0x2266   :  { %3926 = vmatpush1.bf16.msra.mxu1 %v9705_v33 }
0x2267   :  { %3927 = vmatprep.subr.bf16.mxu1 %v9708_v34 }
0x226a   :  { %3928 = vmatpush1.bf16.msra.mxu1 %v9711_v35 }
0x226b   :  { %3929 = vmatprep.subr.bf16.mxu1 %v9714_v1 }
0x226e   :  { %3930 = vmatpush1.bf16.msra.mxu1 %v9717_v36 }
0x226f   :  { %3931 = vmatprep.subr.bf16.mxu1 %v9720_v9 }
0x2272   :  { %3932 = vmatpush1.bf16.msra.mxu1 %v9723_v0 }
0x2273   :  { %3933 = vmatprep.subr.bf16.mxu1 %v9726_v10 }
0x2276   :  { %3934 = vmatpush2.bf16.msra.mxu1 %v9729_v11 }
0x2277   :  { %3935 = vmatprep.subr.bf16.mxu1 %v9732_v12 }
0x227a   :  { %3936 = vmatpush2.bf16.msra.mxu1 %v9735_v38 }
0x227b   :  { %3937 = vmatprep.subr.bf16.mxu1 %v9738_v41 }
0x227e   :  { %3938 = vmatpush2.bf16.msra.mxu1 %v9741_v42 }
0x227f   :  { %3939 = vmatprep.subr.bf16.mxu1 %v9744_v45 }
0x2282   :  { %3940 = vmatpush2.bf16.msra.mxu1 %v9747_v46 }
0x2283   :  { %3941 = vmatprep.subr.bf16.mxu1 %v9750_v37 }
0x2286   :  { %3942 = vmatpush2.bf16.msra.mxu1 %v9753_v47 }
0x2287   :  { %3943 = vmatprep.subr.bf16.mxu1 %v9756_v25 }
0x228a   :  { %3944 = vmatpush2.bf16.msra.mxu1 %v9759_v26 }
0x228b   :  { %3945 = vmatprep.subr.bf16.mxu1 %v9762_v27 }
0x228e   :  { %3946 = vmatpush2.bf16.msra.mxu1 %v9765_v4 }
0x228f   :  { %3947 = vmatprep.subr.bf16.mxu1 %v9768_v28 }
0x2292   :  { %3948 = vmatpush2.bf16.msra.mxu1 %v9771_v44 }
0x2293   :  { %4064 = vmatprep.subr.bf16.mxu1 %v9678_v30 }
0x2315   :  { %v3816_v48 = vpop.f32.mrf.mxu1 }
0x2316   :  { %v3823_v49 = vadd.f32 %v3816_v48, %v3772_v21 }
0x2317   :  { %v3818_v51 = vpop.f32.mrf.mxu1 }
0x2318   :  { %v3824_v52 = vadd.f32 %v3818_v51, %v3773_v50  ;;  %7735 = vtanh.f32 %v3823_v49  ;;  %v3907_v50 = vld [vmem:[#allocation3 + $0x8] sm:$0x30] }
0x2319   :  { %v3820_v3 = vpop.f32.mrf.mxu1 }
0x231a   :  { %7737 = vtanh.f32 %v3824_v52 }
0x231b   :  { %v3821_v15 = vpop.f32.mrf.mxu1 }
0x231c   :  { %v3908_v15 = vld [vmem:[#allocation3 + $0x48] sm:$0x30] }
0x2325   :  { %v7736_v16 = vpop.eup %7735 }
0x2326   :  { %v3841_v60 = vpack.c.bf16 %v7736_v16, %v7736_v16 }
0x2327   :  { %v7738_v40 = vpop.eup %7737 }
0x2328   :  { %v3829_v17 = vcombine.low %v7736_v16, %v7738_v40  ;;  %v3842_v18 = vpack.c.bf16 %v7738_v40, %v7738_v40 }
0x232a   :  { %7450 = vst.sshfl [vmem:[#allocation4 + $0x30] sm:$0x33 pattern:$0x76325410] %v3829_v17  ;;  %3875 = vmatprep.mubr.bf16.mxu0 %v3842_v18 }
0x232b   :  { %3876 = vmatmul.mubr.bf16.vlgmr.msra.gmra.mxu0 %v3841_v60 }
0x232c   :  { %3991 = vmatpush1.bf16.msra.mxu0 %v9681_v53 }
0x232d   :  { %3992 = vmatprep.subr.bf16.mxu0 %v9684_v22 }
0x2330   :  { %3993 = vmatpush1.bf16.msra.mxu0 %v9687_v23 }
0x2331   :  { %3994 = vmatprep.subr.bf16.mxu0 %v9690_v24 }
0x2334   :  { %3995 = vmatpush1.bf16.msra.mxu0 %v9693_v62 }
0x2335   :  { %3996 = vmatprep.subr.bf16.mxu0 %v9696_v55 }
0x2338   :  { %3997 = vmatpush1.bf16.msra.mxu0 %v9699_v7 }
0x2339   :  { %3998 = vmatprep.subr.bf16.mxu0 %v9702_v63 }
0x233c   :  { %3999 = vmatpush1.bf16.msra.mxu0 %v9705_v33 }
0x233d   :  { %4000 = vmatprep.subr.bf16.mxu0 %v9708_v34 }
0x2340   :  { %4001 = vmatpush1.bf16.msra.mxu0 %v9711_v35 }
0x2341   :  { %4002 = vmatprep.subr.bf16.mxu0 %v9714_v1 }
0x2344   :  { %4003 = vmatpush1.bf16.msra.mxu0 %v9717_v36 }
0x2345   :  { %4004 = vmatprep.subr.bf16.mxu0 %v9720_v9 }
0x2348   :  { %4005 = vmatpush1.bf16.msra.mxu0 %v9723_v0 }
0x2349   :  { %4006 = vmatprep.subr.bf16.mxu0 %v9726_v10 }
0x234c   :  { %4007 = vmatpush2.bf16.msra.mxu0 %v9729_v11 }
0x234d   :  { %4008 = vmatprep.subr.bf16.mxu0 %v9732_v12 }
0x2350   :  { %4009 = vmatpush2.bf16.msra.mxu0 %v9735_v38 }
0x2351   :  { %4010 = vmatprep.subr.bf16.mxu0 %v9738_v41 }
0x2354   :  { %4011 = vmatpush2.bf16.msra.mxu0 %v9741_v42 }
0x2355   :  { %4012 = vmatprep.subr.bf16.mxu0 %v9744_v45 }
0x2358   :  { %4013 = vmatpush2.bf16.msra.mxu0 %v9747_v46 }
0x2359   :  { %4014 = vmatprep.subr.bf16.mxu0 %v9750_v37 }
0x235c   :  { %4015 = vmatpush2.bf16.msra.mxu0 %v9753_v47 }
0x235d   :  { %4016 = vmatprep.subr.bf16.mxu0 %v9756_v25 }
0x2360   :  { %4017 = vmatpush2.bf16.msra.mxu0 %v9759_v26 }
0x2361   :  { %4018 = vmatprep.subr.bf16.mxu0 %v9762_v27 }
0x2364   :  { %4019 = vmatpush2.bf16.msra.mxu0 %v9765_v4 }
0x2365   :  { %4020 = vmatprep.subr.bf16.mxu0 %v9768_v28 }
0x2368   :  { %4021 = vmatpush2.bf16.msra.mxu0 %v9771_v44 }
0x2369   :  { %4125 = vmatprep.subr.bf16.mxu0 %v9678_v30 }
0x23eb   :  { %v3877_v61 = vpop.f32.mrf.mxu0 }
0x23ec   :  { %v3886_v19 = vrot.slane %v3877_v61, 6 }
0x23ed   :  { %v3879_v43 = vpop.f32.mrf.mxu0 }
0x23ee   :  { %v3890_v29 = vadd.f32 %v3886_v19, %v3839_v20  ;;  %v3887_v54 = vrot.slane %v3879_v43, 6 }
0x23ef   :  { %v3881_v5 = vpop.f32.mrf.mxu0 }
0x23f0   :  { %7739 = vtanh.f32 %v3890_v29  ;;  %v3891_v6 = vadd.f32 %v3887_v54, %v3840_v8  ;;  %v3980_v5 = vld [vmem:[#allocation3 + $0x8] sm:$0xc0] }
0x23f1   :  { %v3882_v13 = vpop.f32.mrf.mxu0 }
0x23f2   :  { %7741 = vtanh.f32 %v3891_v6 }
0x23fd   :  { %v7740_v14 = vpop.eup %7739 }
0x23fe   :  { %v3909_v31 = vpack.c.bf16 %v7740_v14, %v7740_v14 }
0x23ff   :  { %v7742_v56 = vpop.eup %7741 }
0x2400   :  { %v3896_v32 = vcombine.low %v7740_v14, %v7742_v56  ;;  %v3910_v57 = vpack.c.bf16 %v7742_v56, %v7742_v56  ;;  %v3913_v2 = vrot.slane %v3909_v31, 1  ;;  %v3981_v56 = vld [vmem:[#allocation3 + $0x48] sm:$0xc0] }
0x2402   :  { %v3903_v58 = vrot.slane %v3896_v32, %v8300_v39  ;;  %v3914_v59 = vrot.slane %v3910_v57, 1 }
0x2404   :  { %v3904_v21 = vcombine.high %v3903_v58, %v3903_v58  ;;  %3949 = vmatprep.mubr.bf16.mxu1 %v3914_v59 }
0x2405   :  { %3950 = vmatmul.mubr.bf16.vlgmr.msra.gmra.mxu1 %v3913_v2 }
0x2406   :  { %3906 = vst [vmem:[#allocation4 + $0x34] sm:$0xf] %v3904_v21  ;;  %4065 = vmatpush1.bf16.msra.mxu1 %v9681_v53 }
0x2407   :  { %4066 = vmatprep.subr.bf16.mxu1 %v9684_v22 }
0x240a   :  { %4067 = vmatpush1.bf16.msra.mxu1 %v9687_v23 }
0x240b   :  { %4068 = vmatprep.subr.bf16.mxu1 %v9690_v24 }
0x240e   :  { %4069 = vmatpush1.bf16.msra.mxu1 %v9693_v62 }
0x240f   :  { %4070 = vmatprep.subr.bf16.mxu1 %v9696_v55 }
0x2412   :  { %4071 = vmatpush1.bf16.msra.mxu1 %v9699_v7 }
0x2413   :  { %4072 = vmatprep.subr.bf16.mxu1 %v9702_v63 }
0x2416   :  { %4073 = vmatpush1.bf16.msra.mxu1 %v9705_v33 }
0x2417   :  { %4074 = vmatprep.subr.bf16.mxu1 %v9708_v34 }
0x241a   :  { %4075 = vmatpush1.bf16.msra.mxu1 %v9711_v35 }
0x241b   :  { %4076 = vmatprep.subr.bf16.mxu1 %v9714_v1 }
0x241e   :  { %4077 = vmatpush1.bf16.msra.mxu1 %v9717_v36 }
0x241f   :  { %4078 = vmatprep.subr.bf16.mxu1 %v9720_v9 }
0x2422   :  { %4079 = vmatpush1.bf16.msra.mxu1 %v9723_v0 }
0x2423   :  { %4080 = vmatprep.subr.bf16.mxu1 %v9726_v10 }
0x2426   :  { %4081 = vmatpush2.bf16.msra.mxu1 %v9729_v11 }
0x2427   :  { %4082 = vmatprep.subr.bf16.mxu1 %v9732_v12 }
0x242a   :  { %4083 = vmatpush2.bf16.msra.mxu1 %v9735_v38 }
0x242b   :  { %4084 = vmatprep.subr.bf16.mxu1 %v9738_v41 }
0x242e   :  { %4085 = vmatpush2.bf16.msra.mxu1 %v9741_v42 }
0x242f   :  { %4086 = vmatprep.subr.bf16.mxu1 %v9744_v45 }
0x2432   :  { %4087 = vmatpush2.bf16.msra.mxu1 %v9747_v46 }
0x2433   :  { %4088 = vmatprep.subr.bf16.mxu1 %v9750_v37 }
0x2436   :  { %4089 = vmatpush2.bf16.msra.mxu1 %v9753_v47 }
0x2437   :  { %4090 = vmatprep.subr.bf16.mxu1 %v9756_v25 }
0x243a   :  { %4091 = vmatpush2.bf16.msra.mxu1 %v9759_v26 }
0x243b   :  { %4092 = vmatprep.subr.bf16.mxu1 %v9762_v27 }
0x243e   :  { %4093 = vmatpush2.bf16.msra.mxu1 %v9765_v4 }
0x243f   :  { %4094 = vmatprep.subr.bf16.mxu1 %v9768_v28 }
0x2442   :  { %4095 = vmatpush2.bf16.msra.mxu1 %v9771_v44 }
0x2443   :  { %4199 = vmatprep.subr.bf16.mxu1 %v9678_v30 }
0x24c5   :  { %v3951_v48 = vpop.f32.mrf.mxu1 }
0x24c6   :  { %v3960_v49 = vrot.slane %v3951_v48, 4 }
0x24c7   :  { %v3953_v51 = vpop.f32.mrf.mxu1 }
0x24c8   :  { %v3964_v52 = vadd.f32 %v3960_v49, %v3907_v50  ;;  %v3961_v3 = vrot.slane %v3953_v51, 4 }
0x24c9   :  { %v3955_v16 = vpop.f32.mrf.mxu1 }
0x24ca   :  { %7743 = vtanh.f32 %v3964_v52  ;;  %v3965_v40 = vadd.f32 %v3961_v3, %v3908_v15  ;;  %v10121_v52 = vld [vmem:[#allocation11 + $0xe4] ss:$8 sps:$4 sm:$0xff]   ;;  %v10124_v3 = vld [vmem:[#allocation11 + $0xe0] ss:$8 sps:$4 sm:$0xff]   ;;  %v10127_v15 = vld [vmem:[#allocation11 + $0xd4] ss:$8 sps:$4 sm:$0xff]  }
0x24cb   :  { %v3956_v17 = vpop.f32.mrf.mxu1  ;;  %v10130_v16 = vld [vmem:[#allocation11 + $0xd0] ss:$8 sps:$4 sm:$0xff]  }
0x24cc   :  { %7745 = vtanh.f32 %v3965_v40  ;;  %v10133_v40 = vld [vmem:[#allocation11 + $0xc4] ss:$8 sps:$4 sm:$0xff]   ;;  %v10136_v17 = vld [vmem:[#allocation11 + $0xc0] ss:$8 sps:$4 sm:$0xff]  }
0x24d7   :  { %v7744_v18 = vpop.eup %7743 }
0x24d8   :  { %v3982_v61 = vpack.c.bf16 %v7744_v18, %v7744_v18 }
0x24d9   :  { %v7746_v60 = vpop.eup %7745 }
0x24da   :  { %v3970_v19 = vcombine.high %v7744_v18, %v7746_v60  ;;  %v3983_v20 = vpack.c.bf16 %v7746_v60, %v7746_v60  ;;  %v3986_v29 = vrot.slane %v3982_v61, 2  ;;  %v10139_v18 = vld [vmem:[#allocation11 + $0xb4] ss:$8 sps:$4 sm:$0xff]   ;;  %v10142_v60 = vld [vmem:[#allocation11 + $0xb0] ss:$8 sps:$4 sm:$0xff]  }
0x24db   :  { %v10145_v61 = vld [vmem:[#allocation11 + $0xa4] ss:$8 sps:$4 sm:$0xff]  }
0x24dc   :  { %7451 = vst.sshfl [vmem:[#allocation4 + $0x38] sm:$0x33 pattern:$0x76325410] %v3970_v19  ;;  %v3987_v43 = vrot.slane %v3983_v20, 2 }
0x24dd   :  { %v10148_v19 = vld [vmem:[#allocation11 + $0xa0] ss:$8 sps:$4 sm:$0xff]   ;;  %v10151_v20 = vld [vmem:[#allocation11 + $0x94] ss:$8 sps:$4 sm:$0xff]  }
0x24de   :  { %4022 = vmatprep.mubr.bf16.mxu0 %v3987_v43  ;;  %v10154_v43 = vld [vmem:[#allocation11 + $0x90] ss:$8 sps:$4 sm:$0xff]  }
0x24df   :  { %4023 = vmatmul.mubr.bf16.vlgmr.msra.gmra.mxu0 %v3986_v29  ;;  %v10157_v29 = vld [vmem:[#allocation11 + $0x84] ss:$8 sps:$4 sm:$0xff]  }
0x24e0   :  { %4126 = vmatpush1.bf16.msra.mxu0 %v9681_v53 }
0x24e1   :  { %4127 = vmatprep.subr.bf16.mxu0 %v9684_v22 }
0x24e4   :  { %4128 = vmatpush1.bf16.msra.mxu0 %v9687_v23 }
0x24e5   :  { %4129 = vmatprep.subr.bf16.mxu0 %v9690_v24 }
0x24e8   :  { %4130 = vmatpush1.bf16.msra.mxu0 %v9693_v62 }
0x24e9   :  { %4131 = vmatprep.subr.bf16.mxu0 %v9696_v55 }
0x24ec   :  { %4132 = vmatpush1.bf16.msra.mxu0 %v9699_v7 }
0x24ed   :  { %4133 = vmatprep.subr.bf16.mxu0 %v9702_v63 }
0x24f0   :  { %4134 = vmatpush1.bf16.msra.mxu0 %v9705_v33 }
0x24f1   :  { %4135 = vmatprep.subr.bf16.mxu0 %v9708_v34 }
0x24f4   :  { %4136 = vmatpush1.bf16.msra.mxu0 %v9711_v35 }
0x24f5   :  { %4137 = vmatprep.subr.bf16.mxu0 %v9714_v1 }
0x24f8   :  { %4138 = vmatpush1.bf16.msra.mxu0 %v9717_v36 }
0x24f9   :  { %4139 = vmatprep.subr.bf16.mxu0 %v9720_v9 }
0x24fc   :  { %4140 = vmatpush1.bf16.msra.mxu0 %v9723_v0 }
0x24fd   :  { %4141 = vmatprep.subr.bf16.mxu0 %v9726_v10 }
0x2500   :  { %4142 = vmatpush2.bf16.msra.mxu0 %v9729_v11 }
0x2501   :  { %4143 = vmatprep.subr.bf16.mxu0 %v9732_v12 }
0x2504   :  { %4144 = vmatpush2.bf16.msra.mxu0 %v9735_v38 }
0x2505   :  { %4145 = vmatprep.subr.bf16.mxu0 %v9738_v41 }
0x2508   :  { %4146 = vmatpush2.bf16.msra.mxu0 %v9741_v42 }
0x2509   :  { %4147 = vmatprep.subr.bf16.mxu0 %v9744_v45 }
0x250c   :  { %4148 = vmatpush2.bf16.msra.mxu0 %v9747_v46 }
0x250d   :  { %4149 = vmatprep.subr.bf16.mxu0 %v9750_v37 }
0x2510   :  { %4150 = vmatpush2.bf16.msra.mxu0 %v9753_v47 }
0x2511   :  { %4151 = vmatprep.subr.bf16.mxu0 %v9756_v25 }
0x2514   :  { %4152 = vmatpush2.bf16.msra.mxu0 %v9759_v26 }
0x2515   :  { %4153 = vmatprep.subr.bf16.mxu0 %v9762_v27 }
0x2518   :  { %4154 = vmatpush2.bf16.msra.mxu0 %v9765_v4 }
0x2519   :  { %4155 = vmatprep.subr.bf16.mxu0 %v9768_v28 }
0x251c   :  { %4156 = vmatpush2.bf16.msra.mxu0 %v9771_v44 }
0x251d   :  { %4272 = vmatprep.subr.bf16.mxu0 %v9678_v30 }
0x259f   :  { %v4024_v54 = vpop.f32.mrf.mxu0 }
0x25a0   :  { %v4033_v8 = vrot.slane %v4024_v54, 2  ;;  %v10160_v54 = vld [vmem:[#allocation11 + $0x80] ss:$8 sps:$4 sm:$0xff]  }
0x25a1   :  { %v4026_v6 = vpop.f32.mrf.mxu0 }
0x25a2   :  { %v4037_v13 = vadd.f32 %v4033_v8, %v3980_v5  ;;  %v4034_v14 = vrot.slane %v4026_v6, 2  ;;  %v4121_v6 = vld [vmem:[#allocation3 + $0x40] sm:$0xc] }
0x25a3   :  { %v4028_v31 = vpop.f32.mrf.mxu0 }
0x25a4   :  { %7747 = vtanh.f32 %v4037_v13  ;;  %v4038_v32 = vadd.f32 %v4034_v14, %v3981_v56  ;;  %v4122_v31 = vld [vmem:[#allocation3 + $0x20] sm:$0xc] }
0x25a5   :  { %v4029_v57 = vpop.f32.mrf.mxu0 }
0x25a6   :  { %7749 = vtanh.f32 %v4038_v32 }
0x25b1   :  { %v7748_v58 = vpop.eup %7747 }
0x25b2   :  { %v4056_v2 = vpack.c.bf16 %v7748_v58, %v7748_v58 }
0x25b3   :  { %v7750_v59 = vpop.eup %7749 }
0x25b4   :  { %v4043_v21 = vcombine.high %v7748_v58, %v7750_v59  ;;  %v4057_v48 = vpack.c.bf16 %v7750_v59, %v7750_v59  ;;  %v4060_v50 = vrot.slane %v4056_v2, 3 }
0x25b6   :  { %v4050_v49 = vrot.slane %v4043_v21, %v8300_v39  ;;  %v4061_v30 = vrot.slane %v4057_v48, 3 }
0x25b8   :  { %v4051_v51 = vcombine.high %v4050_v49, %v4050_v49  ;;  %4096 = vmatprep.mubr.bf16.mxu1 %v4061_v30 }
0x25b9   :  { %4097 = vmatmul.mubr.bf16.vlgmr.msra.gmra.mxu1 %v4060_v50 }
0x25ba   :  { %4053 = vst [vmem:[#allocation4 + $0x3c] sm:$0xf] %v4051_v51  ;;  %4200 = vmatpush1.bf16.msra.mxu1 %v9681_v53  ;;  %v10067_v53 = vld [vmem:[#allocation11 + $0x74] ss:$8 sps:$4 sm:$0xff]  }
0x25bb   :  { %4201 = vmatprep.subr.bf16.mxu1 %v9684_v22  ;;  %v4054_v22 = vld [vmem:[#allocation3 + $0x40] sm:$0x3] }
0x25be   :  { %4202 = vmatpush1.bf16.msra.mxu1 %v9687_v23 }
0x25bf   :  { %4203 = vmatprep.subr.bf16.mxu1 %v9690_v24 }
0x25c2   :  { %4204 = vmatpush1.bf16.msra.mxu1 %v9693_v62  ;;  %v4055_v62 = vld [vmem:[#allocation3 + $0x20] sm:$0x3] }
0x25c3   :  { %4205 = vmatprep.subr.bf16.mxu1 %v9696_v55 }
0x25c6   :  { %4206 = vmatpush1.bf16.msra.mxu1 %v9699_v7 }
0x25c7   :  { %4207 = vmatprep.subr.bf16.mxu1 %v9702_v63 }
0x25ca   :  { %4208 = vmatpush1.bf16.msra.mxu1 %v9705_v33 }
0x25cb   :  { %4209 = vmatprep.subr.bf16.mxu1 %v9708_v34 }
0x25ce   :  { %4210 = vmatpush1.bf16.msra.mxu1 %v9711_v35 }
0x25cf   :  { %4211 = vmatprep.subr.bf16.mxu1 %v9714_v1 }
0x25d2   :  { %4212 = vmatpush1.bf16.msra.mxu1 %v9717_v36 }
0x25d3   :  { %4213 = vmatprep.subr.bf16.mxu1 %v9720_v9 }
0x25d6   :  { %4214 = vmatpush1.bf16.msra.mxu1 %v9723_v0  ;;  %v10070_v0 = vld [vmem:[#allocation11 + $0x70] ss:$8 sps:$4 sm:$0xff]  }
0x25d7   :  { %4215 = vmatprep.subr.bf16.mxu1 %v9726_v10  ;;  %v10073_v10 = vld [vmem:[#allocation11 + $0x64] ss:$8 sps:$4 sm:$0xff]  }
0x25da   :  { %4216 = vmatpush2.bf16.msra.mxu1 %v9729_v11  ;;  %v10076_v11 = vld [vmem:[#allocation11 + $0x60] ss:$8 sps:$4 sm:$0xff]  }
0x25db   :  { %4217 = vmatprep.subr.bf16.mxu1 %v9732_v12  ;;  %v10079_v12 = vld [vmem:[#allocation11 + $0x54] ss:$8 sps:$4 sm:$0xff]  }
0x25de   :  { %4218 = vmatpush2.bf16.msra.mxu1 %v9735_v38  ;;  %v10082_v38 = vld [vmem:[#allocation11 + $0x50] ss:$8 sps:$4 sm:$0xff]  }
0x25df   :  { %4219 = vmatprep.subr.bf16.mxu1 %v9738_v41  ;;  %v10085_v41 = vld [vmem:[#allocation11 + $0x44] ss:$8 sps:$4 sm:$0xff]  }
0x25e2   :  { %4220 = vmatpush2.bf16.msra.mxu1 %v9741_v42  ;;  %v10088_v42 = vld [vmem:[#allocation11 + $0x40] ss:$8 sps:$4 sm:$0xff]  }
0x25e3   :  { %4221 = vmatprep.subr.bf16.mxu1 %v9744_v45  ;;  %v10091_v45 = vld [vmem:[#allocation11 + $0x34] ss:$8 sps:$4 sm:$0xff]  }
0x25e6   :  { %4222 = vmatpush2.bf16.msra.mxu1 %v9747_v46  ;;  %v10094_v46 = vld [vmem:[#allocation11 + $0x30] ss:$8 sps:$4 sm:$0xff]  }
0x25e7   :  { %4223 = vmatprep.subr.bf16.mxu1 %v9750_v37  ;;  %v10097_v37 = vld [vmem:[#allocation11 + $0x24] ss:$8 sps:$4 sm:$0xff]  }
0x25ea   :  { %4224 = vmatpush2.bf16.msra.mxu1 %v9753_v47  ;;  %v10100_v47 = vld [vmem:[#allocation11 + $0x20] ss:$8 sps:$4 sm:$0xff]  }
0x25eb   :  { %4225 = vmatprep.subr.bf16.mxu1 %v9756_v25  ;;  %v10103_v25 = vld [vmem:[#allocation11 + $0x14] ss:$8 sps:$4 sm:$0xff]  }
0x25ee   :  { %4226 = vmatpush2.bf16.msra.mxu1 %v9759_v26  ;;  %v10106_v26 = vld [vmem:[#allocation11 + $0x10] ss:$8 sps:$4 sm:$0xff]  }
0x25ef   :  { %4227 = vmatprep.subr.bf16.mxu1 %v9762_v27  ;;  %v10109_v27 = vld [vmem:[#allocation11 + $0x4] ss:$8 sps:$4 sm:$0xff]  }
0x25f2   :  { %4228 = vmatpush2.bf16.msra.mxu1 %v9765_v4  ;;  %v10112_v4 = vld [vmem:[#allocation11] ss:$8 sps:$4 sm:$0xff]  }
0x25f3   :  { %4229 = vmatprep.subr.bf16.mxu1 %v9768_v28  ;;  %v10115_v28 = vld [vmem:[#allocation11 + $0xf4] ss:$8 sps:$4 sm:$0xff]  }
0x25f6   :  { %4230 = vmatpush2.bf16.msra.mxu1 %v9771_v44  ;;  %v10118_v44 = vld [vmem:[#allocation11 + $0xf0] ss:$8 sps:$4 sm:$0xff]  }
0x25f7   :  { %4346 = vmatprep.subr.bf16.mxu1 %v10067_v53 }
0x2679   :  { %v4098_v23 = vpop.f32.mrf.mxu1 }
0x267a   :  { %v4105_v24 = vadd.f32 %v4098_v23, %v4054_v22 }
0x267b   :  { %v4100_v55 = vpop.f32.mrf.mxu1 }
0x267c   :  { %v4106_v7 = vadd.f32 %v4100_v55, %v4055_v62  ;;  %7751 = vtanh.f32 %v4105_v24  ;;  %v4189_v62 = vld [vmem:[#allocation3 + $0x40] sm:$0x30] }
0x267d   :  { %v4102_v63 = vpop.f32.mrf.mxu1 }
0x267e   :  { %7753 = vtanh.f32 %v4106_v7 }
0x267f   :  { %v4103_v33 = vpop.f32.mrf.mxu1 }
0x2680   :  { %v4190_v33 = vld [vmem:[#allocation3 + $0x20] sm:$0x30] }
0x2689   :  { %v7752_v34 = vpop.eup %7751 }
0x268a   :  { %v4123_v9 = vpack.c.bf16 %v7752_v34, %v7752_v34 }
0x268b   :  { %v7754_v35 = vpop.eup %7753 }
0x268c   :  { %v4111_v1 = vcombine.low %v7752_v34, %v7754_v35  ;;  %v4124_v36 = vpack.c.bf16 %v7754_v35, %v7754_v35 }
0x268e   :  { %7452 = vst.sshfl [vmem:[#allocation4 + $0x40] sm:$0x33 pattern:$0x76325410] %v4111_v1  ;;  %4157 = vmatprep.mubr.bf16.mxu0 %v4124_v36 }
0x268f   :  { %4158 = vmatmul.mubr.bf16.vlgmr.msra.gmra.mxu0 %v4123_v9 }
0x2690   :  { %4273 = vmatpush1.bf16.msra.mxu0 %v10070_v0 }
0x2691   :  { %4274 = vmatprep.subr.bf16.mxu0 %v10073_v10 }
0x2694   :  { %4275 = vmatpush1.bf16.msra.mxu0 %v10076_v11 }
0x2695   :  { %4276 = vmatprep.subr.bf16.mxu0 %v10079_v12 }
0x2698   :  { %4277 = vmatpush1.bf16.msra.mxu0 %v10082_v38 }
0x2699   :  { %4278 = vmatprep.subr.bf16.mxu0 %v10085_v41 }
0x269c   :  { %4279 = vmatpush1.bf16.msra.mxu0 %v10088_v42 }
0x269d   :  { %4280 = vmatprep.subr.bf16.mxu0 %v10091_v45 }
0x26a0   :  { %4281 = vmatpush1.bf16.msra.mxu0 %v10094_v46 }
0x26a1   :  { %4282 = vmatprep.subr.bf16.mxu0 %v10097_v37 }
0x26a4   :  { %4283 = vmatpush1.bf16.msra.mxu0 %v10100_v47 }
0x26a5   :  { %4284 = vmatprep.subr.bf16.mxu0 %v10103_v25 }
0x26a8   :  { %4285 = vmatpush1.bf16.msra.mxu0 %v10106_v26 }
0x26a9   :  { %4286 = vmatprep.subr.bf16.mxu0 %v10109_v27 }
0x26ac   :  { %4287 = vmatpush1.bf16.msra.mxu0 %v10112_v4 }
0x26ad   :  { %4288 = vmatprep.subr.bf16.mxu0 %v10115_v28 }
0x26b0   :  { %4289 = vmatpush2.bf16.msra.mxu0 %v10118_v44 }
0x26b1   :  { %4290 = vmatprep.subr.bf16.mxu0 %v10121_v52 }
0x26b4   :  { %4291 = vmatpush2.bf16.msra.mxu0 %v10124_v3 }
0x26b5   :  { %4292 = vmatprep.subr.bf16.mxu0 %v10127_v15 }
0x26b8   :  { %4293 = vmatpush2.bf16.msra.mxu0 %v10130_v16 }
0x26b9   :  { %4294 = vmatprep.subr.bf16.mxu0 %v10133_v40 }
0x26bc   :  { %4295 = vmatpush2.bf16.msra.mxu0 %v10136_v17 }
0x26bd   :  { %4296 = vmatprep.subr.bf16.mxu0 %v10139_v18 }
0x26c0   :  { %4297 = vmatpush2.bf16.msra.mxu0 %v10142_v60 }
0x26c1   :  { %4298 = vmatprep.subr.bf16.mxu0 %v10145_v61 }
0x26c4   :  { %4299 = vmatpush2.bf16.msra.mxu0 %v10148_v19 }
0x26c5   :  { %4300 = vmatprep.subr.bf16.mxu0 %v10151_v20 }
0x26c8   :  { %4301 = vmatpush2.bf16.msra.mxu0 %v10154_v43 }
0x26c9   :  { %4302 = vmatprep.subr.bf16.mxu0 %v10157_v29 }
0x26cc   :  { %4303 = vmatpush2.bf16.msra.mxu0 %v10160_v54 }
0x26cd   :  { %4407 = vmatprep.subr.bf16.mxu0 %v10067_v53 }
0x274f   :  { %v4159_v8 = vpop.f32.mrf.mxu0 }
0x2750   :  { %v4168_v5 = vrot.slane %v4159_v8, 6 }
0x2751   :  { %v4161_v13 = vpop.f32.mrf.mxu0 }
0x2752   :  { %v4172_v14 = vadd.f32 %v4168_v5, %v4121_v6  ;;  %v4169_v56 = vrot.slane %v4161_v13, 6 }
0x2753   :  { %v4163_v32 = vpop.f32.mrf.mxu0 }
0x2754   :  { %7755 = vtanh.f32 %v4172_v14  ;;  %v4173_v57 = vadd.f32 %v4169_v56, %v4122_v31  ;;  %v4262_v32 = vld [vmem:[#allocation3 + $0x40] sm:$0xc0] }
0x2755   :  { %v4164_v58 = vpop.f32.mrf.mxu0 }
0x2756   :  { %7757 = vtanh.f32 %v4173_v57 }
0x2761   :  { %v7756_v59 = vpop.eup %7755 }
0x2762   :  { %v4191_v21 = vpack.c.bf16 %v7756_v59, %v7756_v59 }
0x2763   :  { %v7758_v2 = vpop.eup %7757 }
0x2764   :  { %v4178_v48 = vcombine.low %v7756_v59, %v7758_v2  ;;  %v4192_v49 = vpack.c.bf16 %v7758_v2, %v7758_v2  ;;  %v4195_v51 = vrot.slane %v4191_v21, 1  ;;  %v4263_v2 = vld [vmem:[#allocation3 + $0x20] sm:$0xc0] }
0x2766   :  { %v4185_v30 = vrot.slane %v4178_v48, %v8300_v39  ;;  %v4196_v50 = vrot.slane %v4192_v49, 1 }
0x2768   :  { %v4186_v22 = vcombine.high %v4185_v30, %v4185_v30  ;;  %4231 = vmatprep.mubr.bf16.mxu1 %v4196_v50 }
0x2769   :  { %4232 = vmatmul.mubr.bf16.vlgmr.msra.gmra.mxu1 %v4195_v51 }
0x276a   :  { %4188 = vst [vmem:[#allocation4 + $0x44] sm:$0xf] %v4186_v22  ;;  %4347 = vmatpush1.bf16.msra.mxu1 %v10070_v0 }
0x276b   :  { %4348 = vmatprep.subr.bf16.mxu1 %v10073_v10 }
0x276e   :  { %4349 = vmatpush1.bf16.msra.mxu1 %v10076_v11 }
0x276f   :  { %4350 = vmatprep.subr.bf16.mxu1 %v10079_v12 }
0x2772   :  { %4351 = vmatpush1.bf16.msra.mxu1 %v10082_v38 }
0x2773   :  { %4352 = vmatprep.subr.bf16.mxu1 %v10085_v41 }
0x2776   :  { %4353 = vmatpush1.bf16.msra.mxu1 %v10088_v42 }
0x2777   :  { %4354 = vmatprep.subr.bf16.mxu1 %v10091_v45 }
0x277a   :  { %4355 = vmatpush1.bf16.msra.mxu1 %v10094_v46 }
0x277b   :  { %4356 = vmatprep.subr.bf16.mxu1 %v10097_v37 }
0x277e   :  { %4357 = vmatpush1.bf16.msra.mxu1 %v10100_v47 }
0x277f   :  { %4358 = vmatprep.subr.bf16.mxu1 %v10103_v25 }
0x2782   :  { %4359 = vmatpush1.bf16.msra.mxu1 %v10106_v26 }
0x2783   :  { %4360 = vmatprep.subr.bf16.mxu1 %v10109_v27 }
0x2786   :  { %4361 = vmatpush1.bf16.msra.mxu1 %v10112_v4 }
0x2787   :  { %4362 = vmatprep.subr.bf16.mxu1 %v10115_v28 }
0x278a   :  { %4363 = vmatpush2.bf16.msra.mxu1 %v10118_v44 }
0x278b   :  { %4364 = vmatprep.subr.bf16.mxu1 %v10121_v52 }
0x278e   :  { %4365 = vmatpush2.bf16.msra.mxu1 %v10124_v3 }
0x278f   :  { %4366 = vmatprep.subr.bf16.mxu1 %v10127_v15 }
0x2792   :  { %4367 = vmatpush2.bf16.msra.mxu1 %v10130_v16 }
0x2793   :  { %4368 = vmatprep.subr.bf16.mxu1 %v10133_v40 }
0x2796   :  { %4369 = vmatpush2.bf16.msra.mxu1 %v10136_v17 }
0x2797   :  { %4370 = vmatprep.subr.bf16.mxu1 %v10139_v18 }
0x279a   :  { %4371 = vmatpush2.bf16.msra.mxu1 %v10142_v60 }
0x279b   :  { %4372 = vmatprep.subr.bf16.mxu1 %v10145_v61 }
0x279e   :  { %4373 = vmatpush2.bf16.msra.mxu1 %v10148_v19 }
0x279f   :  { %4374 = vmatprep.subr.bf16.mxu1 %v10151_v20 }
0x27a2   :  { %4375 = vmatpush2.bf16.msra.mxu1 %v10154_v43 }
0x27a3   :  { %4376 = vmatprep.subr.bf16.mxu1 %v10157_v29 }
0x27a6   :  { %4377 = vmatpush2.bf16.msra.mxu1 %v10160_v54 }
0x27a7   :  { %4481 = vmatprep.subr.bf16.mxu1 %v10067_v53 }
0x2829   :  { %v4233_v23 = vpop.f32.mrf.mxu1 }
0x282a   :  { %v4242_v24 = vrot.slane %v4233_v23, 4 }
0x282b   :  { %v4235_v55 = vpop.f32.mrf.mxu1 }
0x282c   :  { %v4246_v7 = vadd.f32 %v4242_v24, %v4189_v62  ;;  %v4243_v63 = vrot.slane %v4235_v55, 4 }
0x282d   :  { %v4237_v34 = vpop.f32.mrf.mxu1 }
0x282e   :  { %7759 = vtanh.f32 %v4246_v7  ;;  %v4247_v35 = vadd.f32 %v4243_v63, %v4190_v33  ;;  %v4336_v63 = vld [vmem:[#allocation3 + $0x10] sm:$0x3] }
0x282f   :  { %v4238_v1 = vpop.f32.mrf.mxu1 }
0x2830   :  { %7761 = vtanh.f32 %v4247_v35  ;;  %v4337_v35 = vld [vmem:[#allocation3 + $0x38] sm:$0x3] }
0x283b   :  { %v7760_v36 = vpop.eup %7759 }
0x283c   :  { %v4264_v8 = vpack.c.bf16 %v7760_v36, %v7760_v36 }
0x283d   :  { %v7762_v9 = vpop.eup %7761 }
0x283e   :  { %v4252_v5 = vcombine.high %v7760_v36, %v7762_v9  ;;  %v4265_v6 = vpack.c.bf16 %v7762_v9, %v7762_v9  ;;  %v4268_v14 = vrot.slane %v4264_v8, 2 }
0x2840   :  { %7453 = vst.sshfl [vmem:[#allocation4 + $0x48] sm:$0x33 pattern:$0x76325410] %v4252_v5  ;;  %v4269_v13 = vrot.slane %v4265_v6, 2 }
0x2842   :  { %4304 = vmatprep.mubr.bf16.mxu0 %v4269_v13 }
0x2843   :  { %4305 = vmatmul.mubr.bf16.vlgmr.msra.gmra.mxu0 %v4268_v14 }
0x2844   :  { %4408 = vmatpush1.bf16.msra.mxu0 %v10070_v0 }
0x2845   :  { %4409 = vmatprep.subr.bf16.mxu0 %v10073_v10 }
0x2848   :  { %4410 = vmatpush1.bf16.msra.mxu0 %v10076_v11 }
0x2849   :  { %4411 = vmatprep.subr.bf16.mxu0 %v10079_v12 }
0x284c   :  { %4412 = vmatpush1.bf16.msra.mxu0 %v10082_v38 }
0x284d   :  { %4413 = vmatprep.subr.bf16.mxu0 %v10085_v41 }
0x2850   :  { %4414 = vmatpush1.bf16.msra.mxu0 %v10088_v42 }
0x2851   :  { %4415 = vmatprep.subr.bf16.mxu0 %v10091_v45 }
0x2854   :  { %4416 = vmatpush1.bf16.msra.mxu0 %v10094_v46 }
0x2855   :  { %4417 = vmatprep.subr.bf16.mxu0 %v10097_v37 }
0x2858   :  { %4418 = vmatpush1.bf16.msra.mxu0 %v10100_v47 }
0x2859   :  { %4419 = vmatprep.subr.bf16.mxu0 %v10103_v25 }
0x285c   :  { %4420 = vmatpush1.bf16.msra.mxu0 %v10106_v26 }
0x285d   :  { %4421 = vmatprep.subr.bf16.mxu0 %v10109_v27 }
0x2860   :  { %4422 = vmatpush1.bf16.msra.mxu0 %v10112_v4 }
0x2861   :  { %4423 = vmatprep.subr.bf16.mxu0 %v10115_v28 }
0x2864   :  { %4424 = vmatpush2.bf16.msra.mxu0 %v10118_v44 }
0x2865   :  { %4425 = vmatprep.subr.bf16.mxu0 %v10121_v52 }
0x2868   :  { %4426 = vmatpush2.bf16.msra.mxu0 %v10124_v3 }
0x2869   :  { %4427 = vmatprep.subr.bf16.mxu0 %v10127_v15 }
0x286c   :  { %4428 = vmatpush2.bf16.msra.mxu0 %v10130_v16 }
0x286d   :  { %4429 = vmatprep.subr.bf16.mxu0 %v10133_v40 }
0x2870   :  { %4430 = vmatpush2.bf16.msra.mxu0 %v10136_v17 }
0x2871   :  { %4431 = vmatprep.subr.bf16.mxu0 %v10139_v18 }
0x2874   :  { %4432 = vmatpush2.bf16.msra.mxu0 %v10142_v60 }
0x2875   :  { %4433 = vmatprep.subr.bf16.mxu0 %v10145_v61 }
0x2878   :  { %4434 = vmatpush2.bf16.msra.mxu0 %v10148_v19 }
0x2879   :  { %4435 = vmatprep.subr.bf16.mxu0 %v10151_v20 }
0x287c   :  { %4436 = vmatpush2.bf16.msra.mxu0 %v10154_v43 }
0x287d   :  { %4437 = vmatprep.subr.bf16.mxu0 %v10157_v29 }
0x2880   :  { %4438 = vmatpush2.bf16.msra.mxu0 %v10160_v54 }
0x2881   :  { %4554 = vmatprep.subr.bf16.mxu0 %v10067_v53 }
0x2903   :  { %v4306_v56 = vpop.f32.mrf.mxu0 }
0x2904   :  { %v4315_v31 = vrot.slane %v4306_v56, 2 }
0x2905   :  { %v4308_v57 = vpop.f32.mrf.mxu0 }
0x2906   :  { %v4319_v58 = vadd.f32 %v4315_v31, %v4262_v32  ;;  %v4316_v59 = vrot.slane %v4308_v57, 2  ;;  %v4403_v57 = vld [vmem:[#allocation3 + $0x10] sm:$0xc] }
0x2907   :  { %v4310_v21 = vpop.f32.mrf.mxu0 }
0x2908   :  { %7763 = vtanh.f32 %v4319_v58  ;;  %v4320_v48 = vadd.f32 %v4316_v59, %v4263_v2  ;;  %v4404_v21 = vld [vmem:[#allocation3 + $0x38] sm:$0xc] }
0x2909   :  { %v4311_v49 = vpop.f32.mrf.mxu0 }
0x290a   :  { %7765 = vtanh.f32 %v4320_v48 }
0x2915   :  { %v7764_v30 = vpop.eup %7763 }
0x2916   :  { %v4338_v51 = vpack.c.bf16 %v7764_v30, %v7764_v30 }
0x2917   :  { %v7766_v50 = vpop.eup %7765 }
0x2918   :  { %v4325_v22 = vcombine.high %v7764_v30, %v7766_v50  ;;  %v4339_v23 = vpack.c.bf16 %v7766_v50, %v7766_v50  ;;  %v4342_v55 = vrot.slane %v4338_v51, 3 }
0x291a   :  { %v4332_v24 = vrot.slane %v4325_v22, %v8300_v39  ;;  %v4343_v62 = vrot.slane %v4339_v23, 3 }
0x291c   :  { %v4333_v7 = vcombine.high %v4332_v24, %v4332_v24  ;;  %4378 = vmatprep.mubr.bf16.mxu1 %v4343_v62 }
0x291d   :  { %4379 = vmatmul.mubr.bf16.vlgmr.msra.gmra.mxu1 %v4342_v55 }
0x291e   :  { %4335 = vst [vmem:[#allocation4 + $0x4c] sm:$0xf] %v4333_v7  ;;  %4482 = vmatpush1.bf16.msra.mxu1 %v10070_v0 }
0x291f   :  { %4483 = vmatprep.subr.bf16.mxu1 %v10073_v10 }
0x2922   :  { %4484 = vmatpush1.bf16.msra.mxu1 %v10076_v11 }
0x2923   :  { %4485 = vmatprep.subr.bf16.mxu1 %v10079_v12 }
0x2926   :  { %4486 = vmatpush1.bf16.msra.mxu1 %v10082_v38 }
0x2927   :  { %4487 = vmatprep.subr.bf16.mxu1 %v10085_v41 }
0x292a   :  { %4488 = vmatpush1.bf16.msra.mxu1 %v10088_v42 }
0x292b   :  { %4489 = vmatprep.subr.bf16.mxu1 %v10091_v45 }
0x292e   :  { %4490 = vmatpush1.bf16.msra.mxu1 %v10094_v46 }
0x292f   :  { %4491 = vmatprep.subr.bf16.mxu1 %v10097_v37 }
0x2932   :  { %4492 = vmatpush1.bf16.msra.mxu1 %v10100_v47 }
0x2933   :  { %4493 = vmatprep.subr.bf16.mxu1 %v10103_v25 }
0x2936   :  { %4494 = vmatpush1.bf16.msra.mxu1 %v10106_v26 }
0x2937   :  { %4495 = vmatprep.subr.bf16.mxu1 %v10109_v27 }
0x293a   :  { %4496 = vmatpush1.bf16.msra.mxu1 %v10112_v4 }
0x293b   :  { %4497 = vmatprep.subr.bf16.mxu1 %v10115_v28 }
0x293e   :  { %4498 = vmatpush2.bf16.msra.mxu1 %v10118_v44 }
0x293f   :  { %4499 = vmatprep.subr.bf16.mxu1 %v10121_v52 }
0x2942   :  { %4500 = vmatpush2.bf16.msra.mxu1 %v10124_v3 }
0x2943   :  { %4501 = vmatprep.subr.bf16.mxu1 %v10127_v15 }
0x2946   :  { %4502 = vmatpush2.bf16.msra.mxu1 %v10130_v16 }
0x2947   :  { %4503 = vmatprep.subr.bf16.mxu1 %v10133_v40 }
0x294a   :  { %4504 = vmatpush2.bf16.msra.mxu1 %v10136_v17 }
0x294b   :  { %4505 = vmatprep.subr.bf16.mxu1 %v10139_v18 }
0x294e   :  { %4506 = vmatpush2.bf16.msra.mxu1 %v10142_v60 }
0x294f   :  { %4507 = vmatprep.subr.bf16.mxu1 %v10145_v61 }
0x2952   :  { %4508 = vmatpush2.bf16.msra.mxu1 %v10148_v19 }
0x2953   :  { %4509 = vmatprep.subr.bf16.mxu1 %v10151_v20 }
0x2956   :  { %4510 = vmatpush2.bf16.msra.mxu1 %v10154_v43 }
0x2957   :  { %4511 = vmatprep.subr.bf16.mxu1 %v10157_v29 }
0x295a   :  { %4512 = vmatpush2.bf16.msra.mxu1 %v10160_v54 }
0x295b   :  { %4628 = vmatprep.subr.bf16.mxu1 %v10067_v53 }
0x29dd   :  { %v4380_v33 = vpop.f32.mrf.mxu1 }
0x29de   :  { %v4387_v34 = vadd.f32 %v4380_v33, %v4336_v63 }
0x29df   :  { %v4382_v1 = vpop.f32.mrf.mxu1 }
0x29e0   :  { %v4388_v36 = vadd.f32 %v4382_v1, %v4337_v35  ;;  %7767 = vtanh.f32 %v4387_v34  ;;  %v4471_v35 = vld [vmem:[#allocation3 + $0x10] sm:$0x30] }
0x29e1   :  { %v4384_v9 = vpop.f32.mrf.mxu1 }
0x29e2   :  { %7769 = vtanh.f32 %v4388_v36 }
0x29e3   :  { %v4385_v8 = vpop.f32.mrf.mxu1 }
0x29e4   :  { %v4472_v8 = vld [vmem:[#allocation3 + $0x38] sm:$0x30] }
0x29ed   :  { %v7768_v5 = vpop.eup %7767 }
0x29ee   :  { %v4405_v56 = vpack.c.bf16 %v7768_v5, %v7768_v5 }
0x29ef   :  { %v7770_v6 = vpop.eup %7769 }
0x29f0   :  { %v4393_v13 = vcombine.low %v7768_v5, %v7770_v6  ;;  %v4406_v14 = vpack.c.bf16 %v7770_v6, %v7770_v6 }
0x29f2   :  { %7454 = vst.sshfl [vmem:[#allocation4 + $0x50] sm:$0x33 pattern:$0x76325410] %v4393_v13  ;;  %4439 = vmatprep.mubr.bf16.mxu0 %v4406_v14 }
0x29f3   :  { %4440 = vmatmul.mubr.bf16.vlgmr.msra.gmra.mxu0 %v4405_v56 }
0x29f4   :  { %4555 = vmatpush1.bf16.msra.mxu0 %v10070_v0 }
0x29f5   :  { %4556 = vmatprep.subr.bf16.mxu0 %v10073_v10 }
0x29f8   :  { %4557 = vmatpush1.bf16.msra.mxu0 %v10076_v11 }
0x29f9   :  { %4558 = vmatprep.subr.bf16.mxu0 %v10079_v12 }
0x29fc   :  { %4559 = vmatpush1.bf16.msra.mxu0 %v10082_v38 }
0x29fd   :  { %4560 = vmatprep.subr.bf16.mxu0 %v10085_v41 }
0x2a00   :  { %4561 = vmatpush1.bf16.msra.mxu0 %v10088_v42 }
0x2a01   :  { %4562 = vmatprep.subr.bf16.mxu0 %v10091_v45 }
0x2a04   :  { %4563 = vmatpush1.bf16.msra.mxu0 %v10094_v46 }
0x2a05   :  { %4564 = vmatprep.subr.bf16.mxu0 %v10097_v37 }
0x2a08   :  { %4565 = vmatpush1.bf16.msra.mxu0 %v10100_v47 }
0x2a09   :  { %4566 = vmatprep.subr.bf16.mxu0 %v10103_v25 }
0x2a0c   :  { %4567 = vmatpush1.bf16.msra.mxu0 %v10106_v26 }
0x2a0d   :  { %4568 = vmatprep.subr.bf16.mxu0 %v10109_v27 }
0x2a10   :  { %4569 = vmatpush1.bf16.msra.mxu0 %v10112_v4 }
0x2a11   :  { %4570 = vmatprep.subr.bf16.mxu0 %v10115_v28 }
0x2a14   :  { %4571 = vmatpush2.bf16.msra.mxu0 %v10118_v44 }
0x2a15   :  { %4572 = vmatprep.subr.bf16.mxu0 %v10121_v52 }
0x2a18   :  { %4573 = vmatpush2.bf16.msra.mxu0 %v10124_v3 }
0x2a19   :  { %4574 = vmatprep.subr.bf16.mxu0 %v10127_v15 }
0x2a1c   :  { %4575 = vmatpush2.bf16.msra.mxu0 %v10130_v16 }
0x2a1d   :  { %4576 = vmatprep.subr.bf16.mxu0 %v10133_v40 }
0x2a20   :  { %4577 = vmatpush2.bf16.msra.mxu0 %v10136_v17 }
0x2a21   :  { %4578 = vmatprep.subr.bf16.mxu0 %v10139_v18 }
0x2a24   :  { %4579 = vmatpush2.bf16.msra.mxu0 %v10142_v60 }
0x2a25   :  { %4580 = vmatprep.subr.bf16.mxu0 %v10145_v61 }
0x2a28   :  { %4581 = vmatpush2.bf16.msra.mxu0 %v10148_v19 }
0x2a29   :  { %4582 = vmatprep.subr.bf16.mxu0 %v10151_v20 }
0x2a2c   :  { %4583 = vmatpush2.bf16.msra.mxu0 %v10154_v43 }
0x2a2d   :  { %4584 = vmatprep.subr.bf16.mxu0 %v10157_v29 }
0x2a30   :  { %4585 = vmatpush2.bf16.msra.mxu0 %v10160_v54 }
0x2a31   :  { %4689 = vmatprep.subr.bf16.mxu0 %v10067_v53 }
0x2ab3   :  { %v4441_v31 = vpop.f32.mrf.mxu0 }
0x2ab4   :  { %v4450_v32 = vrot.slane %v4441_v31, 6 }
0x2ab5   :  { %v4443_v58 = vpop.f32.mrf.mxu0 }
0x2ab6   :  { %v4454_v59 = vadd.f32 %v4450_v32, %v4403_v57  ;;  %v4451_v2 = vrot.slane %v4443_v58, 6 }
0x2ab7   :  { %v4445_v48 = vpop.f32.mrf.mxu0 }
0x2ab8   :  { %7771 = vtanh.f32 %v4454_v59  ;;  %v4455_v49 = vadd.f32 %v4451_v2, %v4404_v21  ;;  %v4544_v48 = vld [vmem:[#allocation3 + $0x10] sm:$0xc0] }
0x2ab9   :  { %v4446_v30 = vpop.f32.mrf.mxu0 }
0x2aba   :  { %7773 = vtanh.f32 %v4455_v49 }
0x2ac5   :  { %v7772_v50 = vpop.eup %7771 }
0x2ac6   :  { %v4473_v22 = vpack.c.bf16 %v7772_v50, %v7772_v50 }
0x2ac7   :  { %v7774_v51 = vpop.eup %7773 }
0x2ac8   :  { %v4460_v23 = vcombine.low %v7772_v50, %v7774_v51  ;;  %v4474_v24 = vpack.c.bf16 %v7774_v51, %v7774_v51  ;;  %v4477_v7 = vrot.slane %v4473_v22, 1  ;;  %v4545_v51 = vld [vmem:[#allocation3 + $0x38] sm:$0xc0] }
0x2aca   :  { %v4467_v62 = vrot.slane %v4460_v23, %v8300_v39  ;;  %v4478_v55 = vrot.slane %v4474_v24, 1 }
0x2acc   :  { %v4468_v63 = vcombine.high %v4467_v62, %v4467_v62  ;;  %4513 = vmatprep.mubr.bf16.mxu1 %v4478_v55 }
0x2acd   :  { %4514 = vmatmul.mubr.bf16.vlgmr.msra.gmra.mxu1 %v4477_v7 }
0x2ace   :  { %4470 = vst [vmem:[#allocation4 + $0x54] sm:$0xf] %v4468_v63  ;;  %4629 = vmatpush1.bf16.msra.mxu1 %v10070_v0 }
0x2acf   :  { %4630 = vmatprep.subr.bf16.mxu1 %v10073_v10 }
0x2ad2   :  { %4631 = vmatpush1.bf16.msra.mxu1 %v10076_v11 }
0x2ad3   :  { %4632 = vmatprep.subr.bf16.mxu1 %v10079_v12 }
0x2ad6   :  { %4633 = vmatpush1.bf16.msra.mxu1 %v10082_v38 }
0x2ad7   :  { %4634 = vmatprep.subr.bf16.mxu1 %v10085_v41 }
0x2ada   :  { %4635 = vmatpush1.bf16.msra.mxu1 %v10088_v42 }
0x2adb   :  { %4636 = vmatprep.subr.bf16.mxu1 %v10091_v45 }
0x2ade   :  { %4637 = vmatpush1.bf16.msra.mxu1 %v10094_v46 }
0x2adf   :  { %4638 = vmatprep.subr.bf16.mxu1 %v10097_v37 }
0x2ae2   :  { %4639 = vmatpush1.bf16.msra.mxu1 %v10100_v47 }
0x2ae3   :  { %4640 = vmatprep.subr.bf16.mxu1 %v10103_v25 }
0x2ae6   :  { %4641 = vmatpush1.bf16.msra.mxu1 %v10106_v26 }
0x2ae7   :  { %4642 = vmatprep.subr.bf16.mxu1 %v10109_v27 }
0x2aea   :  { %4643 = vmatpush1.bf16.msra.mxu1 %v10112_v4 }
0x2aeb   :  { %4644 = vmatprep.subr.bf16.mxu1 %v10115_v28 }
0x2aee   :  { %4645 = vmatpush2.bf16.msra.mxu1 %v10118_v44 }
0x2aef   :  { %4646 = vmatprep.subr.bf16.mxu1 %v10121_v52 }
0x2af2   :  { %4647 = vmatpush2.bf16.msra.mxu1 %v10124_v3 }
0x2af3   :  { %4648 = vmatprep.subr.bf16.mxu1 %v10127_v15 }
0x2af6   :  { %4649 = vmatpush2.bf16.msra.mxu1 %v10130_v16 }
0x2af7   :  { %4650 = vmatprep.subr.bf16.mxu1 %v10133_v40 }
0x2afa   :  { %4651 = vmatpush2.bf16.msra.mxu1 %v10136_v17 }
0x2afb   :  { %4652 = vmatprep.subr.bf16.mxu1 %v10139_v18 }
0x2afe   :  { %4653 = vmatpush2.bf16.msra.mxu1 %v10142_v60 }
0x2aff   :  { %4654 = vmatprep.subr.bf16.mxu1 %v10145_v61 }
0x2b02   :  { %4655 = vmatpush2.bf16.msra.mxu1 %v10148_v19 }
0x2b03   :  { %4656 = vmatprep.subr.bf16.mxu1 %v10151_v20 }
0x2b06   :  { %4657 = vmatpush2.bf16.msra.mxu1 %v10154_v43 }
0x2b07   :  { %4658 = vmatprep.subr.bf16.mxu1 %v10157_v29 }
0x2b0a   :  { %4659 = vmatpush2.bf16.msra.mxu1 %v10160_v54 }
0x2b0b   :  { %4763 = vmatprep.subr.bf16.mxu1 %v10067_v53 }
0x2b8d   :  { %v4515_v33 = vpop.f32.mrf.mxu1 }
0x2b8e   :  { %v4524_v34 = vrot.slane %v4515_v33, 4 }
0x2b8f   :  { %v4517_v1 = vpop.f32.mrf.mxu1 }
0x2b90   :  { %v4528_v36 = vadd.f32 %v4524_v34, %v4471_v35  ;;  %v4525_v9 = vrot.slane %v4517_v1, 4 }
0x2b91   :  { %v4519_v5 = vpop.f32.mrf.mxu1 }
0x2b92   :  { %7775 = vtanh.f32 %v4528_v36  ;;  %v4529_v6 = vadd.f32 %v4525_v9, %v4472_v8  ;;  %v4618_v36 = vld [vmem:[#allocation3 + $0x60] sm:$0x3]  ;;  %v4619_v5 = vld [vmem:[#allocation3 + $0x28] sm:$0x3] }
0x2b93   :  { %v4520_v13 = vpop.f32.mrf.mxu1 }
0x2b94   :  { %7777 = vtanh.f32 %v4529_v6 }
0x2b9f   :  { %v7776_v14 = vpop.eup %7775 }
0x2ba0   :  { %v4546_v31 = vpack.c.bf16 %v7776_v14, %v7776_v14 }
0x2ba1   :  { %v7778_v56 = vpop.eup %7777 }
0x2ba2   :  { %v4534_v32 = vcombine.high %v7776_v14, %v7778_v56  ;;  %v4547_v57 = vpack.c.bf16 %v7778_v56, %v7778_v56  ;;  %v4550_v59 = vrot.slane %v4546_v31, 2 }
0x2ba4   :  { %7455 = vst.sshfl [vmem:[#allocation4 + $0x58] sm:$0x33 pattern:$0x76325410] %v4534_v32  ;;  %v4551_v58 = vrot.slane %v4547_v57, 2 }
0x2ba6   :  { %4586 = vmatprep.mubr.bf16.mxu0 %v4551_v58 }
0x2ba7   :  { %4587 = vmatmul.mubr.bf16.vlgmr.msra.gmra.mxu0 %v4550_v59 }
0x2ba8   :  { %4690 = vmatpush1.bf16.msra.mxu0 %v10070_v0 }
0x2ba9   :  { %4691 = vmatprep.subr.bf16.mxu0 %v10073_v10 }
0x2bac   :  { %4692 = vmatpush1.bf16.msra.mxu0 %v10076_v11 }
0x2bad   :  { %4693 = vmatprep.subr.bf16.mxu0 %v10079_v12 }
0x2bb0   :  { %4694 = vmatpush1.bf16.msra.mxu0 %v10082_v38 }
0x2bb1   :  { %4695 = vmatprep.subr.bf16.mxu0 %v10085_v41 }
0x2bb4   :  { %4696 = vmatpush1.bf16.msra.mxu0 %v10088_v42 }
0x2bb5   :  { %4697 = vmatprep.subr.bf16.mxu0 %v10091_v45 }
0x2bb8   :  { %4698 = vmatpush1.bf16.msra.mxu0 %v10094_v46 }
0x2bb9   :  { %4699 = vmatprep.subr.bf16.mxu0 %v10097_v37 }
0x2bbc   :  { %4700 = vmatpush1.bf16.msra.mxu0 %v10100_v47 }
0x2bbd   :  { %4701 = vmatprep.subr.bf16.mxu0 %v10103_v25 }
0x2bc0   :  { %4702 = vmatpush1.bf16.msra.mxu0 %v10106_v26 }
0x2bc1   :  { %4703 = vmatprep.subr.bf16.mxu0 %v10109_v27 }
0x2bc4   :  { %4704 = vmatpush1.bf16.msra.mxu0 %v10112_v4 }
0x2bc5   :  { %4705 = vmatprep.subr.bf16.mxu0 %v10115_v28 }
0x2bc8   :  { %4706 = vmatpush2.bf16.msra.mxu0 %v10118_v44 }
0x2bc9   :  { %4707 = vmatprep.subr.bf16.mxu0 %v10121_v52 }
0x2bcc   :  { %4708 = vmatpush2.bf16.msra.mxu0 %v10124_v3 }
0x2bcd   :  { %4709 = vmatprep.subr.bf16.mxu0 %v10127_v15 }
0x2bd0   :  { %4710 = vmatpush2.bf16.msra.mxu0 %v10130_v16 }
0x2bd1   :  { %4711 = vmatprep.subr.bf16.mxu0 %v10133_v40 }
0x2bd4   :  { %4712 = vmatpush2.bf16.msra.mxu0 %v10136_v17 }
0x2bd5   :  { %4713 = vmatprep.subr.bf16.mxu0 %v10139_v18 }
0x2bd8   :  { %4714 = vmatpush2.bf16.msra.mxu0 %v10142_v60 }
0x2bd9   :  { %4715 = vmatprep.subr.bf16.mxu0 %v10145_v61 }
0x2bdc   :  { %4716 = vmatpush2.bf16.msra.mxu0 %v10148_v19 }
0x2bdd   :  { %4717 = vmatprep.subr.bf16.mxu0 %v10151_v20 }
0x2be0   :  { %4718 = vmatpush2.bf16.msra.mxu0 %v10154_v43 }
0x2be1   :  { %4719 = vmatprep.subr.bf16.mxu0 %v10157_v29 }
0x2be4   :  { %4720 = vmatpush2.bf16.msra.mxu0 %v10160_v54 }
0x2be5   :  { %4836 = vmatprep.subr.bf16.mxu0 %v10067_v53 }
0x2c67   :  { %v4588_v2 = vpop.f32.mrf.mxu0 }
0x2c68   :  { %v4597_v21 = vrot.slane %v4588_v2, 2  ;;  %v4917_v2 = vld [vmem:[#allocation13 + $0x18] sm:$0xff] }
0x2c69   :  { %v4590_v49 = vpop.f32.mrf.mxu0 }
0x2c6a   :  { %v4601_v30 = vadd.f32 %v4597_v21, %v4544_v48  ;;  %v4598_v50 = vrot.slane %v4590_v49, 2  ;;  %v4901_v21 = vld [vmem:[#allocation4 + $0x8] sm:$0xff]  ;;  %v4916_v48 = vld [vmem:[#allocation13 + $0x10] sm:$0xff] }
0x2c6b   :  { %v4592_v22 = vpop.f32.mrf.mxu0  ;;  %v4975_v49 = vld [vmem:[#allocation13 + $0x1e8] sm:$0x3] }
0x2c6c   :  { %7779 = vtanh.f32 %v4601_v30  ;;  %v4602_v23 = vadd.f32 %v4598_v50, %v4545_v51  ;;  %v5071_v30 = vrot.slane %v4901_v21, %v8300_v39  ;;  %v4974_v50 = vld [vmem:[#allocation13 + $0x1e0] sm:$0x3]  ;;  %v4919_v22 = vld [vmem:[#allocation13 + $0x28] sm:$0xff] }
0x2c6d   :  { %v4593_v24 = vpop.f32.mrf.mxu0 }
0x2c6e   :  { %7781 = vtanh.f32 %v4602_v23  ;;  %v5079_v51 = vcombine.high %v5071_v30, %v5071_v30  ;;  %v5064_v23 = vcombine.high %v4901_v21, %v4901_v21  ;;  %v4918_v24 = vld [vmem:[#allocation13 + $0x20] sm:$0xff]  ;;  %v10446_v21 = vld [vmem:[#allocation4 + $0x38] sm:$0xff] }
0x2c79   :  { %v7780_v62 = vpop.eup %7779 }
0x2c7a   :  { %v4620_v7 = vpack.c.bf16 %v7780_v62, %v7780_v62 }
0x2c7b   :  { %v7782_v55 = vpop.eup %7781 }
0x2c7c   :  { %v4607_v63 = vcombine.high %v7780_v62, %v7782_v55  ;;  %v4621_v33 = vpack.c.bf16 %v7782_v55, %v7782_v55  ;;  %v4624_v35 = vrot.slane %v4620_v7, 3  ;;  %v4977_v62 = vld [vmem:[#allocation13 + $0x1f8] sm:$0x3]  ;;  %v5078_v55 = vrot.slane %v5064_v23, %v8300_v39  ;;  %v4976_v7 = vld [vmem:[#allocation13 + $0x1f0] sm:$0x3] }
0x2c7e   :  { %v4614_v34 = vrot.slane %v4607_v63, %v8300_v39  ;;  %v4625_v53 = vrot.slane %v4621_v33, 3  ;;  %v5080_v63 = vcombine.high %v5078_v55, %v5078_v55  ;;  %v4921_v33 = vld [vmem:[#allocation13 + $0x38] sm:$0xff] }
0x2c80   :  { %v4615_v1 = vcombine.high %v4614_v34, %v4614_v34  ;;  %4660 = vmatprep.mubr.bf16.mxu1 %v4625_v53  ;;  %v4902_v34 = vld [vmem:[#allocation4 + $0x10] sm:$0xff] }
0x2c81   :  { %4661 = vmatmul.mubr.bf16.vlgmr.msra.gmra.mxu1 %v4624_v35  ;;  %v4920_v53 = vld [vmem:[#allocation13 + $0x30] sm:$0xff]  ;;  %v4979_v35 = vld [vmem:[#allocation13 + $0x208] sm:$0x3] }
0x2c82   :  { %4617 = vst [vmem:[#allocation4 + $0x5c] sm:$0xf] %v4615_v1  ;;  %4764 = vmatpush1.bf16.msra.mxu1 %v10070_v0  ;;  %v5088_v1 = vrot.slane %v4902_v34, %v8300_v39 }
0x2c83   :  { %4765 = vmatprep.subr.bf16.mxu1 %v10073_v10 }
0x2c86   :  { %4766 = vmatpush1.bf16.msra.mxu1 %v10076_v11 }
0x2c87   :  { %4767 = vmatprep.subr.bf16.mxu1 %v10079_v12 }
0x2c8a   :  { %4768 = vmatpush1.bf16.msra.mxu1 %v10082_v38 }
0x2c8b   :  { %4769 = vmatprep.subr.bf16.mxu1 %v10085_v41 }
0x2c8e   :  { %4770 = vmatpush1.bf16.msra.mxu1 %v10088_v42 }
0x2c8f   :  { %4771 = vmatprep.subr.bf16.mxu1 %v10091_v45 }
0x2c92   :  { %4772 = vmatpush1.bf16.msra.mxu1 %v10094_v46 }
0x2c93   :  { %4773 = vmatprep.subr.bf16.mxu1 %v10097_v37 }
0x2c96   :  { %4774 = vmatpush1.bf16.msra.mxu1 %v10100_v47 }
0x2c97   :  { %4775 = vmatprep.subr.bf16.mxu1 %v10103_v25 }
0x2c9a   :  { %4776 = vmatpush1.bf16.msra.mxu1 %v10106_v26 }
0x2c9b   :  { %4777 = vmatprep.subr.bf16.mxu1 %v10109_v27 }
0x2c9e   :  { %4778 = vmatpush1.bf16.msra.mxu1 %v10112_v4 }
0x2c9f   :  { %4779 = vmatprep.subr.bf16.mxu1 %v10115_v28 }
0x2ca2   :  { %4780 = vmatpush2.bf16.msra.mxu1 %v10118_v44 }
0x2ca3   :  { %4781 = vmatprep.subr.bf16.mxu1 %v10121_v52 }
0x2ca6   :  { %4782 = vmatpush2.bf16.msra.mxu1 %v10124_v3 }
0x2ca7   :  { %4783 = vmatprep.subr.bf16.mxu1 %v10127_v15 }
0x2caa   :  { %4784 = vmatpush2.bf16.msra.mxu1 %v10130_v16 }
0x2cab   :  { %4785 = vmatprep.subr.bf16.mxu1 %v10133_v40 }
0x2cae   :  { %4786 = vmatpush2.bf16.msra.mxu1 %v10136_v17 }
0x2caf   :  { %4787 = vmatprep.subr.bf16.mxu1 %v10139_v18 }
0x2cb2   :  { %4788 = vmatpush2.bf16.msra.mxu1 %v10142_v60 }
0x2cb3   :  { %4789 = vmatprep.subr.bf16.mxu1 %v10145_v61 }
0x2cb6   :  { %4790 = vmatpush2.bf16.msra.mxu1 %v10148_v19 }
0x2cb7   :  { %4791 = vmatprep.subr.bf16.mxu1 %v10151_v20 }
0x2cba   :  { %4792 = vmatpush2.bf16.msra.mxu1 %v10154_v43 }
0x2cbb   :  { %4793 = vmatprep.subr.bf16.mxu1 %v10157_v29 }
0x2cbe   :  { %4794 = vmatpush2.bf16.msra.mxu1 %v10160_v54 }
0x2d41   :  { %v4662_v9 = vpop.f32.mrf.mxu1 }
0x2d42   :  { %v4669_v8 = vadd.f32 %v4662_v9, %v4618_v36  ;;  %v4978_v36 = vld [vmem:[#allocation13 + $0x200] sm:$0x3]  ;;  %v5096_v9 = vcombine.high %v5088_v1, %v5088_v1 }
0x2d43   :  { %v4664_v6 = vpop.f32.mrf.mxu1 }
0x2d44   :  { %v4670_v13 = vadd.f32 %v4664_v6, %v4619_v5  ;;  %7783 = vtanh.f32 %v4669_v8  ;;  %v4923_v8 = vld [vmem:[#allocation13 + $0x48] sm:$0xff]  ;;  %v5081_v5 = vcombine.high %v4902_v34, %v4902_v34  ;;  %v4922_v6 = vld [vmem:[#allocation13 + $0x40] sm:$0xff]  ;;  %v4944_v34 = vld [vmem:[#allocation13 + $0xf0] sm:$0xff] }
0x2d45   :  { %v4666_v14 = vpop.f32.mrf.mxu1 }
0x2d46   :  { %7785 = vtanh.f32 %v4670_v13  ;;  %v4981_v13 = vld [vmem:[#allocation13 + $0x218] sm:$0x3]  ;;  %v5095_v14 = vrot.slane %v5081_v5, %v8300_v39 }
0x2d47   :  { %v4667_v56 = vpop.f32.mrf.mxu1 }
0x2d48   :  { %v4980_v56 = vld [vmem:[#allocation13 + $0x210] sm:$0x3] }
0x2d51   :  { %v7784_v31 = vpop.eup %7783 }
0x2d52   :  { %v4687_v59 = vpack.c.bf16 %v7784_v31, %v7784_v31 }
0x2d53   :  { %v7786_v32 = vpop.eup %7785 }
0x2d54   :  { %v4675_v57 = vcombine.low %v7784_v31, %v7786_v32  ;;  %v4688_v58 = vpack.c.bf16 %v7786_v32, %v7786_v32  ;;  %v5097_v31 = vcombine.high %v5095_v14, %v5095_v14  ;;  %v4925_v32 = vld [vmem:[#allocation13 + $0x58] sm:$0xff] }
0x2d56   :  { %7456 = vst.sshfl [vmem:[#allocation4 + $0x60] sm:$0x33 pattern:$0x76325410] %v4675_v57  ;;  %4721 = vmatprep.mubr.bf16.mxu0 %v4688_v58  ;;  %v4903_v57 = vld [vmem:[#allocation4 + $0x18] sm:$0xff]  ;;  %v4924_v58 = vld [vmem:[#allocation13 + $0x50] sm:$0xff] }
0x2d57   :  { %4722 = vmatmul.mubr.bf16.vlgmr.msra.gmra.mxu0 %v4687_v59  ;;  %v4983_v59 = vld [vmem:[#allocation13 + $0x228] sm:$0x3] }
0x2d58   :  { %4837 = vmatpush1.bf16.msra.mxu0 %v10070_v0  ;;  %v4971_v0 = vld [vmem:[#allocation13 + $0x1c8] sm:$0x3] }
0x2d59   :  { %4838 = vmatprep.subr.bf16.mxu0 %v10073_v10  ;;  %5369 = vmatprep.subr.mxu1 %v4971_v0  ;;  %v5105_v0 = vrot.slane %v4903_v57, %v8300_v39 }
0x2d5c   :  { %4839 = vmatpush1.bf16.msra.mxu0 %v10076_v11 }
0x2d5d   :  { %4840 = vmatprep.subr.bf16.mxu0 %v10079_v12  ;;  %v4685_v12 = vld [vmem:[#allocation3 + $0x60] sm:$0xc] }
0x2d60   :  { %4841 = vmatpush1.bf16.msra.mxu0 %v10082_v38 }
0x2d61   :  { %4842 = vmatprep.subr.bf16.mxu0 %v10085_v41 }
0x2d64   :  { %4843 = vmatpush1.bf16.msra.mxu0 %v10088_v42 }
0x2d65   :  { %4844 = vmatprep.subr.bf16.mxu0 %v10091_v45  ;;  %v4686_v45 = vld [vmem:[#allocation3 + $0x28] sm:$0xc] }
0x2d68   :  { %4845 = vmatpush1.bf16.msra.mxu0 %v10094_v46 }
0x2d69   :  { %4846 = vmatprep.subr.bf16.mxu0 %v10097_v37 }
0x2d6c   :  { %4847 = vmatpush1.bf16.msra.mxu0 %v10100_v47 }
0x2d6d   :  { %4848 = vmatprep.subr.bf16.mxu0 %v10103_v25 }
0x2d70   :  { %4849 = vmatpush1.bf16.msra.mxu0 %v10106_v26  ;;  %v4900_v26 = vld [vmem:[#allocation4] sm:$0xff] }
0x2d71   :  { %4850 = vmatprep.subr.bf16.mxu0 %v10109_v27 }
0x2d74   :  { %4851 = vmatpush1.bf16.msra.mxu0 %v10112_v4 }
0x2d75   :  { %4852 = vmatprep.subr.bf16.mxu0 %v10115_v28 }
0x2d78   :  { %4853 = vmatpush2.bf16.msra.mxu0 %v10118_v44 }
0x2d79   :  { %4854 = vmatprep.subr.bf16.mxu0 %v10121_v52  ;;  %v5054_v52 = vrot.slane %v4900_v26, %v8300_v39 }
0x2d7c   :  { %4855 = vmatpush2.bf16.msra.mxu0 %v10124_v3 }
0x2d7d   :  { %4856 = vmatprep.subr.bf16.mxu0 %v10127_v15 }
0x2d80   :  { %4857 = vmatpush2.bf16.msra.mxu0 %v10130_v16 }
0x2d81   :  { %4858 = vmatprep.subr.bf16.mxu0 %v10133_v40  ;;  %v4970_v40 = vld [vmem:[#allocation13 + $0x1c0] sm:$0x3] }
0x2d84   :  { %4859 = vmatpush2.bf16.msra.mxu0 %v10136_v17 }
0x2d85   :  { %4860 = vmatprep.subr.bf16.mxu0 %v10139_v18  ;;  %v5062_v18 = vcombine.high %v5054_v52, %v5054_v52 }
0x2d88   :  { %4861 = vmatpush2.bf16.msra.mxu0 %v10142_v60  ;;  %v4915_v60 = vld [vmem:[#allocation13 + $0x8] sm:$0xff] }
0x2d89   :  { %4862 = vmatprep.subr.bf16.mxu0 %v10145_v61  ;;  %v5047_v61 = vcombine.high %v4900_v26, %v4900_v26 }
0x2d8c   :  { %4863 = vmatpush2.bf16.msra.mxu0 %v10148_v19  ;;  %v4914_v19 = vld [vmem:[#allocation13] sm:$0xff] }
0x2d8d   :  { %4864 = vmatprep.subr.bf16.mxu0 %v10151_v20  ;;  %v4973_v20 = vld [vmem:[#allocation13 + $0x1d8] sm:$0x3] }
0x2d90   :  { %4865 = vmatpush2.bf16.msra.mxu0 %v10154_v43  ;;  %v5061_v43 = vrot.slane %v5047_v61, %v8300_v39  ;;  %v4992_v61 = vld [vmem:[#allocation13 + $0x270] sm:$0x3] }
0x2d91   :  { %4866 = vmatprep.subr.bf16.mxu0 %v10157_v29  ;;  %v4972_v29 = vld [vmem:[#allocation13 + $0x1d0] sm:$0x3] }
0x2d94   :  { %4867 = vmatpush2.bf16.msra.mxu0 %v10160_v54  ;;  %v5063_v54 = vcombine.high %v5061_v43, %v5061_v43 }
0x2e17   :  { %v4723_v10 = vpop.f32.mrf.mxu0 }
0x2e18   :  { %v4732_v11 = vrot.slane %v4723_v10, 6  ;;  %v4982_v10 = vld [vmem:[#allocation13 + $0x220] sm:$0x3] }
0x2e19   :  { %v4725_v38 = vpop.f32.mrf.mxu0 }
0x2e1a   :  { %v4736_v41 = vadd.f32 %v4732_v11, %v4685_v12  ;;  %v4733_v42 = vrot.slane %v4725_v38, 6  ;;  %v5113_v11 = vcombine.high %v5105_v0, %v5105_v0  ;;  %v4927_v12 = vld [vmem:[#allocation13 + $0x68] sm:$0xff]  ;;  %v5098_v38 = vcombine.high %v4903_v57, %v4903_v57  ;;  %v4953_v57 = vld [vmem:[#allocation13 + $0x138] sm:$0xff] }
0x2e1b   :  { %v4727_v46 = vpop.f32.mrf.mxu0 }
0x2e1c   :  { %7787 = vtanh.f32 %v4736_v41  ;;  %v4737_v37 = vadd.f32 %v4733_v42, %v4686_v45  ;;  %v4926_v41 = vld [vmem:[#allocation13 + $0x60] sm:$0xff]  ;;  %v4985_v42 = vld [vmem:[#allocation13 + $0x238] sm:$0x3]  ;;  %v5112_v45 = vrot.slane %v5098_v38, %v8300_v39 }
0x2e1d   :  { %v4728_v47 = vpop.f32.mrf.mxu0  ;;  %v10431_v46 = vld [vmem:[#allocation4 + $0x20] sm:$0xff] }
0x2e1e   :  { %7789 = vtanh.f32 %v4737_v37  ;;  %v4984_v37 = vld [vmem:[#allocation13 + $0x230] sm:$0x3]  ;;  %v5114_v47 = vcombine.high %v5112_v45, %v5112_v45  ;;  %v5115_v26 = vcombine.high %v10431_v46, %v10431_v46 }
0x2e29   :  { %v7788_v25 = vpop.eup %7787 }
0x2e2a   :  { %v4755_v4 = vpack.c.bf16 %v7788_v25, %v7788_v25 }
0x2e2b   :  { %v7790_v27 = vpop.eup %7789 }
0x2e2c   :  { %v4742_v28 = vcombine.low %v7788_v25, %v7790_v27  ;;  %v4756_v44 = vpack.c.bf16 %v7790_v27, %v7790_v27  ;;  %v4759_v16 = vrot.slane %v4755_v4, 1  ;;  %v4929_v25 = vld [vmem:[#allocation13 + $0x78] sm:$0xff]  ;;  %v4928_v27 = vld [vmem:[#allocation13 + $0x70] sm:$0xff] }
0x2e2d   :  { %v4989_v4 = vld [vmem:[#allocation13 + $0x258] sm:$0x3] }
0x2e2e   :  { %v4749_v3 = vrot.slane %v4742_v28, %v8300_v39  ;;  %v4760_v15 = vrot.slane %v4756_v44, 1  ;;  %v5129_v28 = vrot.slane %v5115_v26, %v8300_v39  ;;  %v10436_v44 = vld [vmem:[#allocation4 + $0x28] sm:$0xff]  ;;  %v5016_v26 = vld [vmem:[#allocation13 + $0x330] sm:$0x3] }
0x2e30   :  { %v4750_v17 = vcombine.high %v4749_v3, %v4749_v3  ;;  %4795 = vmatprep.mubr.bf16.mxu1 %v4760_v15  ;;  %v5131_v3 = vcombine.high %v5129_v28, %v5129_v28  ;;  %v4933_v15 = vld [vmem:[#allocation13 + $0x98] sm:$0xff] }
0x2e31   :  { %4796 = vmatmul.mubr.bf16.vlgmr.msra.gmra.mxu1 %v4759_v16  ;;  %v5132_v16 = vcombine.high %v10436_v44, %v10436_v44 }
0x2e32   :  { %4752 = vst [vmem:[#allocation4 + $0x64] sm:$0xf] %v4750_v17  ;;  %5370 = vmatpush1.xpose.msra.mxu1 %v4970_v40  ;;  %5405 = vmatprep.mubr.f32.mxu1 %v5062_v18  ;;  %v4932_v40 = vld [vmem:[#allocation13 + $0x90] sm:$0xff]  ;;  %v4993_v17 = vld [vmem:[#allocation13 + $0x278] sm:$0x3] }
0x2e33   :  { %5371 = vmatprep.subr.mxu1 %v4915_v60  ;;  %v5146_v18 = vrot.slane %v5132_v16, %v8300_v39  ;;  %v10441_v60 = vld [vmem:[#allocation4 + $0x30] sm:$0xff] }
0x2e34   :  { %v5020_v16 = vld [vmem:[#allocation13 + $0x350] sm:$0x3] }
0x2e36   :  { %5372 = vmatpush1.xpose.msra.mxu1 %v4914_v19  ;;  %v5148_v19 = vcombine.high %v5146_v18, %v5146_v18 }
0x2e37   :  { %5439 = vmatprep.subr.mxu1 %v4973_v20  ;;  %v4937_v20 = vld [vmem:[#allocation13 + $0xb8] sm:$0xff] }
0x2e39   :  { %5406 = vmatmul.mubr.f32.vlgmr.msra.gmra.mxu1 %v5054_v52  ;;  %v4988_v52 = vld [vmem:[#allocation13 + $0x250] sm:$0x3] }
0x2e3a   :  { %5440 = vmatpush1.xpose.msra.mxu1 %v4972_v29  ;;  %5475 = vmatprep.mubr.f32.mxu1 %v5063_v54  ;;  %v4936_v29 = vld [vmem:[#allocation13 + $0xb0] sm:$0xff]  ;;  %v4997_v54 = vld [vmem:[#allocation13 + $0x298] sm:$0x3] }
0x2e3b   :  { %5441 = vmatprep.subr.mxu1 %v4917_v2 }
0x2e3e   :  { %5442 = vmatpush1.xpose.msra.mxu1 %v4916_v48  ;;  %v4996_v48 = vld [vmem:[#allocation13 + $0x290] sm:$0x3] }
0x2e3f   :  { %5509 = vmatprep.subr.mxu1 %v4975_v49 }
0x2e41   :  { %5476 = vmatmul.mubr.f32.vlgmr.msra.gmra.mxu1 %v5061_v43  ;;  %v5149_v43 = vcombine.high %v10441_v60, %v10441_v60 }
0x2e42   :  { %5510 = vmatpush1.xpose.msra.mxu1 %v4974_v50  ;;  %5545 = vmatprep.mubr.f32.mxu1 %v5079_v51  ;;  %v5166_v50 = vcombine.high %v10446_v21, %v10446_v21  ;;  %v4940_v51 = vld [vmem:[#allocation13 + $0xd0] sm:$0xff] }
0x2e43   :  { %5511 = vmatprep.subr.mxu1 %v4919_v22  ;;  %v5163_v2 = vrot.slane %v5149_v43, %v8300_v39  ;;  %v5001_v22 = vld [vmem:[#allocation13 + $0x2b8] sm:$0x3] }
0x2e44   :  { %v5180_v23 = vrot.slane %v5166_v50, %v8300_v39 }
0x2e45   :  { %v5165_v49 = vcombine.high %v5163_v2, %v5163_v2 }
0x2e46   :  { %5512 = vmatpush1.xpose.msra.mxu1 %v4918_v24  ;;  %v10451_v24 = vld [vmem:[#allocation4 + $0x40] sm:$0xff] }
0x2e47   :  { %5579 = vmatprep.subr.mxu1 %v4977_v62  ;;  %v5000_v62 = vld [vmem:[#allocation13 + $0x2b0] sm:$0x3] }
0x2e49   :  { %5546 = vmatmul.mubr.f32.vlgmr.msra.gmra.mxu1 %v5071_v30  ;;  %v4941_v30 = vld [vmem:[#allocation13 + $0xd8] sm:$0xff] }
0x2e4a   :  { %5580 = vmatpush1.xpose.msra.mxu1 %v4976_v7  ;;  %5615 = vmatprep.mubr.f32.mxu1 %v5080_v63  ;;  %v4945_v7 = vld [vmem:[#allocation13 + $0xf8] sm:$0xff]  ;;  %v5183_v63 = vcombine.high %v10451_v24, %v10451_v24 }
0x2e4b   :  { %5581 = vmatprep.subr.mxu1 %v4921_v33  ;;  %v4987_v33 = vld [vmem:[#allocation13 + $0x248] sm:$0x3] }
0x2e4c   :  { %5929 = vmatprep.subr.mxu0 %v4987_v33 }
0x2e4e   :  { %5582 = vmatpush1.xpose.msra.mxu1 %v4920_v53  ;;  %v5005_v53 = vld [vmem:[#allocation13 + $0x2d8] sm:$0x3] }
0x2e4f   :  { %5649 = vmatprep.subr.mxu1 %v4979_v35  ;;  %v5197_v35 = vrot.slane %v5183_v63, %v8300_v39 }
0x2e51   :  { %5616 = vmatmul.mubr.f32.vlgmr.msra.gmra.mxu1 %v5078_v55  ;;  %v5182_v55 = vcombine.high %v5180_v23, %v5180_v23 }
0x2e52   :  { %5650 = vmatpush1.xpose.msra.mxu1 %v4978_v36  ;;  %5685 = vmatprep.mubr.f32.mxu1 %v5096_v9  ;;  %v5004_v36 = vld [vmem:[#allocation13 + $0x2d0] sm:$0x3]  ;;  %v5199_v9 = vcombine.high %v5197_v35, %v5197_v35 }
0x2e53   :  { %5651 = vmatprep.subr.mxu1 %v4923_v8  ;;  %v4949_v8 = vld [vmem:[#allocation13 + $0x118] sm:$0xff] }
0x2e56   :  { %5652 = vmatpush1.xpose.msra.mxu1 %v4922_v6  ;;  %v4948_v6 = vld [vmem:[#allocation13 + $0x110] sm:$0xff] }
0x2e57   :  { %5719 = vmatprep.subr.mxu1 %v4981_v13  ;;  %v5009_v13 = vld [vmem:[#allocation13 + $0x2f8] sm:$0x3] }
0x2e59   :  { %5686 = vmatmul.mubr.f32.vlgmr.msra.gmra.mxu1 %v5088_v1  ;;  %v10456_v1 = vld [vmem:[#allocation4 + $0x48] sm:$0xff] }
0x2e5a   :  { %5720 = vmatpush1.xpose.msra.mxu1 %v4980_v56  ;;  %5755 = vmatprep.mubr.f32.mxu1 %v5097_v31  ;;  %v5200_v5 = vcombine.high %v10456_v1, %v10456_v1  ;;  %v10461_v56 = vld [vmem:[#allocation4 + $0x50] sm:$0xff] }
0x2e5b   :  { %5721 = vmatprep.subr.mxu1 %v4925_v32  ;;  %v5008_v31 = vld [vmem:[#allocation13 + $0x2f0] sm:$0x3] }
0x2e5e   :  { %5722 = vmatpush1.xpose.msra.mxu1 %v4924_v58  ;;  %v5217_v58 = vcombine.high %v10461_v56, %v10461_v56 }
0x2e5f   :  { %5789 = vmatprep.subr.mxu1 %v4983_v59  ;;  %v4952_v59 = vld [vmem:[#allocation13 + $0x130] sm:$0xff] }
0x2e61   :  { %5756 = vmatmul.mubr.f32.vlgmr.msra.gmra.mxu1 %v5095_v14  ;;  %v5214_v14 = vrot.slane %v5200_v5, %v8300_v39 }
0x2e62   :  { %5790 = vmatpush1.xpose.msra.mxu1 %v4982_v10  ;;  %5825 = vmatprep.mubr.f32.mxu1 %v5113_v11  ;;  %v5231_v10 = vrot.slane %v5217_v58, %v8300_v39  ;;  %v10466_v11 = vld [vmem:[#allocation4 + $0x58] sm:$0xff]  ;;  %v4991_v58 = vld [vmem:[#allocation13 + $0x268] sm:$0x3] }
0x2e63   :  { %5791 = vmatprep.subr.mxu1 %v4927_v12  ;;  %v5216_v32 = vcombine.high %v5214_v14, %v5214_v14  ;;  %v5012_v12 = vld [vmem:[#allocation13 + $0x310] sm:$0x3] }
0x2e64   :  { %v5233_v38 = vcombine.high %v5231_v10, %v5231_v10 }
0x2e66   :  { %5792 = vmatpush1.xpose.msra.mxu1 %v4926_v41  ;;  %v4957_v41 = vld [vmem:[#allocation13 + $0x158] sm:$0xff] }
0x2e67   :  { %5859 = vmatprep.subr.mxu1 %v4985_v42  ;;  %v5234_v42 = vcombine.high %v10466_v11, %v10466_v11 }
0x2e69   :  { %5826 = vmatmul.mubr.f32.vlgmr.msra.gmra.mxu1 %v5105_v0  ;;  %v5013_v0 = vld [vmem:[#allocation13 + $0x318] sm:$0x3] }
0x2e6a   :  { %5860 = vmatpush1.xpose.msra.mxu1 %v4984_v37  ;;  %5895 = vmatprep.mubr.f32.mxu1 %v5114_v47  ;;  %v5017_v37 = vld [vmem:[#allocation13 + $0x338] sm:$0x3]  ;;  %v5248_v47 = vrot.slane %v5234_v42, %v8300_v39  ;;  %v4934_v42 = vld [vmem:[#allocation13 + $0xa0] sm:$0xff] }
0x2e6b   :  { %5861 = vmatprep.subr.mxu1 %v4929_v25  ;;  %v10471_v25 = vld [vmem:[#allocation4 + $0x60] sm:$0xff] }
0x2e6e   :  { %5862 = vmatpush1.xpose.msra.mxu1 %v4928_v27  ;;  %v5250_v27 = vcombine.high %v5248_v47, %v5248_v47 }
0x2e6f   :  { %5999 = vmatprep.subr.mxu1 %v4989_v4  ;;  %v4961_v4 = vld [vmem:[#allocation13 + $0x178] sm:$0xff] }
0x2e71   :  { %5896 = vmatmul.mubr.f32.vlgmr.msra.gmra.mxu1 %v5112_v45  ;;  %v4956_v45 = vld [vmem:[#allocation13 + $0x150] sm:$0xff] }
0x2e72   :  { %6000 = vmatpush1.xpose.msra.mxu1 %v4988_v52  ;;  %6035 = vmatprep.mubr.f32.mxu1 %v5131_v3  ;;  %v4960_v52 = vld [vmem:[#allocation13 + $0x170] sm:$0xff]  ;;  %v5021_v3 = vld [vmem:[#allocation13 + $0x358] sm:$0x3] }
0x2e73   :  { %6001 = vmatprep.subr.mxu1 %v4933_v15 }
0x2e76   :  { %6002 = vmatpush1.xpose.msra.mxu1 %v4932_v40 }
0x2e77   :  { %6139 = vmatprep.subr.mxu1 %v4993_v17  ;;  %v4965_v17 = vld [vmem:[#allocation13 + $0x198] sm:$0xff] }
0x2e79   :  { %6036 = vmatmul.mubr.f32.vlgmr.msra.gmra.mxu1 %v5129_v28  ;;  %v5251_v28 = vcombine.high %v10471_v25, %v10471_v25 }
0x2e7a   :  { %6140 = vmatpush1.xpose.msra.mxu1 %v4992_v61  ;;  %6175 = vmatprep.mubr.f32.mxu1 %v5148_v19 }
0x2e7b   :  { %6141 = vmatprep.subr.mxu1 %v4937_v20  ;;  %v5265_v15 = vrot.slane %v5251_v28, %v8300_v39  ;;  %v4753_v20 = vld [vmem:[#allocation3 + $0x60] sm:$0x30] }
0x2e7d   :  { %v5267_v40 = vcombine.high %v5265_v15, %v5265_v15 }
0x2e7e   :  { %6142 = vmatpush1.xpose.msra.mxu1 %v4936_v29 }
0x2e7f   :  { %6279 = vmatprep.subr.mxu1 %v4997_v54 }
0x2e81   :  { %6176 = vmatmul.mubr.f32.vlgmr.msra.gmra.mxu1 %v5146_v18  ;;  %v4964_v18 = vld [vmem:[#allocation13 + $0x190] sm:$0xff] }
0x2e82   :  { %6280 = vmatpush1.xpose.msra.mxu1 %v4996_v48  ;;  %6315 = vmatprep.mubr.f32.mxu1 %v5165_v49 }
0x2e83   :  { %6281 = vmatprep.subr.mxu1 %v4941_v30 }
0x2e86   :  { %6282 = vmatpush1.xpose.msra.mxu1 %v4940_v51 }
0x2e87   :  { %6419 = vmatprep.subr.mxu1 %v5001_v22  ;;  %v7458_v22 = vld [vmem:[%s10539_s6] ss:$0 sm:$0xff]  ;;  %s8068_s6 = smov [#allocation14]  }
0x2e88   :  { %s7309_s28 = sshll.u32 %s8068_s6, 4  ;;  %s7310_s28 = int_to_ptr.vmem [resolvable:$true] %s7309_s28 }
0x2e89   :  { %6316 = vmatmul.mubr.f32.vlgmr.msra.gmra.mxu1 %v5163_v2  ;;  %v4754_v2 = vld [vmem:[#allocation3 + $0x28] sm:$0x30]  ;;  %s8027_s8 = scalar_lea.vmem %s7310_s28, 32  ;;  %p8032_p12 = scmp.lt.s32.totalorder %s7310_s28, %s7310_s28 }
0x2e8a   :  { %6420 = vmatpush1.xpose.msra.mxu1 %v5000_v62  ;;  %6455 = vmatprep.mubr.f32.mxu1 %v5182_v55  ;;  %p8028_p11 = scmp.ne.s32.totalorder %s7310_s28, %s8027_s8  ;;  %p8033_p13 = scmp.lt.s32.totalorder %s8027_s8, %s8027_s8 }
0x2e8b   :  { %6421 = vmatprep.subr.mxu1 %v4945_v7 }
0x2e8c   :  { %p8034_p0 = por %p8033_p13, %p8032_p12 }
0x2e8e   :  { %6422 = vmatpush1.xpose.msra.mxu1 %v4944_v34  ;;  %p8035_p1 = pnand %p8034_p0, %p8028_p11 }
0x2e8f   :  { %6559 = vmatprep.subr.mxu1 %v5005_v53 }
0x2e91   :  { %6456 = vmatmul.mubr.f32.vlgmr.msra.gmra.mxu1 %v5180_v23 }
0x2e92   :  { %6560 = vmatpush1.xpose.msra.mxu1 %v5004_v36  ;;  %6595 = vmatprep.mubr.f32.mxu1 %v5199_v9  ;;  %v5122_v36 = vrot.slane %v10431_v46, %v8300_v39 }
0x2e93   :  { %6561 = vmatprep.subr.mxu1 %v4949_v8 }
0x2e96   :  { %6562 = vmatpush1.xpose.msra.mxu1 %v4948_v6  ;;  %v4986_v6 = vld [vmem:[#allocation13 + $0x240] sm:$0x3] }
0x2e97   :  { %6699 = vmatprep.subr.mxu1 %v5009_v13 }
0x2e99   :  { %6596 = vmatmul.mubr.f32.vlgmr.msra.gmra.mxu1 %v5197_v35 }
0x2e9a   :  { %6700 = vmatpush1.xpose.msra.mxu1 %v5008_v31  ;;  %6735 = vmatprep.mubr.f32.mxu1 %v5216_v32  ;;  %v4931_v31 = vld [vmem:[#allocation13 + $0x88] sm:$0xff] }
0x2e9b   :  { %6701 = vmatprep.subr.mxu1 %v4953_v57  ;;  %v4930_v57 = vld [vmem:[#allocation13 + $0x80] sm:$0xff] }
0x2e9e   :  { %6702 = vmatpush1.xpose.msra.mxu1 %v4952_v59  ;;  %v5139_v59 = vrot.slane %v10436_v44, %v8300_v39  ;;  %v4994_v44 = vld [vmem:[#allocation13 + $0x280] sm:$0x3] }
0x2e9f   :  { %6839 = vmatprep.subr.mxu1 %v5013_v0  ;;  %v4990_v0 = vld [vmem:[#allocation13 + $0x260] sm:$0x3] }
0x2ea1   :  { %6736 = vmatmul.mubr.f32.vlgmr.msra.gmra.mxu1 %v5214_v14  ;;  %v5130_v14 = vcombine.high %v5122_v36, %v5122_v36 }
0x2ea2   :  { %6840 = vmatpush1.xpose.msra.mxu1 %v5012_v12  ;;  %6875 = vmatprep.mubr.f32.mxu1 %v5233_v38  ;;  %v5147_v12 = vcombine.high %v5139_v59, %v5139_v59  ;;  %v4935_v38 = vld [vmem:[#allocation13 + $0xa8] sm:$0xff] }
0x2ea3   :  { %6841 = vmatprep.subr.mxu1 %v4957_v41 }
0x2ea6   :  { %6842 = vmatpush1.xpose.msra.mxu1 %v4956_v45  ;;  %v4995_v45 = vld [vmem:[#allocation13 + $0x288] sm:$0x3] }
0x2ea7   :  { %6979 = vmatprep.subr.mxu1 %v5017_v37  ;;  %v5156_v37 = vrot.slane %v10441_v60, %v8300_v39  ;;  %v4998_v60 = vld [vmem:[#allocation13 + $0x2a0] sm:$0x3] }
0x2ea9   :  { %6876 = vmatmul.mubr.f32.vlgmr.msra.gmra.mxu1 %v5231_v10 }
0x2eaa   :  { %6980 = vmatpush1.xpose.msra.mxu1 %v5016_v26  ;;  %7015 = vmatprep.mubr.f32.mxu1 %v5250_v27  ;;  %v5164_v27 = vcombine.high %v5156_v37, %v5156_v37 }
0x2eab   :  { %6981 = vmatprep.subr.mxu1 %v4961_v4  ;;  %v4939_v4 = vld [vmem:[#allocation13 + $0xc8] sm:$0xff] }
0x2eae   :  { %6982 = vmatpush1.xpose.msra.mxu1 %v4960_v52  ;;  %v4938_v52 = vld [vmem:[#allocation13 + $0xc0] sm:$0xff] }
0x2eaf   :  { %7119 = vmatprep.subr.mxu1 %v5021_v3  ;;  %v4999_v3 = vld [vmem:[#allocation13 + $0x2a8] sm:$0x3] }
0x2eb1   :  { %7016 = vmatmul.mubr.f32.vlgmr.msra.gmra.mxu1 %v5248_v47 }
0x2eb2   :  { %7120 = vmatpush1.xpose.msra.mxu1 %v5020_v16  ;;  %7155 = vmatprep.mubr.f32.mxu1 %v5267_v40 }
0x2eb3   :  { %7121 = vmatprep.subr.mxu1 %v4965_v17 }
0x2eb6   :  { %7122 = vmatpush1.xpose.msra.mxu1 %v4964_v18  ;;  %v4943_v18 = vld [vmem:[#allocation13 + $0xe8] sm:$0xff] }
0x2eb9   :  { %7156 = vmatmul.mubr.f32.vlgmr.msra.gmra.mxu1 %v5265_v15  ;;  %v5173_v15 = vrot.slane %v10446_v21, %v8300_v39  ;;  %v5002_v21 = vld [vmem:[#allocation13 + $0x2c0] sm:$0x3] }
0x2ebb   :  { %v5181_v17 = vcombine.high %v5173_v15, %v5173_v15 }
0x2ef1   :  { %v4797_v61 = vpop.f32.mrf.mxu1 }
0x2ef2   :  { %v4806_v19 = vrot.slane %v4797_v61, 4 }
0x2ef3   :  { %v4799_v43 = vpop.f32.mrf.mxu1 }
0x2ef4   :  { %v4810_v29 = vadd.f32 %v4806_v19, %v4753_v20  ;;  %v4807_v54 = vrot.slane %v4799_v43, 4  ;;  %v4942_v19 = vld [vmem:[#allocation13 + $0xe0] sm:$0xff]  ;;  %v5003_v20 = vld [vmem:[#allocation13 + $0x2c8] sm:$0x3]  ;;  %v5190_v43 = vrot.slane %v10451_v24, %v8300_v39 }
0x2ef5   :  { %v4801_v48 = vpop.f32.mrf.mxu1  ;;  %v5006_v24 = vld [vmem:[#allocation13 + $0x2e0] sm:$0x3] }
0x2ef6   :  { %7791 = vtanh.f32 %v4810_v29  ;;  %v4811_v49 = vadd.f32 %v4807_v54, %v4754_v2  ;;  %v5198_v2 = vcombine.high %v5190_v43, %v5190_v43  ;;  %v4947_v48 = vld [vmem:[#allocation13 + $0x108] sm:$0xff] }
0x2ef7   :  { %v4802_v30 = vpop.f32.mrf.mxu1 }
0x2ef8   :  { %7793 = vtanh.f32 %v4811_v49  ;;  %v4946_v30 = vld [vmem:[#allocation13 + $0x100] sm:$0xff] }
0x2ef9   :  { %v5407_v50 = vpop.f32.mrf.mxu1 }
0x2efa   :  { %v5408_v23 = vadd.f32 %v7458_v22, %v5407_v50  ;;  %v5007_v50 = vld [vmem:[#allocation13 + $0x2e8] sm:$0x3] }
0x2efb   :  { %v5409_v51 = vpop.f32.mrf.mxu1 }
0x2efc   :  { %v5207_v51 = vrot.slane %v10456_v1, %v8300_v39 }
0x2f01   :  { %v5477_v62 = vpop.f32.mrf.mxu1 }
0x2f02   :  { %v5478_v55 = vadd.f32 %v5477_v62, %v5408_v23  ;;  %v5215_v62 = vcombine.high %v5207_v51, %v5207_v51 }
0x2f03   :  { %v7792_v7 = vpop.eup %7791  ;;  %v5479_v63 = vpop.f32.mrf.mxu1 }
0x2f04   :  { %v4828_v34 = vpack.c.bf16 %v7792_v7, %v7792_v7  ;;  %v4950_v63 = vld [vmem:[#allocation13 + $0x120] sm:$0xff] }
0x2f05   :  { %v7794_v33 = vpop.eup %7793 }
0x2f06   :  { %v4816_v53 = vcombine.high %v7792_v7, %v7794_v33  ;;  %v4829_v35 = vpack.c.bf16 %v7794_v33, %v7794_v33  ;;  %v4832_v5 = vrot.slane %v4828_v34, 2  ;;  %v5011_v33 = vld [vmem:[#allocation13 + $0x308] sm:$0x3]  ;;  %v5224_v34 = vrot.slane %v10461_v56, %v8300_v39  ;;  %v5014_v56 = vld [vmem:[#allocation13 + $0x320] sm:$0x3] }
0x2f08   :  { %7457 = vst.sshfl [vmem:[#allocation4 + $0x68] sm:$0x33 pattern:$0x76325410] %v4816_v53  ;;  %v4833_v9 = vrot.slane %v4829_v35, 2  ;;  %v5232_v35 = vcombine.high %v5224_v34, %v5224_v34 }
0x2f09   :  { %v5547_v8 = vpop.f32.mrf.mxu1  ;;  %v5010_v53 = vld [vmem:[#allocation13 + $0x300] sm:$0x3] }
0x2f0a   :  { %v5548_v13 = vadd.f32 %v5547_v8, %v5478_v55  ;;  %4868 = vmatprep.mubr.bf16.mxu0 %v4833_v9  ;;  %v4951_v55 = vld [vmem:[#allocation13 + $0x128] sm:$0xff]  ;;  %v4954_v8 = vld [vmem:[#allocation13 + $0x140] sm:$0xff] }
0x2f0b   :  { %v5549_v32 = vpop.f32.mrf.mxu1  ;;  %4869 = vmatmul.mubr.bf16.vlgmr.msra.gmra.mxu0 %v4832_v5  ;;  %v5015_v5 = vld [vmem:[#allocation13 + $0x328] sm:$0x3] }
0x2f0c   :  { %5930 = vmatpush1.xpose.msra.mxu0 %v4986_v6  ;;  %5965 = vmatprep.mubr.f32.mxu0 %v5130_v14  ;;  %v5241_v6 = vrot.slane %v10466_v11, %v8300_v39  ;;  %v5018_v11 = vld [vmem:[#allocation13 + $0x340] sm:$0x3] }
0x2f0d   :  { %5931 = vmatprep.subr.mxu0 %v4931_v31  ;;  %v4959_v31 = vld [vmem:[#allocation13 + $0x168] sm:$0xff] }
0x2f0e   :  { %v5249_v14 = vcombine.high %v5241_v6, %v5241_v6 }
0x2f10   :  { %5932 = vmatpush1.xpose.msra.mxu0 %v4930_v57  ;;  %v4958_v57 = vld [vmem:[#allocation13 + $0x160] sm:$0xff] }
0x2f11   :  { %v5617_v46 = vpop.f32.mrf.mxu1  ;;  %6069 = vmatprep.subr.mxu0 %v4991_v58  ;;  %v5019_v58 = vld [vmem:[#allocation13 + $0x348] sm:$0x3] }
0x2f12   :  { %v5618_v10 = vadd.f32 %v5617_v46, %v5548_v13 }
0x2f13   :  { %v5619_v41 = vpop.f32.mrf.mxu1  ;;  %5966 = vmatmul.mubr.f32.vlgmr.msra.gmra.mxu0 %v5122_v36  ;;  %v4955_v36 = vld [vmem:[#allocation13 + $0x148] sm:$0xff] }
0x2f14   :  { %6070 = vmatpush1.xpose.msra.mxu0 %v4990_v0  ;;  %6105 = vmatprep.mubr.f32.mxu0 %v5147_v12 }
0x2f15   :  { %6071 = vmatprep.subr.mxu0 %v4935_v38  ;;  %v4962_v38 = vld [vmem:[#allocation13 + $0x180] sm:$0xff] }
0x2f18   :  { %6072 = vmatpush1.xpose.msra.mxu0 %v4934_v42 }
0x2f19   :  { %v5687_v47 = vpop.f32.mrf.mxu1  ;;  %6209 = vmatprep.subr.mxu0 %v4995_v45 }
0x2f1a   :  { %v5688_v26 = vadd.f32 %v5687_v47, %v5618_v10  ;;  %v4963_v10 = vld [vmem:[#allocation13 + $0x188] sm:$0xff] }
0x2f1b   :  { %v5689_v28 = vpop.f32.mrf.mxu1  ;;  %6106 = vmatmul.mubr.f32.vlgmr.msra.gmra.mxu0 %v5139_v59  ;;  %v5258_v59 = vrot.slane %v10471_v25, %v8300_v39 }
0x2f1c   :  { %6210 = vmatpush1.xpose.msra.mxu0 %v4994_v44  ;;  %6245 = vmatprep.mubr.f32.mxu0 %v5164_v27  ;;  %v5023_v27 = vld [vmem:[#allocation13 + $0x368] sm:$0x3]  ;;  %v5025_v28 = vld [vmem:[#allocation13 + $0x378] sm:$0x3] }
0x2f1d   :  { %6211 = vmatprep.subr.mxu0 %v4939_v4  ;;  %v5266_v0 = vcombine.high %v5258_v59, %v5258_v59  ;;  %v5022_v4 = vld [vmem:[#allocation13 + $0x360] sm:$0x3]  ;;  %7259 = vmatprep.subr.mxu1 %v5025_v28 }
0x2f20   :  { %6212 = vmatpush1.xpose.msra.mxu0 %v4938_v52  ;;  %v5024_v52 = vld [vmem:[#allocation13 + $0x370] sm:$0x3] }
0x2f21   :  { %v5757_v16 = vpop.f32.mrf.mxu1  ;;  %6349 = vmatprep.subr.mxu0 %v4999_v3  ;;  %v4967_v3 = vld [vmem:[#allocation13 + $0x1a8] sm:$0xff]  ;;  %7260 = vmatpush1.xpose.msra.mxu1 %v5024_v52 }
0x2f22   :  { %v5758_v40 = vadd.f32 %v5757_v16, %v5688_v26  ;;  %v4969_v16 = vld [vmem:[#allocation13 + $0x1b8] sm:$0xff] }
0x2f23   :  { %v5759_v61 = vpop.f32.mrf.mxu1  ;;  %6246 = vmatmul.mubr.f32.vlgmr.msra.gmra.mxu0 %v5156_v37  ;;  %7261 = vmatprep.subr.mxu1 %v4969_v16 }
0x2f24   :  { %6350 = vmatpush1.xpose.msra.mxu0 %v4998_v60  ;;  %6385 = vmatprep.mubr.f32.mxu0 %v5181_v17 }
0x2f25   :  { %6351 = vmatprep.subr.mxu0 %v4943_v18 }
0x2f28   :  { %6352 = vmatpush1.xpose.msra.mxu0 %v4942_v19 }
0x2f29   :  { %v5827_v29 = vpop.f32.mrf.mxu1  ;;  %6489 = vmatprep.subr.mxu0 %v5003_v20 }
0x2f2a   :  { %v5828_v54 = vadd.f32 %v5827_v29, %v5758_v40  ;;  %v4968_v40 = vld [vmem:[#allocation13 + $0x1b0] sm:$0xff] }
0x2f2b   :  { %v5829_v49 = vpop.f32.mrf.mxu1  ;;  %6386 = vmatmul.mubr.f32.vlgmr.msra.gmra.mxu0 %v5173_v15  ;;  %v4966_v15 = vld [vmem:[#allocation13 + $0x1a0] sm:$0xff]  ;;  %7262 = vmatpush1.xpose.msra.mxu1 %v4968_v40 }
0x2f2c   :  { %6490 = vmatpush1.xpose.msra.mxu0 %v5002_v21  ;;  %6525 = vmatprep.mubr.f32.mxu0 %v5198_v2  ;;  %v4827_v2 = vld [vmem:[#allocation3 + $0x28] sm:$0xc0] }
0x2f2d   :  { %6491 = vmatprep.subr.mxu0 %v4947_v48 }
0x2f30   :  { %6492 = vmatpush1.xpose.msra.mxu0 %v4946_v30 }
0x2f31   :  { %v5897_v22 = vpop.f32.mrf.mxu1  ;;  %6629 = vmatprep.subr.mxu0 %v5007_v50 }
0x2f32   :  { %v10491_v23 = vadd.f32 %v5897_v22, %v5828_v54 }
0x2f33   :  { %v5899_v7 = vpop.f32.mrf.mxu1  ;;  %6526 = vmatmul.mubr.f32.vlgmr.msra.gmra.mxu0 %v5190_v43  ;;  %v4826_v43 = vld [vmem:[#allocation3 + $0x60] sm:$0xc0] }
0x2f34   :  { %6630 = vmatpush1.xpose.msra.mxu0 %v5006_v24  ;;  %6665 = vmatprep.mubr.f32.mxu0 %v5215_v62 }
0x2f35   :  { %6631 = vmatprep.subr.mxu0 %v4951_v55 }
0x2f38   :  { %6632 = vmatpush1.xpose.msra.mxu0 %v4950_v63 }
0x2f39   :  { %v10495_v1 = vpop.f32.mrf.mxu1  ;;  %6769 = vmatprep.subr.mxu0 %v5011_v33 }
0x2f3b   :  { %v6039_v9 = vpop.f32.mrf.mxu1  ;;  %6666 = vmatmul.mubr.f32.vlgmr.msra.gmra.mxu0 %v5207_v51 }
0x2f3c   :  { %6770 = vmatpush1.xpose.msra.mxu0 %v5010_v53  ;;  %6805 = vmatprep.mubr.f32.mxu0 %v5232_v35 }
0x2f3d   :  { %6771 = vmatprep.subr.mxu0 %v4955_v36 }
0x2f40   :  { %6772 = vmatpush1.xpose.msra.mxu0 %v4954_v8 }
0x2f41   :  { %v10499_v13 = vpop.f32.mrf.mxu1  ;;  %6909 = vmatprep.subr.mxu0 %v5015_v5 }
0x2f43   :  { %v6179_v32 = vpop.f32.mrf.mxu1  ;;  %6806 = vmatmul.mubr.f32.vlgmr.msra.gmra.mxu0 %v5224_v34 }
0x2f44   :  { %6910 = vmatpush1.xpose.msra.mxu0 %v5014_v56  ;;  %6945 = vmatprep.mubr.f32.mxu0 %v5249_v14 }
0x2f45   :  { %6911 = vmatprep.subr.mxu0 %v4959_v31 }
0x2f48   :  { %6912 = vmatpush1.xpose.msra.mxu0 %v4958_v57 }
0x2f49   :  { %v10503_v46 = vpop.f32.mrf.mxu1  ;;  %7049 = vmatprep.subr.mxu0 %v5019_v58 }
0x2f4b   :  { %v6319_v12 = vpop.f32.mrf.mxu1  ;;  %6946 = vmatmul.mubr.f32.vlgmr.msra.gmra.mxu0 %v5241_v6 }
0x2f4c   :  { %7050 = vmatpush1.xpose.msra.mxu0 %v5018_v11  ;;  %7085 = vmatprep.mubr.f32.mxu0 %v5266_v0 }
0x2f4d   :  { %7051 = vmatprep.subr.mxu0 %v4963_v10 }
0x2f50   :  { %7052 = vmatpush1.xpose.msra.mxu0 %v4962_v38 }
0x2f51   :  { %v10505_v41 = vpop.f32.mrf.mxu1  ;;  %7189 = vmatprep.subr.mxu0 %v5023_v27 }
0x2f53   :  { %v6459_v42 = vpop.f32.mrf.mxu1  ;;  %7086 = vmatmul.mubr.f32.vlgmr.msra.gmra.mxu0 %v5258_v59 }
0x2f54   :  { %7190 = vmatpush1.xpose.msra.mxu0 %v5022_v4 }
0x2f55   :  { %7191 = vmatprep.subr.mxu0 %v4967_v3 }
0x2f58   :  { %7192 = vmatpush1.xpose.msra.mxu0 %v4966_v15 }
0x2f59   :  { %v10507_v45 = vpop.f32.mrf.mxu1 }
0x2f5b   :  { %v6599_v25 = vpop.f32.mrf.mxu1 }
0x2f61   :  { %v10509_v37 = vpop.f32.mrf.mxu1 }
0x2f63   :  { %v6739_v47 = vpop.f32.mrf.mxu1 }
0x2f69   :  { %v10511_v44 = vpop.f32.mrf.mxu1 }
0x2f6b   :  { %v6879_v26 = vpop.f32.mrf.mxu1 }
0x2f71   :  { %v10513_v60 = vpop.f32.mrf.mxu1 }
0x2f73   :  { %v7019_v17 = vpop.f32.mrf.mxu1 }
0x2f79   :  { %v10515_v18 = vpop.f32.mrf.mxu1 }
0x2f7b   :  { %v7159_v61 = vpop.f32.mrf.mxu1 }
0x2fcb   :  { %v4870_v19 = vpop.f32.mrf.mxu0 }
0x2fcc   :  { %v4879_v20 = vrot.slane %v4870_v19, 2 }
0x2fcd   :  { %v4872_v29 = vpop.f32.mrf.mxu0 }
0x2fce   :  { %v4883_v21 = vadd.f32 %v4879_v20, %v4826_v43  ;;  %v4880_v54 = vrot.slane %v4872_v29, 2 }
0x2fcf   :  { %v4874_v48 = vpop.f32.mrf.mxu0 }
0x2fd0   :  { %v4884_v49 = vadd.f32 %v4880_v54, %v4827_v2  ;;  %7795 = vtanh.f32 %v4883_v21 }
0x2fd1   :  { %v4875_v30 = vpop.f32.mrf.mxu0 }
0x2fd2   :  { %7797 = vtanh.f32 %v4884_v49 }
0x2fd3   :  { %v5967_v50 = vpop.f32.mrf.mxu0 }
0x2fd4   :  { %v5968_v51 = vadd.f32 %v5967_v50, %v10491_v23 }
0x2fd5   :  { %v5969_v22 = vpop.f32.mrf.mxu0 }
0x2fd6   :  { %v6038_v24 = vadd.f32 %v10495_v1, %v5968_v51 }
0x2fdb   :  { %v6107_v62 = vpop.f32.mrf.mxu0 }
0x2fdc   :  { %v6108_v55 = vadd.f32 %v6107_v62, %v6038_v24 }
0x2fdd   :  { %v6109_v7 = vpop.f32.mrf.mxu0  ;;  %v7796_v63 = vpop.eup %7795 }
0x2fde   :  { %v6178_v35 = vadd.f32 %v10499_v13, %v6108_v55 }
0x2fdf   :  { %v7798_v33 = vpop.eup %7797 }
0x2fe0   :  { %v4889_v34 = vcombine.high %v7796_v63, %v7798_v33 }
0x2fe2   :  { %v4896_v53 = vrot.slane %v4889_v34, %v8300_v39 }
0x2fe3   :  { %v6247_v36 = vpop.f32.mrf.mxu0 }
0x2fe4   :  { %v4897_v9 = vcombine.high %v4896_v53, %v4896_v53  ;;  %v6248_v8 = vadd.f32 %v6247_v36, %v6178_v35 }
0x2fe5   :  { %v6249_v5 = vpop.f32.mrf.mxu0 }
0x2fe6   :  { %4899 = vst [vmem:[#allocation4 + $0x6c] sm:$0xf] %v4897_v9  ;;  %v6318_v23 = vadd.f32 %v10503_v46, %v6248_v8 }
0x2feb   :  { %v6387_v6 = vpop.f32.mrf.mxu0 }
0x2fec   :  { %v6388_v56 = vadd.f32 %v6387_v6, %v6318_v23 }
0x2fed   :  { %v6389_v1 = vpop.f32.mrf.mxu0  ;;  %v4913_v14 = vld [vmem:[#allocation4 + $0x68] sm:$0xff] }
0x2fee   :  { %v5275_v31 = vrot.slane %v4913_v14, %v8300_v39  ;;  %v5268_v32 = vcombine.high %v4913_v14, %v4913_v14  ;;  %v6458_v59 = vadd.f32 %v10505_v41, %v6388_v56 }
0x2ff0   :  { %v5283_v57 = vcombine.high %v5275_v31, %v5275_v31  ;;  %v5282_v58 = vrot.slane %v5268_v32, %v8300_v39 }
0x2ff2   :  { %7225 = vmatprep.mubr.f32.mxu0 %v5283_v57  ;;  %v5284_v13 = vcombine.high %v5282_v58, %v5282_v58 }
0x2ff3   :  { %v6527_v11 = vpop.f32.mrf.mxu0  ;;  %7226 = vmatmul.mubr.f32.vlgmr.msra.gmra.mxu0 %v5275_v31 }
0x2ff4   :  { %v6528_v0 = vadd.f32 %v6527_v11, %v6458_v59  ;;  %7295 = vmatprep.mubr.f32.mxu1 %v5284_v13 }
0x2ff5   :  { %v6529_v10 = vpop.f32.mrf.mxu0  ;;  %7296 = vmatmul.mubr.f32.vlgmr.msra.gmra.mxu1 %v5282_v58 }
0x2ff6   :  { %v6598_v46 = vadd.f32 %v10507_v45, %v6528_v0 }
0x2ffb   :  { %v6667_v12 = vpop.f32.mrf.mxu0 }
0x2ffc   :  { %v6668_v38 = vadd.f32 %v6667_v12, %v6598_v46 }
0x2ffd   :  { %v6669_v42 = vpop.f32.mrf.mxu0 }
0x2ffe   :  { %v6738_v25 = vadd.f32 %v10509_v37, %v6668_v38 }
0x3003   :  { %v6807_v47 = vpop.f32.mrf.mxu0 }
0x3004   :  { %v6808_v26 = vadd.f32 %v6807_v47, %v6738_v25 }
0x3005   :  { %v6809_v39 = vpop.f32.mrf.mxu0 }
0x3006   :  { %v6878_v41 = vadd.f32 %v10511_v44, %v6808_v26 }
0x300b   :  { %v6947_v27 = vpop.f32.mrf.mxu0 }
0x300c   :  { %v6948_v4 = vadd.f32 %v6947_v27, %v6878_v41 }
0x300d   :  { %v6949_v28 = vpop.f32.mrf.mxu0 }
0x300e   :  { %v7018_v52 = vadd.f32 %v10513_v60, %v6948_v4 }
0x3013   :  { %v7087_v3 = vpop.f32.mrf.mxu0 }
0x3014   :  { %v7088_v15 = vadd.f32 %v7087_v3, %v7018_v52 }
0x3015   :  { %v7089_v16 = vpop.f32.mrf.mxu0 }
0x3016   :  { %v7158_v45 = vadd.f32 %v10515_v18, %v7088_v15 }
0x30b3   :  { %v7227_v40 = vpop.f32.mrf.mxu0 }
0x30b4   :  { %v7228_v17 = vadd.f32 %v7227_v40, %v7158_v45 }
0x30b5   :  { %v7229_v37 = vpop.f32.mrf.mxu0  ;;  %v7297_v61 = vpop.f32.mrf.mxu1 }
0x30b6   :  { %v7298_v19 = vadd.f32 %v7297_v61, %v7228_v17 }
0x30b7   :  { %v7299_v44 = vpop.f32.mrf.mxu1 }
0x30b8   :  { %7302 = vst.msk [vmem:[#allocation14] sm:$0x3] %vm7301_vm0, %v7298_v19 }
0x30b9   :  { %8038 = shalt.err (!%p8035_p1)
}
0x30ba   :  { %7312 = dma.vmem_to_hbm [thread:$0]  %s7310_s28, 32, %s10540_s7, [#allocation7]  }
0x30bb   :  { %8053 = dma.done.wait [#allocation7], 32  }
0x30bc   :  { %8054 = vsyncadd [#allocation7], 4294967264 }
0x30bd   :  { %7316 = vsyncpa [#allocation6], 1 }
0x30be   :  { %7317 = vsyncpa [#allocation9], 1 }
0x30bf   :  { %7318 = vsyncpa [#allocation12], 1 }
0x30c0   :  { %7319 = vsyncpa [#allocation7], 1 }

</bundles_post_ra>
